<compile_context>
chip_gen: v7x
topology: tpu7x:2x2x1
jax: 0.10.0
libtpu: 0.0.40
codegen_flags: <defaults>
</compile_context>

<pallas_src>
import functools

import jax
import jax.numpy as jnp
from jax.experimental import pallas as pl
from jax.experimental.pallas import tpu as pltpu


# ----------------------------------------------------------------------------
# Fused kernel: conv1..conv4 (+LeakyReLU) -> conv5 -> *0.2 + residual
# ----------------------------------------------------------------------------
def _rdb_fused_kernel(x_ref, w1_ref, w2_ref, w3_ref, w4_ref, w5t_ref,
                      b1_ref, b2_ref, b3_ref, b4_ref, b5_ref,
                      o_ref, xc_ref, *, H, W, C0, G):
    """One batch element per grid step.

    x_ref  : (1, C0, H*W)        unpadded input, NCHW-flat (f32)
    w1..w4 : (3, 3, Cin_k, G)    HWIO weights (dot dtype)
    w5t    : (3, 3, C0, C0+4G)   conv5 weight pre-transposed to (Cout, Cin)
    b1..b4 : (1, G) f32 ; b5 : (C0, 1) f32
    o_ref  : (1, C0, H*W)        output, NCHW-flat (lane-dense stores)
    xc_ref : (H+2, W+2, C0+4G)   combined zero-halo scratch [x|x1|x2|x3|x4]
    """
    HW = H * W
    Ct = C0 + 4 * G
    cdt = xc_ref.dtype                              # conv-operand / scratch dtype

    # ---- 1) zero ONLY the 1-px halo ring (interior fully rewritten below) ----
    xc_ref[0:1, :, :] = jnp.zeros((1, W + 2, Ct), cdt)
    xc_ref[H + 1:H + 2, :, :] = jnp.zeros((1, W + 2, Ct), cdt)
    xc_ref[:, 0:1, :] = jnp.zeros((H + 2, 1, Ct), cdt)
    xc_ref[:, W + 1:W + 2, :] = jnp.zeros((H + 2, 1, Ct), cdt)

    # ---- 2) in-kernel "same" padding: copy x (NCHW-flat) into the interior ----
    x_chw = x_ref[0]                                # (C0, HW), residual source
    eye = (jax.lax.broadcasted_iota(jnp.int32, (C0, C0), 0)
           == jax.lax.broadcasted_iota(jnp.int32, (C0, C0), 1)).astype(cdt)
    # A^T @ B on the MXU: (C0,HW)^T @ eye -> (HW, C0) orientation change.
    x_hwc = jax.lax.dot_general(x_chw.astype(cdt), eye,
                                (((0,), (0,)), ((), ())),
                                preferred_element_type=jnp.float32)
    xc_ref[1:H + 1, 1:W + 1, 0:C0] = x_hwc.reshape(H, W, C0).astype(cdt)

    def patch(ky, kx, cin):
        # channel slice always starts at 0 -> lane-aligned load
        return xc_ref[ky:ky + H, kx:kx + W, 0:cin].reshape(HW, cin)

    def lrelu(v):
        return jnp.where(v >= 0, v, 0.2 * v)

    def conv_nhwc(cin, w_ref, b_ref, cout):
        # (HW, cout) f32 accumulator; bias folded into the init.
        acc = jnp.zeros((HW, cout), jnp.float32) + b_ref[...].astype(jnp.float32)
        for ky in range(3):
            for kx in range(3):
                acc = acc + jnp.dot(patch(ky, kx, cin), w_ref[ky, kx],
                                    preferred_element_type=jnp.float32)
        return acc

    def write_slot(k, val):
        off = C0 + k * G
        xc_ref[1:H + 1, 1:W + 1, off:off + G] = val.reshape(H, W, G).astype(cdt)

    write_slot(0, lrelu(conv_nhwc(C0, w1_ref, b1_ref, G)))
    write_slot(1, lrelu(conv_nhwc(C0 + G, w2_ref, b2_ref, G)))
    write_slot(2, lrelu(conv_nhwc(C0 + 2 * G, w3_ref, b3_ref, G)))
    write_slot(3, lrelu(conv_nhwc(C0 + 3 * G, w4_ref, b4_ref, G)))

    # ---- conv5 accumulated lane-dense as (C0, HW) via the A @ B^T pattern ----
    acc5 = jnp.zeros((C0, HW), jnp.float32) + b5_ref[...].astype(jnp.float32)
    for ky in range(3):
        for kx in range(3):
            acc5 = acc5 + jax.lax.dot_general(
                w5t_ref[ky, kx], patch(ky, kx, Ct),
                (((1,), (1,)), ((), ())),
                preferred_element_type=jnp.float32)

    # ---- fused epilogue: out = conv5 * 0.2 + residual (lane-dense NCHW) ----
    out = acc5 * 0.2 + x_chw.astype(jnp.float32)
    o_ref[...] = out.reshape(1, C0, HW).astype(o_ref.dtype)


# ----------------------------------------------------------------------------
# Public forward (NCHW in / NCHW out, matching PyTorch)
# ----------------------------------------------------------------------------
def residual_dense_block(x_nchw, params, *, dot_dtype=jnp.bfloat16):
    """ESRGAN ResidualDenseBlock forward.

    x_nchw: (N, num_feat, H, W).  Default dot_dtype=bfloat16 (native MXU dtype
    on v5e/v6e/v7x) with f32 accumulation; pass jnp.float32 for strict parity
    with an f32 reference.
    """
    N, C0, H, W = x_nchw.shape
    G = params["w1"].shape[3]
    HW = H * W
    Ct = C0 + 4 * G

    x_flat = x_nchw.reshape(N, C0, HW)              # trivial; no pad / transpose

    ws = [params["w1"].astype(dot_dtype),
          params["w2"].astype(dot_dtype),
          params["w3"].astype(dot_dtype),
          params["w4"].astype(dot_dtype),
          # conv5 weight pre-transposed to (3, 3, Cout=C0, Cin=Ct) so the kernel
          # accumulates lane-dense (C0, HW) with one A@B^T matmul per tap.
          jnp.transpose(params["w5"], (0, 1, 3, 2)).astype(dot_dtype)]
    bs = [params["b1"].reshape(1, -1).astype(jnp.float32),
          params["b2"].reshape(1, -1).astype(jnp.float32),
          params["b3"].reshape(1, -1).astype(jnp.float32),
          params["b4"].reshape(1, -1).astype(jnp.float32),
          params["b5"].reshape(-1, 1).astype(jnp.float32)]

    kernel = functools.partial(_rdb_fused_kernel, H=H, W=W, C0=C0, G=G)

    flops = 2 * N * HW * 9 * (C0 * G + (C0 + G) * G + (C0 + 2 * G) * G
                              + (C0 + 3 * G) * G + Ct * C0)
    bytes_accessed = int(x_flat.size * x_flat.dtype.itemsize
                         + N * C0 * HW * x_nchw.dtype.itemsize
                         + sum(w.size * w.dtype.itemsize for w in ws)
                         + sum(b.size * b.dtype.itemsize for b in bs))

    w_specs = [pl.BlockSpec(w.shape, lambda n: (0, 0, 0, 0)) for w in ws]
    b_specs = [pl.BlockSpec(b.shape, lambda n: (0, 0)) for b in bs]

    out = pl.pallas_call(
        kernel,
        out_shape=jax.ShapeDtypeStruct((N, C0, HW), x_nchw.dtype),
        grid_spec=pltpu.PrefetchScalarGridSpec(
            num_scalar_prefetch=0,
            grid=(N,),
            in_specs=[pl.BlockSpec((1, C0, HW), lambda n: (n, 0, 0))]
                     + w_specs + b_specs,
            out_specs=pl.BlockSpec((1, C0, HW), lambda n: (n, 0, 0)),
            scratch_shapes=[pltpu.VMEM((H + 2, W + 2, Ct), dot_dtype)],
        ),
        compiler_params=pltpu.CompilerParams(
            dimension_semantics=("parallel",),
            vmem_limit_bytes=32 * 1024 * 1024),
        cost_estimate=pl.CostEstimate(flops=flops, transcendentals=0,
                                      bytes_accessed=bytes_accessed),
    )(x_flat, *ws, *bs)

    return out.reshape(N, C0, H, W)


# ----------------------------------------------------------------------------
# Pure-JAX reference (for correctness check)
# ----------------------------------------------------------------------------
def _ref_conv(x_nhwc, w, b):
    y = jax.lax.conv_general_dilated(
        x_nhwc, w, window_strides=(1, 1), padding="SAME",
        dimension_numbers=("NHWC", "HWIO", "NHWC"))
    return y + b


def residual_dense_block_ref(x_nchw, params):
    x = jnp.transpose(x_nchw, (0, 2, 3, 1))
    lrelu = lambda v: jnp.where(v >= 0, v, 0.2 * v)
    x1 = lrelu(_ref_conv(x, params["w1"], params["b1"]))
    x2 = lrelu(_ref_conv(jnp.concatenate([x, x1], -1), params["w2"], params["b2"]))
    x3 = lrelu(_ref_conv(jnp.concatenate([x, x1, x2], -1), params["w3"], params["b3"]))
    x4 = lrelu(_ref_conv(jnp.concatenate([x, x1, x2, x3], -1), params["w4"], params["b4"]))
    x5 = _ref_conv(jnp.concatenate([x, x1, x2, x3, x4], -1), params["w5"], params["b5"])
    return jnp.transpose(x5 * 0.2 + x, (0, 3, 1, 2))


# ----------------------------------------------------------------------------
# main
# ----------------------------------------------------------------------------
if __name__ == "__main__":
    # Small, module-consistent shapes: batch=2, num_feat=8, num_grow_ch=4, 16x16.
    N, NUM_FEAT, NUM_GROW, H, W = 2, 8, 4, 16, 16

    key = jax.random.PRNGKey(0)
    keys = jax.random.split(key, 12)

    def make_w(k, cin, cout):
        fan_in = cin * 9
        return (jax.random.normal(k, (3, 3, cin, cout), jnp.float32)
                * (0.1 * (2.0 / fan_in) ** 0.5))

    def make_b(k, c):
        return 0.01 * jax.random.normal(k, (c,), jnp.float32)

    params = {
        "w1": make_w(keys[0], NUM_FEAT, NUM_GROW),
        "b1": make_b(keys[5], NUM_GROW),
        "w2": make_w(keys[1], NUM_FEAT + NUM_GROW, NUM_GROW),
        "b2": make_b(keys[6], NUM_GROW),
        "w3": make_w(keys[2], NUM_FEAT + 2 * NUM_GROW, NUM_GROW),
        "b3": make_b(keys[7], NUM_GROW),
        "w4": make_w(keys[3], NUM_FEAT + 3 * NUM_GROW, NUM_GROW),
        "b4": make_b(keys[8], NUM_GROW),
        "w5": make_w(keys[4], NUM_FEAT + 4 * NUM_GROW, NUM_FEAT),
        "b5": make_b(keys[9], NUM_FEAT),
    }

    x = jax.random.normal(keys[10], (N, NUM_FEAT, H, W), jnp.float32)  # NCHW

    ref = jax.block_until_ready(residual_dense_block_ref(x, params))

    # Strict f32 path (exact parity with the f32 reference).
    out_f32 = jax.block_until_ready(
        residual_dense_block(x, params, dot_dtype=jnp.float32))
    assert out_f32.shape == (N, NUM_FEAT, H, W)
    assert jnp.allclose(out_f32, ref, atol=1e-5, rtol=1e-5)

    # Default bf16-operand path (f32 accumulation) — looser tolerance.
    out_bf16 = jax.block_until_ready(residual_dense_block(x, params))
    assert out_bf16.shape == (N, NUM_FEAT, H, W)
    assert jnp.allclose(out_bf16, ref, atol=2e-2, rtol=2e-2)

    print("KERNEL_OK")
</pallas_src>

<mosaic_0001>
module attributes {stable_mosaic.version = 11 : i64} {
  func.func @_rdb_fused_kernel(%arg0: i32, %arg1: memref<1x8x256xf32, #tpu.memory_space<vmem>>, %arg2: memref<3x3x8x4xf32, #tpu.memory_space<vmem>>, %arg3: memref<3x3x12x4xf32, #tpu.memory_space<vmem>>, %arg4: memref<3x3x16x4xf32, #tpu.memory_space<vmem>>, %arg5: memref<3x3x20x4xf32, #tpu.memory_space<vmem>>, %arg6: memref<3x3x8x24xf32, #tpu.memory_space<vmem>>, %arg7: memref<1x4xf32, #tpu.memory_space<vmem>>, %arg8: memref<1x4xf32, #tpu.memory_space<vmem>>, %arg9: memref<1x4xf32, #tpu.memory_space<vmem>>, %arg10: memref<1x4xf32, #tpu.memory_space<vmem>>, %arg11: memref<8x1xf32, #tpu.memory_space<vmem>>, %arg12: memref<1x8x256xf32, #tpu.memory_space<vmem>>, %arg13: memref<18x18x24xf32, #tpu.memory_space<vmem>>) attributes {dimension_semantics = [#tpu.dimension_semantics<parallel>], iteration_bounds = array<i64: 2>, scalar_prefetch = 0 : i64, scratch_operands = 1 : i64, tpu.core_type = #tpu.core_type<tc>, window_params = [{transform_indices = @transform_0, window_bounds = array<i64: 1, 8, 256>}, {pipeline_mode = #tpu.pipeline_mode<synchronous>, transform_indices = @transform_1, window_bounds = array<i64: 3, 3, 8, 4>}, {pipeline_mode = #tpu.pipeline_mode<synchronous>, transform_indices = @transform_2, window_bounds = array<i64: 3, 3, 12, 4>}, {pipeline_mode = #tpu.pipeline_mode<synchronous>, transform_indices = @transform_3, window_bounds = array<i64: 3, 3, 16, 4>}, {pipeline_mode = #tpu.pipeline_mode<synchronous>, transform_indices = @transform_4, window_bounds = array<i64: 3, 3, 20, 4>}, {pipeline_mode = #tpu.pipeline_mode<synchronous>, transform_indices = @transform_5, window_bounds = array<i64: 3, 3, 8, 24>}, {pipeline_mode = #tpu.pipeline_mode<synchronous>, transform_indices = @transform_6, window_bounds = array<i64: 1, 4>}, {pipeline_mode = #tpu.pipeline_mode<synchronous>, transform_indices = @transform_7, window_bounds = array<i64: 1, 4>}, {pipeline_mode = #tpu.pipeline_mode<synchronous>, transform_indices = @transform_8, window_bounds = array<i64: 1, 4>}, {pipeline_mode = #tpu.pipeline_mode<synchronous>, transform_indices = @transform_9, window_bounds = array<i64: 1, 4>}, {pipeline_mode = #tpu.pipeline_mode<synchronous>, transform_indices = @transform_10, window_bounds = array<i64: 8, 1>}, {transform_indices = @transform_11, window_bounds = array<i64: 1, 8, 256>}]} {
    %cst = arith.constant 0.000000e+00 : f32
    %0 = vector.broadcast %cst : f32 to vector<1x18x24xf32>
    %c0 = arith.constant 0 : index
    %c0_0 = arith.constant 0 : index
    %c0_1 = arith.constant 0 : index
    %1 = vector.load %arg13[%c0, %c0_0, %c0_1] : memref<18x18x24xf32, #tpu.memory_space<vmem>>, vector<1x18x24xf32>
    tpu.vector_store %arg13[%c0, %c0_0, %c0_1], %0 {strides = array<i32>} : memref<18x18x24xf32, #tpu.memory_space<vmem>>, vector<1x18x24xf32>,
    %cst_2 = arith.constant 0.000000e+00 : f32
    %2 = vector.broadcast %cst_2 : f32 to vector<1x18x24xf32>
    %c17 = arith.constant 17 : index
    %c0_3 = arith.constant 0 : index
    %c0_4 = arith.constant 0 : index
    %3 = vector.load %arg13[%c17, %c0_3, %c0_4] : memref<18x18x24xf32, #tpu.memory_space<vmem>>, vector<1x18x24xf32>
    tpu.vector_store %arg13[%c17, %c0_3, %c0_4], %2 {strides = array<i32>} : memref<18x18x24xf32, #tpu.memory_space<vmem>>, vector<1x18x24xf32>,
    %cst_5 = arith.constant 0.000000e+00 : f32
    %4 = vector.broadcast %cst_5 : f32 to vector<18x1x24xf32>
    %c0_6 = arith.constant 0 : index
    %c0_7 = arith.constant 0 : index
    %c0_8 = arith.constant 0 : index
    %5 = vector.load %arg13[%c0_6, %c0_7, %c0_8] : memref<18x18x24xf32, #tpu.memory_space<vmem>>, vector<18x1x24xf32>
    tpu.vector_store %arg13[%c0_6, %c0_7, %c0_8], %4 {strides = array<i32>} : memref<18x18x24xf32, #tpu.memory_space<vmem>>, vector<18x1x24xf32>,
    %cst_9 = arith.constant 0.000000e+00 : f32
    %6 = vector.broadcast %cst_9 : f32 to vector<18x1x24xf32>
    %c0_10 = arith.constant 0 : index
    %c17_11 = arith.constant 17 : index
    %c0_12 = arith.constant 0 : index
    %7 = vector.load %arg13[%c0_10, %c17_11, %c0_12] : memref<18x18x24xf32, #tpu.memory_space<vmem>>, vector<18x1x24xf32>
    tpu.vector_store %arg13[%c0_10, %c17_11, %c0_12], %6 {strides = array<i32>} : memref<18x18x24xf32, #tpu.memory_space<vmem>>, vector<18x1x24xf32>,
    %c0_13 = arith.constant 0 : index
    %c0_14 = arith.constant 0 : index
    %c0_15 = arith.constant 0 : index
    %8 = vector.load %arg1[%c0_13, %c0_14, %c0_15] : memref<1x8x256xf32, #tpu.memory_space<vmem>>, vector<1x8x256xf32>
    %9 = vector.shape_cast %8 : vector<1x8x256xf32> to vector<8x256xf32>
    %10 = tpu.iota {dimensions = array<i32: 0>} : vector<8x8xi32>
    %11 = tpu.iota {dimensions = array<i32: 1>} : vector<8x8xi32>
    %12 = arith.cmpi eq, %10, %11 : vector<8x8xi32>
    %13 = arith.extui %12 : vector<8x8xi1> to vector<8x8xi32>
    %14 = arith.sitofp %13 : vector<8x8xi32> to vector<8x8xf32>
    %cst_16 = arith.constant dense<0.000000e+00> : vector<256x8xf32>
    %15 = tpu.matmul %9, %14, %cst_16 {dimension_numbers = #tpu.dot_dimension_numbers<[0], [0], [1], [1], [0, 1, 1, 1], [], []>} : vector<8x256xf32>, vector<8x8xf32>, vector<256x8xf32> -> vector<256x8xf32>
    %16 = vector.shape_cast %15 : vector<256x8xf32> to vector<16x16x8xf32>
    %c1 = arith.constant 1 : index
    %c1_17 = arith.constant 1 : index
    %c0_18 = arith.constant 0 : index
    %17 = vector.load %arg13[%c1, %c1_17, %c0_18] : memref<18x18x24xf32, #tpu.memory_space<vmem>>, vector<16x16x8xf32>
    tpu.vector_store %arg13[%c1, %c1_17, %c0_18], %16 {strides = array<i32>} : memref<18x18x24xf32, #tpu.memory_space<vmem>>, vector<16x16x8xf32>,
    %cst_19 = arith.constant 0.000000e+00 : f32
    %18 = vector.broadcast %cst_19 : f32 to vector<256x4xf32>
    %c0_20 = arith.constant 0 : index
    %c0_21 = arith.constant 0 : index
    %19 = vector.load %arg7[%c0_20, %c0_21] : memref<1x4xf32, #tpu.memory_space<vmem>>, vector<1x4xf32>
    %20 = vector.broadcast %19 : vector<1x4xf32> to vector<256x4xf32>
    %21 = arith.addf %18, %20 : vector<256x4xf32>
    %c0_22 = arith.constant 0 : index
    %c0_23 = arith.constant 0 : index
    %c0_24 = arith.constant 0 : index
    %22 = vector.load %arg13[%c0_22, %c0_23, %c0_24] : memref<18x18x24xf32, #tpu.memory_space<vmem>>, vector<16x16x8xf32>
    %23 = vector.shape_cast %22 : vector<16x16x8xf32> to vector<256x8xf32>
    %c0_25 = arith.constant 0 : index
    %c0_26 = arith.constant 0 : index
    %c0_27 = arith.constant 0 : index
    %c0_28 = arith.constant 0 : index
    %24 = vector.load %arg2[%c0_25, %c0_26, %c0_27, %c0_28] : memref<3x3x8x4xf32, #tpu.memory_space<vmem>>, vector<1x1x8x4xf32>
    %25 = vector.shape_cast %24 : vector<1x1x8x4xf32> to vector<8x4xf32>
    %cst_29 = arith.constant dense<0.000000e+00> : vector<256x4xf32>
    %26 = tpu.matmul %23, %25, %cst_29 {dimension_numbers = #tpu.dot_dimension_numbers<[1], [0], [0], [1], [0, 0, 1, 1], [], []>} : vector<256x8xf32>, vector<8x4xf32>, vector<256x4xf32> -> vector<256x4xf32>
    %27 = arith.addf %21, %26 : vector<256x4xf32>
    %c0_30 = arith.constant 0 : index
    %c1_31 = arith.constant 1 : index
    %c0_32 = arith.constant 0 : index
    %28 = vector.load %arg13[%c0_30, %c1_31, %c0_32] : memref<18x18x24xf32, #tpu.memory_space<vmem>>, vector<16x16x8xf32>
    %29 = vector.shape_cast %28 : vector<16x16x8xf32> to vector<256x8xf32>
    %c0_33 = arith.constant 0 : index
    %c1_34 = arith.constant 1 : index
    %c0_35 = arith.constant 0 : index
    %c0_36 = arith.constant 0 : index
    %30 = vector.load %arg2[%c0_33, %c1_34, %c0_35, %c0_36] : memref<3x3x8x4xf32, #tpu.memory_space<vmem>>, vector<1x1x8x4xf32>
    %31 = vector.shape_cast %30 : vector<1x1x8x4xf32> to vector<8x4xf32>
    %cst_37 = arith.constant dense<0.000000e+00> : vector<256x4xf32>
    %32 = tpu.matmul %29, %31, %cst_37 {dimension_numbers = #tpu.dot_dimension_numbers<[1], [0], [0], [1], [0, 0, 1, 1], [], []>} : vector<256x8xf32>, vector<8x4xf32>, vector<256x4xf32> -> vector<256x4xf32>
    %33 = arith.addf %27, %32 : vector<256x4xf32>
    %c0_38 = arith.constant 0 : index
    %c2 = arith.constant 2 : index
    %c0_39 = arith.constant 0 : index
    %34 = vector.load %arg13[%c0_38, %c2, %c0_39] : memref<18x18x24xf32, #tpu.memory_space<vmem>>, vector<16x16x8xf32>
    %35 = vector.shape_cast %34 : vector<16x16x8xf32> to vector<256x8xf32>
    %c0_40 = arith.constant 0 : index
    %c2_41 = arith.constant 2 : index
    %c0_42 = arith.constant 0 : index
    %c0_43 = arith.constant 0 : index
    %36 = vector.load %arg2[%c0_40, %c2_41, %c0_42, %c0_43] : memref<3x3x8x4xf32, #tpu.memory_space<vmem>>, vector<1x1x8x4xf32>
    %37 = vector.shape_cast %36 : vector<1x1x8x4xf32> to vector<8x4xf32>
    %cst_44 = arith.constant dense<0.000000e+00> : vector<256x4xf32>
    %38 = tpu.matmul %35, %37, %cst_44 {dimension_numbers = #tpu.dot_dimension_numbers<[1], [0], [0], [1], [0, 0, 1, 1], [], []>} : vector<256x8xf32>, vector<8x4xf32>, vector<256x4xf32> -> vector<256x4xf32>
    %39 = arith.addf %33, %38 : vector<256x4xf32>
    %c1_45 = arith.constant 1 : index
    %c0_46 = arith.constant 0 : index
    %c0_47 = arith.constant 0 : index
    %40 = vector.load %arg13[%c1_45, %c0_46, %c0_47] : memref<18x18x24xf32, #tpu.memory_space<vmem>>, vector<16x16x8xf32>
    %41 = vector.shape_cast %40 : vector<16x16x8xf32> to vector<256x8xf32>
    %c1_48 = arith.constant 1 : index
    %c0_49 = arith.constant 0 : index
    %c0_50 = arith.constant 0 : index
    %c0_51 = arith.constant 0 : index
    %42 = vector.load %arg2[%c1_48, %c0_49, %c0_50, %c0_51] : memref<3x3x8x4xf32, #tpu.memory_space<vmem>>, vector<1x1x8x4xf32>
    %43 = vector.shape_cast %42 : vector<1x1x8x4xf32> to vector<8x4xf32>
    %cst_52 = arith.constant dense<0.000000e+00> : vector<256x4xf32>
    %44 = tpu.matmul %41, %43, %cst_52 {dimension_numbers = #tpu.dot_dimension_numbers<[1], [0], [0], [1], [0, 0, 1, 1], [], []>} : vector<256x8xf32>, vector<8x4xf32>, vector<256x4xf32> -> vector<256x4xf32>
    %45 = arith.addf %39, %44 : vector<256x4xf32>
    %c1_53 = arith.constant 1 : index
    %c1_54 = arith.constant 1 : index
    %c0_55 = arith.constant 0 : index
    %46 = vector.load %arg13[%c1_53, %c1_54, %c0_55] : memref<18x18x24xf32, #tpu.memory_space<vmem>>, vector<16x16x8xf32>
    %47 = vector.shape_cast %46 : vector<16x16x8xf32> to vector<256x8xf32>
    %c1_56 = arith.constant 1 : index
    %c1_57 = arith.constant 1 : index
    %c0_58 = arith.constant 0 : index
    %c0_59 = arith.constant 0 : index
    %48 = vector.load %arg2[%c1_56, %c1_57, %c0_58, %c0_59] : memref<3x3x8x4xf32, #tpu.memory_space<vmem>>, vector<1x1x8x4xf32>
    %49 = vector.shape_cast %48 : vector<1x1x8x4xf32> to vector<8x4xf32>
    %cst_60 = arith.constant dense<0.000000e+00> : vector<256x4xf32>
    %50 = tpu.matmul %47, %49, %cst_60 {dimension_numbers = #tpu.dot_dimension_numbers<[1], [0], [0], [1], [0, 0, 1, 1], [], []>} : vector<256x8xf32>, vector<8x4xf32>, vector<256x4xf32> -> vector<256x4xf32>
    %51 = arith.addf %45, %50 : vector<256x4xf32>
    %c1_61 = arith.constant 1 : index
    %c2_62 = arith.constant 2 : index
    %c0_63 = arith.constant 0 : index
    %52 = vector.load %arg13[%c1_61, %c2_62, %c0_63] : memref<18x18x24xf32, #tpu.memory_space<vmem>>, vector<16x16x8xf32>
    %53 = vector.shape_cast %52 : vector<16x16x8xf32> to vector<256x8xf32>
    %c1_64 = arith.constant 1 : index
    %c2_65 = arith.constant 2 : index
    %c0_66 = arith.constant 0 : index
    %c0_67 = arith.constant 0 : index
    %54 = vector.load %arg2[%c1_64, %c2_65, %c0_66, %c0_67] : memref<3x3x8x4xf32, #tpu.memory_space<vmem>>, vector<1x1x8x4xf32>
    %55 = vector.shape_cast %54 : vector<1x1x8x4xf32> to vector<8x4xf32>
    %cst_68 = arith.constant dense<0.000000e+00> : vector<256x4xf32>
    %56 = tpu.matmul %53, %55, %cst_68 {dimension_numbers = #tpu.dot_dimension_numbers<[1], [0], [0], [1], [0, 0, 1, 1], [], []>} : vector<256x8xf32>, vector<8x4xf32>, vector<256x4xf32> -> vector<256x4xf32>
    %57 = arith.addf %51, %56 : vector<256x4xf32>
    %c2_69 = arith.constant 2 : index
    %c0_70 = arith.constant 0 : index
    %c0_71 = arith.constant 0 : index
    %58 = vector.load %arg13[%c2_69, %c0_70, %c0_71] : memref<18x18x24xf32, #tpu.memory_space<vmem>>, vector<16x16x8xf32>
    %59 = vector.shape_cast %58 : vector<16x16x8xf32> to vector<256x8xf32>
    %c2_72 = arith.constant 2 : index
    %c0_73 = arith.constant 0 : index
    %c0_74 = arith.constant 0 : index
    %c0_75 = arith.constant 0 : index
    %60 = vector.load %arg2[%c2_72, %c0_73, %c0_74, %c0_75] : memref<3x3x8x4xf32, #tpu.memory_space<vmem>>, vector<1x1x8x4xf32>
    %61 = vector.shape_cast %60 : vector<1x1x8x4xf32> to vector<8x4xf32>
    %cst_76 = arith.constant dense<0.000000e+00> : vector<256x4xf32>
    %62 = tpu.matmul %59, %61, %cst_76 {dimension_numbers = #tpu.dot_dimension_numbers<[1], [0], [0], [1], [0, 0, 1, 1], [], []>} : vector<256x8xf32>, vector<8x4xf32>, vector<256x4xf32> -> vector<256x4xf32>
    %63 = arith.addf %57, %62 : vector<256x4xf32>
    %c2_77 = arith.constant 2 : index
    %c1_78 = arith.constant 1 : index
    %c0_79 = arith.constant 0 : index
    %64 = vector.load %arg13[%c2_77, %c1_78, %c0_79] : memref<18x18x24xf32, #tpu.memory_space<vmem>>, vector<16x16x8xf32>
    %65 = vector.shape_cast %64 : vector<16x16x8xf32> to vector<256x8xf32>
    %c2_80 = arith.constant 2 : index
    %c1_81 = arith.constant 1 : index
    %c0_82 = arith.constant 0 : index
    %c0_83 = arith.constant 0 : index
    %66 = vector.load %arg2[%c2_80, %c1_81, %c0_82, %c0_83] : memref<3x3x8x4xf32, #tpu.memory_space<vmem>>, vector<1x1x8x4xf32>
    %67 = vector.shape_cast %66 : vector<1x1x8x4xf32> to vector<8x4xf32>
    %cst_84 = arith.constant dense<0.000000e+00> : vector<256x4xf32>
    %68 = tpu.matmul %65, %67, %cst_84 {dimension_numbers = #tpu.dot_dimension_numbers<[1], [0], [0], [1], [0, 0, 1, 1], [], []>} : vector<256x8xf32>, vector<8x4xf32>, vector<256x4xf32> -> vector<256x4xf32>
    %69 = arith.addf %63, %68 : vector<256x4xf32>
    %c2_85 = arith.constant 2 : index
    %c2_86 = arith.constant 2 : index
    %c0_87 = arith.constant 0 : index
    %70 = vector.load %arg13[%c2_85, %c2_86, %c0_87] : memref<18x18x24xf32, #tpu.memory_space<vmem>>, vector<16x16x8xf32>
    %71 = vector.shape_cast %70 : vector<16x16x8xf32> to vector<256x8xf32>
    %c2_88 = arith.constant 2 : index
    %c2_89 = arith.constant 2 : index
    %c0_90 = arith.constant 0 : index
    %c0_91 = arith.constant 0 : index
    %72 = vector.load %arg2[%c2_88, %c2_89, %c0_90, %c0_91] : memref<3x3x8x4xf32, #tpu.memory_space<vmem>>, vector<1x1x8x4xf32>
    %73 = vector.shape_cast %72 : vector<1x1x8x4xf32> to vector<8x4xf32>
    %cst_92 = arith.constant dense<0.000000e+00> : vector<256x4xf32>
    %74 = tpu.matmul %71, %73, %cst_92 {dimension_numbers = #tpu.dot_dimension_numbers<[1], [0], [0], [1], [0, 0, 1, 1], [], []>} : vector<256x8xf32>, vector<8x4xf32>, vector<256x4xf32> -> vector<256x4xf32>
    %75 = arith.addf %69, %74 : vector<256x4xf32>
    %cst_93 = arith.constant 0.000000e+00 : f32
    %76 = vector.broadcast %cst_93 : f32 to vector<256x4xf32>
    %77 = arith.cmpf oge, %75, %76 : vector<256x4xf32>
    %cst_94 = arith.constant 2.000000e-01 : f32
    %78 = vector.broadcast %cst_94 : f32 to vector<256x4xf32>
    %79 = arith.mulf %78, %75 : vector<256x4xf32>
    %80 = arith.select %77, %75, %79 : vector<256x4xi1>, vector<256x4xf32>
    %81 = vector.shape_cast %80 : vector<256x4xf32> to vector<16x16x4xf32>
    %c1_95 = arith.constant 1 : index
    %c1_96 = arith.constant 1 : index
    %c8 = arith.constant 8 : index
    %82 = vector.load %arg13[%c1_95, %c1_96, %c8] : memref<18x18x24xf32, #tpu.memory_space<vmem>>, vector<16x16x4xf32>
    tpu.vector_store %arg13[%c1_95, %c1_96, %c8], %81 {strides = array<i32>} : memref<18x18x24xf32, #tpu.memory_space<vmem>>, vector<16x16x4xf32>,
    %cst_97 = arith.constant 0.000000e+00 : f32
    %83 = vector.broadcast %cst_97 : f32 to vector<256x4xf32>
    %c0_98 = arith.constant 0 : index
    %c0_99 = arith.constant 0 : index
    %84 = vector.load %arg8[%c0_98, %c0_99] : memref<1x4xf32, #tpu.memory_space<vmem>>, vector<1x4xf32>
    %85 = vector.broadcast %84 : vector<1x4xf32> to vector<256x4xf32>
    %86 = arith.addf %83, %85 : vector<256x4xf32>
    %c0_100 = arith.constant 0 : index
    %c0_101 = arith.constant 0 : index
    %c0_102 = arith.constant 0 : index
    %87 = vector.load %arg13[%c0_100, %c0_101, %c0_102] : memref<18x18x24xf32, #tpu.memory_space<vmem>>, vector<16x16x12xf32>
    %88 = vector.shape_cast %87 : vector<16x16x12xf32> to vector<256x12xf32>
    %c0_103 = arith.constant 0 : index
    %c0_104 = arith.constant 0 : index
    %c0_105 = arith.constant 0 : index
    %c0_106 = arith.constant 0 : index
    %89 = vector.load %arg3[%c0_103, %c0_104, %c0_105, %c0_106] : memref<3x3x12x4xf32, #tpu.memory_space<vmem>>, vector<1x1x12x4xf32>
    %90 = vector.shape_cast %89 : vector<1x1x12x4xf32> to vector<12x4xf32>
    %cst_107 = arith.constant dense<0.000000e+00> : vector<256x4xf32>
    %91 = tpu.matmul %88, %90, %cst_107 {dimension_numbers = #tpu.dot_dimension_numbers<[1], [0], [0], [1], [0, 0, 1, 1], [], []>} : vector<256x12xf32>, vector<12x4xf32>, vector<256x4xf32> -> vector<256x4xf32>
    %92 = arith.addf %86, %91 : vector<256x4xf32>
    %c0_108 = arith.constant 0 : index
    %c1_109 = arith.constant 1 : index
    %c0_110 = arith.constant 0 : index
    %93 = vector.load %arg13[%c0_108, %c1_109, %c0_110] : memref<18x18x24xf32, #tpu.memory_space<vmem>>, vector<16x16x12xf32>
    %94 = vector.shape_cast %93 : vector<16x16x12xf32> to vector<256x12xf32>
    %c0_111 = arith.constant 0 : index
    %c1_112 = arith.constant 1 : index
    %c0_113 = arith.constant 0 : index
    %c0_114 = arith.constant 0 : index
    %95 = vector.load %arg3[%c0_111, %c1_112, %c0_113, %c0_114] : memref<3x3x12x4xf32, #tpu.memory_space<vmem>>, vector<1x1x12x4xf32>
    %96 = vector.shape_cast %95 : vector<1x1x12x4xf32> to vector<12x4xf32>
    %cst_115 = arith.constant dense<0.000000e+00> : vector<256x4xf32>
    %97 = tpu.matmul %94, %96, %cst_115 {dimension_numbers = #tpu.dot_dimension_numbers<[1], [0], [0], [1], [0, 0, 1, 1], [], []>} : vector<256x12xf32>, vector<12x4xf32>, vector<256x4xf32> -> vector<256x4xf32>
    %98 = arith.addf %92, %97 : vector<256x4xf32>
    %c0_116 = arith.constant 0 : index
    %c2_117 = arith.constant 2 : index
    %c0_118 = arith.constant 0 : index
    %99 = vector.load %arg13[%c0_116, %c2_117, %c0_118] : memref<18x18x24xf32, #tpu.memory_space<vmem>>, vector<16x16x12xf32>
    %100 = vector.shape_cast %99 : vector<16x16x12xf32> to vector<256x12xf32>
    %c0_119 = arith.constant 0 : index
    %c2_120 = arith.constant 2 : index
    %c0_121 = arith.constant 0 : index
    %c0_122 = arith.constant 0 : index
    %101 = vector.load %arg3[%c0_119, %c2_120, %c0_121, %c0_122] : memref<3x3x12x4xf32, #tpu.memory_space<vmem>>, vector<1x1x12x4xf32>
    %102 = vector.shape_cast %101 : vector<1x1x12x4xf32> to vector<12x4xf32>
    %cst_123 = arith.constant dense<0.000000e+00> : vector<256x4xf32>
    %103 = tpu.matmul %100, %102, %cst_123 {dimension_numbers = #tpu.dot_dimension_numbers<[1], [0], [0], [1], [0, 0, 1, 1], [], []>} : vector<256x12xf32>, vector<12x4xf32>, vector<256x4xf32> -> vector<256x4xf32>
    %104 = arith.addf %98, %103 : vector<256x4xf32>
    %c1_124 = arith.constant 1 : index
    %c0_125 = arith.constant 0 : index
    %c0_126 = arith.constant 0 : index
    %105 = vector.load %arg13[%c1_124, %c0_125, %c0_126] : memref<18x18x24xf32, #tpu.memory_space<vmem>>, vector<16x16x12xf32>
    %106 = vector.shape_cast %105 : vector<16x16x12xf32> to vector<256x12xf32>
    %c1_127 = arith.constant 1 : index
    %c0_128 = arith.constant 0 : index
    %c0_129 = arith.constant 0 : index
    %c0_130 = arith.constant 0 : index
    %107 = vector.load %arg3[%c1_127, %c0_128, %c0_129, %c0_130] : memref<3x3x12x4xf32, #tpu.memory_space<vmem>>, vector<1x1x12x4xf32>
    %108 = vector.shape_cast %107 : vector<1x1x12x4xf32> to vector<12x4xf32>
    %cst_131 = arith.constant dense<0.000000e+00> : vector<256x4xf32>
    %109 = tpu.matmul %106, %108, %cst_131 {dimension_numbers = #tpu.dot_dimension_numbers<[1], [0], [0], [1], [0, 0, 1, 1], [], []>} : vector<256x12xf32>, vector<12x4xf32>, vector<256x4xf32> -> vector<256x4xf32>
    %110 = arith.addf %104, %109 : vector<256x4xf32>
    %c1_132 = arith.constant 1 : index
    %c1_133 = arith.constant 1 : index
    %c0_134 = arith.constant 0 : index
    %111 = vector.load %arg13[%c1_132, %c1_133, %c0_134] : memref<18x18x24xf32, #tpu.memory_space<vmem>>, vector<16x16x12xf32>
    %112 = vector.shape_cast %111 : vector<16x16x12xf32> to vector<256x12xf32>
    %c1_135 = arith.constant 1 : index
    %c1_136 = arith.constant 1 : index
    %c0_137 = arith.constant 0 : index
    %c0_138 = arith.constant 0 : index
    %113 = vector.load %arg3[%c1_135, %c1_136, %c0_137, %c0_138] : memref<3x3x12x4xf32, #tpu.memory_space<vmem>>, vector<1x1x12x4xf32>
    %114 = vector.shape_cast %113 : vector<1x1x12x4xf32> to vector<12x4xf32>
    %cst_139 = arith.constant dense<0.000000e+00> : vector<256x4xf32>
    %115 = tpu.matmul %112, %114, %cst_139 {dimension_numbers = #tpu.dot_dimension_numbers<[1], [0], [0], [1], [0, 0, 1, 1], [], []>} : vector<256x12xf32>, vector<12x4xf32>, vector<256x4xf32> -> vector<256x4xf32>
    %116 = arith.addf %110, %115 : vector<256x4xf32>
    %c1_140 = arith.constant 1 : index
    %c2_141 = arith.constant 2 : index
    %c0_142 = arith.constant 0 : index
    %117 = vector.load %arg13[%c1_140, %c2_141, %c0_142] : memref<18x18x24xf32, #tpu.memory_space<vmem>>, vector<16x16x12xf32>
    %118 = vector.shape_cast %117 : vector<16x16x12xf32> to vector<256x12xf32>
    %c1_143 = arith.constant 1 : index
    %c2_144 = arith.constant 2 : index
    %c0_145 = arith.constant 0 : index
    %c0_146 = arith.constant 0 : index
    %119 = vector.load %arg3[%c1_143, %c2_144, %c0_145, %c0_146] : memref<3x3x12x4xf32, #tpu.memory_space<vmem>>, vector<1x1x12x4xf32>
    %120 = vector.shape_cast %119 : vector<1x1x12x4xf32> to vector<12x4xf32>
    %cst_147 = arith.constant dense<0.000000e+00> : vector<256x4xf32>
    %121 = tpu.matmul %118, %120, %cst_147 {dimension_numbers = #tpu.dot_dimension_numbers<[1], [0], [0], [1], [0, 0, 1, 1], [], []>} : vector<256x12xf32>, vector<12x4xf32>, vector<256x4xf32> -> vector<256x4xf32>
    %122 = arith.addf %116, %121 : vector<256x4xf32>
    %c2_148 = arith.constant 2 : index
    %c0_149 = arith.constant 0 : index
    %c0_150 = arith.constant 0 : index
    %123 = vector.load %arg13[%c2_148, %c0_149, %c0_150] : memref<18x18x24xf32, #tpu.memory_space<vmem>>, vector<16x16x12xf32>
    %124 = vector.shape_cast %123 : vector<16x16x12xf32> to vector<256x12xf32>
    %c2_151 = arith.constant 2 : index
    %c0_152 = arith.constant 0 : index
    %c0_153 = arith.constant 0 : index
    %c0_154 = arith.constant 0 : index
    %125 = vector.load %arg3[%c2_151, %c0_152, %c0_153, %c0_154] : memref<3x3x12x4xf32, #tpu.memory_space<vmem>>, vector<1x1x12x4xf32>
    %126 = vector.shape_cast %125 : vector<1x1x12x4xf32> to vector<12x4xf32>
    %cst_155 = arith.constant dense<0.000000e+00> : vector<256x4xf32>
    %127 = tpu.matmul %124, %126, %cst_155 {dimension_numbers = #tpu.dot_dimension_numbers<[1], [0], [0], [1], [0, 0, 1, 1], [], []>} : vector<256x12xf32>, vector<12x4xf32>, vector<256x4xf32> -> vector<256x4xf32>
    %128 = arith.addf %122, %127 : vector<256x4xf32>
    %c2_156 = arith.constant 2 : index
    %c1_157 = arith.constant 1 : index
    %c0_158 = arith.constant 0 : index
    %129 = vector.load %arg13[%c2_156, %c1_157, %c0_158] : memref<18x18x24xf32, #tpu.memory_space<vmem>>, vector<16x16x12xf32>
    %130 = vector.shape_cast %129 : vector<16x16x12xf32> to vector<256x12xf32>
    %c2_159 = arith.constant 2 : index
    %c1_160 = arith.constant 1 : index
    %c0_161 = arith.constant 0 : index
    %c0_162 = arith.constant 0 : index
    %131 = vector.load %arg3[%c2_159, %c1_160, %c0_161, %c0_162] : memref<3x3x12x4xf32, #tpu.memory_space<vmem>>, vector<1x1x12x4xf32>
    %132 = vector.shape_cast %131 : vector<1x1x12x4xf32> to vector<12x4xf32>
    %cst_163 = arith.constant dense<0.000000e+00> : vector<256x4xf32>
    %133 = tpu.matmul %130, %132, %cst_163 {dimension_numbers = #tpu.dot_dimension_numbers<[1], [0], [0], [1], [0, 0, 1, 1], [], []>} : vector<256x12xf32>, vector<12x4xf32>, vector<256x4xf32> -> vector<256x4xf32>
    %134 = arith.addf %128, %133 : vector<256x4xf32>
    %c2_164 = arith.constant 2 : index
    %c2_165 = arith.constant 2 : index
    %c0_166 = arith.constant 0 : index
    %135 = vector.load %arg13[%c2_164, %c2_165, %c0_166] : memref<18x18x24xf32, #tpu.memory_space<vmem>>, vector<16x16x12xf32>
    %136 = vector.shape_cast %135 : vector<16x16x12xf32> to vector<256x12xf32>
    %c2_167 = arith.constant 2 : index
    %c2_168 = arith.constant 2 : index
    %c0_169 = arith.constant 0 : index
    %c0_170 = arith.constant 0 : index
    %137 = vector.load %arg3[%c2_167, %c2_168, %c0_169, %c0_170] : memref<3x3x12x4xf32, #tpu.memory_space<vmem>>, vector<1x1x12x4xf32>
    %138 = vector.shape_cast %137 : vector<1x1x12x4xf32> to vector<12x4xf32>
    %cst_171 = arith.constant dense<0.000000e+00> : vector<256x4xf32>
    %139 = tpu.matmul %136, %138, %cst_171 {dimension_numbers = #tpu.dot_dimension_numbers<[1], [0], [0], [1], [0, 0, 1, 1], [], []>} : vector<256x12xf32>, vector<12x4xf32>, vector<256x4xf32> -> vector<256x4xf32>
    %140 = arith.addf %134, %139 : vector<256x4xf32>
    %cst_172 = arith.constant 0.000000e+00 : f32
    %141 = vector.broadcast %cst_172 : f32 to vector<256x4xf32>
    %142 = arith.cmpf oge, %140, %141 : vector<256x4xf32>
    %cst_173 = arith.constant 2.000000e-01 : f32
    %143 = vector.broadcast %cst_173 : f32 to vector<256x4xf32>
    %144 = arith.mulf %143, %140 : vector<256x4xf32>
    %145 = arith.select %142, %140, %144 : vector<256x4xi1>, vector<256x4xf32>
    %146 = vector.shape_cast %145 : vector<256x4xf32> to vector<16x16x4xf32>
    %c1_174 = arith.constant 1 : index
    %c1_175 = arith.constant 1 : index
    %c12 = arith.constant 12 : index
    %147 = vector.load %arg13[%c1_174, %c1_175, %c12] : memref<18x18x24xf32, #tpu.memory_space<vmem>>, vector<16x16x4xf32>
    tpu.vector_store %arg13[%c1_174, %c1_175, %c12], %146 {strides = array<i32>} : memref<18x18x24xf32, #tpu.memory_space<vmem>>, vector<16x16x4xf32>,
    %cst_176 = arith.constant 0.000000e+00 : f32
    %148 = vector.broadcast %cst_176 : f32 to vector<256x4xf32>
    %c0_177 = arith.constant 0 : index
    %c0_178 = arith.constant 0 : index
    %149 = vector.load %arg9[%c0_177, %c0_178] : memref<1x4xf32, #tpu.memory_space<vmem>>, vector<1x4xf32>
    %150 = vector.broadcast %149 : vector<1x4xf32> to vector<256x4xf32>
    %151 = arith.addf %148, %150 : vector<256x4xf32>
    %c0_179 = arith.constant 0 : index
    %c0_180 = arith.constant 0 : index
    %c0_181 = arith.constant 0 : index
    %152 = vector.load %arg13[%c0_179, %c0_180, %c0_181] : memref<18x18x24xf32, #tpu.memory_space<vmem>>, vector<16x16x16xf32>
    %153 = vector.shape_cast %152 : vector<16x16x16xf32> to vector<256x16xf32>
    %c0_182 = arith.constant 0 : index
    %c0_183 = arith.constant 0 : index
    %c0_184 = arith.constant 0 : index
    %c0_185 = arith.constant 0 : index
    %154 = vector.load %arg4[%c0_182, %c0_183, %c0_184, %c0_185] : memref<3x3x16x4xf32, #tpu.memory_space<vmem>>, vector<1x1x16x4xf32>
    %155 = vector.shape_cast %154 : vector<1x1x16x4xf32> to vector<16x4xf32>
    %cst_186 = arith.constant dense<0.000000e+00> : vector<256x4xf32>
    %156 = tpu.matmul %153, %155, %cst_186 {dimension_numbers = #tpu.dot_dimension_numbers<[1], [0], [0], [1], [0, 0, 1, 1], [], []>} : vector<256x16xf32>, vector<16x4xf32>, vector<256x4xf32> -> vector<256x4xf32>
    %157 = arith.addf %151, %156 : vector<256x4xf32>
    %c0_187 = arith.constant 0 : index
    %c1_188 = arith.constant 1 : index
    %c0_189 = arith.constant 0 : index
    %158 = vector.load %arg13[%c0_187, %c1_188, %c0_189] : memref<18x18x24xf32, #tpu.memory_space<vmem>>, vector<16x16x16xf32>
    %159 = vector.shape_cast %158 : vector<16x16x16xf32> to vector<256x16xf32>
    %c0_190 = arith.constant 0 : index
    %c1_191 = arith.constant 1 : index
    %c0_192 = arith.constant 0 : index
    %c0_193 = arith.constant 0 : index
    %160 = vector.load %arg4[%c0_190, %c1_191, %c0_192, %c0_193] : memref<3x3x16x4xf32, #tpu.memory_space<vmem>>, vector<1x1x16x4xf32>
    %161 = vector.shape_cast %160 : vector<1x1x16x4xf32> to vector<16x4xf32>
    %cst_194 = arith.constant dense<0.000000e+00> : vector<256x4xf32>
    %162 = tpu.matmul %159, %161, %cst_194 {dimension_numbers = #tpu.dot_dimension_numbers<[1], [0], [0], [1], [0, 0, 1, 1], [], []>} : vector<256x16xf32>, vector<16x4xf32>, vector<256x4xf32> -> vector<256x4xf32>
    %163 = arith.addf %157, %162 : vector<256x4xf32>
    %c0_195 = arith.constant 0 : index
    %c2_196 = arith.constant 2 : index
    %c0_197 = arith.constant 0 : index
    %164 = vector.load %arg13[%c0_195, %c2_196, %c0_197] : memref<18x18x24xf32, #tpu.memory_space<vmem>>, vector<16x16x16xf32>
    %165 = vector.shape_cast %164 : vector<16x16x16xf32> to vector<256x16xf32>
    %c0_198 = arith.constant 0 : index
    %c2_199 = arith.constant 2 : index
    %c0_200 = arith.constant 0 : index
    %c0_201 = arith.constant 0 : index
    %166 = vector.load %arg4[%c0_198, %c2_199, %c0_200, %c0_201] : memref<3x3x16x4xf32, #tpu.memory_space<vmem>>, vector<1x1x16x4xf32>
    %167 = vector.shape_cast %166 : vector<1x1x16x4xf32> to vector<16x4xf32>
    %cst_202 = arith.constant dense<0.000000e+00> : vector<256x4xf32>
    %168 = tpu.matmul %165, %167, %cst_202 {dimension_numbers = #tpu.dot_dimension_numbers<[1], [0], [0], [1], [0, 0, 1, 1], [], []>} : vector<256x16xf32>, vector<16x4xf32>, vector<256x4xf32> -> vector<256x4xf32>
    %169 = arith.addf %163, %168 : vector<256x4xf32>
    %c1_203 = arith.constant 1 : index
    %c0_204 = arith.constant 0 : index
    %c0_205 = arith.constant 0 : index
    %170 = vector.load %arg13[%c1_203, %c0_204, %c0_205] : memref<18x18x24xf32, #tpu.memory_space<vmem>>, vector<16x16x16xf32>
    %171 = vector.shape_cast %170 : vector<16x16x16xf32> to vector<256x16xf32>
    %c1_206 = arith.constant 1 : index
    %c0_207 = arith.constant 0 : index
    %c0_208 = arith.constant 0 : index
    %c0_209 = arith.constant 0 : index
    %172 = vector.load %arg4[%c1_206, %c0_207, %c0_208, %c0_209] : memref<3x3x16x4xf32, #tpu.memory_space<vmem>>, vector<1x1x16x4xf32>
    %173 = vector.shape_cast %172 : vector<1x1x16x4xf32> to vector<16x4xf32>
    %cst_210 = arith.constant dense<0.000000e+00> : vector<256x4xf32>
    %174 = tpu.matmul %171, %173, %cst_210 {dimension_numbers = #tpu.dot_dimension_numbers<[1], [0], [0], [1], [0, 0, 1, 1], [], []>} : vector<256x16xf32>, vector<16x4xf32>, vector<256x4xf32> -> vector<256x4xf32>
    %175 = arith.addf %169, %174 : vector<256x4xf32>
    %c1_211 = arith.constant 1 : index
    %c1_212 = arith.constant 1 : index
    %c0_213 = arith.constant 0 : index
    %176 = vector.load %arg13[%c1_211, %c1_212, %c0_213] : memref<18x18x24xf32, #tpu.memory_space<vmem>>, vector<16x16x16xf32>
    %177 = vector.shape_cast %176 : vector<16x16x16xf32> to vector<256x16xf32>
    %c1_214 = arith.constant 1 : index
    %c1_215 = arith.constant 1 : index
    %c0_216 = arith.constant 0 : index
    %c0_217 = arith.constant 0 : index
    %178 = vector.load %arg4[%c1_214, %c1_215, %c0_216, %c0_217] : memref<3x3x16x4xf32, #tpu.memory_space<vmem>>, vector<1x1x16x4xf32>
    %179 = vector.shape_cast %178 : vector<1x1x16x4xf32> to vector<16x4xf32>
    %cst_218 = arith.constant dense<0.000000e+00> : vector<256x4xf32>
    %180 = tpu.matmul %177, %179, %cst_218 {dimension_numbers = #tpu.dot_dimension_numbers<[1], [0], [0], [1], [0, 0, 1, 1], [], []>} : vector<256x16xf32>, vector<16x4xf32>, vector<256x4xf32> -> vector<256x4xf32>
    %181 = arith.addf %175, %180 : vector<256x4xf32>
    %c1_219 = arith.constant 1 : index
    %c2_220 = arith.constant 2 : index
    %c0_221 = arith.constant 0 : index
    %182 = vector.load %arg13[%c1_219, %c2_220, %c0_221] : memref<18x18x24xf32, #tpu.memory_space<vmem>>, vector<16x16x16xf32>
    %183 = vector.shape_cast %182 : vector<16x16x16xf32> to vector<256x16xf32>
    %c1_222 = arith.constant 1 : index
    %c2_223 = arith.constant 2 : index
    %c0_224 = arith.constant 0 : index
    %c0_225 = arith.constant 0 : index
    %184 = vector.load %arg4[%c1_222, %c2_223, %c0_224, %c0_225] : memref<3x3x16x4xf32, #tpu.memory_space<vmem>>, vector<1x1x16x4xf32>
    %185 = vector.shape_cast %184 : vector<1x1x16x4xf32> to vector<16x4xf32>
    %cst_226 = arith.constant dense<0.000000e+00> : vector<256x4xf32>
    %186 = tpu.matmul %183, %185, %cst_226 {dimension_numbers = #tpu.dot_dimension_numbers<[1], [0], [0], [1], [0, 0, 1, 1], [], []>} : vector<256x16xf32>, vector<16x4xf32>, vector<256x4xf32> -> vector<256x4xf32>
    %187 = arith.addf %181, %186 : vector<256x4xf32>
    %c2_227 = arith.constant 2 : index
    %c0_228 = arith.constant 0 : index
    %c0_229 = arith.constant 0 : index
    %188 = vector.load %arg13[%c2_227, %c0_228, %c0_229] : memref<18x18x24xf32, #tpu.memory_space<vmem>>, vector<16x16x16xf32>
    %189 = vector.shape_cast %188 : vector<16x16x16xf32> to vector<256x16xf32>
    %c2_230 = arith.constant 2 : index
    %c0_231 = arith.constant 0 : index
    %c0_232 = arith.constant 0 : index
    %c0_233 = arith.constant 0 : index
    %190 = vector.load %arg4[%c2_230, %c0_231, %c0_232, %c0_233] : memref<3x3x16x4xf32, #tpu.memory_space<vmem>>, vector<1x1x16x4xf32>
    %191 = vector.shape_cast %190 : vector<1x1x16x4xf32> to vector<16x4xf32>
    %cst_234 = arith.constant dense<0.000000e+00> : vector<256x4xf32>
    %192 = tpu.matmul %189, %191, %cst_234 {dimension_numbers = #tpu.dot_dimension_numbers<[1], [0], [0], [1], [0, 0, 1, 1], [], []>} : vector<256x16xf32>, vector<16x4xf32>, vector<256x4xf32> -> vector<256x4xf32>
    %193 = arith.addf %187, %192 : vector<256x4xf32>
    %c2_235 = arith.constant 2 : index
    %c1_236 = arith.constant 1 : index
    %c0_237 = arith.constant 0 : index
    %194 = vector.load %arg13[%c2_235, %c1_236, %c0_237] : memref<18x18x24xf32, #tpu.memory_space<vmem>>, vector<16x16x16xf32>
    %195 = vector.shape_cast %194 : vector<16x16x16xf32> to vector<256x16xf32>
    %c2_238 = arith.constant 2 : index
    %c1_239 = arith.constant 1 : index
    %c0_240 = arith.constant 0 : index
    %c0_241 = arith.constant 0 : index
    %196 = vector.load %arg4[%c2_238, %c1_239, %c0_240, %c0_241] : memref<3x3x16x4xf32, #tpu.memory_space<vmem>>, vector<1x1x16x4xf32>
    %197 = vector.shape_cast %196 : vector<1x1x16x4xf32> to vector<16x4xf32>
    %cst_242 = arith.constant dense<0.000000e+00> : vector<256x4xf32>
    %198 = tpu.matmul %195, %197, %cst_242 {dimension_numbers = #tpu.dot_dimension_numbers<[1], [0], [0], [1], [0, 0, 1, 1], [], []>} : vector<256x16xf32>, vector<16x4xf32>, vector<256x4xf32> -> vector<256x4xf32>
    %199 = arith.addf %193, %198 : vector<256x4xf32>
    %c2_243 = arith.constant 2 : index
    %c2_244 = arith.constant 2 : index
    %c0_245 = arith.constant 0 : index
    %200 = vector.load %arg13[%c2_243, %c2_244, %c0_245] : memref<18x18x24xf32, #tpu.memory_space<vmem>>, vector<16x16x16xf32>
    %201 = vector.shape_cast %200 : vector<16x16x16xf32> to vector<256x16xf32>
    %c2_246 = arith.constant 2 : index
    %c2_247 = arith.constant 2 : index
    %c0_248 = arith.constant 0 : index
    %c0_249 = arith.constant 0 : index
    %202 = vector.load %arg4[%c2_246, %c2_247, %c0_248, %c0_249] : memref<3x3x16x4xf32, #tpu.memory_space<vmem>>, vector<1x1x16x4xf32>
    %203 = vector.shape_cast %202 : vector<1x1x16x4xf32> to vector<16x4xf32>
    %cst_250 = arith.constant dense<0.000000e+00> : vector<256x4xf32>
    %204 = tpu.matmul %201, %203, %cst_250 {dimension_numbers = #tpu.dot_dimension_numbers<[1], [0], [0], [1], [0, 0, 1, 1], [], []>} : vector<256x16xf32>, vector<16x4xf32>, vector<256x4xf32> -> vector<256x4xf32>
    %205 = arith.addf %199, %204 : vector<256x4xf32>
    %cst_251 = arith.constant 0.000000e+00 : f32
    %206 = vector.broadcast %cst_251 : f32 to vector<256x4xf32>
    %207 = arith.cmpf oge, %205, %206 : vector<256x4xf32>
    %cst_252 = arith.constant 2.000000e-01 : f32
    %208 = vector.broadcast %cst_252 : f32 to vector<256x4xf32>
    %209 = arith.mulf %208, %205 : vector<256x4xf32>
    %210 = arith.select %207, %205, %209 : vector<256x4xi1>, vector<256x4xf32>
    %211 = vector.shape_cast %210 : vector<256x4xf32> to vector<16x16x4xf32>
    %c1_253 = arith.constant 1 : index
    %c1_254 = arith.constant 1 : index
    %c16 = arith.constant 16 : index
    %212 = vector.load %arg13[%c1_253, %c1_254, %c16] : memref<18x18x24xf32, #tpu.memory_space<vmem>>, vector<16x16x4xf32>
    tpu.vector_store %arg13[%c1_253, %c1_254, %c16], %211 {strides = array<i32>} : memref<18x18x24xf32, #tpu.memory_space<vmem>>, vector<16x16x4xf32>,
    %cst_255 = arith.constant 0.000000e+00 : f32
    %213 = vector.broadcast %cst_255 : f32 to vector<256x4xf32>
    %c0_256 = arith.constant 0 : index
    %c0_257 = arith.constant 0 : index
    %214 = vector.load %arg10[%c0_256, %c0_257] : memref<1x4xf32, #tpu.memory_space<vmem>>, vector<1x4xf32>
    %215 = vector.broadcast %214 : vector<1x4xf32> to vector<256x4xf32>
    %216 = arith.addf %213, %215 : vector<256x4xf32>
    %c0_258 = arith.constant 0 : index
    %c0_259 = arith.constant 0 : index
    %c0_260 = arith.constant 0 : index
    %217 = vector.load %arg13[%c0_258, %c0_259, %c0_260] : memref<18x18x24xf32, #tpu.memory_space<vmem>>, vector<16x16x20xf32>
    %218 = vector.shape_cast %217 : vector<16x16x20xf32> to vector<256x20xf32>
    %c0_261 = arith.constant 0 : index
    %c0_262 = arith.constant 0 : index
    %c0_263 = arith.constant 0 : index
    %c0_264 = arith.constant 0 : index
    %219 = vector.load %arg5[%c0_261, %c0_262, %c0_263, %c0_264] : memref<3x3x20x4xf32, #tpu.memory_space<vmem>>, vector<1x1x20x4xf32>
    %220 = vector.shape_cast %219 : vector<1x1x20x4xf32> to vector<20x4xf32>
    %cst_265 = arith.constant dense<0.000000e+00> : vector<256x4xf32>
    %221 = tpu.matmul %218, %220, %cst_265 {dimension_numbers = #tpu.dot_dimension_numbers<[1], [0], [0], [1], [0, 0, 1, 1], [], []>} : vector<256x20xf32>, vector<20x4xf32>, vector<256x4xf32> -> vector<256x4xf32>
    %222 = arith.addf %216, %221 : vector<256x4xf32>
    %c0_266 = arith.constant 0 : index
    %c1_267 = arith.constant 1 : index
    %c0_268 = arith.constant 0 : index
    %223 = vector.load %arg13[%c0_266, %c1_267, %c0_268] : memref<18x18x24xf32, #tpu.memory_space<vmem>>, vector<16x16x20xf32>
    %224 = vector.shape_cast %223 : vector<16x16x20xf32> to vector<256x20xf32>
    %c0_269 = arith.constant 0 : index
    %c1_270 = arith.constant 1 : index
    %c0_271 = arith.constant 0 : index
    %c0_272 = arith.constant 0 : index
    %225 = vector.load %arg5[%c0_269, %c1_270, %c0_271, %c0_272] : memref<3x3x20x4xf32, #tpu.memory_space<vmem>>, vector<1x1x20x4xf32>
    %226 = vector.shape_cast %225 : vector<1x1x20x4xf32> to vector<20x4xf32>
    %cst_273 = arith.constant dense<0.000000e+00> : vector<256x4xf32>
    %227 = tpu.matmul %224, %226, %cst_273 {dimension_numbers = #tpu.dot_dimension_numbers<[1], [0], [0], [1], [0, 0, 1, 1], [], []>} : vector<256x20xf32>, vector<20x4xf32>, vector<256x4xf32> -> vector<256x4xf32>
    %228 = arith.addf %222, %227 : vector<256x4xf32>
    %c0_274 = arith.constant 0 : index
    %c2_275 = arith.constant 2 : index
    %c0_276 = arith.constant 0 : index
    %229 = vector.load %arg13[%c0_274, %c2_275, %c0_276] : memref<18x18x24xf32, #tpu.memory_space<vmem>>, vector<16x16x20xf32>
    %230 = vector.shape_cast %229 : vector<16x16x20xf32> to vector<256x20xf32>
    %c0_277 = arith.constant 0 : index
    %c2_278 = arith.constant 2 : index
    %c0_279 = arith.constant 0 : index
    %c0_280 = arith.constant 0 : index
    %231 = vector.load %arg5[%c0_277, %c2_278, %c0_279, %c0_280] : memref<3x3x20x4xf32, #tpu.memory_space<vmem>>, vector<1x1x20x4xf32>
    %232 = vector.shape_cast %231 : vector<1x1x20x4xf32> to vector<20x4xf32>
    %cst_281 = arith.constant dense<0.000000e+00> : vector<256x4xf32>
    %233 = tpu.matmul %230, %232, %cst_281 {dimension_numbers = #tpu.dot_dimension_numbers<[1], [0], [0], [1], [0, 0, 1, 1], [], []>} : vector<256x20xf32>, vector<20x4xf32>, vector<256x4xf32> -> vector<256x4xf32>
    %234 = arith.addf %228, %233 : vector<256x4xf32>
    %c1_282 = arith.constant 1 : index
    %c0_283 = arith.constant 0 : index
    %c0_284 = arith.constant 0 : index
    %235 = vector.load %arg13[%c1_282, %c0_283, %c0_284] : memref<18x18x24xf32, #tpu.memory_space<vmem>>, vector<16x16x20xf32>
    %236 = vector.shape_cast %235 : vector<16x16x20xf32> to vector<256x20xf32>
    %c1_285 = arith.constant 1 : index
    %c0_286 = arith.constant 0 : index
    %c0_287 = arith.constant 0 : index
    %c0_288 = arith.constant 0 : index
    %237 = vector.load %arg5[%c1_285, %c0_286, %c0_287, %c0_288] : memref<3x3x20x4xf32, #tpu.memory_space<vmem>>, vector<1x1x20x4xf32>
    %238 = vector.shape_cast %237 : vector<1x1x20x4xf32> to vector<20x4xf32>
    %cst_289 = arith.constant dense<0.000000e+00> : vector<256x4xf32>
    %239 = tpu.matmul %236, %238, %cst_289 {dimension_numbers = #tpu.dot_dimension_numbers<[1], [0], [0], [1], [0, 0, 1, 1], [], []>} : vector<256x20xf32>, vector<20x4xf32>, vector<256x4xf32> -> vector<256x4xf32>
    %240 = arith.addf %234, %239 : vector<256x4xf32>
    %c1_290 = arith.constant 1 : index
    %c1_291 = arith.constant 1 : index
    %c0_292 = arith.constant 0 : index
    %241 = vector.load %arg13[%c1_290, %c1_291, %c0_292] : memref<18x18x24xf32, #tpu.memory_space<vmem>>, vector<16x16x20xf32>
    %242 = vector.shape_cast %241 : vector<16x16x20xf32> to vector<256x20xf32>
    %c1_293 = arith.constant 1 : index
    %c1_294 = arith.constant 1 : index
    %c0_295 = arith.constant 0 : index
    %c0_296 = arith.constant 0 : index
    %243 = vector.load %arg5[%c1_293, %c1_294, %c0_295, %c0_296] : memref<3x3x20x4xf32, #tpu.memory_space<vmem>>, vector<1x1x20x4xf32>
    %244 = vector.shape_cast %243 : vector<1x1x20x4xf32> to vector<20x4xf32>
    %cst_297 = arith.constant dense<0.000000e+00> : vector<256x4xf32>
    %245 = tpu.matmul %242, %244, %cst_297 {dimension_numbers = #tpu.dot_dimension_numbers<[1], [0], [0], [1], [0, 0, 1, 1], [], []>} : vector<256x20xf32>, vector<20x4xf32>, vector<256x4xf32> -> vector<256x4xf32>
    %246 = arith.addf %240, %245 : vector<256x4xf32>
    %c1_298 = arith.constant 1 : index
    %c2_299 = arith.constant 2 : index
    %c0_300 = arith.constant 0 : index
    %247 = vector.load %arg13[%c1_298, %c2_299, %c0_300] : memref<18x18x24xf32, #tpu.memory_space<vmem>>, vector<16x16x20xf32>
    %248 = vector.shape_cast %247 : vector<16x16x20xf32> to vector<256x20xf32>
    %c1_301 = arith.constant 1 : index
    %c2_302 = arith.constant 2 : index
    %c0_303 = arith.constant 0 : index
    %c0_304 = arith.constant 0 : index
    %249 = vector.load %arg5[%c1_301, %c2_302, %c0_303, %c0_304] : memref<3x3x20x4xf32, #tpu.memory_space<vmem>>, vector<1x1x20x4xf32>
    %250 = vector.shape_cast %249 : vector<1x1x20x4xf32> to vector<20x4xf32>
    %cst_305 = arith.constant dense<0.000000e+00> : vector<256x4xf32>
    %251 = tpu.matmul %248, %250, %cst_305 {dimension_numbers = #tpu.dot_dimension_numbers<[1], [0], [0], [1], [0, 0, 1, 1], [], []>} : vector<256x20xf32>, vector<20x4xf32>, vector<256x4xf32> -> vector<256x4xf32>
    %252 = arith.addf %246, %251 : vector<256x4xf32>
    %c2_306 = arith.constant 2 : index
    %c0_307 = arith.constant 0 : index
    %c0_308 = arith.constant 0 : index
    %253 = vector.load %arg13[%c2_306, %c0_307, %c0_308] : memref<18x18x24xf32, #tpu.memory_space<vmem>>, vector<16x16x20xf32>
    %254 = vector.shape_cast %253 : vector<16x16x20xf32> to vector<256x20xf32>
    %c2_309 = arith.constant 2 : index
    %c0_310 = arith.constant 0 : index
    %c0_311 = arith.constant 0 : index
    %c0_312 = arith.constant 0 : index
    %255 = vector.load %arg5[%c2_309, %c0_310, %c0_311, %c0_312] : memref<3x3x20x4xf32, #tpu.memory_space<vmem>>, vector<1x1x20x4xf32>
    %256 = vector.shape_cast %255 : vector<1x1x20x4xf32> to vector<20x4xf32>
    %cst_313 = arith.constant dense<0.000000e+00> : vector<256x4xf32>
    %257 = tpu.matmul %254, %256, %cst_313 {dimension_numbers = #tpu.dot_dimension_numbers<[1], [0], [0], [1], [0, 0, 1, 1], [], []>} : vector<256x20xf32>, vector<20x4xf32>, vector<256x4xf32> -> vector<256x4xf32>
    %258 = arith.addf %252, %257 : vector<256x4xf32>
    %c2_314 = arith.constant 2 : index
    %c1_315 = arith.constant 1 : index
    %c0_316 = arith.constant 0 : index
    %259 = vector.load %arg13[%c2_314, %c1_315, %c0_316] : memref<18x18x24xf32, #tpu.memory_space<vmem>>, vector<16x16x20xf32>
    %260 = vector.shape_cast %259 : vector<16x16x20xf32> to vector<256x20xf32>
    %c2_317 = arith.constant 2 : index
    %c1_318 = arith.constant 1 : index
    %c0_319 = arith.constant 0 : index
    %c0_320 = arith.constant 0 : index
    %261 = vector.load %arg5[%c2_317, %c1_318, %c0_319, %c0_320] : memref<3x3x20x4xf32, #tpu.memory_space<vmem>>, vector<1x1x20x4xf32>
    %262 = vector.shape_cast %261 : vector<1x1x20x4xf32> to vector<20x4xf32>
    %cst_321 = arith.constant dense<0.000000e+00> : vector<256x4xf32>
    %263 = tpu.matmul %260, %262, %cst_321 {dimension_numbers = #tpu.dot_dimension_numbers<[1], [0], [0], [1], [0, 0, 1, 1], [], []>} : vector<256x20xf32>, vector<20x4xf32>, vector<256x4xf32> -> vector<256x4xf32>
    %264 = arith.addf %258, %263 : vector<256x4xf32>
    %c2_322 = arith.constant 2 : index
    %c2_323 = arith.constant 2 : index
    %c0_324 = arith.constant 0 : index
    %265 = vector.load %arg13[%c2_322, %c2_323, %c0_324] : memref<18x18x24xf32, #tpu.memory_space<vmem>>, vector<16x16x20xf32>
    %266 = vector.shape_cast %265 : vector<16x16x20xf32> to vector<256x20xf32>
    %c2_325 = arith.constant 2 : index
    %c2_326 = arith.constant 2 : index
    %c0_327 = arith.constant 0 : index
    %c0_328 = arith.constant 0 : index
    %267 = vector.load %arg5[%c2_325, %c2_326, %c0_327, %c0_328] : memref<3x3x20x4xf32, #tpu.memory_space<vmem>>, vector<1x1x20x4xf32>
    %268 = vector.shape_cast %267 : vector<1x1x20x4xf32> to vector<20x4xf32>
    %cst_329 = arith.constant dense<0.000000e+00> : vector<256x4xf32>
    %269 = tpu.matmul %266, %268, %cst_329 {dimension_numbers = #tpu.dot_dimension_numbers<[1], [0], [0], [1], [0, 0, 1, 1], [], []>} : vector<256x20xf32>, vector<20x4xf32>, vector<256x4xf32> -> vector<256x4xf32>
    %270 = arith.addf %264, %269 : vector<256x4xf32>
    %cst_330 = arith.constant 0.000000e+00 : f32
    %271 = vector.broadcast %cst_330 : f32 to vector<256x4xf32>
    %272 = arith.cmpf oge, %270, %271 : vector<256x4xf32>
    %cst_331 = arith.constant 2.000000e-01 : f32
    %273 = vector.broadcast %cst_331 : f32 to vector<256x4xf32>
    %274 = arith.mulf %273, %270 : vector<256x4xf32>
    %275 = arith.select %272, %270, %274 : vector<256x4xi1>, vector<256x4xf32>
    %276 = vector.shape_cast %275 : vector<256x4xf32> to vector<16x16x4xf32>
    %c1_332 = arith.constant 1 : index
    %c1_333 = arith.constant 1 : index
    %c20 = arith.constant 20 : index
    %277 = vector.load %arg13[%c1_332, %c1_333, %c20] : memref<18x18x24xf32, #tpu.memory_space<vmem>>, vector<16x16x4xf32>
    tpu.vector_store %arg13[%c1_332, %c1_333, %c20], %276 {strides = array<i32>} : memref<18x18x24xf32, #tpu.memory_space<vmem>>, vector<16x16x4xf32>,
    %cst_334 = arith.constant 0.000000e+00 : f32
    %278 = vector.broadcast %cst_334 : f32 to vector<8x256xf32>
    %c0_335 = arith.constant 0 : index
    %c0_336 = arith.constant 0 : index
    %279 = vector.load %arg11[%c0_335, %c0_336] : memref<8x1xf32, #tpu.memory_space<vmem>>, vector<8x1xf32>
    %280 = vector.broadcast %279 : vector<8x1xf32> to vector<8x256xf32>
    %281 = arith.addf %278, %280 : vector<8x256xf32>
    %c0_337 = arith.constant 0 : index
    %c0_338 = arith.constant 0 : index
    %c0_339 = arith.constant 0 : index
    %c0_340 = arith.constant 0 : index
    %282 = vector.load %arg6[%c0_337, %c0_338, %c0_339, %c0_340] : memref<3x3x8x24xf32, #tpu.memory_space<vmem>>, vector<1x1x8x24xf32>
    %283 = vector.shape_cast %282 : vector<1x1x8x24xf32> to vector<8x24xf32>
    %c0_341 = arith.constant 0 : index
    %c0_342 = arith.constant 0 : index
    %c0_343 = arith.constant 0 : index
    %284 = vector.load %arg13[%c0_341, %c0_342, %c0_343] : memref<18x18x24xf32, #tpu.memory_space<vmem>>, vector<16x16x24xf32>
    %285 = vector.shape_cast %284 : vector<16x16x24xf32> to vector<256x24xf32>
    %cst_344 = arith.constant dense<0.000000e+00> : vector<8x256xf32>
    %286 = tpu.matmul %283, %285, %cst_344 {dimension_numbers = #tpu.dot_dimension_numbers<[1], [1], [0], [0], [0, 0, 1, 0], [], []>} : vector<8x24xf32>, vector<256x24xf32>, vector<8x256xf32> -> vector<8x256xf32>
    %287 = arith.addf %281, %286 : vector<8x256xf32>
    %c0_345 = arith.constant 0 : index
    %c1_346 = arith.constant 1 : index
    %c0_347 = arith.constant 0 : index
    %c0_348 = arith.constant 0 : index
    %288 = vector.load %arg6[%c0_345, %c1_346, %c0_347, %c0_348] : memref<3x3x8x24xf32, #tpu.memory_space<vmem>>, vector<1x1x8x24xf32>
    %289 = vector.shape_cast %288 : vector<1x1x8x24xf32> to vector<8x24xf32>
    %c0_349 = arith.constant 0 : index
    %c1_350 = arith.constant 1 : index
    %c0_351 = arith.constant 0 : index
    %290 = vector.load %arg13[%c0_349, %c1_350, %c0_351] : memref<18x18x24xf32, #tpu.memory_space<vmem>>, vector<16x16x24xf32>
    %291 = vector.shape_cast %290 : vector<16x16x24xf32> to vector<256x24xf32>
    %cst_352 = arith.constant dense<0.000000e+00> : vector<8x256xf32>
    %292 = tpu.matmul %289, %291, %cst_352 {dimension_numbers = #tpu.dot_dimension_numbers<[1], [1], [0], [0], [0, 0, 1, 0], [], []>} : vector<8x24xf32>, vector<256x24xf32>, vector<8x256xf32> -> vector<8x256xf32>
    %293 = arith.addf %287, %292 : vector<8x256xf32>
    %c0_353 = arith.constant 0 : index
    %c2_354 = arith.constant 2 : index
    %c0_355 = arith.constant 0 : index
    %c0_356 = arith.constant 0 : index
    %294 = vector.load %arg6[%c0_353, %c2_354, %c0_355, %c0_356] : memref<3x3x8x24xf32, #tpu.memory_space<vmem>>, vector<1x1x8x24xf32>
    %295 = vector.shape_cast %294 : vector<1x1x8x24xf32> to vector<8x24xf32>
    %c0_357 = arith.constant 0 : index
    %c2_358 = arith.constant 2 : index
    %c0_359 = arith.constant 0 : index
    %296 = vector.load %arg13[%c0_357, %c2_358, %c0_359] : memref<18x18x24xf32, #tpu.memory_space<vmem>>, vector<16x16x24xf32>
    %297 = vector.shape_cast %296 : vector<16x16x24xf32> to vector<256x24xf32>
    %cst_360 = arith.constant dense<0.000000e+00> : vector<8x256xf32>
    %298 = tpu.matmul %295, %297, %cst_360 {dimension_numbers = #tpu.dot_dimension_numbers<[1], [1], [0], [0], [0, 0, 1, 0], [], []>} : vector<8x24xf32>, vector<256x24xf32>, vector<8x256xf32> -> vector<8x256xf32>
    %299 = arith.addf %293, %298 : vector<8x256xf32>
    %c1_361 = arith.constant 1 : index
    %c0_362 = arith.constant 0 : index
    %c0_363 = arith.constant 0 : index
    %c0_364 = arith.constant 0 : index
    %300 = vector.load %arg6[%c1_361, %c0_362, %c0_363, %c0_364] : memref<3x3x8x24xf32, #tpu.memory_space<vmem>>, vector<1x1x8x24xf32>
    %301 = vector.shape_cast %300 : vector<1x1x8x24xf32> to vector<8x24xf32>
    %c1_365 = arith.constant 1 : index
    %c0_366 = arith.constant 0 : index
    %c0_367 = arith.constant 0 : index
    %302 = vector.load %arg13[%c1_365, %c0_366, %c0_367] : memref<18x18x24xf32, #tpu.memory_space<vmem>>, vector<16x16x24xf32>
    %303 = vector.shape_cast %302 : vector<16x16x24xf32> to vector<256x24xf32>
    %cst_368 = arith.constant dense<0.000000e+00> : vector<8x256xf32>
    %304 = tpu.matmul %301, %303, %cst_368 {dimension_numbers = #tpu.dot_dimension_numbers<[1], [1], [0], [0], [0, 0, 1, 0], [], []>} : vector<8x24xf32>, vector<256x24xf32>, vector<8x256xf32> -> vector<8x256xf32>
    %305 = arith.addf %299, %304 : vector<8x256xf32>
    %c1_369 = arith.constant 1 : index
    %c1_370 = arith.constant 1 : index
    %c0_371 = arith.constant 0 : index
    %c0_372 = arith.constant 0 : index
    %306 = vector.load %arg6[%c1_369, %c1_370, %c0_371, %c0_372] : memref<3x3x8x24xf32, #tpu.memory_space<vmem>>, vector<1x1x8x24xf32>
    %307 = vector.shape_cast %306 : vector<1x1x8x24xf32> to vector<8x24xf32>
    %c1_373 = arith.constant 1 : index
    %c1_374 = arith.constant 1 : index
    %c0_375 = arith.constant 0 : index
    %308 = vector.load %arg13[%c1_373, %c1_374, %c0_375] : memref<18x18x24xf32, #tpu.memory_space<vmem>>, vector<16x16x24xf32>
    %309 = vector.shape_cast %308 : vector<16x16x24xf32> to vector<256x24xf32>
    %cst_376 = arith.constant dense<0.000000e+00> : vector<8x256xf32>
    %310 = tpu.matmul %307, %309, %cst_376 {dimension_numbers = #tpu.dot_dimension_numbers<[1], [1], [0], [0], [0, 0, 1, 0], [], []>} : vector<8x24xf32>, vector<256x24xf32>, vector<8x256xf32> -> vector<8x256xf32>
    %311 = arith.addf %305, %310 : vector<8x256xf32>
    %c1_377 = arith.constant 1 : index
    %c2_378 = arith.constant 2 : index
    %c0_379 = arith.constant 0 : index
    %c0_380 = arith.constant 0 : index
    %312 = vector.load %arg6[%c1_377, %c2_378, %c0_379, %c0_380] : memref<3x3x8x24xf32, #tpu.memory_space<vmem>>, vector<1x1x8x24xf32>
    %313 = vector.shape_cast %312 : vector<1x1x8x24xf32> to vector<8x24xf32>
    %c1_381 = arith.constant 1 : index
    %c2_382 = arith.constant 2 : index
    %c0_383 = arith.constant 0 : index
    %314 = vector.load %arg13[%c1_381, %c2_382, %c0_383] : memref<18x18x24xf32, #tpu.memory_space<vmem>>, vector<16x16x24xf32>
    %315 = vector.shape_cast %314 : vector<16x16x24xf32> to vector<256x24xf32>
    %cst_384 = arith.constant dense<0.000000e+00> : vector<8x256xf32>
    %316 = tpu.matmul %313, %315, %cst_384 {dimension_numbers = #tpu.dot_dimension_numbers<[1], [1], [0], [0], [0, 0, 1, 0], [], []>} : vector<8x24xf32>, vector<256x24xf32>, vector<8x256xf32> -> vector<8x256xf32>
    %317 = arith.addf %311, %316 : vector<8x256xf32>
    %c2_385 = arith.constant 2 : index
    %c0_386 = arith.constant 0 : index
    %c0_387 = arith.constant 0 : index
    %c0_388 = arith.constant 0 : index
    %318 = vector.load %arg6[%c2_385, %c0_386, %c0_387, %c0_388] : memref<3x3x8x24xf32, #tpu.memory_space<vmem>>, vector<1x1x8x24xf32>
    %319 = vector.shape_cast %318 : vector<1x1x8x24xf32> to vector<8x24xf32>
    %c2_389 = arith.constant 2 : index
    %c0_390 = arith.constant 0 : index
    %c0_391 = arith.constant 0 : index
    %320 = vector.load %arg13[%c2_389, %c0_390, %c0_391] : memref<18x18x24xf32, #tpu.memory_space<vmem>>, vector<16x16x24xf32>
    %321 = vector.shape_cast %320 : vector<16x16x24xf32> to vector<256x24xf32>
    %cst_392 = arith.constant dense<0.000000e+00> : vector<8x256xf32>
    %322 = tpu.matmul %319, %321, %cst_392 {dimension_numbers = #tpu.dot_dimension_numbers<[1], [1], [0], [0], [0, 0, 1, 0], [], []>} : vector<8x24xf32>, vector<256x24xf32>, vector<8x256xf32> -> vector<8x256xf32>
    %323 = arith.addf %317, %322 : vector<8x256xf32>
    %c2_393 = arith.constant 2 : index
    %c1_394 = arith.constant 1 : index
    %c0_395 = arith.constant 0 : index
    %c0_396 = arith.constant 0 : index
    %324 = vector.load %arg6[%c2_393, %c1_394, %c0_395, %c0_396] : memref<3x3x8x24xf32, #tpu.memory_space<vmem>>, vector<1x1x8x24xf32>
    %325 = vector.shape_cast %324 : vector<1x1x8x24xf32> to vector<8x24xf32>
    %c2_397 = arith.constant 2 : index
    %c1_398 = arith.constant 1 : index
    %c0_399 = arith.constant 0 : index
    %326 = vector.load %arg13[%c2_397, %c1_398, %c0_399] : memref<18x18x24xf32, #tpu.memory_space<vmem>>, vector<16x16x24xf32>
    %327 = vector.shape_cast %326 : vector<16x16x24xf32> to vector<256x24xf32>
    %cst_400 = arith.constant dense<0.000000e+00> : vector<8x256xf32>
    %328 = tpu.matmul %325, %327, %cst_400 {dimension_numbers = #tpu.dot_dimension_numbers<[1], [1], [0], [0], [0, 0, 1, 0], [], []>} : vector<8x24xf32>, vector<256x24xf32>, vector<8x256xf32> -> vector<8x256xf32>
    %329 = arith.addf %323, %328 : vector<8x256xf32>
    %c2_401 = arith.constant 2 : index
    %c2_402 = arith.constant 2 : index
    %c0_403 = arith.constant 0 : index
    %c0_404 = arith.constant 0 : index
    %330 = vector.load %arg6[%c2_401, %c2_402, %c0_403, %c0_404] : memref<3x3x8x24xf32, #tpu.memory_space<vmem>>, vector<1x1x8x24xf32>
    %331 = vector.shape_cast %330 : vector<1x1x8x24xf32> to vector<8x24xf32>
    %c2_405 = arith.constant 2 : index
    %c2_406 = arith.constant 2 : index
    %c0_407 = arith.constant 0 : index
    %332 = vector.load %arg13[%c2_405, %c2_406, %c0_407] : memref<18x18x24xf32, #tpu.memory_space<vmem>>, vector<16x16x24xf32>
    %333 = vector.shape_cast %332 : vector<16x16x24xf32> to vector<256x24xf32>
    %cst_408 = arith.constant dense<0.000000e+00> : vector<8x256xf32>
    %334 = tpu.matmul %331, %333, %cst_408 {dimension_numbers = #tpu.dot_dimension_numbers<[1], [1], [0], [0], [0, 0, 1, 0], [], []>} : vector<8x24xf32>, vector<256x24xf32>, vector<8x256xf32> -> vector<8x256xf32>
    %335 = arith.addf %329, %334 : vector<8x256xf32>
    %cst_409 = arith.constant 2.000000e-01 : f32
    %336 = vector.broadcast %cst_409 : f32 to vector<8x256xf32>
    %337 = arith.mulf %335, %336 : vector<8x256xf32>
    %338 = arith.addf %337, %9 : vector<8x256xf32>
    %339 = vector.shape_cast %338 : vector<8x256xf32> to vector<1x8x256xf32>
    %c0_410 = arith.constant 0 : index
    %c0_411 = arith.constant 0 : index
    %c0_412 = arith.constant 0 : index
    %340 = vector.load %arg12[%c0_410, %c0_411, %c0_412] : memref<1x8x256xf32, #tpu.memory_space<vmem>>, vector<1x8x256xf32>
    tpu.vector_store %arg12[%c0_410, %c0_411, %c0_412], %339 {strides = array<i32>} : memref<1x8x256xf32, #tpu.memory_space<vmem>>, vector<1x8x256xf32>,
    return
  }
  func.func @transform_0(%arg0: i32) -> (i32, i32, i32) {
    %c0_i32 = arith.constant 0 : i32
    %c0_i32_0 = arith.constant 0 : i32
    %c0_i32_1 = arith.constant 0 : i32
    return %arg0, %c0_i32, %c0_i32_0 : i32, i32, i32
  }
  func.func @transform_1(%arg0: i32) -> (i32, i32, i32, i32) {
    %c0_i32 = arith.constant 0 : i32
    %c0_i32_0 = arith.constant 0 : i32
    %c0_i32_1 = arith.constant 0 : i32
    %c0_i32_2 = arith.constant 0 : i32
    %c0_i32_3 = arith.constant 0 : i32
    return %c0_i32, %c0_i32_0, %c0_i32_1, %c0_i32_2 : i32, i32, i32, i32
  }
  func.func @transform_2(%arg0: i32) -> (i32, i32, i32, i32) {
    %c0_i32 = arith.constant 0 : i32
    %c0_i32_0 = arith.constant 0 : i32
    %c0_i32_1 = arith.constant 0 : i32
    %c0_i32_2 = arith.constant 0 : i32
    %c0_i32_3 = arith.constant 0 : i32
    return %c0_i32, %c0_i32_0, %c0_i32_1, %c0_i32_2 : i32, i32, i32, i32
  }
  func.func @transform_3(%arg0: i32) -> (i32, i32, i32, i32) {
    %c0_i32 = arith.constant 0 : i32
    %c0_i32_0 = arith.constant 0 : i32
    %c0_i32_1 = arith.constant 0 : i32
    %c0_i32_2 = arith.constant 0 : i32
    %c0_i32_3 = arith.constant 0 : i32
    return %c0_i32, %c0_i32_0, %c0_i32_1, %c0_i32_2 : i32, i32, i32, i32
  }
  func.func @transform_4(%arg0: i32) -> (i32, i32, i32, i32) {
    %c0_i32 = arith.constant 0 : i32
    %c0_i32_0 = arith.constant 0 : i32
    %c0_i32_1 = arith.constant 0 : i32
    %c0_i32_2 = arith.constant 0 : i32
    %c0_i32_3 = arith.constant 0 : i32
    return %c0_i32, %c0_i32_0, %c0_i32_1, %c0_i32_2 : i32, i32, i32, i32
  }
  func.func @transform_5(%arg0: i32) -> (i32, i32, i32, i32) {
    %c0_i32 = arith.constant 0 : i32
    %c0_i32_0 = arith.constant 0 : i32
    %c0_i32_1 = arith.constant 0 : i32
    %c0_i32_2 = arith.constant 0 : i32
    %c0_i32_3 = arith.constant 0 : i32
    return %c0_i32, %c0_i32_0, %c0_i32_1, %c0_i32_2 : i32, i32, i32, i32
  }
  func.func @transform_6(%arg0: i32) -> (i32, i32) {
    %c0_i32 = arith.constant 0 : i32
    %c0_i32_0 = arith.constant 0 : i32
    %c0_i32_1 = arith.constant 0 : i32
    return %c0_i32, %c0_i32_0 : i32, i32
  }
  func.func @transform_7(%arg0: i32) -> (i32, i32) {
    %c0_i32 = arith.constant 0 : i32
    %c0_i32_0 = arith.constant 0 : i32
    %c0_i32_1 = arith.constant 0 : i32
    return %c0_i32, %c0_i32_0 : i32, i32
  }
  func.func @transform_8(%arg0: i32) -> (i32, i32) {
    %c0_i32 = arith.constant 0 : i32
    %c0_i32_0 = arith.constant 0 : i32
    %c0_i32_1 = arith.constant 0 : i32
    return %c0_i32, %c0_i32_0 : i32, i32
  }
  func.func @transform_9(%arg0: i32) -> (i32, i32) {
    %c0_i32 = arith.constant 0 : i32
    %c0_i32_0 = arith.constant 0 : i32
    %c0_i32_1 = arith.constant 0 : i32
    return %c0_i32, %c0_i32_0 : i32, i32
  }
  func.func @transform_10(%arg0: i32) -> (i32, i32) {
    %c0_i32 = arith.constant 0 : i32
    %c0_i32_0 = arith.constant 0 : i32
    %c0_i32_1 = arith.constant 0 : i32
    return %c0_i32, %c0_i32_0 : i32, i32
  }
  func.func @transform_11(%arg0: i32) -> (i32, i32, i32) {
    %c0_i32 = arith.constant 0 : i32
    %c0_i32_0 = arith.constant 0 : i32
    %c0_i32_1 = arith.constant 0 : i32
    return %arg0, %c0_i32, %c0_i32_0 : i32, i32, i32
  }
}

</mosaic_0001>

<bundles_post_ra>
// kernel: tpu_custom_call.1
= control target key start
LH: loop header
LB: loop body
LE: loop exit
PB: predicated region body
PF: predicated region fallthrough
CT: control target
= control target key end

     0   :  { %s29663_s0 = inlined_call_operand.vmem [shape: f32[2,8,256], index: 0, kind: input, shape index: {}]   ;;  %s29664_s1 = inlined_call_operand.vmem [shape: f32[3,3,8,4], index: 1, kind: input, shape index: {}]   ;;  %s29665_s2 = inlined_call_operand.vmem [shape: f32[3,3,12,4], index: 2, kind: input, shape index: {}]   ;;  %s29666_s3 = inlined_call_operand.vmem [shape: f32[3,3,16,4], index: 3, kind: input, shape index: {}]   ;;  %s29667_s4 = inlined_call_operand.vmem [shape: f32[3,3,20,4], index: 4, kind: input, shape index: {}]   ;;  %s29668_s5 = inlined_call_operand.vmem [shape: f32[3,3,8,24], index: 5, kind: input, shape index: {}]   ;;  %s29669_s6 = inlined_call_operand.vmem [shape: f32[1,4], index: 6, kind: input, shape index: {}]   ;;  %s29670_s7 = inlined_call_operand.vmem [shape: f32[1,4], index: 7, kind: input, shape index: {}]   ;;  %s29671_s8 = inlined_call_operand.vmem [shape: f32[1,4], index: 8, kind: input, shape index: {}]   ;;  %s29672_s9 = inlined_call_operand.vmem [shape: f32[1,4], index: 9, kind: input, shape index: {}]   ;;  %s29673_s10 = inlined_call_operand.vmem [shape: f32[8,1], index: 10, kind: input, shape index: {}]   ;;  %s29674_s11 = inlined_call_operand.hbm [shape: f32[2,8,256], index: 11, kind: output, shape index: {}]  }
   0x1   :  { %29903 = sst [smem:[#allocation42_spill]] %s29663_s0 }
   0x2   :  { %16 = vsyncpa [#allocation4], 0 }
   0x3   :  { %18 = vsyncpa [#allocation4 + $0x1], 0  ;;  %s24870_s17 = smov 0   ;;  %s24872_s18 = smov 0  }
   0x4   :  { %s24874_s19 = smov 0   ;;  %s24876_s20 = smov 0  }
   0x5 LB: > { %s24891_s21 = sadd.s32 4294967295, %s24799_s20   ;;  %s17882_s22 = sadd.s32 4294967294, %s24799_s20   ;;  %s24799_s20 = sphi %s24876_s20, %s30261_s20   ;;  %s24795_s19 = sphi %s24874_s19, %s30260_s19   ;;  %s24791_s18 = sphi %s24872_s18, %s30259_s18   ;;  %s24787_s17 = sphi %s24870_s17, %s30258_s17  }
   0x6   : > { %s24895_s23 = sadd.s32 1, %s24799_s20   ;;  %s267_s24 = sadd.s32 1, %s24795_s19 }
   0x7   : > { %s264_s25 = ssub.s32 %s24799_s20, %s24895_s23  ;;  %p277_p0 = scmp.ne.s32.totalorder %s24795_s19, %s24791_s18 }
   0x8   : > { %p265_p1 = scmp.eq.s32.totalorder %s264_s25, 0  ;;  %p278_p2 = scmp.eq.s32.totalorder %s24891_s21, 1 }
   0x9   : > { %p283_p3 = scmp.ne.s32.totalorder %s24791_s18, %s24787_s17  ;;  %p284_p4 = scmp.eq.s32.totalorder %s17882_s22, 1 }
   0xa   : > { %s24906_s26 = scalar_select %p265_p1, %s24795_s19, %s267_s24  }
   0xb   : > { %p24908_p5 = por %p278_p2, %p277_p0  ;;  %p24912_p6 = por %p284_p4, %p283_p3 }
   0xc   : > { %p17885_p7 = scmp.ge.s32.totalorder %s24799_s20, 1  ;;  %p340_p8 = scmp.lt.s32.totalorder %s24799_s20, 3 }
   0xe   : > { %p341_p9 = pnand %p17885_p7, %p340_p8 }
  0x10   : > { %344 = sbr.rel (%p341_p9) target bundleno = 4506 (0x119a), region = 64 }
  0x17   : > { %p380_p10 = scmp.lt.s32.totalorder %s24891_s21, 1  ;;  %s29906_s0 = sld [smem:[#allocation42_spill]]  ;;  %v433_v0 = vlaneseq  ;;  %v24801_v4 = vmov 1.0   ;;  %vm504_vm1 = vcmask 64512   ;;  %vm385_vm2 = vcmask 195584   ;;  %v899_v30 = vld [vmem:[%s29664_s1] sm:$0xff] }
  0x18   : > { %v24802_v28 = vmov 0.0   ;;  %vm394_vm3 = vcmask 188416   ;;  %v18022_v33 = vld [vmem:[%s29664_s1 + $0x18] sm:$0xff]  ;;  %v18055_v43 = vld [vmem:[%s29664_s1 + $0x20] sm:$0xff]  ;;  %vm388_vm4 = vcmask 189440   ;;  %v17956_v44 = vld [vmem:[%s29664_s1 + $0x8] sm:$0xff] }
  0x19   : > { %s381_s29 = scalar_select %p380_p10, %s24891_s21, 1  ;;  %v434_v2 = vshrl.u32 %v433_v0, 7  ;;  %v436_v3 = vand.u32 127, %v433_v0  ;;  %386 = vst.msk [vmem:[#allocation2] sm:$0xff] %vm385_vm2, %v24802_v28  ;;  %387 = vst.msk [vmem:[#allocation2 + $0x8] sm:$0xff] %vm385_vm2, %v24802_v28  ;;  %21236 = vmatprep.subr.mxu1 %v18022_v33  ;;  %v25064_v51 = vld [vmem:[%s29664_s1 + $0x28] sm:$0xff] }
  0x1a   : > { %391 = vst.msk [vmem:[#allocation2 + $0x198] sm:$0xff] %vm385_vm2, %v24802_v28  ;;  %392 = vst.msk [vmem:[#allocation2 + $0x1a0] sm:$0xff] %vm385_vm2, %v24802_v28  ;;  %21237 = vmatpush3.msra.mxu1 %v18022_v33  ;;  %vm4746_vm5 = vcmask 1043456   ;;  %vm24803_vm6 = vmmov 1   ;;  %vm4649_vm8 = vcmask 97280   ;;  %s24805_s15 = smov 12  }
  0x1b   : > { %s19471_s30 = sshll.u32 %s381_s29, 4  ;;  %vm437_vm0 = vcmp.eq.s32.totalorder %v434_v2, %v436_v3  ;;  %395 = vst.msk [vmem:[#allocation2] sm:$0x1] %vm394_vm3, %v24802_v28  ;;  %396 = vst.msk [vmem:[#allocation2 + $0x18] sm:$0x1] %vm394_vm3, %v24802_v28  ;;  %21286 = vmatprep.subr.mxu1 %v18055_v43  ;;  %s24807_s22 = smov 20  }
  0x1c   : > { %21036 = vmatprep.subr.msk.mxu0 %vm437_vm0, %v24801_v4  ;;  %397 = vst.msk [vmem:[#allocation2 + $0x30] sm:$0x1] %vm394_vm3, %v24802_v28  ;;  %398 = vst.msk [vmem:[#allocation2 + $0x48] sm:$0x1] %vm394_vm3, %v24802_v28  ;;  %s377_s29 = sand.u32 1, %s24791_s18   ;;  %s19472_s12 = sshll.u32 %s24891_s21, 8 }
  0x1d   : > { %s24923_s14 = scalar_lea.vmem %s29906_s0, %s19471_s30  ;;  %21037 = vmatpush3.msk.msra.mxu0 %vm437_vm0, %v24801_v4  ;;  %399 = vst.msk [vmem:[#allocation2 + $0x60] sm:$0x1] %vm394_vm3, %v24802_v28  ;;  %400 = vst.msk [vmem:[#allocation2 + $0x78] sm:$0x1] %vm394_vm3, %v24802_v28  ;;  %s24804_s30 = smov 8  }
  0x1e   : > { %v431_v1 = vld [vmem:[%s24923_s14] sm:$0xff]  ;;  %v432_v5 = vld [vmem:[%s24923_s14 + $0x8] sm:$0xff]  ;;  %401 = vst.msk [vmem:[#allocation2 + $0x90] sm:$0x1] %vm394_vm3, %v24802_v28  ;;  %402 = vst.msk [vmem:[#allocation2 + $0xa8] sm:$0x1] %vm394_vm3, %v24802_v28  ;;  %21086 = vmatprep.subr.mxu0 %v899_v30  ;;  %s29621_s24 = scalar_lea.hbm %s29674_s11, %s19472_s12 }
  0x1f   : > { %440 = vxpose.xlu0.b32.start.end [1/1] (short) %v431_v1, 128  ;;  %403 = vst.msk [vmem:[#allocation2 + $0xc0] sm:$0x1] %vm394_vm3, %v24802_v28  ;;  %404 = vst.msk [vmem:[#allocation2 + $0xd8] sm:$0x1] %vm394_vm3, %v24802_v28  ;;  %s17809_s21 = scalar_lea.sflag [#allocation4], %s377_s29 }
  0x20   : > { %405 = vst.msk [vmem:[#allocation2 + $0xf0] sm:$0x1] %vm394_vm3, %v24802_v28  ;;  %406 = vst.msk [vmem:[#allocation2 + $0x108] sm:$0x1] %vm394_vm3, %v24802_v28  ;;  %v868_v42 = vld [vmem:[#allocation2 + $0x8] sm:$0xff] }
  0x21   : > { %407 = vst.msk [vmem:[#allocation2 + $0x120] sm:$0x1] %vm394_vm3, %v24802_v28  ;;  %408 = vst.msk [vmem:[#allocation2 + $0x138] sm:$0x1] %vm394_vm3, %v24802_v28 }
  0x22   : > { %409 = vst.msk [vmem:[#allocation2 + $0x150] sm:$0x1] %vm394_vm3, %v24802_v28  ;;  %410 = vst.msk [vmem:[#allocation2 + $0x168] sm:$0x1] %vm394_vm3, %v24802_v28  ;;  %v867_v40 = vld [vmem:[#allocation2] sm:$0xff] }
  0x23   : > { %411 = vst.msk [vmem:[#allocation2 + $0x180] sm:$0x1] %vm394_vm3, %v24802_v28  ;;  %414 = vst.msk [vmem:[#allocation2 + $0x29] sm:$0x1] %vm394_vm3, %v24802_v28 }
  0x24   : > { %415 = vst.msk [vmem:[#allocation2 + $0x41] sm:$0x1] %vm394_vm3, %v24802_v28  ;;  %416 = vst.msk [vmem:[#allocation2 + $0x59] sm:$0x1] %vm394_vm3, %v24802_v28 }
  0x25   : > { %417 = vst.msk [vmem:[#allocation2 + $0x71] sm:$0x1] %vm394_vm3, %v24802_v28  ;;  %418 = vst.msk [vmem:[#allocation2 + $0x89] sm:$0x1] %vm394_vm3, %v24802_v28 }
  0x26   : > { %419 = vst.msk [vmem:[#allocation2 + $0xa1] sm:$0x1] %vm394_vm3, %v24802_v28  ;;  %420 = vst.msk [vmem:[#allocation2 + $0xb9] sm:$0x1] %vm394_vm3, %v24802_v28 }
  0x27   : > { %421 = vst.msk [vmem:[#allocation2 + $0xd1] sm:$0x1] %vm394_vm3, %v24802_v28  ;;  %422 = vst.msk [vmem:[#allocation2 + $0xe9] sm:$0x1] %vm394_vm3, %v24802_v28 }
  0x28   : > { %423 = vst.msk [vmem:[#allocation2 + $0x101] sm:$0x1] %vm394_vm3, %v24802_v28  ;;  %424 = vst.msk [vmem:[#allocation2 + $0x119] sm:$0x1] %vm394_vm3, %v24802_v28 }
  0x29   : > { %425 = vst.msk [vmem:[#allocation2 + $0x131] sm:$0x1] %vm394_vm3, %v24802_v28  ;;  %426 = vst.msk [vmem:[#allocation2 + $0x149] sm:$0x1] %vm394_vm3, %v24802_v28 }
  0x2a   : > { %427 = vst.msk [vmem:[#allocation2 + $0x161] sm:$0x1] %vm394_vm3, %v24802_v28  ;;  %428 = vst.msk [vmem:[#allocation2 + $0x179] sm:$0x1] %vm394_vm3, %v24802_v28 }
  0x2b   : > { %429 = vst.msk [vmem:[#allocation2 + $0x191] sm:$0x1] %vm394_vm3, %v24802_v28  ;;  %412 = vst.msk [vmem:[#allocation2 + $0x198] sm:$0x1] %vm394_vm3, %v24802_v28 }
  0x2c   : > { %389 = vst.msk [vmem:[#allocation2 + $0x10] sm:$0x3] %vm388_vm4, %v24802_v28  ;;  %393 = vst.msk [vmem:[#allocation2 + $0x1a8] sm:$0x3] %vm388_vm4, %v24802_v28 }
  0x2d   : > { %413 = vst.msk [vmem:[#allocation2 + $0x11] sm:$0x1] %vm394_vm3, %v24802_v28  ;;  %430 = vst.msk [vmem:[#allocation2 + $0x1a9] sm:$0x1] %vm394_vm3, %v24802_v28 }
  0x2e   : > { %vm25939_vm7 = vmpackc.low %vm4746_vm5, %vm24803_vm6 }
  0x5c   : > { %472 = vxpose.xlu0.b32.start.end [1/1] (short) %v432_v5, 128 }
  0x9f   : > { %v456_v6 = vpop.trf.xlu0 }
  0xa0   : > { %21038 = vmatprep.mubr.msk.f32.mxu0 %vm504_vm1, %v456_v6 }
  0xa3   : > { %v457_v7 = vpop.trf.xlu0 }
  0xa4   : > { %21039 = vmatmul.mubr.msk.f32.vlgmr.msra.gmra.mrb[0].mxu0 %vm504_vm1, %v457_v7 }
  0xa5   : > { %21087 = vmatpush3.msra.mxu0 %v899_v30 }
  0xa6   : > { %21136 = vmatprep.subr.mxu0 %v17956_v44 }
  0xa7   : > { %v458_v8 = vpop.trf.xlu0 }
  0xa8   : > { %21041 = vmatprep.mubr.msk.f32.mxu0 %vm504_vm1, %v458_v8 }
  0xab   : > { %v459_v9 = vpop.trf.xlu0 }
  0xac   : > { %21042 = vmatmul.mubr.msk.f32.gmra.mrb[2].mxu0 %vm504_vm1, %v459_v9 }
  0xaf   : > { %v460_v10 = vpop.trf.xlu0 }
  0xb0   : > { %21044 = vmatprep.mubr.msk.f32.mxu0 %vm504_vm1, %v460_v10 }
  0xb3   : > { %v461_v11 = vpop.trf.xlu0 }
  0xb4   : > { %21045 = vmatmul.mubr.msk.f32.gmra.mrb[4].mxu0 %vm504_vm1, %v461_v11 }
  0xb7   : > { %v462_v12 = vpop.trf.xlu0 }
  0xb8   : > { %21047 = vmatprep.mubr.msk.f32.mxu0 %vm504_vm1, %v462_v12  ;;  %v25156_v12 = vld [vmem:[%s29664_s1 + $0x10] sm:$0xff] }
  0xbb   : > { %v463_v13 = vpop.trf.xlu0 }
  0xbc   : > { %21048 = vmatmul.mubr.msk.f32.gmra.mrb[6].mxu0 %vm504_vm1, %v463_v13 }
  0xbf   : > { %v464_v14 = vpop.trf.xlu0 }
  0xc0   : > { %21050 = vmatprep.mubr.msk.f32.mxu0 %vm504_vm1, %v464_v14 }
  0xc3   : > { %v465_v15 = vpop.trf.xlu0 }
  0xc4   : > { %21051 = vmatmul.mubr.msk.f32.gmra.mrb[8].mxu0 %vm504_vm1, %v465_v15 }
  0xc7   : > { %v466_v16 = vpop.trf.xlu0 }
  0xc8   : > { %21053 = vmatprep.mubr.msk.f32.mxu0 %vm504_vm1, %v466_v16 }
  0xcb   : > { %v467_v17 = vpop.trf.xlu0 }
  0xcc   : > { %21054 = vmatmul.mubr.msk.f32.gmra.mrb[10].mxu0 %vm504_vm1, %v467_v17 }
  0xcf   : > { %v468_v18 = vpop.trf.xlu0 }
  0xd0   : > { %21056 = vmatprep.mubr.msk.f32.mxu0 %vm504_vm1, %v468_v18 }
  0xd3   : > { %v469_v19 = vpop.trf.xlu0 }
  0xd4   : > { %21057 = vmatmul.mubr.msk.f32.gmra.mrb[12].mxu0 %vm504_vm1, %v469_v19 }
  0xd7   : > { %v470_v20 = vpop.trf.xlu0 }
  0xd8   : > { %21059 = vmatprep.mubr.msk.f32.mxu0 %vm504_vm1, %v470_v20 }
  0xdb   : > { %v471_v21 = vpop.trf.xlu0 }
  0xdc   : > { %21060 = vmatmul.mubr.msk.f32.gmra.mrb[14].mxu0 %vm504_vm1, %v471_v21 }
  0xdf   : > { %v488_v22 = vpop.trf.xlu0 }
  0xe0   : > { %21062 = vmatprep.mubr.msk.f32.mxu0 %vm504_vm1, %v488_v22 }
  0xe3   : > { %v489_v23 = vpop.trf.xlu0 }
  0xe4   : > { %21063 = vmatmul.mubr.msk.f32.gmra.mrb[16].mxu0 %vm504_vm1, %v489_v23 }
  0xe7   : > { %v490_v24 = vpop.trf.xlu0 }
  0xe8   : > { %21065 = vmatprep.mubr.msk.f32.mxu0 %vm504_vm1, %v490_v24 }
  0xeb   : > { %v491_v25 = vpop.trf.xlu0 }
  0xec   : > { %21066 = vmatmul.mubr.msk.f32.gmra.mrb[18].mxu0 %vm504_vm1, %v491_v25 }
  0xef   : > { %v492_v26 = vpop.trf.xlu0 }
  0xf0   : > { %21068 = vmatprep.mubr.msk.f32.mxu0 %vm504_vm1, %v492_v26 }
  0xf3   : > { %v493_v27 = vpop.trf.xlu0 }
  0xf4   : > { %21069 = vmatmul.mubr.msk.f32.gmra.mrb[20].mxu0 %vm504_vm1, %v493_v27 }
  0xf7   : > { %v494_v29 = vpop.trf.xlu0 }
  0xf8   : > { %21071 = vmatprep.mubr.msk.f32.mxu0 %vm504_vm1, %v494_v29 }
  0xfb   : > { %v495_v31 = vpop.trf.xlu0 }
  0xfc   : > { %21072 = vmatmul.mubr.msk.f32.gmra.mrb[22].mxu0 %vm504_vm1, %v495_v31 }
  0xff   : > { %v496_v32 = vpop.trf.xlu0 }
 0x100   : > { %21074 = vmatprep.mubr.msk.f32.mxu0 %vm504_vm1, %v496_v32 }
 0x103   : > { %v497_v34 = vpop.trf.xlu0 }
 0x104   : > { %21075 = vmatmul.mubr.msk.f32.gmra.mrb[24].mxu0 %vm504_vm1, %v497_v34 }
 0x107   : > { %v498_v35 = vpop.trf.xlu0 }
 0x108   : > { %21077 = vmatprep.mubr.msk.f32.mxu0 %vm504_vm1, %v498_v35 }
 0x10b   : > { %v499_v36 = vpop.trf.xlu0 }
 0x10c   : > { %21078 = vmatmul.mubr.msk.f32.gmra.mrb[26].mxu0 %vm504_vm1, %v499_v36 }
 0x10f   : > { %v500_v37 = vpop.trf.xlu0 }
 0x110   : > { %21080 = vmatprep.mubr.msk.f32.mxu0 %vm504_vm1, %v500_v37 }
 0x113   : > { %v501_v38 = vpop.trf.xlu0 }
 0x114   : > { %21081 = vmatmul.mubr.msk.f32.gmra.mrb[28].mxu0 %vm504_vm1, %v501_v38 }
 0x117   : > { %v502_v39 = vpop.trf.xlu0 }
 0x118   : > { %21083 = vmatprep.mubr.msk.f32.mxu0 %vm504_vm1, %v502_v39 }
 0x11b   : > { %v503_v41 = vpop.trf.xlu0 }
 0x11c   : > { %21084 = vmatmul.mubr.msk.f32.gmra.mrb[30].mxu0 %vm504_vm1, %v503_v41 }
 0x11d   : > { %21088 = vmatprep.mubr.msk.f32.mxu0 %vm504_vm1, %v867_v40 }
 0x120   : > { %21089 = vmatmul.mubr.msk.f32.vlgmr.msra.gmra.mrb[32].mxu0 %vm504_vm1, %v868_v42 }
 0x121   : > { %21137 = vmatpush3.msra.mxu0 %v17956_v44 }
 0x122   : > { %21186 = vmatprep.subr.mxu0 %v25156_v12 }
 0x177   : > { %v21040_v45 = vpop.f32.mrb[0].mxu0 }
 0x178   : > { %828 = vst.msk [vmem:[#allocation2 + $0x21] sm:$0xff] %vm504_vm1, %v21040_v45  ;;  %v667_v46 = vpop.f32.mrb[1].mxu0  ;;  %v1253_v45 = vld [vmem:[#allocation2 + $0x1] sm:$0xff] }
 0x179   : > { %827 = vst.msk [vmem:[#allocation2 + $0x19] sm:$0xff] %vm504_vm1, %v667_v46  ;;  %v1254_v46 = vld [vmem:[#allocation2 + $0x9] sm:$0xff] }
 0x17f   : > { %v21043_v47 = vpop.f32.mrb[2].mxu0 }
 0x180   : > { %830 = vst.msk [vmem:[#allocation2 + $0x39] sm:$0xff] %vm504_vm1, %v21043_v47  ;;  %v677_v48 = vpop.f32.mrb[3].mxu0  ;;  %v869_v49 = vld [vmem:[#allocation2 + $0x18] sm:$0xff]  ;;  %v870_v50 = vld [vmem:[#allocation2 + $0x20] sm:$0xff] }
 0x181   : > { %829 = vst.msk [vmem:[#allocation2 + $0x31] sm:$0xff] %vm504_vm1, %v677_v48  ;;  %21091 = vmatprep.mubr.msk.f32.mxu0 %vm504_vm1, %v869_v49  ;;  %21238 = vmatprep.mubr.msk.f32.mxu1 %vm504_vm1, %v869_v49  ;;  %v1255_v47 = vld [vmem:[#allocation2 + $0x19] sm:$0xff] }
 0x182   : > { %21092 = vmatmul.mubr.msk.f32.gmra.mrb[34].mxu0 %vm504_vm1, %v870_v50  ;;  %21239 = vmatmul.mubr.msk.f32.vlgmr.msra.gmra.mrb[0].mxu1 %vm504_vm1, %v870_v50  ;;  %v1256_v50 = vld [vmem:[#allocation2 + $0x21] sm:$0xff] }
 0x183   : > { %21287 = vmatpush3.msra.mxu1 %v18055_v43 }
 0x184   : > { %21336 = vmatprep.subr.mxu1 %v25064_v51 }
 0x187   : > { %v21046_v52 = vpop.f32.mrb[4].mxu0 }
 0x188   : > { %832 = vst.msk [vmem:[#allocation2 + $0x51] sm:$0xff] %vm504_vm1, %v21046_v52  ;;  %v687_v53 = vpop.f32.mrb[5].mxu0  ;;  %v25070_v54 = vld [vmem:[#allocation2 + $0x30] sm:$0xff]  ;;  %v25072_v55 = vld [vmem:[#allocation2 + $0x38] sm:$0xff] }
 0x189   : > { %831 = vst.msk [vmem:[#allocation2 + $0x49] sm:$0xff] %vm504_vm1, %v687_v53  ;;  %21094 = vmatprep.mubr.msk.f32.mxu0 %vm504_vm1, %v25070_v54  ;;  %21241 = vmatprep.mubr.msk.f32.mxu1 %vm504_vm1, %v25070_v54  ;;  %v25284_v52 = vld [vmem:[#allocation2 + $0x31] sm:$0xff]  ;;  %v25289_v53 = vld [vmem:[#allocation2 + $0x39] sm:$0xff] }
 0x18a   : > { %21095 = vmatmul.mubr.msk.f32.gmra.mrb[36].mxu0 %vm504_vm1, %v25072_v55  ;;  %21242 = vmatmul.mubr.msk.f32.gmra.mrb[2].mxu1 %vm504_vm1, %v25072_v55 }
 0x18f   : > { %v21049_v56 = vpop.f32.mrb[6].mxu0 }
 0x190   : > { %834 = vst.msk [vmem:[#allocation2 + $0x69] sm:$0xff] %vm504_vm1, %v21049_v56  ;;  %v697_v57 = vpop.f32.mrb[7].mxu0  ;;  %v25084_v58 = vld [vmem:[#allocation2 + $0x48] sm:$0xff]  ;;  %v25086_v59 = vld [vmem:[#allocation2 + $0x50] sm:$0xff] }
 0x191   : > { %833 = vst.msk [vmem:[#allocation2 + $0x61] sm:$0xff] %vm504_vm1, %v697_v57  ;;  %21097 = vmatprep.mubr.msk.f32.mxu0 %vm504_vm1, %v25084_v58  ;;  %21244 = vmatprep.mubr.msk.f32.mxu1 %vm504_vm1, %v25084_v58  ;;  %v25294_v56 = vld [vmem:[%s29664_s1 + $0x30] sm:$0xff] }
 0x192   : > { %21098 = vmatmul.mubr.msk.f32.gmra.mrb[38].mxu0 %vm504_vm1, %v25086_v59  ;;  %21245 = vmatmul.mubr.msk.f32.gmra.mrb[4].mxu1 %vm504_vm1, %v25086_v59  ;;  %v25299_v57 = vld [vmem:[#allocation2 + $0x49] sm:$0xff] }
 0x197   : > { %v21052_v60 = vpop.f32.mrb[8].mxu0 }
 0x198   : > { %836 = vst.msk [vmem:[#allocation2 + $0x81] sm:$0xff] %vm504_vm1, %v21052_v60  ;;  %v707_v61 = vpop.f32.mrb[9].mxu0  ;;  %v25098_v62 = vld [vmem:[#allocation2 + $0x60] sm:$0xff]  ;;  %v25100_v63 = vld [vmem:[#allocation2 + $0x68] sm:$0xff]  ;;  %v25307_v60 = vld [vmem:[#allocation2 + $0x51] sm:$0xff] }
 0x199   : > { %835 = vst.msk [vmem:[#allocation2 + $0x79] sm:$0xff] %vm504_vm1, %v707_v61  ;;  %21100 = vmatprep.mubr.msk.f32.mxu0 %vm504_vm1, %v25098_v62  ;;  %21247 = vmatprep.mubr.msk.f32.mxu1 %vm504_vm1, %v25098_v62  ;;  %v25313_v61 = vld [vmem:[#allocation2 + $0x61] sm:$0xff] }
 0x19a   : > { %21101 = vmatmul.mubr.msk.f32.gmra.mrb[40].mxu0 %vm504_vm1, %v25100_v63  ;;  %21248 = vmatmul.mubr.msk.f32.gmra.mrb[6].mxu1 %vm504_vm1, %v25100_v63 }
 0x19f   : > { %v21055_v0 = vpop.f32.mrb[10].mxu0 }
 0x1a0   : > { %838 = vst.msk [vmem:[#allocation2 + $0x99] sm:$0xff] %vm504_vm1, %v21055_v0  ;;  %v717_v1 = vpop.f32.mrb[11].mxu0  ;;  %v25112_v2 = vld [vmem:[#allocation2 + $0x78] sm:$0xff]  ;;  %v25114_v3 = vld [vmem:[#allocation2 + $0x80] sm:$0xff] }
 0x1a1   : > { %837 = vst.msk [vmem:[#allocation2 + $0x91] sm:$0xff] %vm504_vm1, %v717_v1  ;;  %21103 = vmatprep.mubr.msk.f32.mxu0 %vm504_vm1, %v25112_v2  ;;  %21250 = vmatprep.mubr.msk.f32.mxu1 %vm504_vm1, %v25112_v2  ;;  %v25325_v0 = vld [vmem:[#allocation2 + $0x79] sm:$0xff]  ;;  %v25331_v1 = vld [vmem:[#allocation2 + $0x81] sm:$0xff] }
 0x1a2   : > { %21104 = vmatmul.mubr.msk.f32.gmra.mrb[42].mxu0 %vm504_vm1, %v25114_v3  ;;  %21251 = vmatmul.mubr.msk.f32.gmra.mrb[8].mxu1 %vm504_vm1, %v25114_v3 }
 0x1a7   : > { %v21058_v4 = vpop.f32.mrb[12].mxu0 }
 0x1a8   : > { %840 = vst.msk [vmem:[#allocation2 + $0xb1] sm:$0xff] %vm504_vm1, %v21058_v4  ;;  %v727_v5 = vpop.f32.mrb[13].mxu0  ;;  %v25126_v6 = vld [vmem:[#allocation2 + $0x90] sm:$0xff]  ;;  %v25128_v7 = vld [vmem:[#allocation2 + $0x98] sm:$0xff] }
 0x1a9   : > { %839 = vst.msk [vmem:[#allocation2 + $0xa9] sm:$0xff] %vm504_vm1, %v727_v5  ;;  %21106 = vmatprep.mubr.msk.f32.mxu0 %vm504_vm1, %v25126_v6  ;;  %21253 = vmatprep.mubr.msk.f32.mxu1 %vm504_vm1, %v25126_v6  ;;  %v25337_v4 = vld [vmem:[#allocation2 + $0x91] sm:$0xff]  ;;  %v25343_v5 = vld [vmem:[#allocation2 + $0x99] sm:$0xff] }
 0x1aa   : > { %21107 = vmatmul.mubr.msk.f32.gmra.mrb[44].mxu0 %vm504_vm1, %v25128_v7  ;;  %21254 = vmatmul.mubr.msk.f32.gmra.mrb[10].mxu1 %vm504_vm1, %v25128_v7 }
 0x1af   : > { %v21061_v8 = vpop.f32.mrb[14].mxu0 }
 0x1b0   : > { %842 = vst.msk [vmem:[#allocation2 + $0xc9] sm:$0xff] %vm504_vm1, %v21061_v8  ;;  %v737_v9 = vpop.f32.mrb[15].mxu0  ;;  %v25140_v10 = vld [vmem:[#allocation2 + $0xa8] sm:$0xff]  ;;  %v25142_v11 = vld [vmem:[#allocation2 + $0xb0] sm:$0xff] }
 0x1b1   : > { %841 = vst.msk [vmem:[#allocation2 + $0xc1] sm:$0xff] %vm504_vm1, %v737_v9  ;;  %21109 = vmatprep.mubr.msk.f32.mxu0 %vm504_vm1, %v25140_v10  ;;  %21256 = vmatprep.mubr.msk.f32.mxu1 %vm504_vm1, %v25140_v10  ;;  %v25349_v8 = vld [vmem:[#allocation2 + $0xa9] sm:$0xff]  ;;  %v25355_v9 = vld [vmem:[#allocation2 + $0xb1] sm:$0xff] }
 0x1b2   : > { %21110 = vmatmul.mubr.msk.f32.gmra.mrb[46].mxu0 %vm504_vm1, %v25142_v11  ;;  %21257 = vmatmul.mubr.msk.f32.gmra.mrb[12].mxu1 %vm504_vm1, %v25142_v11 }
 0x1b7   : > { %v21064_v13 = vpop.f32.mrb[16].mxu0 }
 0x1b8   : > { %844 = vst.msk [vmem:[#allocation2 + $0xe1] sm:$0xff] %vm504_vm1, %v21064_v13  ;;  %v747_v14 = vpop.f32.mrb[17].mxu0  ;;  %v25160_v15 = vld [vmem:[#allocation2 + $0xc0] sm:$0xff]  ;;  %v25162_v16 = vld [vmem:[#allocation2 + $0xc8] sm:$0xff] }
 0x1b9   : > { %843 = vst.msk [vmem:[#allocation2 + $0xd9] sm:$0xff] %vm504_vm1, %v747_v14  ;;  %21112 = vmatprep.mubr.msk.f32.mxu0 %vm504_vm1, %v25160_v15  ;;  %21259 = vmatprep.mubr.msk.f32.mxu1 %vm504_vm1, %v25160_v15  ;;  %v25367_v13 = vld [vmem:[#allocation2 + $0xc9] sm:$0xff] }
 0x1ba   : > { %21113 = vmatmul.mubr.msk.f32.gmra.mrb[48].mxu0 %vm504_vm1, %v25162_v16  ;;  %21260 = vmatmul.mubr.msk.f32.gmra.mrb[14].mxu1 %vm504_vm1, %v25162_v16 }
 0x1bf   : > { %v21067_v17 = vpop.f32.mrb[18].mxu0 }
 0x1c0   : > { %846 = vst.msk [vmem:[#allocation2 + $0xf9] sm:$0xff] %vm504_vm1, %v21067_v17  ;;  %v757_v18 = vpop.f32.mrb[19].mxu0  ;;  %v25174_v19 = vld [vmem:[#allocation2 + $0xd8] sm:$0xff]  ;;  %v25176_v20 = vld [vmem:[#allocation2 + $0xe0] sm:$0xff] }
 0x1c1   : > { %845 = vst.msk [vmem:[#allocation2 + $0xf1] sm:$0xff] %vm504_vm1, %v757_v18  ;;  %21115 = vmatprep.mubr.msk.f32.mxu0 %vm504_vm1, %v25174_v19  ;;  %21262 = vmatprep.mubr.msk.f32.mxu1 %vm504_vm1, %v25174_v19  ;;  %v25373_v14 = vld [vmem:[#allocation2 + $0xd9] sm:$0xff]  ;;  %v25379_v17 = vld [vmem:[#allocation2 + $0xe1] sm:$0xff] }
 0x1c2   : > { %21116 = vmatmul.mubr.msk.f32.gmra.mrb[50].mxu0 %vm504_vm1, %v25176_v20  ;;  %21263 = vmatmul.mubr.msk.f32.gmra.mrb[16].mxu1 %vm504_vm1, %v25176_v20 }
 0x1c7   : > { %v21070_v21 = vpop.f32.mrb[20].mxu0 }
 0x1c8   : > { %848 = vst.msk [vmem:[#allocation2 + $0x111] sm:$0xff] %vm504_vm1, %v21070_v21  ;;  %v767_v22 = vpop.f32.mrb[21].mxu0  ;;  %v25188_v23 = vld [vmem:[#allocation2 + $0xf0] sm:$0xff]  ;;  %v25190_v24 = vld [vmem:[#allocation2 + $0xf8] sm:$0xff] }
 0x1c9   : > { %847 = vst.msk [vmem:[#allocation2 + $0x109] sm:$0xff] %vm504_vm1, %v767_v22  ;;  %21118 = vmatprep.mubr.msk.f32.mxu0 %vm504_vm1, %v25188_v23  ;;  %21265 = vmatprep.mubr.msk.f32.mxu1 %vm504_vm1, %v25188_v23  ;;  %v25385_v18 = vld [vmem:[#allocation2 + $0xf1] sm:$0xff]  ;;  %v25391_v21 = vld [vmem:[#allocation2 + $0xf9] sm:$0xff] }
 0x1ca   : > { %21119 = vmatmul.mubr.msk.f32.gmra.mrb[52].mxu0 %vm504_vm1, %v25190_v24  ;;  %21266 = vmatmul.mubr.msk.f32.gmra.mrb[18].mxu1 %vm504_vm1, %v25190_v24 }
 0x1cf   : > { %v21073_v25 = vpop.f32.mrb[22].mxu0 }
 0x1d0   : > { %850 = vst.msk [vmem:[#allocation2 + $0x129] sm:$0xff] %vm504_vm1, %v21073_v25  ;;  %v777_v26 = vpop.f32.mrb[23].mxu0  ;;  %v25202_v27 = vld [vmem:[#allocation2 + $0x108] sm:$0xff]  ;;  %v25204_v28 = vld [vmem:[#allocation2 + $0x110] sm:$0xff] }
 0x1d1   : > { %849 = vst.msk [vmem:[#allocation2 + $0x121] sm:$0xff] %vm504_vm1, %v777_v26  ;;  %21121 = vmatprep.mubr.msk.f32.mxu0 %vm504_vm1, %v25202_v27  ;;  %21268 = vmatprep.mubr.msk.f32.mxu1 %vm504_vm1, %v25202_v27  ;;  %v25397_v22 = vld [vmem:[#allocation2 + $0x109] sm:$0xff]  ;;  %v25403_v25 = vld [vmem:[#allocation2 + $0x111] sm:$0xff] }
 0x1d2   : > { %21122 = vmatmul.mubr.msk.f32.gmra.mrb[54].mxu0 %vm504_vm1, %v25204_v28  ;;  %21269 = vmatmul.mubr.msk.f32.gmra.mrb[20].mxu1 %vm504_vm1, %v25204_v28 }
 0x1d7   : > { %v21076_v29 = vpop.f32.mrb[24].mxu0 }
 0x1d8   : > { %852 = vst.msk [vmem:[#allocation2 + $0x141] sm:$0xff] %vm504_vm1, %v21076_v29  ;;  %v787_v30 = vpop.f32.mrb[25].mxu0  ;;  %v25216_v31 = vld [vmem:[#allocation2 + $0x120] sm:$0xff]  ;;  %v25218_v32 = vld [vmem:[#allocation2 + $0x128] sm:$0xff] }
 0x1d9   : > { %851 = vst.msk [vmem:[#allocation2 + $0x139] sm:$0xff] %vm504_vm1, %v787_v30  ;;  %21124 = vmatprep.mubr.msk.f32.mxu0 %vm504_vm1, %v25216_v31  ;;  %21271 = vmatprep.mubr.msk.f32.mxu1 %vm504_vm1, %v25216_v31  ;;  %v25409_v26 = vld [vmem:[#allocation2 + $0x121] sm:$0xff]  ;;  %v25415_v29 = vld [vmem:[#allocation2 + $0x129] sm:$0xff] }
 0x1da   : > { %21125 = vmatmul.mubr.msk.f32.gmra.mrb[56].mxu0 %vm504_vm1, %v25218_v32  ;;  %21272 = vmatmul.mubr.msk.f32.gmra.mrb[22].mxu1 %vm504_vm1, %v25218_v32 }
 0x1df   : > { %v21079_v33 = vpop.f32.mrb[26].mxu0 }
 0x1e0   : > { %854 = vst.msk [vmem:[#allocation2 + $0x159] sm:$0xff] %vm504_vm1, %v21079_v33  ;;  %v797_v34 = vpop.f32.mrb[27].mxu0  ;;  %v25230_v35 = vld [vmem:[#allocation2 + $0x138] sm:$0xff]  ;;  %v25232_v36 = vld [vmem:[#allocation2 + $0x140] sm:$0xff] }
 0x1e1   : > { %853 = vst.msk [vmem:[#allocation2 + $0x151] sm:$0xff] %vm504_vm1, %v797_v34  ;;  %21127 = vmatprep.mubr.msk.f32.mxu0 %vm504_vm1, %v25230_v35  ;;  %21274 = vmatprep.mubr.msk.f32.mxu1 %vm504_vm1, %v25230_v35  ;;  %v25421_v30 = vld [vmem:[#allocation2 + $0x139] sm:$0xff]  ;;  %v25427_v33 = vld [vmem:[#allocation2 + $0x141] sm:$0xff] }
 0x1e2   : > { %21128 = vmatmul.mubr.msk.f32.gmra.mrb[58].mxu0 %vm504_vm1, %v25232_v36  ;;  %21275 = vmatmul.mubr.msk.f32.gmra.mrb[24].mxu1 %vm504_vm1, %v25232_v36 }
 0x1e7   : > { %v21082_v37 = vpop.f32.mrb[28].mxu0 }
 0x1e8   : > { %856 = vst.msk [vmem:[#allocation2 + $0x171] sm:$0xff] %vm504_vm1, %v21082_v37  ;;  %v807_v38 = vpop.f32.mrb[29].mxu0  ;;  %v25244_v39 = vld [vmem:[#allocation2 + $0x150] sm:$0xff]  ;;  %v25246_v40 = vld [vmem:[#allocation2 + $0x158] sm:$0xff] }
 0x1e9   : > { %855 = vst.msk [vmem:[#allocation2 + $0x169] sm:$0xff] %vm504_vm1, %v807_v38  ;;  %21130 = vmatprep.mubr.msk.f32.mxu0 %vm504_vm1, %v25244_v39  ;;  %21277 = vmatprep.mubr.msk.f32.mxu1 %vm504_vm1, %v25244_v39  ;;  %v25433_v34 = vld [vmem:[#allocation2 + $0x151] sm:$0xff]  ;;  %v25439_v37 = vld [vmem:[#allocation2 + $0x159] sm:$0xff] }
 0x1ea   : > { %21131 = vmatmul.mubr.msk.f32.gmra.mrb[60].mxu0 %vm504_vm1, %v25246_v40  ;;  %21278 = vmatmul.mubr.msk.f32.gmra.mrb[26].mxu1 %vm504_vm1, %v25246_v40  ;;  %29907 = vst [vmem:[#allocation6_spill] sm:$0xff] %v25439_v37 }
 0x1ef   : > { %v21085_v41 = vpop.f32.mrb[30].mxu0 }
 0x1f0   : > { %858 = vst.msk [vmem:[#allocation2 + $0x189] sm:$0xff] %vm504_vm1, %v21085_v41  ;;  %v817_v42 = vpop.f32.mrb[31].mxu0  ;;  %v25258_v43 = vld [vmem:[#allocation2 + $0x168] sm:$0xff]  ;;  %v25260_v44 = vld [vmem:[#allocation2 + $0x170] sm:$0xff] }
 0x1f1   : > { %857 = vst.msk [vmem:[#allocation2 + $0x181] sm:$0xff] %vm504_vm1, %v817_v42  ;;  %21133 = vmatprep.mubr.msk.f32.mxu0 %vm504_vm1, %v25258_v43  ;;  %21280 = vmatprep.mubr.msk.f32.mxu1 %vm504_vm1, %v25258_v43  ;;  %v25445_v38 = vld [vmem:[#allocation2 + $0x169] sm:$0xff]  ;;  %v25451_v42 = vld [vmem:[#allocation2 + $0x171] sm:$0xff] }
 0x1f2   : > { %21134 = vmatmul.mubr.msk.f32.gmra.mrb[62].mxu0 %vm504_vm1, %v25260_v44  ;;  %21281 = vmatmul.mubr.msk.f32.gmra.mrb[28].mxu1 %vm504_vm1, %v25260_v44  ;;  %v1640_v41 = vld [vmem:[#allocation2 + $0x2] sm:$0xff] }
 0x1f3   : > { %21138 = vmatprep.mubr.msk.f32.mxu0 %vm504_vm1, %v1253_v45  ;;  %v1641_v45 = vld [vmem:[#allocation2 + $0xa] sm:$0xff] }
 0x1f6   : > { %21139 = vmatmul.mubr.msk.f32.vlgmr.msra.gmra.mrb[32].mxu0 %vm504_vm1, %v1254_v46  ;;  %v1642_v46 = vld [vmem:[#allocation2 + $0x1a] sm:$0xff] }
 0x1f7   : > { %21141 = vmatprep.mubr.msk.f32.mxu0 %vm504_vm1, %v1255_v47  ;;  %21187 = vmatpush3.msra.mxu0 %v25156_v12  ;;  %v25361_v12 = vld [vmem:[#allocation2 + $0xc1] sm:$0xff] }
 0x1f8   : > { %v25275_v48 = vld [vmem:[#allocation2 + $0x180] sm:$0xff]  ;;  %v25277_v49 = vld [vmem:[#allocation2 + $0x188] sm:$0xff] }
 0x1f9   : > { %21283 = vmatprep.mubr.msk.f32.mxu1 %vm504_vm1, %v25275_v48 }
 0x1fa   : > { %21142 = vmatmul.mubr.msk.f32.gmra.mrb[34].mxu0 %vm504_vm1, %v1256_v50  ;;  %21284 = vmatmul.mubr.msk.f32.gmra.mrb[30].mxu1 %vm504_vm1, %v25277_v49 }
 0x1fb   : > { %21144 = vmatprep.mubr.msk.f32.mxu0 %vm504_vm1, %v25284_v52  ;;  %21288 = vmatprep.mubr.msk.f32.mxu1 %vm504_vm1, %v1255_v47  ;;  %v25463_v47 = vld [vmem:[#allocation2 + $0x181] sm:$0xff] }
 0x1fc   : > { %29908 = vst [vmem:[#allocation7_spill] sm:$0xff] %v25463_v47 }
 0x1fe   : > { %21145 = vmatmul.mubr.msk.f32.gmra.mrb[36].mxu0 %vm504_vm1, %v25289_v53  ;;  %21289 = vmatmul.mubr.msk.f32.vlgmr.msra.gmra.mrb[0].mxu1 %vm504_vm1, %v1256_v50  ;;  %v1643_v50 = vld [vmem:[#allocation2 + $0x22] sm:$0xff] }
 0x1ff   : > { %21337 = vmatpush3.msra.mxu1 %v25064_v51  ;;  %21147 = vmatprep.mubr.msk.f32.mxu0 %vm504_vm1, %v25299_v57  ;;  %v25319_v51 = vld [vmem:[#allocation2 + $0x69] sm:$0xff] }
 0x200   : > { %21291 = vmatprep.mubr.msk.f32.mxu1 %vm504_vm1, %v25284_v52  ;;  %21386 = vmatprep.subr.mxu1 %v25294_v56 }
 0x202   : > { %21148 = vmatmul.mubr.msk.f32.gmra.mrb[38].mxu0 %vm504_vm1, %v25307_v60  ;;  %21292 = vmatmul.mubr.msk.f32.gmra.mrb[2].mxu1 %vm504_vm1, %v25289_v53 }
 0x203   : > { %21150 = vmatprep.mubr.msk.f32.mxu0 %vm504_vm1, %v25313_v61  ;;  %21294 = vmatprep.mubr.msk.f32.mxu1 %vm504_vm1, %v25299_v57 }
 0x206   : > { %21151 = vmatmul.mubr.msk.f32.gmra.mrb[40].mxu0 %vm504_vm1, %v25319_v51  ;;  %21295 = vmatmul.mubr.msk.f32.gmra.mrb[4].mxu1 %vm504_vm1, %v25307_v60 }
 0x207   : > { %21153 = vmatprep.mubr.msk.f32.mxu0 %vm504_vm1, %v25325_v0  ;;  %21297 = vmatprep.mubr.msk.f32.mxu1 %vm504_vm1, %v25313_v61 }
 0x20a   : > { %21154 = vmatmul.mubr.msk.f32.gmra.mrb[42].mxu0 %vm504_vm1, %v25331_v1  ;;  %21298 = vmatmul.mubr.msk.f32.gmra.mrb[6].mxu1 %vm504_vm1, %v25319_v51 }
 0x20b   : > { %21156 = vmatprep.mubr.msk.f32.mxu0 %vm504_vm1, %v25337_v4  ;;  %21300 = vmatprep.mubr.msk.f32.mxu1 %vm504_vm1, %v25325_v0 }
 0x20e   : > { %21157 = vmatmul.mubr.msk.f32.gmra.mrb[44].mxu0 %vm504_vm1, %v25343_v5  ;;  %21301 = vmatmul.mubr.msk.f32.gmra.mrb[8].mxu1 %vm504_vm1, %v25331_v1 }
 0x20f   : > { %21159 = vmatprep.mubr.msk.f32.mxu0 %vm504_vm1, %v25349_v8  ;;  %21303 = vmatprep.mubr.msk.f32.mxu1 %vm504_vm1, %v25337_v4 }
 0x212   : > { %21160 = vmatmul.mubr.msk.f32.gmra.mrb[46].mxu0 %vm504_vm1, %v25355_v9  ;;  %21304 = vmatmul.mubr.msk.f32.gmra.mrb[10].mxu1 %vm504_vm1, %v25343_v5 }
 0x213   : > { %21162 = vmatprep.mubr.msk.f32.mxu0 %vm504_vm1, %v25361_v12  ;;  %21306 = vmatprep.mubr.msk.f32.mxu1 %vm504_vm1, %v25349_v8 }
 0x216   : > { %21163 = vmatmul.mubr.msk.f32.gmra.mrb[48].mxu0 %vm504_vm1, %v25367_v13  ;;  %21307 = vmatmul.mubr.msk.f32.gmra.mrb[12].mxu1 %vm504_vm1, %v25355_v9 }
 0x217   : > { %21165 = vmatprep.mubr.msk.f32.mxu0 %vm504_vm1, %v25373_v14  ;;  %21309 = vmatprep.mubr.msk.f32.mxu1 %vm504_vm1, %v25361_v12 }
 0x21a   : > { %21166 = vmatmul.mubr.msk.f32.gmra.mrb[50].mxu0 %vm504_vm1, %v25379_v17  ;;  %21310 = vmatmul.mubr.msk.f32.gmra.mrb[14].mxu1 %vm504_vm1, %v25367_v13 }
 0x21b   : > { %21168 = vmatprep.mubr.msk.f32.mxu0 %vm504_vm1, %v25385_v18  ;;  %21312 = vmatprep.mubr.msk.f32.mxu1 %vm504_vm1, %v25373_v14 }
 0x21e   : > { %21169 = vmatmul.mubr.msk.f32.gmra.mrb[52].mxu0 %vm504_vm1, %v25391_v21  ;;  %21313 = vmatmul.mubr.msk.f32.gmra.mrb[16].mxu1 %vm504_vm1, %v25379_v17 }
 0x21f   : > { %21171 = vmatprep.mubr.msk.f32.mxu0 %vm504_vm1, %v25397_v22  ;;  %21315 = vmatprep.mubr.msk.f32.mxu1 %vm504_vm1, %v25385_v18 }
 0x222   : > { %21172 = vmatmul.mubr.msk.f32.gmra.mrb[54].mxu0 %vm504_vm1, %v25403_v25  ;;  %21316 = vmatmul.mubr.msk.f32.gmra.mrb[18].mxu1 %vm504_vm1, %v25391_v21 }
 0x223   : > { %21174 = vmatprep.mubr.msk.f32.mxu0 %vm504_vm1, %v25409_v26  ;;  %21318 = vmatprep.mubr.msk.f32.mxu1 %vm504_vm1, %v25397_v22 }
 0x226   : > { %21175 = vmatmul.mubr.msk.f32.gmra.mrb[56].mxu0 %vm504_vm1, %v25415_v29  ;;  %21319 = vmatmul.mubr.msk.f32.gmra.mrb[20].mxu1 %vm504_vm1, %v25403_v25 }
 0x227   : > { %21177 = vmatprep.mubr.msk.f32.mxu0 %vm504_vm1, %v25421_v30  ;;  %21321 = vmatprep.mubr.msk.f32.mxu1 %vm504_vm1, %v25409_v26 }
 0x22a   : > { %21178 = vmatmul.mubr.msk.f32.gmra.mrb[58].mxu0 %vm504_vm1, %v25427_v33  ;;  %21322 = vmatmul.mubr.msk.f32.gmra.mrb[22].mxu1 %vm504_vm1, %v25415_v29 }
 0x22b   : > { %21180 = vmatprep.mubr.msk.f32.mxu0 %vm504_vm1, %v25433_v34  ;;  %21324 = vmatprep.mubr.msk.f32.mxu1 %vm504_vm1, %v25421_v30 }
 0x22e   : > { %21181 = vmatmul.mubr.msk.f32.gmra.mrb[60].mxu0 %vm504_vm1, %v25439_v37  ;;  %21325 = vmatmul.mubr.msk.f32.gmra.mrb[24].mxu1 %vm504_vm1, %v25427_v33 }
 0x22f   : > { %21183 = vmatprep.mubr.msk.f32.mxu0 %vm504_vm1, %v25445_v38  ;;  %21327 = vmatprep.mubr.msk.f32.mxu1 %vm504_vm1, %v25433_v34 }
 0x232   : > { %21184 = vmatmul.mubr.msk.f32.gmra.mrb[62].mxu0 %vm504_vm1, %v25451_v42  ;;  %21328 = vmatmul.mubr.msk.f32.gmra.mrb[26].mxu1 %vm504_vm1, %v25439_v37  ;;  %v25468_v37 = vld [vmem:[#allocation2 + $0x189] sm:$0xff] }
 0x233   : > { %21330 = vmatprep.mubr.msk.f32.mxu1 %vm504_vm1, %v25445_v38  ;;  %21188 = vmatprep.mubr.msk.f32.mxu0 %vm504_vm1, %v1640_v41  ;;  %29909 = vst [vmem:[#allocation8_spill] sm:$0xff] %v25468_v37  ;;  %v25473_v41 = vld [vmem:[#allocation2 + $0x32] sm:$0xff] }
 0x234   : > { %29910 = vst [vmem:[#allocation9_spill] sm:$0xff] %v25473_v41 }
 0x236   : > { %21189 = vmatmul.mubr.msk.f32.vlgmr.msra.gmra.mrb[32].mxu0 %vm504_vm1, %v1641_v45  ;;  %21331 = vmatmul.mubr.msk.f32.gmra.mrb[28].mxu1 %vm504_vm1, %v25451_v42  ;;  %v25478_v45 = vld [vmem:[#allocation2 + $0x3a] sm:$0xff] }
 0x237   : > { %21191 = vmatprep.mubr.msk.f32.mxu0 %vm504_vm1, %v1642_v46  ;;  %21333 = vmatprep.mubr.msk.f32.mxu1 %vm504_vm1, %v25463_v47  ;;  %29911 = vst [vmem:[#allocation10_spill] sm:$0xff] %v25478_v45  ;;  %v25483_v47 = vld [vmem:[%s29664_s1 + $0x38] sm:$0xff] }
 0x23a   : > { %21192 = vmatmul.mubr.msk.f32.gmra.mrb[34].mxu0 %vm504_vm1, %v1643_v50  ;;  %21334 = vmatmul.mubr.msk.f32.gmra.mrb[30].mxu1 %vm504_vm1, %v25468_v37  ;;  %v25488_v37 = vld [vmem:[#allocation2 + $0x4a] sm:$0xff] }
 0x23b   : > { %21194 = vmatprep.mubr.msk.f32.mxu0 %vm504_vm1, %v25473_v41  ;;  %21338 = vmatprep.mubr.msk.f32.mxu1 %vm504_vm1, %v1642_v46  ;;  %29912 = vst [vmem:[#allocation11_spill] sm:$0xff] %v25488_v37  ;;  %v25496_v46 = vld [vmem:[#allocation2 + $0x52] sm:$0xff] }
 0x23c   : > { %29913 = vst [vmem:[#allocation12_spill] sm:$0xff] %v25496_v46 }
 0x23e   : > { %21195 = vmatmul.mubr.msk.f32.gmra.mrb[36].mxu0 %vm504_vm1, %v25478_v45  ;;  %21339 = vmatmul.mubr.msk.f32.vlgmr.msra.gmra.mrb[0].mxu1 %vm504_vm1, %v1643_v50  ;;  %v25502_v50 = vld [vmem:[#allocation2 + $0x62] sm:$0xff] }
 0x23f   : > { %21387 = vmatpush3.msra.mxu1 %v25294_v56  ;;  %21197 = vmatprep.mubr.msk.f32.mxu0 %vm504_vm1, %v25488_v37  ;;  %29914 = vst [vmem:[#allocation13_spill] sm:$0xff] %v25502_v50  ;;  %v25508_v56 = vld [vmem:[#allocation2 + $0x6a] sm:$0xff] }
 0x240   : > { %21341 = vmatprep.mubr.msk.f32.mxu1 %vm504_vm1, %v25473_v41  ;;  %21436 = vmatprep.subr.mxu1 %v25483_v47  ;;  %29915 = vst [vmem:[#allocation14_spill] sm:$0xff] %v25508_v56  ;;  %v25514_v41 = vld [vmem:[#allocation2 + $0x7a] sm:$0xff] }
 0x241   : > { %29916 = vst [vmem:[#allocation15_spill] sm:$0xff] %v25514_v41 }
 0x242   : > { %21198 = vmatmul.mubr.msk.f32.gmra.mrb[38].mxu0 %vm504_vm1, %v25496_v46  ;;  %21342 = vmatmul.mubr.msk.f32.gmra.mrb[2].mxu1 %vm504_vm1, %v25478_v45  ;;  %v25520_v45 = vld [vmem:[#allocation2 + $0x82] sm:$0xff] }
 0x243   : > { %21200 = vmatprep.mubr.msk.f32.mxu0 %vm504_vm1, %v25502_v50  ;;  %21344 = vmatprep.mubr.msk.f32.mxu1 %vm504_vm1, %v25488_v37  ;;  %29917 = vst [vmem:[#allocation16_spill] sm:$0xff] %v25520_v45  ;;  %v25526_v37 = vld [vmem:[#allocation2 + $0x92] sm:$0xff] }
 0x244   : > { %29918 = vst [vmem:[#allocation17_spill] sm:$0xff] %v25526_v37 }
 0x246   : > { %21201 = vmatmul.mubr.msk.f32.gmra.mrb[40].mxu0 %vm504_vm1, %v25508_v56  ;;  %21345 = vmatmul.mubr.msk.f32.gmra.mrb[4].mxu1 %vm504_vm1, %v25496_v46  ;;  %v25532_v46 = vld [vmem:[#allocation2 + $0x9a] sm:$0xff] }
 0x247   : > { %21203 = vmatprep.mubr.msk.f32.mxu0 %vm504_vm1, %v25514_v41  ;;  %21347 = vmatprep.mubr.msk.f32.mxu1 %vm504_vm1, %v25502_v50  ;;  %29919 = vst [vmem:[#allocation18_spill] sm:$0xff] %v25532_v46  ;;  %v25538_v50 = vld [vmem:[#allocation2 + $0xaa] sm:$0xff] }
 0x248   : > { %29920 = vst [vmem:[#allocation19_spill] sm:$0xff] %v25538_v50 }
 0x24a   : > { %21204 = vmatmul.mubr.msk.f32.gmra.mrb[42].mxu0 %vm504_vm1, %v25520_v45  ;;  %21348 = vmatmul.mubr.msk.f32.gmra.mrb[6].mxu1 %vm504_vm1, %v25508_v56  ;;  %v25544_v56 = vld [vmem:[#allocation2 + $0xb2] sm:$0xff] }
 0x24b   : > { %21206 = vmatprep.mubr.msk.f32.mxu0 %vm504_vm1, %v25526_v37  ;;  %21350 = vmatprep.mubr.msk.f32.mxu1 %vm504_vm1, %v25514_v41  ;;  %29921 = vst [vmem:[#allocation20_spill] sm:$0xff] %v25544_v56  ;;  %v25550_v41 = vld [vmem:[#allocation2 + $0xc2] sm:$0xff] }
 0x24c   : > { %29922 = vst [vmem:[#allocation21_spill] sm:$0xff] %v25550_v41 }
 0x24e   : > { %21207 = vmatmul.mubr.msk.f32.gmra.mrb[44].mxu0 %vm504_vm1, %v25532_v46  ;;  %21351 = vmatmul.mubr.msk.f32.gmra.mrb[8].mxu1 %vm504_vm1, %v25520_v45  ;;  %v25556_v45 = vld [vmem:[#allocation2 + $0xca] sm:$0xff] }
 0x24f   : > { %21209 = vmatprep.mubr.msk.f32.mxu0 %vm504_vm1, %v25538_v50  ;;  %21353 = vmatprep.mubr.msk.f32.mxu1 %vm504_vm1, %v25526_v37  ;;  %29923 = vst [vmem:[#allocation22_spill] sm:$0xff] %v25556_v45  ;;  %v25562_v37 = vld [vmem:[#allocation2 + $0xda] sm:$0xff] }
 0x250   : > { %29924 = vst [vmem:[#allocation23_spill] sm:$0xff] %v25562_v37 }
 0x252   : > { %21210 = vmatmul.mubr.msk.f32.gmra.mrb[46].mxu0 %vm504_vm1, %v25544_v56  ;;  %21354 = vmatmul.mubr.msk.f32.gmra.mrb[10].mxu1 %vm504_vm1, %v25532_v46  ;;  %v25568_v46 = vld [vmem:[#allocation2 + $0xe2] sm:$0xff] }
 0x253   : > { %21212 = vmatprep.mubr.msk.f32.mxu0 %vm504_vm1, %v25550_v41  ;;  %21356 = vmatprep.mubr.msk.f32.mxu1 %vm504_vm1, %v25538_v50  ;;  %29925 = vst [vmem:[#allocation24_spill] sm:$0xff] %v25568_v46  ;;  %v25574_v50 = vld [vmem:[#allocation2 + $0xf2] sm:$0xff] }
 0x254   : > { %29926 = vst [vmem:[#allocation25_spill] sm:$0xff] %v25574_v50 }
 0x256   : > { %21213 = vmatmul.mubr.msk.f32.gmra.mrb[48].mxu0 %vm504_vm1, %v25556_v45  ;;  %21357 = vmatmul.mubr.msk.f32.gmra.mrb[12].mxu1 %vm504_vm1, %v25544_v56  ;;  %v25580_v56 = vld [vmem:[#allocation2 + $0xfa] sm:$0xff] }
 0x257   : > { %21215 = vmatprep.mubr.msk.f32.mxu0 %vm504_vm1, %v25562_v37  ;;  %21359 = vmatprep.mubr.msk.f32.mxu1 %vm504_vm1, %v25550_v41  ;;  %29927 = vst [vmem:[#allocation26_spill] sm:$0xff] %v25580_v56  ;;  %v25586_v41 = vld [vmem:[#allocation2 + $0x10a] sm:$0xff] }
 0x258   : > { %29928 = vst [vmem:[#allocation27_spill] sm:$0xff] %v25586_v41 }
 0x25a   : > { %21216 = vmatmul.mubr.msk.f32.gmra.mrb[50].mxu0 %vm504_vm1, %v25568_v46  ;;  %21360 = vmatmul.mubr.msk.f32.gmra.mrb[14].mxu1 %vm504_vm1, %v25556_v45  ;;  %v25592_v45 = vld [vmem:[#allocation2 + $0x112] sm:$0xff] }
 0x25b   : > { %21218 = vmatprep.mubr.msk.f32.mxu0 %vm504_vm1, %v25574_v50  ;;  %21362 = vmatprep.mubr.msk.f32.mxu1 %vm504_vm1, %v25562_v37  ;;  %29929 = vst [vmem:[#allocation28_spill] sm:$0xff] %v25592_v45  ;;  %v25598_v37 = vld [vmem:[#allocation2 + $0x122] sm:$0xff] }
 0x25c   : > { %29930 = vst [vmem:[#allocation29_spill] sm:$0xff] %v25598_v37 }
 0x25e   : > { %21219 = vmatmul.mubr.msk.f32.gmra.mrb[52].mxu0 %vm504_vm1, %v25580_v56  ;;  %21363 = vmatmul.mubr.msk.f32.gmra.mrb[16].mxu1 %vm504_vm1, %v25568_v46  ;;  %v25604_v46 = vld [vmem:[#allocation2 + $0x12a] sm:$0xff] }
 0x25f   : > { %21221 = vmatprep.mubr.msk.f32.mxu0 %vm504_vm1, %v25586_v41  ;;  %21365 = vmatprep.mubr.msk.f32.mxu1 %vm504_vm1, %v25574_v50  ;;  %29931 = vst [vmem:[#allocation30_spill] sm:$0xff] %v25604_v46  ;;  %v25610_v50 = vld [vmem:[#allocation2 + $0x13a] sm:$0xff] }
 0x262   : > { %21222 = vmatmul.mubr.msk.f32.gmra.mrb[54].mxu0 %vm504_vm1, %v25592_v45  ;;  %21366 = vmatmul.mubr.msk.f32.gmra.mrb[18].mxu1 %vm504_vm1, %v25580_v56  ;;  %v25616_v56 = vld [vmem:[#allocation2 + $0x142] sm:$0xff] }
 0x263   : > { %21224 = vmatprep.mubr.msk.f32.mxu0 %vm504_vm1, %v25598_v37  ;;  %21368 = vmatprep.mubr.msk.f32.mxu1 %vm504_vm1, %v25586_v41  ;;  %29932 = vst [vmem:[#allocation31_spill] sm:$0xff] %v25616_v56  ;;  %v25622_v41 = vld [vmem:[#allocation2 + $0x152] sm:$0xff] }
 0x264   : > { %29933 = vst [vmem:[#allocation32_spill] sm:$0xff] %v25622_v41 }
 0x266   : > { %21225 = vmatmul.mubr.msk.f32.gmra.mrb[56].mxu0 %vm504_vm1, %v25604_v46  ;;  %21369 = vmatmul.mubr.msk.f32.gmra.mrb[20].mxu1 %vm504_vm1, %v25592_v45  ;;  %v25628_v45 = vld [vmem:[#allocation2 + $0x15a] sm:$0xff] }
 0x267   : > { %21227 = vmatprep.mubr.msk.f32.mxu0 %vm504_vm1, %v25610_v50  ;;  %21371 = vmatprep.mubr.msk.f32.mxu1 %vm504_vm1, %v25598_v37  ;;  %v25634_v37 = vld [vmem:[#allocation2 + $0x16a] sm:$0xff] }
 0x268   : > { %29934 = vst [vmem:[#allocation33_spill] sm:$0xff] %v25634_v37 }
 0x26a   : > { %21228 = vmatmul.mubr.msk.f32.gmra.mrb[58].mxu0 %vm504_vm1, %v25616_v56  ;;  %21372 = vmatmul.mubr.msk.f32.gmra.mrb[22].mxu1 %vm504_vm1, %v25604_v46  ;;  %v25640_v46 = vld [vmem:[#allocation2 + $0x172] sm:$0xff] }
 0x26b   : > { %21230 = vmatprep.mubr.msk.f32.mxu0 %vm504_vm1, %v25622_v41  ;;  %21374 = vmatprep.mubr.msk.f32.mxu1 %vm504_vm1, %v25610_v50 }
 0x26e   : > { %21231 = vmatmul.mubr.msk.f32.gmra.mrb[60].mxu0 %vm504_vm1, %v25628_v45  ;;  %21375 = vmatmul.mubr.msk.f32.gmra.mrb[24].mxu1 %vm504_vm1, %v25616_v56  ;;  %v25650_v56 = vld [vmem:[#allocation2 + $0x182] sm:$0xff] }
 0x26f   : > { %21233 = vmatprep.mubr.msk.f32.mxu0 %vm504_vm1, %v25634_v37  ;;  %21377 = vmatprep.mubr.msk.f32.mxu1 %vm504_vm1, %v25622_v41  ;;  %v25654_v41 = vld [vmem:[#allocation2 + $0x18a] sm:$0xff] }
 0x272   : > { %21234 = vmatmul.mubr.msk.f32.gmra.mrb[62].mxu0 %vm504_vm1, %v25640_v46  ;;  %21378 = vmatmul.mubr.msk.f32.gmra.mrb[26].mxu1 %vm504_vm1, %v25628_v45 }
 0x273   : > { %21380 = vmatprep.mubr.msk.f32.mxu1 %vm504_vm1, %v25634_v37  ;;  %v18187_v37 = vld [vmem:[%s29664_s1 + $0x40] sm:$0xff] }
 0x276   : > { %21381 = vmatmul.mubr.msk.f32.gmra.mrb[28].mxu1 %vm504_vm1, %v25640_v46 }
 0x277   : > { %21383 = vmatprep.mubr.msk.f32.mxu1 %vm504_vm1, %v25650_v56 }
 0x27a   : > { %21384 = vmatmul.mubr.msk.f32.gmra.mrb[30].mxu1 %vm504_vm1, %v25654_v41 }
 0x27b   : > { %21388 = vmatprep.mubr.msk.f32.mxu1 %vm504_vm1, %v25070_v54  ;;  %v3219_v54 = vld [vmem:[#allocation2 + $0x198] sm:$0xff] }
 0x27e   : > { %21389 = vmatmul.mubr.msk.f32.vlgmr.msra.gmra.mrb[0].mxu1 %vm504_vm1, %v25072_v55  ;;  %v3220_v55 = vld [vmem:[#allocation2 + $0x1a0] sm:$0xff] }
 0x27f   : > { %21437 = vmatpush3.msra.mxu1 %v25483_v47  ;;  %21391 = vmatprep.mubr.msk.f32.mxu1 %vm504_vm1, %v25084_v58  ;;  %v29935_v58 = vld [vmem:[#allocation6_spill] sm:$0xff] }
 0x280   : > { %21486 = vmatprep.subr.mxu1 %v18187_v37 }
 0x282   : > { %21392 = vmatmul.mubr.msk.f32.gmra.mrb[2].mxu1 %vm504_vm1, %v25086_v59  ;;  %v29936_v59 = vld [vmem:[#allocation7_spill] sm:$0xff] }
 0x283   : > { %21394 = vmatprep.mubr.msk.f32.mxu1 %vm504_vm1, %v25098_v62  ;;  %v3606_v62 = vld [vmem:[#allocation2 + $0x199] sm:$0xff] }
 0x286   : > { %21395 = vmatmul.mubr.msk.f32.gmra.mrb[4].mxu1 %vm504_vm1, %v25100_v63  ;;  %v29937_v63 = vld [vmem:[#allocation8_spill] sm:$0xff] }
 0x287   : > { %21397 = vmatprep.mubr.msk.f32.mxu1 %vm504_vm1, %v25112_v2  ;;  %v3607_v2 = vld [vmem:[#allocation2 + $0x1a1] sm:$0xff] }
 0x28a   : > { %21398 = vmatmul.mubr.msk.f32.gmra.mrb[6].mxu1 %vm504_vm1, %v25114_v3  ;;  %v29938_v3 = vld [vmem:[#allocation9_spill] sm:$0xff] }
 0x28b   : > { %21400 = vmatprep.mubr.msk.f32.mxu1 %vm504_vm1, %v25126_v6  ;;  %v29939_v6 = vld [vmem:[#allocation10_spill] sm:$0xff] }
 0x28e   : > { %21401 = vmatmul.mubr.msk.f32.gmra.mrb[8].mxu1 %vm504_vm1, %v25128_v7  ;;  %v29940_v7 = vld [vmem:[#allocation11_spill] sm:$0xff] }
 0x28f   : > { %21403 = vmatprep.mubr.msk.f32.mxu1 %vm504_vm1, %v25140_v10  ;;  %v29941_v10 = vld [vmem:[#allocation12_spill] sm:$0xff] }
 0x292   : > { %21404 = vmatmul.mubr.msk.f32.gmra.mrb[10].mxu1 %vm504_vm1, %v25142_v11  ;;  %v29942_v11 = vld [vmem:[#allocation13_spill] sm:$0xff] }
 0x293   : > { %21406 = vmatprep.mubr.msk.f32.mxu1 %vm504_vm1, %v25160_v15  ;;  %v29943_v15 = vld [vmem:[#allocation14_spill] sm:$0xff] }
 0x296   : > { %21407 = vmatmul.mubr.msk.f32.gmra.mrb[12].mxu1 %vm504_vm1, %v25162_v16  ;;  %v29944_v16 = vld [vmem:[#allocation15_spill] sm:$0xff] }
 0x297   : > { %21409 = vmatprep.mubr.msk.f32.mxu1 %vm504_vm1, %v25174_v19 }
 0x29a   : > { %21410 = vmatmul.mubr.msk.f32.gmra.mrb[14].mxu1 %vm504_vm1, %v25176_v20  ;;  %v29945_v20 = vld [vmem:[#allocation16_spill] sm:$0xff] }
 0x29b   : > { %21412 = vmatprep.mubr.msk.f32.mxu1 %vm504_vm1, %v25188_v23 }
 0x29e   : > { %21413 = vmatmul.mubr.msk.f32.gmra.mrb[16].mxu1 %vm504_vm1, %v25190_v24  ;;  %v29946_v24 = vld [vmem:[#allocation17_spill] sm:$0xff] }
 0x29f   : > { %21415 = vmatprep.mubr.msk.f32.mxu1 %vm504_vm1, %v25202_v27 }
 0x2a2   : > { %21416 = vmatmul.mubr.msk.f32.gmra.mrb[18].mxu1 %vm504_vm1, %v25204_v28 }
 0x2a3   : > { %21418 = vmatprep.mubr.msk.f32.mxu1 %vm504_vm1, %v25216_v31  ;;  %v29947_v31 = vld [vmem:[#allocation18_spill] sm:$0xff] }
 0x2a6   : > { %21419 = vmatmul.mubr.msk.f32.gmra.mrb[20].mxu1 %vm504_vm1, %v25218_v32  ;;  %v29948_v32 = vld [vmem:[#allocation19_spill] sm:$0xff] }
 0x2a7   : > { %21421 = vmatprep.mubr.msk.f32.mxu1 %vm504_vm1, %v25230_v35 }
 0x2aa   : > { %21422 = vmatmul.mubr.msk.f32.gmra.mrb[22].mxu1 %vm504_vm1, %v25232_v36 }
 0x2ab   : > { %21424 = vmatprep.mubr.msk.f32.mxu1 %vm504_vm1, %v25244_v39  ;;  %v29949_v39 = vld [vmem:[#allocation20_spill] sm:$0xff] }
 0x2ae   : > { %21425 = vmatmul.mubr.msk.f32.gmra.mrb[24].mxu1 %vm504_vm1, %v25246_v40  ;;  %v29950_v40 = vld [vmem:[#allocation21_spill] sm:$0xff] }
 0x2af   : > { %21427 = vmatprep.mubr.msk.f32.mxu1 %vm504_vm1, %v25258_v43 }
 0x2b2   : > { %21428 = vmatmul.mubr.msk.f32.gmra.mrb[26].mxu1 %vm504_vm1, %v25260_v44 }
 0x2b3   : > { %21430 = vmatprep.mubr.msk.f32.mxu1 %vm504_vm1, %v25275_v48  ;;  %v29951_v48 = vld [vmem:[#allocation22_spill] sm:$0xff] }
 0x2b6   : > { %21431 = vmatmul.mubr.msk.f32.gmra.mrb[28].mxu1 %vm504_vm1, %v25277_v49  ;;  %v29952_v49 = vld [vmem:[#allocation23_spill] sm:$0xff] }
 0x2b7   : > { %21433 = vmatprep.mubr.msk.f32.mxu1 %vm504_vm1, %v3219_v54 }
 0x2ba   : > { %21434 = vmatmul.mubr.msk.f32.gmra.mrb[30].mxu1 %vm504_vm1, %v3220_v55 }
 0x2bb   : > { %21438 = vmatprep.mubr.msk.f32.mxu1 %vm504_vm1, %v25284_v52 }
 0x2be   : > { %21439 = vmatmul.mubr.msk.f32.vlgmr.msra.gmra.mrb[0].mxu1 %vm504_vm1, %v25289_v53 }
 0x2bf   : > { %21487 = vmatpush3.msra.mxu1 %v18187_v37  ;;  %21441 = vmatprep.mubr.msk.f32.mxu1 %vm504_vm1, %v25299_v57  ;;  %v29953_v57 = vld [vmem:[#allocation24_spill] sm:$0xff]  ;;  %v29962_v37 = vld [vmem:[#allocation33_spill] sm:$0xff] }
 0x2c2   : > { %21442 = vmatmul.mubr.msk.f32.gmra.mrb[2].mxu1 %vm504_vm1, %v25307_v60  ;;  %v29954_v60 = vld [vmem:[#allocation25_spill] sm:$0xff] }
 0x2c3   : > { %21444 = vmatprep.mubr.msk.f32.mxu1 %vm504_vm1, %v25313_v61 }
 0x2c6   : > { %21445 = vmatmul.mubr.msk.f32.gmra.mrb[4].mxu1 %vm504_vm1, %v25319_v51 }
 0x2c7   : > { %21447 = vmatprep.mubr.msk.f32.mxu1 %vm504_vm1, %v25325_v0  ;;  %v29955_v0 = vld [vmem:[#allocation26_spill] sm:$0xff] }
 0x2ca   : > { %21448 = vmatmul.mubr.msk.f32.gmra.mrb[6].mxu1 %vm504_vm1, %v25331_v1  ;;  %v29956_v1 = vld [vmem:[#allocation27_spill] sm:$0xff] }
 0x2cb   : > { %21450 = vmatprep.mubr.msk.f32.mxu1 %vm504_vm1, %v25337_v4 }
 0x2ce   : > { %21451 = vmatmul.mubr.msk.f32.gmra.mrb[8].mxu1 %vm504_vm1, %v25343_v5 }
 0x2cf   : > { %21453 = vmatprep.mubr.msk.f32.mxu1 %vm504_vm1, %v25349_v8  ;;  %v29957_v8 = vld [vmem:[#allocation28_spill] sm:$0xff] }
 0x2d2   : > { %21454 = vmatmul.mubr.msk.f32.gmra.mrb[10].mxu1 %vm504_vm1, %v25355_v9  ;;  %v29958_v9 = vld [vmem:[#allocation29_spill] sm:$0xff] }
 0x2d3   : > { %21456 = vmatprep.mubr.msk.f32.mxu1 %vm504_vm1, %v25361_v12 }
 0x2d6   : > { %21457 = vmatmul.mubr.msk.f32.gmra.mrb[12].mxu1 %vm504_vm1, %v25367_v13 }
 0x2d7   : > { %21459 = vmatprep.mubr.msk.f32.mxu1 %vm504_vm1, %v25373_v14  ;;  %v29959_v14 = vld [vmem:[#allocation30_spill] sm:$0xff] }
 0x2da   : > { %21460 = vmatmul.mubr.msk.f32.gmra.mrb[14].mxu1 %vm504_vm1, %v25379_v17 }
 0x2db   : > { %21462 = vmatprep.mubr.msk.f32.mxu1 %vm504_vm1, %v25385_v18  ;;  %v25869_v18 = vld [vmem:[%s29669_s6] ss:$0 sm:$0xff] }
 0x2de   : > { %21463 = vmatmul.mubr.msk.f32.gmra.mrb[16].mxu1 %vm504_vm1, %v25391_v21 }
 0x2df   : > { %21465 = vmatprep.mubr.msk.f32.mxu1 %vm504_vm1, %v25397_v22  ;;  %v29960_v22 = vld [vmem:[#allocation31_spill] sm:$0xff] }
 0x2e2   : > { %21466 = vmatmul.mubr.msk.f32.gmra.mrb[18].mxu1 %vm504_vm1, %v25403_v25 }
 0x2e3   : > { %21468 = vmatprep.mubr.msk.f32.mxu1 %vm504_vm1, %v25409_v26  ;;  %v29961_v26 = vld [vmem:[#allocation32_spill] sm:$0xff] }
 0x2e6   : > { %21469 = vmatmul.mubr.msk.f32.gmra.mrb[20].mxu1 %vm504_vm1, %v25415_v29 }
 0x2e7   : > { %21471 = vmatprep.mubr.msk.f32.mxu1 %vm504_vm1, %v25421_v30 }
 0x2ea   : > { %21472 = vmatmul.mubr.msk.f32.gmra.mrb[22].mxu1 %vm504_vm1, %v25427_v33 }
 0x2eb   : > { %21474 = vmatprep.mubr.msk.f32.mxu1 %vm504_vm1, %v25433_v34 }
 0x2ee   : > { %21475 = vmatmul.mubr.msk.f32.gmra.mrb[24].mxu1 %vm504_vm1, %v29935_v58 }
 0x2ef   : > { %21477 = vmatprep.mubr.msk.f32.mxu1 %vm504_vm1, %v25445_v38 }
 0x2f2   : > { %21478 = vmatmul.mubr.msk.f32.gmra.mrb[26].mxu1 %vm504_vm1, %v25451_v42 }
 0x2f3   : > { %21480 = vmatprep.mubr.msk.f32.mxu1 %vm504_vm1, %v29936_v59 }
 0x2f6   : > { %21481 = vmatmul.mubr.msk.f32.gmra.mrb[28].mxu1 %vm504_vm1, %v29937_v63 }
 0x2f7   : > { %21483 = vmatprep.mubr.msk.f32.mxu1 %vm504_vm1, %v3606_v62 }
 0x2fa   : > { %21484 = vmatmul.mubr.msk.f32.gmra.mrb[30].mxu1 %vm504_vm1, %v3607_v2 }
 0x2fb   : > { %21488 = vmatprep.mubr.msk.f32.mxu1 %vm504_vm1, %v29938_v3 }
 0x2fe   : > { %21489 = vmatmul.mubr.msk.f32.vlgmr.msra.gmra.mrb[0].mxu1 %vm504_vm1, %v29939_v6 }
 0x2ff   : > { %21491 = vmatprep.mubr.msk.f32.mxu1 %vm504_vm1, %v29940_v7 }
 0x302   : > { %21492 = vmatmul.mubr.msk.f32.gmra.mrb[2].mxu1 %vm504_vm1, %v29941_v10 }
 0x303   : > { %21494 = vmatprep.mubr.msk.f32.mxu1 %vm504_vm1, %v29942_v11 }
 0x306   : > { %21495 = vmatmul.mubr.msk.f32.gmra.mrb[4].mxu1 %vm504_vm1, %v29943_v15 }
 0x307   : > { %21497 = vmatprep.mubr.msk.f32.mxu1 %vm504_vm1, %v29944_v16 }
 0x309   : > { %v25800_v19 = vpop.f32.mrb[32].mxu0 }
 0x30a   : > { %21498 = vmatmul.mubr.msk.f32.gmra.mrb[6].mxu1 %vm504_vm1, %v29945_v20  ;;  %v25804_v23 = vpop.f32.mrb[33].mxu0 }
 0x30b   : > { %21500 = vmatprep.mubr.msk.f32.mxu1 %vm504_vm1, %v29946_v24 }
 0x30d   : > { %v25808_v27 = vpop.f32.mrb[34].mxu0 }
 0x30e   : > { %v25810_v28 = vpop.f32.mrb[35].mxu0  ;;  %21501 = vmatmul.mubr.msk.f32.gmra.mrb[8].mxu1 %vm504_vm1, %v29947_v31 }
 0x30f   : > { %21503 = vmatprep.mubr.msk.f32.mxu1 %vm504_vm1, %v29948_v32 }
 0x311   : > { %v25816_v35 = vpop.f32.mrb[36].mxu0 }
 0x312   : > { %v25818_v36 = vpop.f32.mrb[37].mxu0  ;;  %21504 = vmatmul.mubr.msk.f32.gmra.mrb[10].mxu1 %vm504_vm1, %v29949_v39  ;;  %v4647_v39 = vld [vmem:[%s29665_s2] sm:$0xff] }
 0x313   : > { %21506 = vmatprep.mubr.msk.f32.mxu1 %vm504_vm1, %v29950_v40  ;;  %v4648_v40 = vld [vmem:[%s29665_s2 + $0x8] sm:$0xf] }
 0x315   : > { %v25824_v43 = vpop.f32.mrb[38].mxu0 }
 0x316   : > { %v25826_v44 = vpop.f32.mrb[39].mxu0  ;;  %21507 = vmatmul.mubr.msk.f32.gmra.mrb[12].mxu1 %vm504_vm1, %v29951_v48  ;;  %v22958_v48 = vpack.c.bf16 %v4648_v40, %v4647_v39 }
 0x317   : > { %21509 = vmatprep.mubr.msk.f32.mxu1 %vm504_vm1, %v29952_v49 }
 0x318   : > { %22960 = vmatprep.subr.msk.bf16.mxu0 %vm25939_vm7, %v22958_v48 }
 0x319   : > { %v25832_v52 = vpop.f32.mrb[40].mxu0  ;;  %22963 = vmatpush3.bf16.msk.msra.mxu0 %vm25939_vm7, %v22958_v48 }
 0x31a   : > { %v25834_v53 = vpop.f32.mrb[41].mxu0  ;;  %21510 = vmatmul.mubr.msk.f32.gmra.mrb[14].mxu1 %vm504_vm1, %v29953_v57  ;;  %v23516_v57 = vadd.f32 %v25800_v19, %v25869_v18  ;;  %v23522_v19 = vadd.f32 %v25869_v18, %v25810_v28  ;;  %v23532_v39 = vadd.f32 %v25832_v52, %v25869_v18 }
 0x31b   : > { %21512 = vmatprep.mubr.msk.f32.mxu1 %vm504_vm1, %v29954_v60  ;;  %v23518_v60 = vadd.f32 %v25869_v18, %v25804_v23  ;;  %v23534_v40 = vadd.f32 %v25869_v18, %v25834_v53 }
 0x31d   : > { %v25840_v61 = vpop.f32.mrb[42].mxu0 }
 0x31e   : > { %v25842_v51 = vpop.f32.mrb[43].mxu0  ;;  %21513 = vmatmul.mubr.msk.f32.gmra.mrb[16].mxu1 %vm504_vm1, %v29955_v0 }
 0x31f   : > { %21515 = vmatprep.mubr.msk.f32.mxu1 %vm504_vm1, %v29956_v1 }
 0x321   : > { %v25848_v4 = vpop.f32.mrb[44].mxu0 }
 0x322   : > { %v25850_v5 = vpop.f32.mrb[45].mxu0  ;;  %21516 = vmatmul.mubr.msk.f32.gmra.mrb[18].mxu1 %vm504_vm1, %v29957_v8 }
 0x323   : > { %21518 = vmatprep.mubr.msk.f32.mxu1 %vm504_vm1, %v29958_v9  ;;  %v4615_v9 = vld [vmem:[#allocation2] sm:$0xff] }
 0x324   : > { %21540 = vmatprep.mubr.msk.f32.mxu0 %vm4649_vm8, %v4615_v9 }
 0x325   : > { %v25856_v12 = vpop.f32.mrb[46].mxu0 }
 0x326   : > { %v25858_v13 = vpop.f32.mrb[47].mxu0  ;;  %21519 = vmatmul.mubr.msk.f32.gmra.mrb[20].mxu1 %vm504_vm1, %v29959_v14  ;;  %v4616_v14 = vld [vmem:[#allocation2 + $0x8] sm:$0xff] }
 0x327   : > { %21521 = vmatprep.mubr.msk.f32.mxu1 %vm504_vm1, %v25610_v50  ;;  %21541 = vmatmul.mubr.msk.f32.vlgmr.msra.gmra.mrb[64].mxu0 %vm4649_vm8, %v4616_v14 }
 0x329   : > { %v25864_v17 = vpop.f32.mrb[48].mxu0 }
 0x32a   : > { %v1916_v21 = vpop.f32.mrb[49].mxu0  ;;  %21522 = vmatmul.mubr.msk.f32.gmra.mrb[22].mxu1 %vm504_vm1, %v29960_v22  ;;  %v23520_v22 = vadd.f32 %v25808_v27, %v25869_v18  ;;  %v23524_v27 = vadd.f32 %v25816_v35, %v25869_v18 }
 0x32b   : > { %v25874_v25 = vadd.f32 %v25869_v18, %v1916_v21  ;;  %21524 = vmatprep.mubr.msk.f32.mxu1 %vm504_vm1, %v29961_v26 }
 0x32d   : > { %v21217_v29 = vpop.f32.mrb[50].mxu0 }
 0x32e   : > { %v25879_v30 = vadd.f32 %v21217_v29, %v25869_v18  ;;  %v1926_v33 = vpop.f32.mrb[51].mxu0  ;;  %21525 = vmatmul.mubr.msk.f32.gmra.mrb[24].mxu1 %vm504_vm1, %v25628_v45  ;;  %v3993_v45 = vld [vmem:[#allocation2 + $0x19a] sm:$0xff] }
 0x32f   : > { %v25884_v34 = vadd.f32 %v25869_v18, %v1926_v33  ;;  %21527 = vmatprep.mubr.msk.f32.mxu1 %vm504_vm1, %v29962_v37 }
 0x331   : > { %v21220_v38 = vpop.f32.mrb[52].mxu0 }
 0x332   : > { %v25889_v42 = vadd.f32 %v21220_v38, %v25869_v18  ;;  %v1936_v47 = vpop.f32.mrb[53].mxu0  ;;  %21528 = vmatmul.mubr.msk.f32.gmra.mrb[26].mxu1 %vm504_vm1, %v25640_v46  ;;  %v3994_v46 = vld [vmem:[#allocation2 + $0x1a2] sm:$0xff] }
 0x333   : > { %v25894_v50 = vadd.f32 %v25869_v18, %v1936_v47  ;;  %21530 = vmatprep.mubr.msk.f32.mxu1 %vm504_vm1, %v25650_v56 }
 0x335   : > { %v21223_v54 = vpop.f32.mrb[54].mxu0 }
 0x336   : > { %v25899_v55 = vadd.f32 %v21223_v54, %v25869_v18  ;;  %v1946_v58 = vpop.f32.mrb[55].mxu0  ;;  %21531 = vmatmul.mubr.msk.f32.gmra.mrb[28].mxu1 %vm504_vm1, %v25654_v41 }
 0x337   : > { %v25904_v59 = vadd.f32 %v25869_v18, %v1946_v58  ;;  %21533 = vmatprep.mubr.msk.f32.mxu1 %vm504_vm1, %v3993_v45  ;;  %v23526_v45 = vadd.f32 %v25869_v18, %v25818_v36 }
 0x339   : > { %v21226_v62 = vpop.f32.mrb[56].mxu0 }
 0x33a   : > { %v25908_v63 = vadd.f32 %v21226_v62, %v25869_v18  ;;  %v1956_v56 = vpop.f32.mrb[57].mxu0  ;;  %21534 = vmatmul.mubr.msk.f32.gmra.mrb[30].mxu1 %vm504_vm1, %v3994_v46 }
 0x33b   : > { %v25912_v2 = vadd.f32 %v25869_v18, %v1956_v56 }
 0x33d   : > { %v21229_v3 = vpop.f32.mrb[58].mxu0 }
 0x33e   : > { %v25915_v6 = vadd.f32 %v21229_v3, %v25869_v18  ;;  %v1966_v41 = vpop.f32.mrb[59].mxu0  ;;  %v23528_v3 = vadd.f32 %v25824_v43, %v25869_v18 }
 0x33f   : > { %v25918_v7 = vadd.f32 %v25869_v18, %v1966_v41  ;;  %v23530_v41 = vadd.f32 %v25869_v18, %v25826_v44 }
 0x341   : > { %v21232_v10 = vpop.f32.mrb[60].mxu0 }
 0x342   : > { %v25921_v11 = vadd.f32 %v21232_v10, %v25869_v18  ;;  %v1976_v15 = vpop.f32.mrb[61].mxu0 }
 0x343   : > { %v25924_v16 = vadd.f32 %v25869_v18, %v1976_v15 }
 0x345   : > { %v21235_v20 = vpop.f32.mrb[62].mxu0 }
 0x346   : > { %v25927_v24 = vadd.f32 %v21235_v20, %v25869_v18  ;;  %v1986_v31 = vpop.f32.mrb[63].mxu0 }
 0x347   : > { %v25930_v32 = vadd.f32 %v25869_v18, %v1986_v31 }
 0x3d1   : > { %v21490_v0 = vpop.f32.mrb[0].mxu1 }
 0x3d2   : > { %v23517_v1 = vadd.f32 %v23516_v57, %v21490_v0  ;;  %v4159_v8 = vpop.f32.mrb[1].mxu1 }
 0x3d3   : > { %v23519_v21 = vadd.f32 %v23518_v60, %v4159_v8  ;;  %v23538_v8 = vadd.f32 %v25869_v18, %v25842_v51 }
 0x3d4   : > { %vm4351_vm9 = vcmp.ge.f32.partialorder %v23517_v1, 0.0  ;;  %v4383_v26 = vmul.f32 0.2, %v23517_v1 }
 0x3d5   : > { %v21493_v23 = vpop.f32.mrb[2].mxu1  ;;  %v4382_v29 = vmul.f32 0.2, %v23519_v21  ;;  %vm4350_vm10 = vcmp.ge.f32.partialorder %v23519_v21, 0.0 }
 0x3d6   : > { %v23521_v33 = vadd.f32 %v23520_v22, %v21493_v23  ;;  %v4169_v37 = vpop.f32.mrb[3].mxu1  ;;  %v4415_v38 = vsel %vm4351_vm9, %v23517_v1, %v4383_v26  ;;  %v23536_v1 = vadd.f32 %v25840_v61, %v25869_v18  ;;  %v23540_v26 = vadd.f32 %v25848_v4, %v25869_v18 }
 0x3d7   : > { %v23523_v47 = vadd.f32 %v23522_v19, %v4169_v37  ;;  %4480 = vrot.lane.b32.xlu1 %v4415_v38, %s24804_s30  ;;  %v4414_v62 = vsel %vm4350_vm10, %v23519_v21, %v4382_v29  ;;  %v23542_v19 = vadd.f32 %v25869_v18, %v25850_v5  ;;  %v23544_v38 = vadd.f32 %v25856_v12, %v25869_v18 }
 0x3d8   : > { %v4385_v58 = vmul.f32 0.2, %v23521_v33  ;;  %vm4353_vm11 = vcmp.ge.f32.partialorder %v23521_v33, 0.0  ;;  %v23546_v4 = vadd.f32 %v25869_v18, %v25858_v13 }
 0x3d9   : > { %v21496_v54 = vpop.f32.mrb[4].mxu1  ;;  %v4384_v35 = vmul.f32 0.2, %v23523_v47  ;;  %vm4352_vm12 = vcmp.ge.f32.partialorder %v23523_v47, 0.0 }
 0x3da   : > { %v23525_v46 = vadd.f32 %v23524_v27, %v21496_v54  ;;  %v4179_v28 = vpop.f32.mrb[5].mxu1  ;;  %v4417_v36 = vsel %vm4353_vm11, %v23521_v33, %v4385_v58 }
 0x3db   : > { %v23527_v56 = vadd.f32 %v23526_v45, %v4179_v28  ;;  %4478 = vrot.lane.b32.xlu1 %v4414_v62, %s24804_s30  ;;  %v4416_v44 = vsel %vm4352_vm12, %v23523_v47, %v4384_v35 }
 0x3dc   : > { %v4387_v43 = vmul.f32 0.2, %v23525_v46  ;;  %vm4355_vm13 = vcmp.ge.f32.partialorder %v23525_v46, 0.0 }
 0x3dd   : > { %v21499_v10 = vpop.f32.mrb[6].mxu1  ;;  %v4386_v52 = vmul.f32 0.2, %v23527_v56  ;;  %vm4354_vm14 = vcmp.ge.f32.partialorder %v23527_v56, 0.0 }
 0x3de   : > { %v23529_v15 = vadd.f32 %v23528_v3, %v21499_v10  ;;  %v4189_v20 = vpop.f32.mrb[7].mxu1  ;;  %v4419_v53 = vsel %vm4355_vm13, %v23525_v46, %v4387_v43  ;;  %v23548_v46 = vadd.f32 %v25864_v17, %v25869_v18 }
 0x3df   : > { %v23531_v31 = vadd.f32 %v23530_v41, %v4189_v20  ;;  %4484 = vrot.lane.b32.xlu1 %v4417_v36, %s24804_s30  ;;  %v4418_v33 = vsel %vm4354_vm14, %v23527_v56, %v4386_v52 }
 0x3e0   : > { %v4389_v23 = vmul.f32 0.2, %v23529_v15  ;;  %vm4357_vm15 = vcmp.ge.f32.partialorder %v23529_v15, 0.0 }
 0x3e1   : > { %v21502_v48 = vpop.f32.mrb[8].mxu1  ;;  %v4388_v27 = vmul.f32 0.2, %v23531_v31  ;;  %vm4356_vm0 = vcmp.ge.f32.partialorder %v23531_v31, 0.0 }
 0x3e2   : > { %v23533_v57 = vadd.f32 %v23532_v39, %v21502_v48  ;;  %v4199_v60 = vpop.f32.mrb[9].mxu1  ;;  %v4421_v54 = vsel %vm4357_vm15, %v23529_v15, %v4389_v23 }
 0x3e3   : > { %v23535_v0 = vadd.f32 %v23534_v40, %v4199_v60  ;;  %4482 = vrot.lane.b32.xlu1 %v4416_v44, %s24804_s30  ;;  %v4420_v3 = vsel %vm4356_vm0, %v23531_v31, %v4388_v27 }
 0x3e4   : > { %v4391_v62 = vmul.f32 0.2, %v23533_v57  ;;  %vm4359_vm1 = vcmp.ge.f32.partialorder %v23533_v57, 0.0 }
 0x3e5   : > { %v21505_v9 = vpop.f32.mrb[10].mxu1  ;;  %v4390_v35 = vmul.f32 0.2, %v23535_v0  ;;  %vm4358_vm4 = vcmp.ge.f32.partialorder %v23535_v0, 0.0 }
 0x3e6   : > { %v23537_v14 = vadd.f32 %v23536_v1, %v21505_v9  ;;  %v4209_v21 = vpop.f32.mrb[11].mxu1  ;;  %v4423_v17 = vsel %vm4359_vm1, %v23533_v57, %v4391_v62 }
 0x3e7   : > { %v25977_v22 = vadd.f32 %v23538_v8, %v4209_v21  ;;  %4488 = vrot.lane.b32.xlu1 %v4419_v53, %s24804_s30  ;;  %v4422_v48 = vsel %vm4358_vm4, %v23535_v0, %v4390_v35 }
 0x3e8   : > { %v4393_v31 = vmul.f32 0.2, %v23537_v14  ;;  %vm4361_vm6 = vcmp.ge.f32.partialorder %v23537_v14, 0.0 }
 0x3e9   : > { %v21508_v61 = vpop.f32.mrb[12].mxu1  ;;  %v4392_v43 = vmul.f32 0.2, %v25977_v22  ;;  %vm4360_vm9 = vcmp.ge.f32.partialorder %v25977_v22, 0.0 }
 0x3ea   : > { %v25984_v29 = vadd.f32 %v23540_v26, %v21508_v61  ;;  %v4219_v51 = vpop.f32.mrb[13].mxu1  ;;  %v4425_v44 = vsel %vm4361_vm6, %v23537_v14, %v4393_v31 }
 0x3eb   : > { %v25986_v37 = vadd.f32 %v23542_v19, %v4219_v51  ;;  %4486 = vrot.lane.b32.xlu1 %v4418_v33, %s24804_s30  ;;  %v4424_v9 = vsel %vm4360_vm9, %v25977_v22, %v4392_v43 }
 0x3ec   : > { %vm4363_vm10 = vcmp.ge.f32.partialorder %v25984_v29, 0.0 }
 0x3ed   : > { %v21511_v47 = vpop.f32.mrb[14].mxu1  ;;  %v4394_v21 = vmul.f32 0.2, %v25986_v37  ;;  %vm4362_vm11 = vcmp.ge.f32.partialorder %v25986_v37, 0.0 }
 0x3ee   : > { %v25993_v5 = vadd.f32 %v23544_v38, %v21511_v47  ;;  %v4229_v45 = vpop.f32.mrb[15].mxu1 }
 0x3ef   : > { %v25995_v58 = vadd.f32 %v23546_v4, %v4229_v45  ;;  %4492 = vrot.lane.b32.xlu1 %v4421_v54, %s24804_s30  ;;  %v4426_v51 = vsel %vm4362_vm11, %v25986_v37, %v4394_v21 }
 0x3f0   : > { %v4397_v61 = vmul.f32 0.2, %v25993_v5  ;;  %vm4365_vm12 = vcmp.ge.f32.partialorder %v25993_v5, 0.0 }
 0x3f1   : > { %v21514_v28 = vpop.f32.mrb[16].mxu1  ;;  %v4396_v33 = vmul.f32 0.2, %v25995_v58  ;;  %vm4364_vm13 = vcmp.ge.f32.partialorder %v25995_v58, 0.0 }
 0x3f2   : > { %v23549_v12 = vadd.f32 %v23548_v46, %v21514_v28  ;;  %v4239_v56 = vpop.f32.mrb[17].mxu1  ;;  %v4429_v47 = vsel %vm4365_vm12, %v25993_v5, %v4397_v61 }
 0x3f3   : > { %v26001_v13 = vadd.f32 %v25874_v25, %v4239_v56  ;;  %4490 = vrot.lane.b32.xlu1 %v4420_v3, %s24804_s30  ;;  %v4428_v37 = vsel %vm4364_vm13, %v25995_v58, %v4396_v33 }
 0x3f4   : > { %v4399_v41 = vmul.f32 0.2, %v23549_v12  ;;  %vm4367_vm3 = vcmp.ge.f32.partialorder %v23549_v12, 0.0 }
 0x3f5   : > { %v21517_v10 = vpop.f32.mrb[18].mxu1  ;;  %vm4366_vm14 = vcmp.ge.f32.partialorder %v26001_v13, 0.0 }
 0x3f6   : > { %v26005_v15 = vadd.f32 %v25879_v30, %v21517_v10  ;;  %v4249_v20 = vpop.f32.mrb[19].mxu1  ;;  %v4431_v18 = vsel %vm4367_vm3, %v23549_v12, %v4399_v41 }
 0x3f7   : > { %v26008_v36 = vadd.f32 %v25884_v34, %v4249_v20  ;;  %4496 = vrot.lane.b32.xlu1 %v4423_v17, %s24804_s30  ;;  %4512 = vrot.lane.b32.xlu0 %v4431_v18, %s24804_s30 }
 0x3f8   : > { %vm4369_vm15 = vcmp.ge.f32.partialorder %v26005_v15, 0.0 }
 0x3f9   : > { %v21520_v25 = vpop.f32.mrb[20].mxu1  ;;  %vm4368_vm0 = vcmp.ge.f32.partialorder %v26008_v36, 0.0 }
 0x3fa   : > { %v26013_v39 = vadd.f32 %v25889_v42, %v21520_v25  ;;  %v4259_v40 = vpop.f32.mrb[21].mxu1 }
 0x3fb   : > { %v26016_v30 = vadd.f32 %v25894_v50, %v4259_v40  ;;  %4494 = vrot.lane.b32.xlu1 %v4422_v48, %s24804_s30  ;;  %v4395_v50 = vmul.f32 0.2, %v25984_v29  ;;  %v18290_v40 = vld [vmem:[%s29665_s2 + $0x28] sm:$0xf] }
 0x3fc   : > { %v4403_v45 = vmul.f32 0.2, %v26013_v39  ;;  %vm4371_vm1 = vcmp.ge.f32.partialorder %v26013_v39, 0.0 }
 0x3fd   : > { %v21523_v34 = vpop.f32.mrb[22].mxu1  ;;  %v4427_v26 = vsel %vm4363_vm10, %v25984_v29, %v4395_v50  ;;  %v4402_v58 = vmul.f32 0.2, %v26016_v30  ;;  %vm4370_vm3 = vcmp.ge.f32.partialorder %v26016_v30, 0.0 }
 0x3fe   : > { %v26021_v57 = vadd.f32 %v25899_v55, %v21523_v34  ;;  %v4269_v60 = vpop.f32.mrb[23].mxu1  ;;  %v18254_v55 = vld [vmem:[%s29665_s2 + $0x10] sm:$0xff]  ;;  %v4435_v46 = vsel %vm4371_vm1, %v26013_v39, %v4403_v45  ;;  %v18289_v39 = vld [vmem:[%s29665_s2 + $0x20] sm:$0xff] }
 0x3ff   : > { %v26024_v1 = vadd.f32 %v25904_v59, %v4269_v60  ;;  %4500 = vrot.lane.b32.xlu1 %v4425_v44, %s24804_s30  ;;  %v18255_v59 = vld [vmem:[%s29665_s2 + $0x18] sm:$0xf]  ;;  %v4434_v62 = vsel %vm4370_vm3, %v26016_v30, %v4402_v58  ;;  %v26131_v48 = vpack.c.bf16 %v18290_v40, %v18289_v39 }
 0x400   : > { %v4405_v28 = vmul.f32 0.2, %v26021_v57  ;;  %vm4373_vm4 = vcmp.ge.f32.partialorder %v26021_v57, 0.0 }
 0x401   : > { %v21526_v42 = vpop.f32.mrb[24].mxu1  ;;  %v4404_v12 = vmul.f32 0.2, %v26024_v1  ;;  %vm4372_vm6 = vcmp.ge.f32.partialorder %v26024_v1, 0.0 }
 0x402   : > { %v26030_v0 = vadd.f32 %v25908_v63, %v21526_v42  ;;  %v4279_v8 = vpop.f32.mrb[25].mxu1  ;;  %v22964_v63 = vpack.c.bf16 %v18255_v59, %v18254_v55  ;;  %v4437_v56 = vsel %vm4373_vm4, %v26021_v57, %v4405_v28 }
 0x403   : > { %v26040_v52 = vadd.f32 %v25912_v2, %v4279_v8  ;;  %4498 = vrot.lane.b32.xlu1 %v4424_v9, %s24804_s30 }
 0x404   : > { %22966 = vmatprep.subr.msk.bf16.mxu0 %vm25939_vm7, %v22964_v63  ;;  %v4407_v3 = vmul.f32 0.2, %v26030_v0  ;;  %vm4375_vm9 = vcmp.ge.f32.partialorder %v26030_v0, 0.0 }
 0x405   : > { %v21529_v14 = vpop.f32.mrb[26].mxu1  ;;  %22969 = vmatpush3.bf16.msk.msra.mxu0 %vm25939_vm7, %v22964_v63  ;;  %v4406_v41 = vmul.f32 0.2, %v26040_v52  ;;  %vm4374_vm10 = vcmp.ge.f32.partialorder %v26040_v52, 0.0 }
 0x406   : > { %v26048_v53 = vadd.f32 %v25915_v6, %v21529_v14  ;;  %v4289_v22 = vpop.f32.mrb[27].mxu1  ;;  %v4439_v10 = vsel %vm4375_vm9, %v26030_v0, %v4407_v3  ;;  %22972 = vmatprep.subr.msk.bf16.mxu0 %vm25939_vm7, %v26131_v48 }
 0x407   : > { %v26054_v2 = vadd.f32 %v25918_v7, %v4289_v22  ;;  %4504 = vrot.lane.b32.xlu1 %v4427_v26, %s24804_s30 }
 0x408   : > { %v4409_v35 = vmul.f32 0.2, %v26048_v53  ;;  %vm4377_vm11 = vcmp.ge.f32.partialorder %v26048_v53, 0.0 }
 0x409   : > { %v21532_v19 = vpop.f32.mrb[28].mxu1  ;;  %v4408_v20 = vmul.f32 0.2, %v26054_v2  ;;  %vm4376_vm12 = vcmp.ge.f32.partialorder %v26054_v2, 0.0 }
 0x40a   : > { %v26060_v23 = vadd.f32 %v25921_v11, %v21532_v19  ;;  %v4299_v6 = vpop.f32.mrb[29].mxu1  ;;  %v4441_v17 = vsel %vm4377_vm11, %v26048_v53, %v4409_v35 }
 0x40b   : > { %v23575_v29 = vadd.f32 %v25924_v16, %v4299_v6  ;;  %4502 = vrot.lane.b32.xlu1 %v4426_v51, %s24804_s30  ;;  %v4398_v16 = vmul.f32 0.2, %v26001_v13 }
 0x40c   : > { %v4411_v25 = vmul.f32 0.2, %v26060_v23 }
 0x40d   : > { %v21535_v7 = vpop.f32.mrb[30].mxu1  ;;  %v4430_v27 = vsel %vm4366_vm14, %v26001_v13, %v4398_v16  ;;  %v4436_v13 = vsel %vm4372_vm6, %v26024_v1, %v4404_v12  ;;  %v4410_v18 = vmul.f32 0.2, %v23575_v29  ;;  %vm4378_vm13 = vcmp.ge.f32.partialorder %v23575_v29, 0.0 }
 0x40e   : > { %v26068_v38 = vadd.f32 %v25927_v24, %v21535_v7  ;;  %v4309_v4 = vpop.f32.mrb[31].mxu1  ;;  %v4401_v24 = vmul.f32 0.2, %v26005_v15  ;;  %vm4379_vm14 = vcmp.ge.f32.partialorder %v26060_v23, 0.0 }
 0x40f   : > { %v26072_v11 = vadd.f32 %v25930_v32, %v4309_v4  ;;  %4508 = vrot.lane.b32.xlu1 %v4429_v47, %s24804_s30  ;;  %v4400_v32 = vmul.f32 0.2, %v26008_v36  ;;  %v4442_v31 = vsel %vm4378_vm13, %v23575_v29, %v4410_v18  ;;  %v4443_v34 = vsel %vm4379_vm14, %v26060_v23, %v4411_v25 }
 0x410   : > { %v4433_v5 = vsel %vm4369_vm15, %v26005_v15, %v4401_v24  ;;  %v4438_v15 = vsel %vm4374_vm10, %v26040_v52, %v4406_v41  ;;  %vm4574_vm15 = vcmask 97344   ;;  %v4413_v57 = vmul.f32 0.2, %v26068_v38 }
 0x411   : > { %v4432_v54 = vsel %vm4368_vm0, %v26008_v36, %v4400_v32  ;;  %v4440_v36 = vsel %vm4376_vm12, %v26054_v2, %v4408_v20  ;;  %v4412_v30 = vmul.f32 0.2, %v26072_v11  ;;  %vm4380_vm0 = vcmp.ge.f32.partialorder %v26072_v11, 0.0 }
 0x412   : > { %vm4381_vm1 = vcmp.ge.f32.partialorder %v26068_v38, 0.0 }
 0x413   : > { %4506 = vrot.lane.b32.xlu1 %v4428_v37, %s24804_s30  ;;  %v4444_v60 = vsel %vm4380_vm0, %v26072_v11, %v4412_v30  ;;  %v4445_v1 = vsel %vm4381_vm1, %v26068_v38, %v4413_v57  ;;  %v5007_v57 = vld [vmem:[#allocation2 + $0x1] sm:$0xff] }
 0x417   : > { %4510 = vrot.lane.b32.xlu1 %v4430_v27, %s24804_s30 }
 0x41b   : > { %4516 = vrot.lane.b32.xlu1 %v4433_v5, %s24804_s30 }
 0x41f   : > { %4514 = vrot.lane.b32.xlu1 %v4432_v54, %s24804_s30 }
 0x423   : > { %4520 = vrot.lane.b32.xlu1 %v4435_v46, %s24804_s30 }
 0x427   : > { %4518 = vrot.lane.b32.xlu1 %v4434_v62, %s24804_s30 }
 0x42b   : > { %4524 = vrot.lane.b32.xlu1 %v4437_v56, %s24804_s30 }
 0x42f   : > { %4522 = vrot.lane.b32.xlu1 %v4436_v13, %s24804_s30 }
 0x433   : > { %4528 = vrot.lane.b32.xlu1 %v4439_v10, %s24804_s30 }
 0x437   : > { %4526 = vrot.lane.b32.xlu1 %v4438_v15, %s24804_s30 }
 0x43b   : > { %4532 = vrot.lane.b32.xlu1 %v4441_v17, %s24804_s30 }
 0x43f   : > { %4530 = vrot.lane.b32.xlu1 %v4440_v36, %s24804_s30 }
 0x443   : > { %4534 = vrot.lane.b32.xlu1 %v4442_v31, %s24804_s30 }
 0x447   : > { %4536 = vrot.lane.b32.xlu1 %v4443_v34, %s24804_s30 }
 0x449   : > { %v4481_v43 = vpop.permute.xlu1 %4480 }
 0x44a   : > { %4576 = vst.msk [vmem:[#allocation2 + $0x21] sm:$0xff] %vm4574_vm15, %v4481_v43 }
 0x44b   : > { %4538 = vrot.lane.b32.xlu1 %v4444_v60, %s24804_s30 }
 0x44d   : > { %v4479_v44 = vpop.permute.xlu1 %4478 }
 0x44e   : > { %4575 = vst.msk [vmem:[#allocation2 + $0x19] sm:$0xff] %vm4574_vm15, %v4479_v44 }
 0x44f   : > { %4540 = vrot.lane.b32.xlu1 %v4445_v1, %s24804_s30  ;;  %v18324_v1 = vld [vmem:[%s29665_s2 + $0x30] sm:$0xff]  ;;  %s17886_s30 = sshll.u32 %s377_s29, 4 }
 0x450   : > { %s379_s13 = scalar_lea.vmem [#allocation3], %s17886_s30 }
 0x451   : > { %v4485_v42 = vpop.permute.xlu1 %4484 }
 0x452   : > { %4578 = vst.msk [vmem:[#allocation2 + $0x39] sm:$0xff] %vm4574_vm15, %v4485_v42  ;;  %v18325_v42 = vld [vmem:[%s29665_s2 + $0x38] sm:$0xf] }
 0x455   : > { %v4483_v50 = vpop.permute.xlu1 %4482  ;;  %v26149_v0 = vld [vmem:[#allocation2 + $0x18] sm:$0xff]  ;;  %v26151_v8 = vld [vmem:[#allocation2 + $0x20] sm:$0xff] }
 0x456   : > { %4577 = vst.msk [vmem:[#allocation2 + $0x31] sm:$0xff] %vm4574_vm15, %v4483_v50  ;;  %21543 = vmatprep.mubr.msk.f32.mxu0 %vm4649_vm8, %v26149_v0  ;;  %v5008_v50 = vld [vmem:[#allocation2 + $0x9] sm:$0xff] }
 0x457   : > { %21544 = vmatmul.mubr.msk.f32.gmra.mrb[66].mxu0 %vm4649_vm8, %v26151_v8 }
 0x459   : > { %v4489_v9 = vpop.permute.xlu1 %4488 }
 0x45a   : > { %4580 = vst.msk [vmem:[#allocation2 + $0x51] sm:$0xff] %vm4574_vm15, %v4489_v9  ;;  %v26305_v9 = vpack.c.bf16 %v18325_v42, %v18324_v1  ;;  %v5398_v1 = vld [vmem:[#allocation2 + $0x2] sm:$0xff] }
 0x45d   : > { %v4487_v55 = vpop.permute.xlu1 %4486  ;;  %v26159_v59 = vld [vmem:[#allocation2 + $0x30] sm:$0xff]  ;;  %v26161_v52 = vld [vmem:[#allocation2 + $0x38] sm:$0xff] }
 0x45e   : > { %4579 = vst.msk [vmem:[#allocation2 + $0x49] sm:$0xff] %vm4574_vm15, %v4487_v55  ;;  %21546 = vmatprep.mubr.msk.f32.mxu0 %vm4649_vm8, %v26159_v59  ;;  %v26308_v55 = vld [vmem:[#allocation2 + $0x19] sm:$0xff] }
 0x45f   : > { %21547 = vmatmul.mubr.msk.f32.gmra.mrb[68].mxu0 %vm4649_vm8, %v26161_v52 }
 0x461   : > { %v4493_v63 = vpop.permute.xlu1 %4492 }
 0x462   : > { %4582 = vst.msk [vmem:[#allocation2 + $0x69] sm:$0xff] %vm4574_vm15, %v4493_v63  ;;  %v26318_v63 = vld [vmem:[#allocation2 + $0x21] sm:$0xff] }
 0x465   : > { %v4491_v14 = vpop.permute.xlu1 %4490  ;;  %v26169_v21 = vld [vmem:[#allocation2 + $0x48] sm:$0xff]  ;;  %v26171_v53 = vld [vmem:[#allocation2 + $0x50] sm:$0xff] }
 0x466   : > { %4581 = vst.msk [vmem:[#allocation2 + $0x61] sm:$0xff] %vm4574_vm15, %v4491_v14  ;;  %21549 = vmatprep.mubr.msk.f32.mxu0 %vm4649_vm8, %v26169_v21  ;;  %v26322_v14 = vld [vmem:[#allocation2 + $0x31] sm:$0xff] }
 0x467   : > { %21550 = vmatmul.mubr.msk.f32.gmra.mrb[70].mxu0 %vm4649_vm8, %v26171_v53 }
 0x469   : > { %v4497_v22 = vpop.permute.xlu1 %4496  ;;  %v4513_v26 = vpop.permute.xlu0 %4512 }
 0x46a   : > { %4584 = vst.msk [vmem:[#allocation2 + $0x81] sm:$0xff] %vm4574_vm15, %v4497_v22  ;;  %4592 = vst.msk [vmem:[#allocation2 + $0xe1] sm:$0xff] %vm4574_vm15, %v4513_v26  ;;  %v26326_v22 = vld [vmem:[#allocation2 + $0x39] sm:$0xff]  ;;  %v26334_v26 = vld [vmem:[#allocation2 + $0x51] sm:$0xff] }
 0x46d   : > { %v4495_v2 = vpop.permute.xlu1 %4494  ;;  %v26180_v19 = vld [vmem:[#allocation2 + $0x60] sm:$0xff]  ;;  %v26182_v61 = vld [vmem:[#allocation2 + $0x68] sm:$0xff] }
 0x46e   : > { %4583 = vst.msk [vmem:[#allocation2 + $0x79] sm:$0xff] %vm4574_vm15, %v4495_v2  ;;  %21552 = vmatprep.mubr.msk.f32.mxu0 %vm4649_vm8, %v26180_v19  ;;  %v26338_v2 = vld [vmem:[#allocation2 + $0x61] sm:$0xff] }
 0x46f   : > { %21553 = vmatmul.mubr.msk.f32.gmra.mrb[72].mxu0 %vm4649_vm8, %v26182_v61 }
 0x471   : > { %v4501_v23 = vpop.permute.xlu1 %4500 }
 0x472   : > { %4586 = vst.msk [vmem:[#allocation2 + $0x99] sm:$0xff] %vm4574_vm15, %v4501_v23  ;;  %v26342_v23 = vld [vmem:[#allocation2 + $0x69] sm:$0xff] }
 0x475   : > { %v4499_v6 = vpop.permute.xlu1 %4498  ;;  %v26190_v51 = vld [vmem:[#allocation2 + $0x78] sm:$0xff]  ;;  %v26192_v29 = vld [vmem:[#allocation2 + $0x80] sm:$0xff] }
 0x476   : > { %4585 = vst.msk [vmem:[#allocation2 + $0x91] sm:$0xff] %vm4574_vm15, %v4499_v6  ;;  %21555 = vmatprep.mubr.msk.f32.mxu0 %vm4649_vm8, %v26190_v51  ;;  %v26346_v6 = vld [vmem:[#allocation2 + $0x79] sm:$0xff] }
 0x477   : > { %21556 = vmatmul.mubr.msk.f32.gmra.mrb[74].mxu0 %vm4649_vm8, %v26192_v29 }
 0x479   : > { %v4505_v7 = vpop.permute.xlu1 %4504 }
 0x47a   : > { %4588 = vst.msk [vmem:[#allocation2 + $0xb1] sm:$0xff] %vm4574_vm15, %v4505_v7  ;;  %v26350_v7 = vld [vmem:[#allocation2 + $0x81] sm:$0xff] }
 0x47d   : > { %v4503_v33 = vpop.permute.xlu1 %4502  ;;  %v26200_v38 = vld [vmem:[#allocation2 + $0x90] sm:$0xff]  ;;  %v26202_v4 = vld [vmem:[#allocation2 + $0x98] sm:$0xff] }
 0x47e   : > { %4587 = vst.msk [vmem:[#allocation2 + $0xa9] sm:$0xff] %vm4574_vm15, %v4503_v33  ;;  %21558 = vmatprep.mubr.msk.f32.mxu0 %vm4649_vm8, %v26200_v38  ;;  %v26354_v33 = vld [vmem:[#allocation2 + $0x91] sm:$0xff] }
 0x47f   : > { %21559 = vmatmul.mubr.msk.f32.gmra.mrb[76].mxu0 %vm4649_vm8, %v26202_v4 }
 0x481   : > { %v4509_v47 = vpop.permute.xlu1 %4508 }
 0x482   : > { %4590 = vst.msk [vmem:[#allocation2 + $0xc9] sm:$0xff] %vm4574_vm15, %v4509_v47  ;;  %v26358_v47 = vld [vmem:[#allocation2 + $0x99] sm:$0xff] }
 0x485   : > { %v4507_v11 = vpop.permute.xlu1 %4506  ;;  %v26210_v16 = vld [vmem:[#allocation2 + $0xa8] sm:$0xff]  ;;  %v26212_v37 = vld [vmem:[#allocation2 + $0xb0] sm:$0xff] }
 0x486   : > { %4589 = vst.msk [vmem:[#allocation2 + $0xc1] sm:$0xff] %vm4574_vm15, %v4507_v11  ;;  %21561 = vmatprep.mubr.msk.f32.mxu0 %vm4649_vm8, %v26210_v16  ;;  %v26362_v11 = vld [vmem:[#allocation2 + $0xa9] sm:$0xff] }
 0x487   : > { %21562 = vmatmul.mubr.msk.f32.gmra.mrb[78].mxu0 %vm4649_vm8, %v26212_v37 }
 0x489   : > { %v4511_v24 = vpop.permute.xlu1 %4510 }
 0x48a   : > { %4591 = vst.msk [vmem:[#allocation2 + $0xd9] sm:$0xff] %vm4574_vm15, %v4511_v24  ;;  %v26366_v24 = vld [vmem:[#allocation2 + $0xb1] sm:$0xff] }
 0x48d   : > { %v4517_v27 = vpop.permute.xlu1 %4516  ;;  %v26220_v32 = vld [vmem:[#allocation2 + $0xc0] sm:$0xff]  ;;  %v26222_v5 = vld [vmem:[#allocation2 + $0xc8] sm:$0xff] }
 0x48e   : > { %4594 = vst.msk [vmem:[#allocation2 + $0xf9] sm:$0xff] %vm4574_vm15, %v4517_v27  ;;  %21564 = vmatprep.mubr.msk.f32.mxu0 %vm4649_vm8, %v26220_v32  ;;  %v26370_v27 = vld [vmem:[#allocation2 + $0xc1] sm:$0xff] }
 0x48f   : > { %21565 = vmatmul.mubr.msk.f32.gmra.mrb[80].mxu0 %vm4649_vm8, %v26222_v5 }
 0x491   : > { %v4515_v45 = vpop.permute.xlu1 %4514  ;;  %v26229_v54 = vld [vmem:[#allocation2 + $0xd8] sm:$0xff]  ;;  %v26231_v58 = vld [vmem:[#allocation2 + $0xe0] sm:$0xff] }
 0x492   : > { %4593 = vst.msk [vmem:[#allocation2 + $0xf1] sm:$0xff] %vm4574_vm15, %v4515_v45  ;;  %21567 = vmatprep.mubr.msk.f32.mxu0 %vm4649_vm8, %v26229_v54  ;;  %v26374_v45 = vld [vmem:[#allocation2 + $0xc9] sm:$0xff] }
 0x493   : > { %21568 = vmatmul.mubr.msk.f32.gmra.mrb[82].mxu0 %vm4649_vm8, %v26231_v58 }
 0x495   : > { %v4521_v46 = vpop.permute.xlu1 %4520 }
 0x496   : > { %4596 = vst.msk [vmem:[#allocation2 + $0x111] sm:$0xff] %vm4574_vm15, %v4521_v46  ;;  %v26378_v46 = vld [vmem:[#allocation2 + $0xd9] sm:$0xff] }
 0x499   : > { %v4519_v28 = vpop.permute.xlu1 %4518  ;;  %v26239_v62 = vld [vmem:[#allocation2 + $0xf0] sm:$0xff]  ;;  %v26241_v12 = vld [vmem:[#allocation2 + $0xf8] sm:$0xff] }
 0x49a   : > { %4595 = vst.msk [vmem:[#allocation2 + $0x109] sm:$0xff] %vm4574_vm15, %v4519_v28  ;;  %21570 = vmatprep.mubr.msk.f32.mxu0 %vm4649_vm8, %v26239_v62  ;;  %v26382_v28 = vld [vmem:[#allocation2 + $0xe1] sm:$0xff] }
 0x49b   : > { %21571 = vmatmul.mubr.msk.f32.gmra.mrb[84].mxu0 %vm4649_vm8, %v26241_v12 }
 0x49d   : > { %v4525_v56 = vpop.permute.xlu1 %4524 }
 0x49e   : > { %4598 = vst.msk [vmem:[#allocation2 + $0x129] sm:$0xff] %vm4574_vm15, %v4525_v56  ;;  %v26386_v56 = vld [vmem:[#allocation2 + $0xf1] sm:$0xff] }
 0x4a1   : > { %v4523_v3 = vpop.permute.xlu1 %4522  ;;  %v26249_v13 = vld [vmem:[#allocation2 + $0x108] sm:$0xff]  ;;  %v26251_v41 = vld [vmem:[#allocation2 + $0x110] sm:$0xff] }
 0x4a2   : > { %4597 = vst.msk [vmem:[#allocation2 + $0x121] sm:$0xff] %vm4574_vm15, %v4523_v3  ;;  %21573 = vmatprep.mubr.msk.f32.mxu0 %vm4649_vm8, %v26249_v13  ;;  %v26390_v3 = vld [vmem:[#allocation2 + $0xf9] sm:$0xff] }
 0x4a3   : > { %21574 = vmatmul.mubr.msk.f32.gmra.mrb[86].mxu0 %vm4649_vm8, %v26251_v41 }
 0x4a5   : > { %v4529_v10 = vpop.permute.xlu1 %4528 }
 0x4a6   : > { %4600 = vst.msk [vmem:[#allocation2 + $0x141] sm:$0xff] %vm4574_vm15, %v4529_v10  ;;  %v26394_v10 = vld [vmem:[#allocation2 + $0x109] sm:$0xff] }
 0x4a9   : > { %v4527_v35 = vpop.permute.xlu1 %4526  ;;  %v26259_v15 = vld [vmem:[#allocation2 + $0x120] sm:$0xff]  ;;  %v26261_v20 = vld [vmem:[#allocation2 + $0x128] sm:$0xff] }
 0x4aa   : > { %4599 = vst.msk [vmem:[#allocation2 + $0x139] sm:$0xff] %vm4574_vm15, %v4527_v35  ;;  %21576 = vmatprep.mubr.msk.f32.mxu0 %vm4649_vm8, %v26259_v15  ;;  %v26398_v35 = vld [vmem:[#allocation2 + $0x111] sm:$0xff] }
 0x4ab   : > { %21577 = vmatmul.mubr.msk.f32.gmra.mrb[88].mxu0 %vm4649_vm8, %v26261_v20 }
 0x4ad   : > { %v4533_v17 = vpop.permute.xlu1 %4532 }
 0x4ae   : > { %4602 = vst.msk [vmem:[#allocation2 + $0x159] sm:$0xff] %vm4574_vm15, %v4533_v17  ;;  %v26402_v17 = vld [vmem:[#allocation2 + $0x121] sm:$0xff] }
 0x4af   : > { %29965 = vst [vmem:[#allocation6_spill] sm:$0xff] %v26402_v17 }
 0x4b1   : > { %v4531_v18 = vpop.permute.xlu1 %4530  ;;  %v26269_v36 = vld [vmem:[#allocation2 + $0x138] sm:$0xff]  ;;  %v26271_v25 = vld [vmem:[#allocation2 + $0x140] sm:$0xff] }
 0x4b2   : > { %4601 = vst.msk [vmem:[#allocation2 + $0x151] sm:$0xff] %vm4574_vm15, %v4531_v18  ;;  %21579 = vmatprep.mubr.msk.f32.mxu0 %vm4649_vm8, %v26269_v36  ;;  %v26406_v18 = vld [vmem:[#allocation2 + $0x129] sm:$0xff] }
 0x4b3   : > { %21580 = vmatmul.mubr.msk.f32.gmra.mrb[90].mxu0 %vm4649_vm8, %v26271_v25 }
 0x4b5   : > { %v4535_v31 = vpop.permute.xlu1 %4534 }
 0x4b6   : > { %4603 = vst.msk [vmem:[#allocation2 + $0x169] sm:$0xff] %vm4574_vm15, %v4535_v31  ;;  %v26410_v31 = vld [vmem:[#allocation2 + $0x139] sm:$0xff]  ;;  %v30032_v49 = vld [vmem:[#allocation6_spill] sm:$0xff] }
 0x4b7   : > { %29966 = vst [vmem:[#allocation7_spill] sm:$0xff] %v26410_v31 }
 0x4b9   : > { %v4537_v39 = vpop.permute.xlu1 %4536  ;;  %v26279_v40 = vld [vmem:[#allocation2 + $0x150] sm:$0xff]  ;;  %v26281_v30 = vld [vmem:[#allocation2 + $0x158] sm:$0xff] }
 0x4ba   : > { %4604 = vst.msk [vmem:[#allocation2 + $0x171] sm:$0xff] %vm4574_vm15, %v4537_v39  ;;  %21582 = vmatprep.mubr.msk.f32.mxu0 %vm4649_vm8, %v26279_v40  ;;  %v26414_v39 = vld [vmem:[#allocation2 + $0x141] sm:$0xff] }
 0x4bb   : > { %21583 = vmatmul.mubr.msk.f32.gmra.mrb[92].mxu0 %vm4649_vm8, %v26281_v30  ;;  %29967 = vst [vmem:[#allocation8_spill] sm:$0xff] %v26414_v39 }
 0x4bd   : > { %v4539_v34 = vpop.permute.xlu1 %4538  ;;  %v26288_v43 = vld [vmem:[#allocation2 + $0x168] sm:$0xff] }
 0x4be   : > { %4605 = vst.msk [vmem:[#allocation2 + $0x181] sm:$0xff] %vm4574_vm15, %v4539_v34  ;;  %21585 = vmatprep.mubr.msk.f32.mxu0 %vm4649_vm8, %v26288_v43  ;;  %v26418_v34 = vld [vmem:[#allocation2 + $0x151] sm:$0xff] }
 0x4bf   : > { %29968 = vst [vmem:[#allocation9_spill] sm:$0xff] %v26418_v34 }
 0x4c1   : > { %v4541_v60 = vpop.permute.xlu1 %4540  ;;  %v26293_v44 = vld [vmem:[#allocation2 + $0x170] sm:$0xff] }
 0x4c2   : > { %4606 = vst.msk [vmem:[#allocation2 + $0x189] sm:$0xff] %vm4574_vm15, %v4541_v60  ;;  %21586 = vmatmul.mubr.msk.f32.gmra.mrb[94].mxu0 %vm4649_vm8, %v26293_v44  ;;  %v26426_v60 = vld [vmem:[#allocation2 + $0x169] sm:$0xff]  ;;  %v26430_v42 = vld [vmem:[#allocation2 + $0x171] sm:$0xff] }
 0x4c3   : > { %21592 = vmatprep.mubr.msk.f32.mxu0 %vm4649_vm8, %v5007_v57  ;;  %v26422_v57 = vld [vmem:[#allocation2 + $0x159] sm:$0xff]  ;;  %29970 = vst [vmem:[#allocation11_spill] sm:$0xff] %v26426_v60  ;;  %29971 = vst [vmem:[#allocation12_spill] sm:$0xff] %v26430_v42 }
 0x4c4   : > { %29969 = vst [vmem:[#allocation10_spill] sm:$0xff] %v26422_v57 }
 0x4c6   : > { %21593 = vmatmul.mubr.msk.f32.vlgmr.msra.gmra.mrb[64].mxu0 %vm4649_vm8, %v5008_v50  ;;  %v18359_v50 = vld [vmem:[%s29665_s2 + $0x40] sm:$0xff] }
 0x4c7   : > { %22975 = vmatpush3.bf16.msk.msra.mxu0 %vm25939_vm7, %v26131_v48  ;;  %21595 = vmatprep.mubr.msk.f32.mxu0 %vm4649_vm8, %v26308_v55  ;;  %v26330_v48 = vld [vmem:[#allocation2 + $0x49] sm:$0xff] }
 0x4c8   : > { %22978 = vmatprep.subr.msk.bf16.mxu0 %vm25939_vm7, %v26305_v9 }
 0x4ca   : > { %21596 = vmatmul.mubr.msk.f32.gmra.mrb[66].mxu0 %vm4649_vm8, %v26318_v63 }
 0x4cb   : > { %21598 = vmatprep.mubr.msk.f32.mxu0 %vm4649_vm8, %v26322_v14 }
 0x4ce   : > { %21599 = vmatmul.mubr.msk.f32.gmra.mrb[68].mxu0 %vm4649_vm8, %v26326_v22 }
 0x4cf   : > { %21601 = vmatprep.mubr.msk.f32.mxu0 %vm4649_vm8, %v26330_v48 }
 0x4d2   : > { %21602 = vmatmul.mubr.msk.f32.gmra.mrb[70].mxu0 %vm4649_vm8, %v26334_v26 }
 0x4d3   : > { %21604 = vmatprep.mubr.msk.f32.mxu0 %vm4649_vm8, %v26338_v2 }
 0x4d6   : > { %21605 = vmatmul.mubr.msk.f32.gmra.mrb[72].mxu0 %vm4649_vm8, %v26342_v23 }
 0x4d7   : > { %21607 = vmatprep.mubr.msk.f32.mxu0 %vm4649_vm8, %v26346_v6 }
 0x4da   : > { %21608 = vmatmul.mubr.msk.f32.gmra.mrb[74].mxu0 %vm4649_vm8, %v26350_v7 }
 0x4db   : > { %21610 = vmatprep.mubr.msk.f32.mxu0 %vm4649_vm8, %v26354_v33 }
 0x4de   : > { %21611 = vmatmul.mubr.msk.f32.gmra.mrb[76].mxu0 %vm4649_vm8, %v26358_v47 }
 0x4df   : > { %21613 = vmatprep.mubr.msk.f32.mxu0 %vm4649_vm8, %v26362_v11 }
 0x4e2   : > { %21614 = vmatmul.mubr.msk.f32.gmra.mrb[78].mxu0 %vm4649_vm8, %v26366_v24 }
 0x4e3   : > { %21616 = vmatprep.mubr.msk.f32.mxu0 %vm4649_vm8, %v26370_v27 }
 0x4e6   : > { %21617 = vmatmul.mubr.msk.f32.gmra.mrb[80].mxu0 %vm4649_vm8, %v26374_v45 }
 0x4e7   : > { %21619 = vmatprep.mubr.msk.f32.mxu0 %vm4649_vm8, %v26378_v46 }
 0x4ea   : > { %21620 = vmatmul.mubr.msk.f32.gmra.mrb[82].mxu0 %vm4649_vm8, %v26382_v28 }
 0x4eb   : > { %21622 = vmatprep.mubr.msk.f32.mxu0 %vm4649_vm8, %v26386_v56 }
 0x4ee   : > { %21623 = vmatmul.mubr.msk.f32.gmra.mrb[84].mxu0 %vm4649_vm8, %v26390_v3 }
 0x4ef   : > { %21625 = vmatprep.mubr.msk.f32.mxu0 %vm4649_vm8, %v26394_v10 }
 0x4f2   : > { %21626 = vmatmul.mubr.msk.f32.gmra.mrb[86].mxu0 %vm4649_vm8, %v26398_v35 }
 0x4f3   : > { %21628 = vmatprep.mubr.msk.f32.mxu0 %vm4649_vm8, %v26402_v17 }
 0x4f6   : > { %21629 = vmatmul.mubr.msk.f32.gmra.mrb[88].mxu0 %vm4649_vm8, %v26406_v18 }
 0x4f7   : > { %21631 = vmatprep.mubr.msk.f32.mxu0 %vm4649_vm8, %v26410_v31 }
 0x4fa   : > { %21632 = vmatmul.mubr.msk.f32.gmra.mrb[90].mxu0 %vm4649_vm8, %v26414_v39 }
 0x4fb   : > { %21634 = vmatprep.mubr.msk.f32.mxu0 %vm4649_vm8, %v26418_v34  ;;  %v18360_v34 = vld [vmem:[%s29665_s2 + $0x48] sm:$0xf] }
 0x4fc   : > { %v26441_v39 = vpack.c.bf16 %v18360_v34, %v18359_v50  ;;  %v26458_v34 = vld [vmem:[#allocation2 + $0x32] sm:$0xff]  ;;  %v26474_v50 = vld [vmem:[#allocation2 + $0x62] sm:$0xff] }
 0x4fd   : > { %29972 = vst [vmem:[#allocation13_spill] sm:$0xff] %v26458_v34  ;;  %29976 = vst [vmem:[#allocation17_spill] sm:$0xff] %v26474_v50 }
 0x4fe   : > { %21635 = vmatmul.mubr.msk.f32.gmra.mrb[92].mxu0 %vm4649_vm8, %v26422_v57  ;;  %v5399_v57 = vld [vmem:[#allocation2 + $0xa] sm:$0xff] }
 0x4ff   : > { %21637 = vmatprep.mubr.msk.f32.mxu0 %vm4649_vm8, %v26426_v60  ;;  %v26444_v60 = vld [vmem:[#allocation2 + $0x1a] sm:$0xff] }
 0x502   : > { %21638 = vmatmul.mubr.msk.f32.gmra.mrb[94].mxu0 %vm4649_vm8, %v26430_v42  ;;  %v26454_v42 = vld [vmem:[#allocation2 + $0x22] sm:$0xff] }
 0x503   : > { %21644 = vmatprep.mubr.msk.f32.mxu0 %vm4649_vm8, %v5398_v1  ;;  %v26470_v1 = vld [vmem:[#allocation2 + $0x52] sm:$0xff] }
 0x504   : > { %29975 = vst [vmem:[#allocation16_spill] sm:$0xff] %v26470_v1 }
 0x506   : > { %21645 = vmatmul.mubr.msk.f32.vlgmr.msra.gmra.mrb[64].mxu0 %vm4649_vm8, %v5399_v57  ;;  %v26462_v57 = vld [vmem:[#allocation2 + $0x3a] sm:$0xff] }
 0x507   : > { %22981 = vmatpush3.bf16.msk.msra.mxu0 %vm25939_vm7, %v26305_v9  ;;  %21647 = vmatprep.mubr.msk.f32.mxu0 %vm4649_vm8, %v26444_v60  ;;  %29973 = vst [vmem:[#allocation14_spill] sm:$0xff] %v26462_v57  ;;  %v26466_v9 = vld [vmem:[#allocation2 + $0x4a] sm:$0xff] }
 0x508   : > { %22984 = vmatprep.subr.msk.bf16.mxu0 %vm25939_vm7, %v26441_v39  ;;  %29974 = vst [vmem:[#allocation15_spill] sm:$0xff] %v26466_v9 }
 0x50a   : > { %21648 = vmatmul.mubr.msk.f32.gmra.mrb[66].mxu0 %vm4649_vm8, %v26454_v42 }
 0x50b   : > { %21650 = vmatprep.mubr.msk.f32.mxu0 %vm4649_vm8, %v26458_v34  ;;  %v26478_v34 = vld [vmem:[#allocation2 + $0x6a] sm:$0xff] }
 0x50c   : > { %29977 = vst [vmem:[#allocation18_spill] sm:$0xff] %v26478_v34 }
 0x50e   : > { %21651 = vmatmul.mubr.msk.f32.gmra.mrb[68].mxu0 %vm4649_vm8, %v26462_v57  ;;  %v26482_v57 = vld [vmem:[#allocation2 + $0x7a] sm:$0xff] }
 0x50f   : > { %21653 = vmatprep.mubr.msk.f32.mxu0 %vm4649_vm8, %v26466_v9  ;;  %29978 = vst [vmem:[#allocation19_spill] sm:$0xff] %v26482_v57  ;;  %v26486_v9 = vld [vmem:[#allocation2 + $0x82] sm:$0xff] }
 0x510   : > { %29979 = vst [vmem:[#allocation20_spill] sm:$0xff] %v26486_v9 }
 0x512   : > { %21654 = vmatmul.mubr.msk.f32.gmra.mrb[70].mxu0 %vm4649_vm8, %v26470_v1  ;;  %v26490_v1 = vld [vmem:[#allocation2 + $0x92] sm:$0xff] }
 0x513   : > { %21656 = vmatprep.mubr.msk.f32.mxu0 %vm4649_vm8, %v26474_v50  ;;  %29980 = vst [vmem:[#allocation21_spill] sm:$0xff] %v26490_v1  ;;  %v26494_v50 = vld [vmem:[#allocation2 + $0x9a] sm:$0xff] }
 0x514   : > { %29981 = vst [vmem:[#allocation22_spill] sm:$0xff] %v26494_v50 }
 0x516   : > { %21657 = vmatmul.mubr.msk.f32.gmra.mrb[72].mxu0 %vm4649_vm8, %v26478_v34  ;;  %v26498_v34 = vld [vmem:[#allocation2 + $0xaa] sm:$0xff] }
 0x517   : > { %21659 = vmatprep.mubr.msk.f32.mxu0 %vm4649_vm8, %v26482_v57  ;;  %29982 = vst [vmem:[#allocation23_spill] sm:$0xff] %v26498_v34  ;;  %v26502_v57 = vld [vmem:[#allocation2 + $0xb2] sm:$0xff] }
 0x518   : > { %29983 = vst [vmem:[#allocation24_spill] sm:$0xff] %v26502_v57 }
 0x51a   : > { %21660 = vmatmul.mubr.msk.f32.gmra.mrb[74].mxu0 %vm4649_vm8, %v26486_v9  ;;  %v26506_v9 = vld [vmem:[#allocation2 + $0xc2] sm:$0xff] }
 0x51b   : > { %21662 = vmatprep.mubr.msk.f32.mxu0 %vm4649_vm8, %v26490_v1  ;;  %29984 = vst [vmem:[#allocation25_spill] sm:$0xff] %v26506_v9  ;;  %v26510_v1 = vld [vmem:[#allocation2 + $0xca] sm:$0xff] }
 0x51c   : > { %29985 = vst [vmem:[#allocation26_spill] sm:$0xff] %v26510_v1 }
 0x51e   : > { %21663 = vmatmul.mubr.msk.f32.gmra.mrb[76].mxu0 %vm4649_vm8, %v26494_v50  ;;  %v26514_v50 = vld [vmem:[#allocation2 + $0xda] sm:$0xff] }
 0x51f   : > { %21665 = vmatprep.mubr.msk.f32.mxu0 %vm4649_vm8, %v26498_v34  ;;  %29986 = vst [vmem:[#allocation27_spill] sm:$0xff] %v26514_v50  ;;  %v26518_v34 = vld [vmem:[#allocation2 + $0xe2] sm:$0xff] }
 0x520   : > { %29987 = vst [vmem:[#allocation28_spill] sm:$0xff] %v26518_v34 }
 0x522   : > { %21666 = vmatmul.mubr.msk.f32.gmra.mrb[78].mxu0 %vm4649_vm8, %v26502_v57  ;;  %v26522_v57 = vld [vmem:[#allocation2 + $0xf2] sm:$0xff] }
 0x523   : > { %21668 = vmatprep.mubr.msk.f32.mxu0 %vm4649_vm8, %v26506_v9  ;;  %29988 = vst [vmem:[#allocation29_spill] sm:$0xff] %v26522_v57  ;;  %v26526_v9 = vld [vmem:[#allocation2 + $0xfa] sm:$0xff] }
 0x524   : > { %29989 = vst [vmem:[#allocation30_spill] sm:$0xff] %v26526_v9 }
 0x526   : > { %21669 = vmatmul.mubr.msk.f32.gmra.mrb[80].mxu0 %vm4649_vm8, %v26510_v1  ;;  %v26530_v1 = vld [vmem:[#allocation2 + $0x10a] sm:$0xff] }
 0x527   : > { %21671 = vmatprep.mubr.msk.f32.mxu0 %vm4649_vm8, %v26514_v50  ;;  %29990 = vst [vmem:[#allocation31_spill] sm:$0xff] %v26530_v1  ;;  %v26534_v50 = vld [vmem:[#allocation2 + $0x112] sm:$0xff] }
 0x528   : > { %29991 = vst [vmem:[#allocation32_spill] sm:$0xff] %v26534_v50 }
 0x52a   : > { %21672 = vmatmul.mubr.msk.f32.gmra.mrb[82].mxu0 %vm4649_vm8, %v26518_v34  ;;  %v26538_v34 = vld [vmem:[#allocation2 + $0x122] sm:$0xff] }
 0x52b   : > { %21674 = vmatprep.mubr.msk.f32.mxu0 %vm4649_vm8, %v26522_v57  ;;  %29992 = vst [vmem:[#allocation33_spill] sm:$0xff] %v26538_v34  ;;  %v26542_v57 = vld [vmem:[#allocation2 + $0x12a] sm:$0xff] }
 0x52c   : > { %29993 = vst [vmem:[#allocation34_spill] sm:$0xff] %v26542_v57 }
 0x52e   : > { %21675 = vmatmul.mubr.msk.f32.gmra.mrb[84].mxu0 %vm4649_vm8, %v26526_v9  ;;  %v26546_v9 = vld [vmem:[#allocation2 + $0x13a] sm:$0xff] }
 0x52f   : > { %21677 = vmatprep.mubr.msk.f32.mxu0 %vm4649_vm8, %v26530_v1  ;;  %29994 = vst [vmem:[#allocation35_spill] sm:$0xff] %v26546_v9  ;;  %v26550_v1 = vld [vmem:[#allocation2 + $0x142] sm:$0xff] }
 0x530   : > { %29995 = vst [vmem:[#allocation36_spill] sm:$0xff] %v26550_v1 }
 0x532   : > { %21678 = vmatmul.mubr.msk.f32.gmra.mrb[86].mxu0 %vm4649_vm8, %v26534_v50  ;;  %v26554_v50 = vld [vmem:[#allocation2 + $0x152] sm:$0xff] }
 0x533   : > { %21680 = vmatprep.mubr.msk.f32.mxu0 %vm4649_vm8, %v26538_v34  ;;  %29996 = vst [vmem:[#allocation37_spill] sm:$0xff] %v26554_v50  ;;  %v26558_v34 = vld [vmem:[#allocation2 + $0x15a] sm:$0xff] }
 0x534   : > { %29997 = vst [vmem:[#allocation38_spill] sm:$0xff] %v26558_v34 }
 0x536   : > { %21681 = vmatmul.mubr.msk.f32.gmra.mrb[88].mxu0 %vm4649_vm8, %v26542_v57  ;;  %v26562_v57 = vld [vmem:[#allocation2 + $0x16a] sm:$0xff] }
 0x537   : > { %21683 = vmatprep.mubr.msk.f32.mxu0 %vm4649_vm8, %v26546_v9  ;;  %v26566_v9 = vld [vmem:[#allocation2 + $0x172] sm:$0xff] }
 0x538   : > { %29998 = vst [vmem:[#allocation39_spill] sm:$0xff] %v26566_v9 }
 0x53a   : > { %21684 = vmatmul.mubr.msk.f32.gmra.mrb[90].mxu0 %vm4649_vm8, %v26550_v1  ;;  %v18394_v1 = vld [vmem:[%s29665_s2 + $0x50] sm:$0xff] }
 0x53b   : > { %21686 = vmatprep.mubr.msk.f32.mxu0 %vm4649_vm8, %v26554_v50  ;;  %v18395_v50 = vld [vmem:[%s29665_s2 + $0x58] sm:$0xf] }
 0x53e   : > { %21687 = vmatmul.mubr.msk.f32.gmra.mrb[92].mxu0 %vm4649_vm8, %v26558_v34  ;;  %v22988_v34 = vpack.c.bf16 %v18395_v50, %v18394_v1  ;;  %v18430_v1 = vld [vmem:[%s29665_s2 + $0x68] sm:$0xf] }
 0x53f   : > { %21689 = vmatprep.mubr.msk.f32.mxu0 %vm4649_vm8, %v26562_v57 }
 0x542   : > { %21690 = vmatmul.mubr.msk.f32.gmra.mrb[94].mxu0 %vm4649_vm8, %v26566_v9 }
 0x543   : > { %21696 = vmatprep.mubr.msk.f32.mxu0 %vm4649_vm8, %v26149_v0  ;;  %v26641_v0 = vld [vmem:[#allocation2 + $0x180] sm:$0xff] }
 0x546   : > { %21697 = vmatmul.mubr.msk.f32.vlgmr.msra.gmra.mrb[64].mxu0 %vm4649_vm8, %v26151_v8  ;;  %v26645_v8 = vld [vmem:[#allocation2 + $0x188] sm:$0xff] }
 0x547   : > { %22987 = vmatpush3.bf16.msk.msra.mxu0 %vm25939_vm7, %v26441_v39  ;;  %21699 = vmatprep.mubr.msk.f32.mxu0 %vm4649_vm8, %v26159_v59  ;;  %v18429_v39 = vld [vmem:[%s29665_s2 + $0x60] sm:$0xff] }
 0x548   : > { %22990 = vmatprep.subr.msk.bf16.mxu0 %vm25939_vm7, %v22988_v34  ;;  %v22994_v50 = vpack.c.bf16 %v18430_v1, %v18429_v39  ;;  %v30002_v39 = vld [vmem:[#allocation11_spill] sm:$0xff]  ;;  %v30003_v1 = vld [vmem:[#allocation12_spill] sm:$0xff] }
 0x54a   : > { %21700 = vmatmul.mubr.msk.f32.gmra.mrb[66].mxu0 %vm4649_vm8, %v26161_v52 }
 0x54b   : > { %21702 = vmatprep.mubr.msk.f32.mxu0 %vm4649_vm8, %v26169_v21 }
 0x54e   : > { %21703 = vmatmul.mubr.msk.f32.gmra.mrb[68].mxu0 %vm4649_vm8, %v26171_v53 }
 0x54f   : > { %21705 = vmatprep.mubr.msk.f32.mxu0 %vm4649_vm8, %v26180_v19 }
 0x552   : > { %21706 = vmatmul.mubr.msk.f32.gmra.mrb[70].mxu0 %vm4649_vm8, %v26182_v61 }
 0x553   : > { %21708 = vmatprep.mubr.msk.f32.mxu0 %vm4649_vm8, %v26190_v51 }
 0x556   : > { %21709 = vmatmul.mubr.msk.f32.gmra.mrb[72].mxu0 %vm4649_vm8, %v26192_v29 }
 0x557   : > { %21711 = vmatprep.mubr.msk.f32.mxu0 %vm4649_vm8, %v26200_v38 }
 0x55a   : > { %21712 = vmatmul.mubr.msk.f32.gmra.mrb[74].mxu0 %vm4649_vm8, %v26202_v4 }
 0x55b   : > { %21714 = vmatprep.mubr.msk.f32.mxu0 %vm4649_vm8, %v26210_v16 }
 0x55e   : > { %21715 = vmatmul.mubr.msk.f32.gmra.mrb[76].mxu0 %vm4649_vm8, %v26212_v37 }
 0x55f   : > { %21717 = vmatprep.mubr.msk.f32.mxu0 %vm4649_vm8, %v26220_v32 }
 0x562   : > { %21718 = vmatmul.mubr.msk.f32.gmra.mrb[78].mxu0 %vm4649_vm8, %v26222_v5 }
 0x563   : > { %21720 = vmatprep.mubr.msk.f32.mxu0 %vm4649_vm8, %v26229_v54 }
 0x566   : > { %21721 = vmatmul.mubr.msk.f32.gmra.mrb[80].mxu0 %vm4649_vm8, %v26231_v58 }
 0x567   : > { %21723 = vmatprep.mubr.msk.f32.mxu0 %vm4649_vm8, %v26239_v62 }
 0x56a   : > { %21724 = vmatmul.mubr.msk.f32.gmra.mrb[82].mxu0 %vm4649_vm8, %v26241_v12 }
 0x56b   : > { %21726 = vmatprep.mubr.msk.f32.mxu0 %vm4649_vm8, %v26249_v13 }
 0x56e   : > { %21727 = vmatmul.mubr.msk.f32.gmra.mrb[84].mxu0 %vm4649_vm8, %v26251_v41 }
 0x56f   : > { %21729 = vmatprep.mubr.msk.f32.mxu0 %vm4649_vm8, %v26259_v15 }
 0x572   : > { %21730 = vmatmul.mubr.msk.f32.gmra.mrb[86].mxu0 %vm4649_vm8, %v26261_v20 }
 0x573   : > { %21732 = vmatprep.mubr.msk.f32.mxu0 %vm4649_vm8, %v26269_v36 }
 0x576   : > { %21733 = vmatmul.mubr.msk.f32.gmra.mrb[88].mxu0 %vm4649_vm8, %v26271_v25 }
 0x577   : > { %21735 = vmatprep.mubr.msk.f32.mxu0 %vm4649_vm8, %v26279_v40 }
 0x57a   : > { %21736 = vmatmul.mubr.msk.f32.gmra.mrb[90].mxu0 %vm4649_vm8, %v26281_v30 }
 0x57b   : > { %21738 = vmatprep.mubr.msk.f32.mxu0 %vm4649_vm8, %v26288_v43 }
 0x57e   : > { %21739 = vmatmul.mubr.msk.f32.gmra.mrb[92].mxu0 %vm4649_vm8, %v26293_v44 }
 0x57f   : > { %21741 = vmatprep.mubr.msk.f32.mxu0 %vm4649_vm8, %v26641_v0 }
 0x582   : > { %21742 = vmatmul.mubr.msk.f32.gmra.mrb[94].mxu0 %vm4649_vm8, %v26645_v8 }
 0x583   : > { %21748 = vmatprep.mubr.msk.f32.mxu0 %vm4649_vm8, %v26308_v55  ;;  %v29999_v55 = vld [vmem:[#allocation8_spill] sm:$0xff] }
 0x586   : > { %21749 = vmatmul.mubr.msk.f32.vlgmr.msra.gmra.mrb[64].mxu0 %vm4649_vm8, %v26318_v63  ;;  %v30000_v63 = vld [vmem:[#allocation9_spill] sm:$0xff] }
 0x587   : > { %22993 = vmatpush3.bf16.msk.msra.mxu0 %vm25939_vm7, %v22988_v34  ;;  %21751 = vmatprep.mubr.msk.f32.mxu0 %vm4649_vm8, %v26322_v14  ;;  %v30001_v34 = vld [vmem:[#allocation10_spill] sm:$0xff] }
 0x588   : > { %22996 = vmatprep.subr.msk.bf16.mxu0 %vm25939_vm7, %v22994_v50 }
 0x58a   : > { %21752 = vmatmul.mubr.msk.f32.gmra.mrb[66].mxu0 %vm4649_vm8, %v26326_v22 }
 0x58b   : > { %21754 = vmatprep.mubr.msk.f32.mxu0 %vm4649_vm8, %v26330_v48 }
 0x58e   : > { %21755 = vmatmul.mubr.msk.f32.gmra.mrb[68].mxu0 %vm4649_vm8, %v26334_v26 }
 0x58f   : > { %21757 = vmatprep.mubr.msk.f32.mxu0 %vm4649_vm8, %v26338_v2 }
 0x592   : > { %21758 = vmatmul.mubr.msk.f32.gmra.mrb[70].mxu0 %vm4649_vm8, %v26342_v23 }
 0x593   : > { %21760 = vmatprep.mubr.msk.f32.mxu0 %vm4649_vm8, %v26346_v6 }
 0x596   : > { %21761 = vmatmul.mubr.msk.f32.gmra.mrb[72].mxu0 %vm4649_vm8, %v26350_v7 }
 0x597   : > { %21763 = vmatprep.mubr.msk.f32.mxu0 %vm4649_vm8, %v26354_v33 }
 0x59a   : > { %21764 = vmatmul.mubr.msk.f32.gmra.mrb[74].mxu0 %vm4649_vm8, %v26358_v47 }
 0x59b   : > { %21766 = vmatprep.mubr.msk.f32.mxu0 %vm4649_vm8, %v26362_v11 }
 0x59e   : > { %21767 = vmatmul.mubr.msk.f32.gmra.mrb[76].mxu0 %vm4649_vm8, %v26366_v24 }
 0x59f   : > { %21769 = vmatprep.mubr.msk.f32.mxu0 %vm4649_vm8, %v26370_v27 }
 0x5a2   : > { %21770 = vmatmul.mubr.msk.f32.gmra.mrb[78].mxu0 %vm4649_vm8, %v26374_v45 }
 0x5a3   : > { %21772 = vmatprep.mubr.msk.f32.mxu0 %vm4649_vm8, %v26378_v46 }
 0x5a6   : > { %21773 = vmatmul.mubr.msk.f32.gmra.mrb[80].mxu0 %vm4649_vm8, %v26382_v28 }
 0x5a7   : > { %21775 = vmatprep.mubr.msk.f32.mxu0 %vm4649_vm8, %v26386_v56 }
 0x5aa   : > { %21776 = vmatmul.mubr.msk.f32.gmra.mrb[82].mxu0 %vm4649_vm8, %v26390_v3 }
 0x5ab   : > { %21778 = vmatprep.mubr.msk.f32.mxu0 %vm4649_vm8, %v26394_v10 }
 0x5ae   : > { %21779 = vmatmul.mubr.msk.f32.gmra.mrb[84].mxu0 %vm4649_vm8, %v26398_v35 }
 0x5af   : > { %21781 = vmatprep.mubr.msk.f32.mxu0 %vm4649_vm8, %v26402_v17  ;;  %v26719_v17 = vld [vmem:[#allocation2 + $0x181] sm:$0xff] }
 0x5b0   : > { %30004 = vst [vmem:[#allocation8_spill] sm:$0xff] %v26719_v17 }
 0x5b2   : > { %21782 = vmatmul.mubr.msk.f32.gmra.mrb[86].mxu0 %vm4649_vm8, %v26406_v18 }
 0x5b3   : > { %21784 = vmatprep.mubr.msk.f32.mxu0 %vm4649_vm8, %v26410_v31  ;;  %v26723_v31 = vld [vmem:[#allocation2 + $0x189] sm:$0xff] }
 0x5b4   : > { %30005 = vst [vmem:[#allocation40_spill] sm:$0xff] %v26723_v31 }
 0x5b6   : > { %21785 = vmatmul.mubr.msk.f32.gmra.mrb[88].mxu0 %vm4649_vm8, %v29999_v55 }
 0x5b7   : > { %21787 = vmatprep.mubr.msk.f32.mxu0 %vm4649_vm8, %v30000_v63  ;;  %v18464_v63 = vld [vmem:[%s29665_s2 + $0x70] sm:$0xff] }
 0x5ba   : > { %21788 = vmatmul.mubr.msk.f32.gmra.mrb[90].mxu0 %vm4649_vm8, %v30001_v34  ;;  %v18465_v34 = vld [vmem:[%s29665_s2 + $0x78] sm:$0xf] }
 0x5bb   : > { %21790 = vmatprep.mubr.msk.f32.mxu0 %vm4649_vm8, %v30002_v39  ;;  %v30007_v39 = vld [vmem:[#allocation14_spill] sm:$0xff] }
 0x5be   : > { %21791 = vmatmul.mubr.msk.f32.gmra.mrb[92].mxu0 %vm4649_vm8, %v30003_v1  ;;  %v23000_v1 = vpack.c.bf16 %v18465_v34, %v18464_v63  ;;  %v30010_v63 = vld [vmem:[#allocation17_spill] sm:$0xff]  ;;  %v30013_v34 = vld [vmem:[#allocation20_spill] sm:$0xff] }
 0x5bf   : > { %21793 = vmatprep.mubr.msk.f32.mxu0 %vm4649_vm8, %v26719_v17  ;;  %v30006_v17 = vld [vmem:[#allocation13_spill] sm:$0xff] }
 0x5c2   : > { %21794 = vmatmul.mubr.msk.f32.gmra.mrb[94].mxu0 %vm4649_vm8, %v26723_v31  ;;  %v30008_v31 = vld [vmem:[#allocation15_spill] sm:$0xff] }
 0x5c3   : > { %21800 = vmatprep.mubr.msk.f32.mxu0 %vm4649_vm8, %v26444_v60  ;;  %v30009_v60 = vld [vmem:[#allocation16_spill] sm:$0xff] }
 0x5c6   : > { %21801 = vmatmul.mubr.msk.f32.vlgmr.msra.gmra.mrb[64].mxu0 %vm4649_vm8, %v26454_v42  ;;  %v30011_v42 = vld [vmem:[#allocation18_spill] sm:$0xff] }
 0x5c7   : > { %22999 = vmatpush3.bf16.msk.msra.mxu0 %vm25939_vm7, %v22994_v50  ;;  %21803 = vmatprep.mubr.msk.f32.mxu0 %vm4649_vm8, %v30006_v17  ;;  %v30012_v50 = vld [vmem:[#allocation19_spill] sm:$0xff]  ;;  %v30014_v17 = vld [vmem:[#allocation21_spill] sm:$0xff] }
 0x5c8   : > { %23002 = vmatprep.subr.msk.bf16.mxu0 %vm25939_vm7, %v23000_v1 }
 0x5ca   : > { %21804 = vmatmul.mubr.msk.f32.gmra.mrb[66].mxu0 %vm4649_vm8, %v30007_v39  ;;  %v30015_v39 = vld [vmem:[#allocation22_spill] sm:$0xff] }
 0x5cb   : > { %21806 = vmatprep.mubr.msk.f32.mxu0 %vm4649_vm8, %v30008_v31  ;;  %v30016_v31 = vld [vmem:[#allocation23_spill] sm:$0xff] }
 0x5ce   : > { %21807 = vmatmul.mubr.msk.f32.gmra.mrb[68].mxu0 %vm4649_vm8, %v30009_v60  ;;  %v30017_v60 = vld [vmem:[#allocation24_spill] sm:$0xff] }
 0x5cf   : > { %21809 = vmatprep.mubr.msk.f32.mxu0 %vm4649_vm8, %v30010_v63  ;;  %v30018_v63 = vld [vmem:[#allocation25_spill] sm:$0xff] }
 0x5d2   : > { %21810 = vmatmul.mubr.msk.f32.gmra.mrb[70].mxu0 %vm4649_vm8, %v30011_v42  ;;  %v30019_v42 = vld [vmem:[#allocation26_spill] sm:$0xff] }
 0x5d3   : > { %21812 = vmatprep.mubr.msk.f32.mxu0 %vm4649_vm8, %v30012_v50  ;;  %v30020_v50 = vld [vmem:[#allocation27_spill] sm:$0xff] }
 0x5d6   : > { %21813 = vmatmul.mubr.msk.f32.gmra.mrb[72].mxu0 %vm4649_vm8, %v30013_v34  ;;  %v30021_v34 = vld [vmem:[#allocation28_spill] sm:$0xff] }
 0x5d7   : > { %21815 = vmatprep.mubr.msk.f32.mxu0 %vm4649_vm8, %v30014_v17  ;;  %v30022_v17 = vld [vmem:[#allocation29_spill] sm:$0xff] }
 0x5da   : > { %21816 = vmatmul.mubr.msk.f32.gmra.mrb[74].mxu0 %vm4649_vm8, %v30015_v39  ;;  %v30023_v39 = vld [vmem:[#allocation30_spill] sm:$0xff] }
 0x5db   : > { %21818 = vmatprep.mubr.msk.f32.mxu0 %vm4649_vm8, %v30016_v31  ;;  %v30024_v31 = vld [vmem:[#allocation31_spill] sm:$0xff] }
 0x5de   : > { %21819 = vmatmul.mubr.msk.f32.gmra.mrb[76].mxu0 %vm4649_vm8, %v30017_v60  ;;  %v30025_v60 = vld [vmem:[#allocation32_spill] sm:$0xff] }
 0x5df   : > { %21821 = vmatprep.mubr.msk.f32.mxu0 %vm4649_vm8, %v30018_v63  ;;  %v30026_v63 = vld [vmem:[#allocation33_spill] sm:$0xff] }
 0x5e2   : > { %21822 = vmatmul.mubr.msk.f32.gmra.mrb[78].mxu0 %vm4649_vm8, %v30019_v42  ;;  %v30027_v42 = vld [vmem:[#allocation34_spill] sm:$0xff] }
 0x5e3   : > { %21824 = vmatprep.mubr.msk.f32.mxu0 %vm4649_vm8, %v30020_v50  ;;  %v30028_v50 = vld [vmem:[#allocation35_spill] sm:$0xff] }
 0x5e6   : > { %21825 = vmatmul.mubr.msk.f32.gmra.mrb[80].mxu0 %vm4649_vm8, %v30021_v34  ;;  %v30029_v34 = vld [vmem:[#allocation36_spill] sm:$0xff] }
 0x5e7   : > { %21827 = vmatprep.mubr.msk.f32.mxu0 %vm4649_vm8, %v30022_v17  ;;  %v30030_v17 = vld [vmem:[#allocation37_spill] sm:$0xff] }
 0x5ea   : > { %21828 = vmatmul.mubr.msk.f32.gmra.mrb[82].mxu0 %vm4649_vm8, %v30023_v39  ;;  %v30031_v39 = vld [vmem:[#allocation38_spill] sm:$0xff] }
 0x5eb   : > { %21830 = vmatprep.mubr.msk.f32.mxu0 %vm4649_vm8, %v30024_v31 }
 0x5ee   : > { %21831 = vmatmul.mubr.msk.f32.gmra.mrb[84].mxu0 %vm4649_vm8, %v30025_v60 }
 0x5ef   : > { %21833 = vmatprep.mubr.msk.f32.mxu0 %vm4649_vm8, %v30026_v63  ;;  %v26797_v63 = vld [vmem:[#allocation2 + $0x182] sm:$0xff] }
 0x5f2   : > { %21834 = vmatmul.mubr.msk.f32.gmra.mrb[86].mxu0 %vm4649_vm8, %v30027_v42 }
 0x5f3   : > { %21836 = vmatprep.mubr.msk.f32.mxu0 %vm4649_vm8, %v30028_v50  ;;  %v26801_v50 = vld [vmem:[#allocation2 + $0x18a] sm:$0xff] }
 0x5f6   : > { %21837 = vmatmul.mubr.msk.f32.gmra.mrb[88].mxu0 %vm4649_vm8, %v30029_v34 }
 0x5f7   : > { %21839 = vmatprep.mubr.msk.f32.mxu0 %vm4649_vm8, %v30030_v17  ;;  %v18499_v17 = vld [vmem:[%s29665_s2 + $0x80] sm:$0xff] }
 0x5fa   : > { %21840 = vmatmul.mubr.msk.f32.gmra.mrb[90].mxu0 %vm4649_vm8, %v30031_v39  ;;  %v18500_v39 = vld [vmem:[%s29665_s2 + $0x88] sm:$0xf] }
 0x5fb   : > { %21842 = vmatprep.mubr.msk.f32.mxu0 %vm4649_vm8, %v26562_v57 }
 0x5fe   : > { %21843 = vmatmul.mubr.msk.f32.gmra.mrb[92].mxu0 %vm4649_vm8, %v26566_v9  ;;  %v23006_v9 = vpack.c.bf16 %v18500_v39, %v18499_v17 }
 0x5ff   : > { %21845 = vmatprep.mubr.msk.f32.mxu0 %vm4649_vm8, %v26797_v63 }
 0x602   : > { %21846 = vmatmul.mubr.msk.f32.gmra.mrb[94].mxu0 %vm4649_vm8, %v26801_v50 }
 0x603   : > { %21852 = vmatprep.mubr.msk.f32.mxu0 %vm4649_vm8, %v26159_v59  ;;  %v6992_v59 = vld [vmem:[#allocation2 + $0x198] sm:$0xff] }
 0x606   : > { %21853 = vmatmul.mubr.msk.f32.vlgmr.msra.gmra.mrb[64].mxu0 %vm4649_vm8, %v26161_v52  ;;  %v6993_v52 = vld [vmem:[#allocation2 + $0x1a0] sm:$0xff] }
 0x607   : > { %23005 = vmatpush3.bf16.msk.msra.mxu0 %vm25939_vm7, %v23000_v1  ;;  %21855 = vmatprep.mubr.msk.f32.mxu0 %vm4649_vm8, %v26169_v21  ;;  %v30033_v21 = vld [vmem:[#allocation7_spill] sm:$0xff] }
 0x608   : > { %23008 = vmatprep.subr.msk.bf16.mxu0 %vm25939_vm7, %v23006_v9 }
 0x60a   : > { %21856 = vmatmul.mubr.msk.f32.gmra.mrb[66].mxu0 %vm4649_vm8, %v26171_v53  ;;  %v30034_v53 = vld [vmem:[#allocation9_spill] sm:$0xff] }
 0x60b   : > { %21858 = vmatprep.mubr.msk.f32.mxu0 %vm4649_vm8, %v26180_v19  ;;  %v30035_v19 = vld [vmem:[#allocation10_spill] sm:$0xff] }
 0x60e   : > { %21859 = vmatmul.mubr.msk.f32.gmra.mrb[68].mxu0 %vm4649_vm8, %v26182_v61  ;;  %v30036_v61 = vld [vmem:[#allocation11_spill] sm:$0xff] }
 0x60f   : > { %21861 = vmatprep.mubr.msk.f32.mxu0 %vm4649_vm8, %v26190_v51  ;;  %v30037_v51 = vld [vmem:[#allocation12_spill] sm:$0xff] }
 0x612   : > { %21862 = vmatmul.mubr.msk.f32.gmra.mrb[70].mxu0 %vm4649_vm8, %v26192_v29  ;;  %v30038_v29 = vld [vmem:[#allocation8_spill] sm:$0xff] }
 0x613   : > { %21864 = vmatprep.mubr.msk.f32.mxu0 %vm4649_vm8, %v26200_v38  ;;  %v7383_v38 = vld [vmem:[#allocation2 + $0x199] sm:$0xff] }
 0x616   : > { %21865 = vmatmul.mubr.msk.f32.gmra.mrb[72].mxu0 %vm4649_vm8, %v26202_v4  ;;  %v30039_v4 = vld [vmem:[#allocation40_spill] sm:$0xff] }
 0x617   : > { %21867 = vmatprep.mubr.msk.f32.mxu0 %vm4649_vm8, %v26210_v16  ;;  %v7384_v16 = vld [vmem:[#allocation2 + $0x1a1] sm:$0xff] }
 0x61a   : > { %21868 = vmatmul.mubr.msk.f32.gmra.mrb[74].mxu0 %vm4649_vm8, %v26212_v37  ;;  %v30040_v37 = vld [vmem:[#allocation13_spill] sm:$0xff] }
 0x61b   : > { %21870 = vmatprep.mubr.msk.f32.mxu0 %vm4649_vm8, %v26220_v32  ;;  %v30041_v32 = vld [vmem:[#allocation14_spill] sm:$0xff] }
 0x61e   : > { %21871 = vmatmul.mubr.msk.f32.gmra.mrb[76].mxu0 %vm4649_vm8, %v26222_v5  ;;  %v30042_v5 = vld [vmem:[#allocation15_spill] sm:$0xff] }
 0x61f   : > { %21873 = vmatprep.mubr.msk.f32.mxu0 %vm4649_vm8, %v26229_v54  ;;  %v30043_v54 = vld [vmem:[#allocation16_spill] sm:$0xff] }
 0x622   : > { %21874 = vmatmul.mubr.msk.f32.gmra.mrb[78].mxu0 %vm4649_vm8, %v26231_v58  ;;  %v30044_v58 = vld [vmem:[#allocation17_spill] sm:$0xff] }
 0x623   : > { %21876 = vmatprep.mubr.msk.f32.mxu0 %vm4649_vm8, %v26239_v62  ;;  %v30045_v62 = vld [vmem:[#allocation18_spill] sm:$0xff] }
 0x626   : > { %21877 = vmatmul.mubr.msk.f32.gmra.mrb[80].mxu0 %vm4649_vm8, %v26241_v12  ;;  %v30046_v12 = vld [vmem:[#allocation19_spill] sm:$0xff] }
 0x627   : > { %21879 = vmatprep.mubr.msk.f32.mxu0 %vm4649_vm8, %v26249_v13  ;;  %v30047_v13 = vld [vmem:[#allocation20_spill] sm:$0xff] }
 0x62a   : > { %21880 = vmatmul.mubr.msk.f32.gmra.mrb[82].mxu0 %vm4649_vm8, %v26251_v41  ;;  %v30048_v41 = vld [vmem:[#allocation21_spill] sm:$0xff] }
 0x62b   : > { %21882 = vmatprep.mubr.msk.f32.mxu0 %vm4649_vm8, %v26259_v15  ;;  %v30049_v15 = vld [vmem:[#allocation22_spill] sm:$0xff] }
 0x62e   : > { %21883 = vmatmul.mubr.msk.f32.gmra.mrb[84].mxu0 %vm4649_vm8, %v26261_v20  ;;  %v30050_v20 = vld [vmem:[#allocation23_spill] sm:$0xff] }
 0x62f   : > { %21885 = vmatprep.mubr.msk.f32.mxu0 %vm4649_vm8, %v26269_v36  ;;  %v30051_v36 = vld [vmem:[#allocation24_spill] sm:$0xff] }
 0x632   : > { %21886 = vmatmul.mubr.msk.f32.gmra.mrb[86].mxu0 %vm4649_vm8, %v26271_v25  ;;  %v30052_v25 = vld [vmem:[#allocation25_spill] sm:$0xff] }
 0x633   : > { %21888 = vmatprep.mubr.msk.f32.mxu0 %vm4649_vm8, %v26279_v40  ;;  %v30053_v40 = vld [vmem:[#allocation26_spill] sm:$0xff] }
 0x636   : > { %21889 = vmatmul.mubr.msk.f32.gmra.mrb[88].mxu0 %vm4649_vm8, %v26281_v30  ;;  %v30054_v30 = vld [vmem:[#allocation27_spill] sm:$0xff] }
 0x637   : > { %21891 = vmatprep.mubr.msk.f32.mxu0 %vm4649_vm8, %v26288_v43  ;;  %v30055_v43 = vld [vmem:[#allocation28_spill] sm:$0xff] }
 0x63a   : > { %21892 = vmatmul.mubr.msk.f32.gmra.mrb[90].mxu0 %vm4649_vm8, %v26293_v44  ;;  %v30056_v44 = vld [vmem:[#allocation29_spill] sm:$0xff] }
 0x63b   : > { %21894 = vmatprep.mubr.msk.f32.mxu0 %vm4649_vm8, %v26641_v0 }
 0x63e   : > { %21895 = vmatmul.mubr.msk.f32.gmra.mrb[92].mxu0 %vm4649_vm8, %v26645_v8 }
 0x63f   : > { %21897 = vmatprep.mubr.msk.f32.mxu0 %vm4649_vm8, %v6992_v59 }
 0x642   : > { %21898 = vmatmul.mubr.msk.f32.gmra.mrb[94].mxu0 %vm4649_vm8, %v6993_v52 }
 0x643   : > { %21904 = vmatprep.mubr.msk.f32.mxu0 %vm4649_vm8, %v26322_v14  ;;  %v30057_v14 = vld [vmem:[#allocation30_spill] sm:$0xff] }
 0x646   : > { %21905 = vmatmul.mubr.msk.f32.vlgmr.msra.gmra.mrb[64].mxu0 %vm4649_vm8, %v26326_v22  ;;  %v30058_v22 = vld [vmem:[#allocation33_spill] sm:$0xff] }
 0x647   : > { %23011 = vmatpush3.bf16.msk.msra.mxu0 %vm25939_vm7, %v23006_v9  ;;  %21907 = vmatprep.mubr.msk.f32.mxu0 %vm4649_vm8, %v26330_v48  ;;  %v30059_v48 = vld [vmem:[#allocation35_spill] sm:$0xff]  ;;  %vm8434_vm7 = vcmask 130048  }
 0x64a   : > { %21908 = vmatmul.mubr.msk.f32.gmra.mrb[66].mxu0 %vm4649_vm8, %v26334_v26  ;;  %v30060_v26 = vld [vmem:[#allocation37_spill] sm:$0xff] }
 0x64b   : > { %21910 = vmatprep.mubr.msk.f32.mxu0 %vm4649_vm8, %v26338_v2  ;;  %v30061_v2 = vld [vmem:[#allocation38_spill] sm:$0xff] }
 0x64e   : > { %21911 = vmatmul.mubr.msk.f32.gmra.mrb[68].mxu0 %vm4649_vm8, %v26342_v23  ;;  %v30062_v23 = vld [vmem:[#allocation39_spill] sm:$0xff] }
 0x64f   : > { %21913 = vmatprep.mubr.msk.f32.mxu0 %vm4649_vm8, %v26346_v6  ;;  %v7774_v6 = vld [vmem:[#allocation2 + $0x19a] sm:$0xff] }
 0x652   : > { %21914 = vmatmul.mubr.msk.f32.gmra.mrb[70].mxu0 %vm4649_vm8, %v26350_v7  ;;  %v7775_v7 = vld [vmem:[#allocation2 + $0x1a2] sm:$0xff] }
 0x653   : > { %21916 = vmatprep.mubr.msk.f32.mxu0 %vm4649_vm8, %v26354_v33  ;;  %v8432_v33 = vld [vmem:[%s29666_s3] sm:$0xff] }
 0x656   : > { %21917 = vmatmul.mubr.msk.f32.gmra.mrb[72].mxu0 %vm4649_vm8, %v26358_v47  ;;  %v8433_v47 = vld [vmem:[%s29666_s3 + $0x8] sm:$0xff] }
 0x657   : > { %21919 = vmatprep.mubr.msk.f32.mxu0 %vm4649_vm8, %v26362_v11  ;;  %v23012_v11 = vpack.c.bf16 %v8433_v47, %v8432_v33 }
 0x659   : > { %23013 = vmatprep.subr.bf16.mxu1 %v23012_v11 }
 0x65a   : > { %21920 = vmatmul.mubr.msk.f32.gmra.mrb[74].mxu0 %vm4649_vm8, %v26366_v24  ;;  %23015 = vmatpush3.bf16.msra.mxu1 %v23012_v11  ;;  %v27012_v24 = vld [vmem:[%s29670_s7] ss:$0 sm:$0xff] }
 0x65b   : > { %21922 = vmatprep.mubr.msk.f32.mxu0 %vm4649_vm8, %v26370_v27 }
 0x65e   : > { %21923 = vmatmul.mubr.msk.f32.gmra.mrb[76].mxu0 %vm4649_vm8, %v26374_v45  ;;  %v8400_v45 = vld [vmem:[#allocation2] sm:$0xff] }
 0x65f   : > { %21925 = vmatprep.mubr.msk.f32.mxu0 %vm4649_vm8, %v26378_v46  ;;  %v8401_v46 = vld [vmem:[#allocation2 + $0x8] sm:$0xff]  ;;  %22008 = vmatprep.mubr.msk.f32.mxu1 %vm8434_vm7, %v8400_v45 }
 0x660   : > { %22009 = vmatmul.mubr.msk.f32.vlgmr.msra.gmra.mrb[32].mxu1 %vm8434_vm7, %v8401_v46 }
 0x662   : > { %21926 = vmatmul.mubr.msk.f32.gmra.mrb[78].mxu0 %vm4649_vm8, %v26382_v28 }
 0x663   : > { %21928 = vmatprep.mubr.msk.f32.mxu0 %vm4649_vm8, %v26386_v56 }
 0x666   : > { %21929 = vmatmul.mubr.msk.f32.gmra.mrb[80].mxu0 %vm4649_vm8, %v26390_v3 }
 0x667   : > { %21931 = vmatprep.mubr.msk.f32.mxu0 %vm4649_vm8, %v26394_v10 }
 0x66a   : > { %21932 = vmatmul.mubr.msk.f32.gmra.mrb[82].mxu0 %vm4649_vm8, %v26398_v35 }
 0x66b   : > { %21934 = vmatprep.mubr.msk.f32.mxu0 %vm4649_vm8, %v30032_v49 }
 0x66e   : > { %21935 = vmatmul.mubr.msk.f32.gmra.mrb[84].mxu0 %vm4649_vm8, %v26406_v18 }
 0x66f   : > { %21937 = vmatprep.mubr.msk.f32.mxu0 %vm4649_vm8, %v30033_v21 }
 0x672   : > { %21938 = vmatmul.mubr.msk.f32.gmra.mrb[86].mxu0 %vm4649_vm8, %v29999_v55 }
 0x673   : > { %21940 = vmatprep.mubr.msk.f32.mxu0 %vm4649_vm8, %v30034_v53  ;;  %v18567_v53 = vld [vmem:[%s29666_s3 + $0x10] sm:$0xff] }
 0x676   : > { %21941 = vmatmul.mubr.msk.f32.gmra.mrb[88].mxu0 %vm4649_vm8, %v30035_v19  ;;  %v18568_v19 = vld [vmem:[%s29666_s3 + $0x18] sm:$0xff] }
 0x677   : > { %21943 = vmatprep.mubr.msk.f32.mxu0 %vm4649_vm8, %v30036_v61  ;;  %v23016_v61 = vpack.c.bf16 %v18568_v19, %v18567_v53 }
 0x679   : > { %23017 = vmatprep.subr.bf16.mxu1 %v23016_v61 }
 0x67a   : > { %21944 = vmatmul.mubr.msk.f32.gmra.mrb[90].mxu0 %vm4649_vm8, %v30037_v51  ;;  %23019 = vmatpush3.bf16.msra.mxu1 %v23016_v61 }
 0x67b   : > { %21946 = vmatprep.mubr.msk.f32.mxu0 %vm4649_vm8, %v30038_v29 }
 0x67e   : > { %21947 = vmatmul.mubr.msk.f32.gmra.mrb[92].mxu0 %vm4649_vm8, %v30039_v4 }
 0x67f   : > { %21949 = vmatprep.mubr.msk.f32.mxu0 %vm4649_vm8, %v7383_v38 }
 0x682   : > { %21950 = vmatmul.mubr.msk.f32.gmra.mrb[94].mxu0 %vm4649_vm8, %v7384_v16 }
 0x683   : > { %21956 = vmatprep.mubr.msk.f32.mxu0 %vm4649_vm8, %v30040_v37 }
 0x686   : > { %21957 = vmatmul.mubr.msk.f32.vlgmr.msra.gmra.mrb[64].mxu0 %vm4649_vm8, %v30041_v32 }
 0x687   : > { %21959 = vmatprep.mubr.msk.f32.mxu0 %vm4649_vm8, %v30042_v5 }
 0x68a   : > { %21960 = vmatmul.mubr.msk.f32.gmra.mrb[66].mxu0 %vm4649_vm8, %v30043_v54 }
 0x68b   : > { %21962 = vmatprep.mubr.msk.f32.mxu0 %vm4649_vm8, %v30044_v58 }
 0x68e   : > { %21963 = vmatmul.mubr.msk.f32.gmra.mrb[68].mxu0 %vm4649_vm8, %v30045_v62 }
 0x68f   : > { %21965 = vmatprep.mubr.msk.f32.mxu0 %vm4649_vm8, %v30046_v12 }
 0x692   : > { %21966 = vmatmul.mubr.msk.f32.gmra.mrb[70].mxu0 %vm4649_vm8, %v30047_v13 }
 0x693   : > { %21968 = vmatprep.mubr.msk.f32.mxu0 %vm4649_vm8, %v30048_v41 }
 0x696   : > { %21969 = vmatmul.mubr.msk.f32.gmra.mrb[72].mxu0 %vm4649_vm8, %v30049_v15 }
 0x697   : > { %21971 = vmatprep.mubr.msk.f32.mxu0 %vm4649_vm8, %v30050_v20 }
 0x69a   : > { %21972 = vmatmul.mubr.msk.f32.gmra.mrb[74].mxu0 %vm4649_vm8, %v30051_v36 }
 0x69b   : > { %21974 = vmatprep.mubr.msk.f32.mxu0 %vm4649_vm8, %v30052_v25 }
 0x69e   : > { %21975 = vmatmul.mubr.msk.f32.gmra.mrb[76].mxu0 %vm4649_vm8, %v30053_v40 }
 0x69f   : > { %21977 = vmatprep.mubr.msk.f32.mxu0 %vm4649_vm8, %v30054_v30 }
 0x6a2   : > { %21978 = vmatmul.mubr.msk.f32.gmra.mrb[78].mxu0 %vm4649_vm8, %v30055_v43 }
 0x6a3   : > { %21980 = vmatprep.mubr.msk.f32.mxu0 %vm4649_vm8, %v30056_v44 }
 0x6a6   : > { %21981 = vmatmul.mubr.msk.f32.gmra.mrb[80].mxu0 %vm4649_vm8, %v30057_v14 }
 0x6a7   : > { %21983 = vmatprep.mubr.msk.f32.mxu0 %vm4649_vm8, %v30024_v31 }
 0x6aa   : > { %21984 = vmatmul.mubr.msk.f32.gmra.mrb[82].mxu0 %vm4649_vm8, %v30025_v60 }
 0x6ab   : > { %21986 = vmatprep.mubr.msk.f32.mxu0 %vm4649_vm8, %v30058_v22 }
 0x6ae   : > { %21987 = vmatmul.mubr.msk.f32.gmra.mrb[84].mxu0 %vm4649_vm8, %v30027_v42 }
 0x6af   : > { %21989 = vmatprep.mubr.msk.f32.mxu0 %vm4649_vm8, %v30059_v48 }
 0x6b2   : > { %21990 = vmatmul.mubr.msk.f32.gmra.mrb[86].mxu0 %vm4649_vm8, %v30029_v34 }
 0x6b3   : > { %21992 = vmatprep.mubr.msk.f32.mxu0 %vm4649_vm8, %v30060_v26 }
 0x6b6   : > { %21993 = vmatmul.mubr.msk.f32.gmra.mrb[88].mxu0 %vm4649_vm8, %v30061_v2 }
 0x6b7   : > { %21995 = vmatprep.mubr.msk.f32.mxu0 %vm4649_vm8, %v26562_v57 }
 0x6ba   : > { %21996 = vmatmul.mubr.msk.f32.gmra.mrb[90].mxu0 %vm4649_vm8, %v30062_v23 }
 0x6bb   : > { %21998 = vmatprep.mubr.msk.f32.mxu0 %vm4649_vm8, %v26797_v63 }
 0x6be   : > { %21999 = vmatmul.mubr.msk.f32.gmra.mrb[92].mxu0 %vm4649_vm8, %v26801_v50 }
 0x6bf   : > { %22001 = vmatprep.mubr.msk.f32.mxu0 %vm4649_vm8, %v7774_v6 }
 0x6c2   : > { %22002 = vmatmul.mubr.msk.f32.gmra.mrb[94].mxu0 %vm4649_vm8, %v7775_v7 }
 0x759   : > { %v21958_v27 = vpop.f32.mrb[64].mxu0 }
 0x75a   : > { %v23580_v28 = vadd.f32 %v21958_v27, %v27012_v24  ;;  %v7944_v56 = vpop.f32.mrb[65].mxu0 }
 0x75b   : > { %v23581_v3 = vadd.f32 %v27012_v24, %v7944_v56 }
 0x75c   : > { %v8168_v10 = vmul.f32 0.2, %v23580_v28  ;;  %vm8136_vm8 = vcmp.ge.f32.partialorder %v23580_v28, 0.0 }
 0x75d   : > { %v21961_v35 = vpop.f32.mrb[66].mxu0  ;;  %v8167_v17 = vmul.f32 0.2, %v23581_v3  ;;  %vm8135_vm3 = vcmp.ge.f32.partialorder %v23581_v3, 0.0 }
 0x75e   : > { %v23582_v18 = vadd.f32 %v21961_v35, %v27012_v24  ;;  %v7954_v31 = vpop.f32.mrb[67].mxu0  ;;  %v8200_v57 = vsel %vm8136_vm8, %v23580_v28, %v8168_v10 }
 0x75f   : > { %8265 = vrot.lane.b32.xlu1 %v8200_v57, %s24805_s15  ;;  %v23583_v8 = vadd.f32 %v27012_v24, %v7954_v31  ;;  %v8199_v39 = vsel %vm8135_vm3, %v23581_v3, %v8167_v17 }
 0x760   : > { %v8170_v0 = vmul.f32 0.2, %v23582_v18  ;;  %vm8138_vm4 = vcmp.ge.f32.partialorder %v23582_v18, 0.0 }
 0x761   : > { %v21964_v9 = vpop.f32.mrb[68].mxu0  ;;  %v8169_v60 = vmul.f32 0.2, %v23583_v8  ;;  %vm8137_vm6 = vcmp.ge.f32.partialorder %v23583_v8, 0.0 }
 0x762   : > { %v7964_v55 = vpop.f32.mrb[69].mxu0  ;;  %v23584_v63 = vadd.f32 %v21964_v9, %v27012_v24  ;;  %v8202_v50 = vsel %vm8138_vm4, %v23582_v18, %v8170_v0 }
 0x763   : > { %8263 = vrot.lane.b32.xlu1 %v8199_v39, %s24805_s15  ;;  %v23585_v52 = vadd.f32 %v27012_v24, %v7964_v55  ;;  %v8201_v21 = vsel %vm8137_vm6, %v23583_v8, %v8169_v60 }
 0x764   : > { %v8172_v59 = vmul.f32 0.2, %v23584_v63  ;;  %vm8140_vm9 = vcmp.ge.f32.partialorder %v23584_v63, 0.0 }
 0x765   : > { %v21967_v1 = vpop.f32.mrb[70].mxu0  ;;  %v8171_v29 = vmul.f32 0.2, %v23585_v52  ;;  %vm8139_vm10 = vcmp.ge.f32.partialorder %v23585_v52, 0.0 }
 0x766   : > { %v7974_v42 = vpop.f32.mrb[71].mxu0  ;;  %v23586_v38 = vadd.f32 %v21967_v1, %v27012_v24  ;;  %v8204_v37 = vsel %vm8140_vm9, %v23584_v63, %v8172_v59 }
 0x767   : > { %8269 = vrot.lane.b32.xlu1 %v8202_v50, %s24805_s15  ;;  %v23587_v5 = vadd.f32 %v27012_v24, %v7974_v42  ;;  %v8203_v13 = vsel %vm8139_vm10, %v23585_v52, %v8171_v29 }
 0x768   : > { %v8174_v58 = vmul.f32 0.2, %v23586_v38  ;;  %vm8142_vm12 = vcmp.ge.f32.partialorder %v23586_v38, 0.0 }
 0x769   : > { %v21970_v34 = vpop.f32.mrb[72].mxu0  ;;  %v8173_v20 = vmul.f32 0.2, %v23587_v5  ;;  %vm8141_vm14 = vcmp.ge.f32.partialorder %v23587_v5, 0.0 }
 0x76a   : > { %v7984_v49 = vpop.f32.mrb[73].mxu0  ;;  %v23588_v25 = vadd.f32 %v21970_v34, %v27012_v24  ;;  %v8206_v43 = vsel %vm8142_vm12, %v23586_v38, %v8174_v58 }
 0x76b   : > { %8267 = vrot.lane.b32.xlu1 %v8201_v21, %s24805_s15  ;;  %v23589_v22 = vadd.f32 %v27012_v24, %v7984_v49  ;;  %v8205_v6 = vsel %vm8141_vm14, %v23587_v5, %v8173_v20 }
 0x76c   : > { %v8176_v26 = vmul.f32 0.2, %v23588_v25  ;;  %vm8144_vm0 = vcmp.ge.f32.partialorder %v23588_v25, 0.0 }
 0x76d   : > { %v21973_v51 = vpop.f32.mrb[74].mxu0  ;;  %v8175_v47 = vmul.f32 0.2, %v23589_v22  ;;  %vm8143_vm8 = vcmp.ge.f32.partialorder %v23589_v22, 0.0 }
 0x76e   : > { %v23590_v4 = vadd.f32 %v21973_v51, %v27012_v24  ;;  %v7994_v16 = vpop.f32.mrb[75].mxu0  ;;  %v8208_v28 = vsel %vm8144_vm0, %v23588_v25, %v8176_v26 }
 0x76f   : > { %8273 = vrot.lane.b32.xlu1 %v8204_v37, %s24805_s15  ;;  %v23591_v27 = vadd.f32 %v27012_v24, %v7994_v16  ;;  %v8207_v35 = vsel %vm8143_vm8, %v23589_v22, %v8175_v47 }
 0x770   : > { %v8178_v32 = vmul.f32 0.2, %v23590_v4  ;;  %vm8146_vm11 = vcmp.ge.f32.partialorder %v23590_v4, 0.0 }
 0x771   : > { %v21976_v54 = vpop.f32.mrb[76].mxu0  ;;  %v8177_v17 = vmul.f32 0.2, %v23591_v27  ;;  %vm8145_vm4 = vcmp.ge.f32.partialorder %v23591_v27, 0.0 }
 0x772   : > { %v23592_v62 = vadd.f32 %v21976_v54, %v27012_v24  ;;  %v8004_v12 = vpop.f32.mrb[77].mxu0  ;;  %v8210_v41 = vsel %vm8146_vm11, %v23590_v4, %v8178_v32 }
 0x773   : > { %8271 = vrot.lane.b32.xlu1 %v8203_v13, %s24805_s15  ;;  %8285 = vrot.lane.b32.xlu0 %v8210_v41, %s24805_s15  ;;  %v23593_v18 = vadd.f32 %v27012_v24, %v8004_v12  ;;  %v8209_v63 = vsel %vm8145_vm4, %v23591_v27, %v8177_v17 }
 0x774   : > { %v8180_v15 = vmul.f32 0.2, %v23592_v62  ;;  %vm8148_vm13 = vcmp.ge.f32.partialorder %v23592_v62, 0.0 }
 0x775   : > { %v21979_v36 = vpop.f32.mrb[78].mxu0  ;;  %v8179_v39 = vmul.f32 0.2, %v23593_v18  ;;  %vm8147_vm9 = vcmp.ge.f32.partialorder %v23593_v18, 0.0 }
 0x776   : > { %v23594_v40 = vadd.f32 %v21979_v36, %v27012_v24  ;;  %v8014_v30 = vpop.f32.mrb[79].mxu0  ;;  %v8212_v44 = vsel %vm8148_vm13, %v23592_v62, %v8180_v15 }
 0x777   : > { %8277 = vrot.lane.b32.xlu1 %v8206_v43, %s24805_s15  ;;  %8289 = vrot.lane.b32.xlu0 %v8212_v44, %s24805_s15  ;;  %v23595_v8 = vadd.f32 %v27012_v24, %v8014_v30  ;;  %v8211_v19 = vsel %vm8147_vm9, %v23593_v18, %v8179_v39 }
 0x778   : > { %v8182_v14 = vmul.f32 0.2, %v23594_v40  ;;  %vm8150_vm15 = vcmp.ge.f32.partialorder %v23594_v40, 0.0 }
 0x779   : > { %v21982_v48 = vpop.f32.mrb[80].mxu0  ;;  %v8181_v59 = vmul.f32 0.2, %v23595_v8  ;;  %vm8149_vm11 = vcmp.ge.f32.partialorder %v23595_v8, 0.0 }
 0x77a   : > { %v23596_v2 = vadd.f32 %v21982_v48, %v27012_v24  ;;  %v8024_v23 = vpop.f32.mrb[81].mxu0  ;;  %v8214_v7 = vsel %vm8150_vm15, %v23594_v40, %v8182_v14 }
 0x77b   : > { %8275 = vrot.lane.b32.xlu1 %v8205_v6, %s24805_s15  ;;  %8293 = vrot.lane.b32.xlu0 %v8214_v7, %s24805_s15  ;;  %v23597_v52 = vadd.f32 %v27012_v24, %v8024_v23  ;;  %v8213_v16 = vsel %vm8149_vm11, %v23595_v8, %v8181_v59  ;;  %vm8359_vm11 = vcmask 130144  }
 0x77c   : > { %v8184_v33 = vmul.f32 0.2, %v23596_v2  ;;  %vm8152_vm1 = vcmp.ge.f32.partialorder %v23596_v2, 0.0 }
 0x77d   : > { %v21985_v11 = vpop.f32.mrb[82].mxu0  ;;  %v8183_v38 = vmul.f32 0.2, %v23597_v52  ;;  %vm8151_vm13 = vcmp.ge.f32.partialorder %v23597_v52, 0.0 }
 0x77e   : > { %v23598_v45 = vadd.f32 %v21985_v11, %v27012_v24  ;;  %v8034_v46 = vpop.f32.mrb[83].mxu0  ;;  %v8216_v56 = vsel %vm8152_vm1, %v23596_v2, %v8184_v33 }
 0x77f   : > { %8281 = vrot.lane.b32.xlu1 %v8208_v28, %s24805_s15  ;;  %8297 = vrot.lane.b32.xlu0 %v8216_v56, %s24805_s15  ;;  %v23599_v37 = vadd.f32 %v27012_v24, %v8034_v46  ;;  %v8215_v13 = vsel %vm8151_vm13, %v23597_v52, %v8183_v38  ;;  %v18601_v28 = vld [vmem:[%s29666_s3 + $0x20] sm:$0xff]  ;;  %v18602_v56 = vld [vmem:[%s29666_s3 + $0x28] sm:$0xff] }
 0x780   : > { %v8186_v3 = vmul.f32 0.2, %v23598_v45  ;;  %vm8154_vm3 = vcmp.ge.f32.partialorder %v23598_v45, 0.0 }
 0x781   : > { %v21988_v10 = vpop.f32.mrb[84].mxu0  ;;  %v8185_v41 = vmul.f32 0.2, %v23599_v37  ;;  %vm8153_vm15 = vcmp.ge.f32.partialorder %v23599_v37, 0.0 }
 0x782   : > { %v23600_v31 = vadd.f32 %v21988_v10, %v27012_v24  ;;  %v8044_v57 = vpop.f32.mrb[85].mxu0  ;;  %v8218_v9 = vsel %vm8154_vm3, %v23598_v45, %v8186_v3  ;;  %v27095_v3 = vpack.c.bf16 %v18602_v56, %v18601_v28 }
 0x783   : > { %8279 = vrot.lane.b32.xlu1 %v8207_v35, %s24805_s15  ;;  %8301 = vrot.lane.b32.xlu0 %v8218_v9, %s24805_s15  ;;  %v23601_v15 = vadd.f32 %v27012_v24, %v8044_v57  ;;  %v8217_v48 = vsel %vm8153_vm15, %v23599_v37, %v8185_v41 }
 0x784   : > { %v8188_v0 = vmul.f32 0.2, %v23600_v31  ;;  %vm8156_vm6 = vcmp.ge.f32.partialorder %v23600_v31, 0.0  ;;  %23021 = vmatprep.subr.bf16.mxu1 %v27095_v3 }
 0x785   : > { %v21991_v55 = vpop.f32.mrb[86].mxu0  ;;  %v8187_v44 = vmul.f32 0.2, %v23601_v15  ;;  %vm8155_vm1 = vcmp.ge.f32.partialorder %v23601_v15, 0.0 }
 0x786   : > { %v23602_v1 = vadd.f32 %v21991_v55, %v27012_v24  ;;  %v8054_v60 = vpop.f32.mrb[87].mxu0  ;;  %v8220_v42 = vsel %vm8156_vm6, %v23600_v31, %v8188_v0 }
 0x787   : > { %v27058_v50 = vadd.f32 %v27012_v24, %v8054_v60  ;;  %8283 = vrot.lane.b32.xlu1 %v8209_v63, %s24805_s15  ;;  %8305 = vrot.lane.b32.xlu0 %v8220_v42, %s24805_s15  ;;  %v8219_v7 = vsel %vm8155_vm1, %v23601_v15, %v8187_v44 }
 0x788   : > { %v8190_v34 = vmul.f32 0.2, %v23602_v1  ;;  %vm8158_vm10 = vcmp.ge.f32.partialorder %v23602_v1, 0.0 }
 0x789   : > { %v21994_v49 = vpop.f32.mrb[88].mxu0  ;;  %v8189_v6 = vmul.f32 0.2, %v27058_v50  ;;  %vm8157_vm3 = vcmp.ge.f32.partialorder %v27058_v50, 0.0 }
 0x78a   : > { %v23604_v21 = vadd.f32 %v21994_v49, %v27012_v24  ;;  %v8064_v53 = vpop.f32.mrb[89].mxu0  ;;  %v8222_v61 = vsel %vm8158_vm10, %v23602_v1, %v8190_v34 }
 0x78b   : > { %v23605_v51 = vadd.f32 %v27012_v24, %v8064_v53  ;;  %8287 = vrot.lane.b32.xlu1 %v8211_v19, %s24805_s15  ;;  %8309 = vrot.lane.b32.xlu0 %v8222_v61, %s24805_s15 }
 0x78c   : > { %v8192_v29 = vmul.f32 0.2, %v23604_v21  ;;  %vm8160_vm12 = vcmp.ge.f32.partialorder %v23604_v21, 0.0 }
 0x78d   : > { %v21997_v4 = vpop.f32.mrb[90].mxu0  ;;  %v8191_v47 = vmul.f32 0.2, %v23605_v51  ;;  %vm8159_vm4 = vcmp.ge.f32.partialorder %v23605_v51, 0.0 }
 0x78e   : > { %v23606_v32 = vadd.f32 %v21997_v4, %v27012_v24  ;;  %v8074_v5 = vpop.f32.mrb[91].mxu0  ;;  %v8224_v54 = vsel %vm8160_vm12, %v23604_v21, %v8192_v29 }
 0x78f   : > { %v23607_v58 = vadd.f32 %v27012_v24, %v8074_v5  ;;  %8291 = vrot.lane.b32.xlu1 %v8213_v16, %s24805_s15  ;;  %8313 = vrot.lane.b32.xlu0 %v8224_v54, %s24805_s15  ;;  %v8223_v27 = vsel %vm8159_vm4, %v23605_v51, %v8191_v47 }
 0x790   : > { %v8194_v62 = vmul.f32 0.2, %v23606_v32  ;;  %vm8162_vm14 = vcmp.ge.f32.partialorder %v23606_v32, 0.0 }
 0x791   : > { %v22000_v12 = vpop.f32.mrb[92].mxu0  ;;  %v8193_v11 = vmul.f32 0.2, %v23607_v58  ;;  %vm8161_vm6 = vcmp.ge.f32.partialorder %v23607_v58, 0.0 }
 0x792   : > { %v23608_v20 = vadd.f32 %v22000_v12, %v27012_v24  ;;  %v8084_v36 = vpop.f32.mrb[93].mxu0  ;;  %v8226_v25 = vsel %vm8162_vm14, %v23606_v32, %v8194_v62 }
 0x793   : > { %v23609_v40 = vadd.f32 %v27012_v24, %v8084_v36  ;;  %8295 = vrot.lane.b32.xlu1 %v8215_v13, %s24805_s15  ;;  %8317 = vrot.lane.b32.xlu0 %v8226_v25, %s24805_s15  ;;  %v8225_v46 = vsel %vm8161_vm6, %v23607_v58, %v8193_v11 }
 0x794   : > { %v8196_v30 = vmul.f32 0.2, %v23608_v20  ;;  %vm8164_vm0 = vcmp.ge.f32.partialorder %v23608_v20, 0.0 }
 0x795   : > { %v22003_v43 = vpop.f32.mrb[94].mxu0  ;;  %v8195_v45 = vmul.f32 0.2, %v23609_v40  ;;  %vm8163_vm9 = vcmp.ge.f32.partialorder %v23609_v40, 0.0 }
 0x796   : > { %v23610_v14 = vadd.f32 %v22003_v43, %v27012_v24  ;;  %v8094_v22 = vpop.f32.mrb[95].mxu0  ;;  %v8228_v26 = vsel %vm8164_vm0, %v23608_v20, %v8196_v30 }
 0x797   : > { %v23611_v2 = vadd.f32 %v27012_v24, %v8094_v22  ;;  %8299 = vrot.lane.b32.xlu1 %v8217_v48, %s24805_s15  ;;  %8321 = vrot.lane.b32.xlu0 %v8228_v26, %s24805_s15  ;;  %v8221_v24 = vsel %vm8157_vm3, %v27058_v50, %v8189_v6  ;;  %v8227_v35 = vsel %vm8163_vm9, %v23609_v40, %v8195_v45 }
 0x798   : > { %v8198_v23 = vmul.f32 0.2, %v23610_v14  ;;  %vm8166_vm8 = vcmp.ge.f32.partialorder %v23610_v14, 0.0 }
 0x799   : > { %v8197_v10 = vmul.f32 0.2, %v23611_v2  ;;  %vm8165_vm10 = vcmp.ge.f32.partialorder %v23611_v2, 0.0 }
 0x79a   : > { %v8230_v33 = vsel %vm8166_vm8, %v23610_v14, %v8198_v23 }
 0x79b   : > { %8303 = vrot.lane.b32.xlu1 %v8219_v7, %s24805_s15  ;;  %8325 = vrot.lane.b32.xlu0 %v8230_v33, %s24805_s15  ;;  %v8229_v17 = vsel %vm8165_vm10, %v23611_v2, %v8197_v10 }
 0x79f   : > { %8307 = vrot.lane.b32.xlu1 %v8221_v24, %s24805_s15 }
 0x7a3   : > { %8311 = vrot.lane.b32.xlu1 %v8223_v27, %s24805_s15 }
 0x7a7   : > { %8315 = vrot.lane.b32.xlu1 %v8225_v46, %s24805_s15 }
 0x7ab   : > { %8319 = vrot.lane.b32.xlu1 %v8227_v35, %s24805_s15 }
 0x7af   : > { %8323 = vrot.lane.b32.xlu1 %v8229_v17, %s24805_s15  ;;  %v8788_v17 = vld [vmem:[#allocation2 + $0x1] sm:$0xff]  ;;  %s24806_s15 = smov 16  }
 0x7d1   : > { %v8266_v18 = vpop.permute.xlu1 %8265 }
 0x7d2   : > { %8361 = vst.msk [vmem:[#allocation2 + $0x21] sm:$0xff] %vm8359_vm11, %v8266_v18  ;;  %v18635_v18 = vld [vmem:[%s29666_s3 + $0x30] sm:$0xff] }
 0x7d5   : > { %v8264_v31 = vpop.permute.xlu1 %8263 }
 0x7d6   : > { %8360 = vst.msk [vmem:[#allocation2 + $0x19] sm:$0xff] %vm8359_vm11, %v8264_v31  ;;  %v18636_v31 = vld [vmem:[%s29666_s3 + $0x38] sm:$0xff] }
 0x7d9   : > { %v8270_v57 = vpop.permute.xlu1 %8269 }
 0x7da   : > { %8363 = vst.msk [vmem:[#allocation2 + $0x39] sm:$0xff] %vm8359_vm11, %v8270_v57  ;;  %v8789_v57 = vld [vmem:[#allocation2 + $0x9] sm:$0xff] }
 0x7dd   : > { %v8268_v9 = vpop.permute.xlu1 %8267  ;;  %v27103_v0 = vld [vmem:[#allocation2 + $0x18] sm:$0xff]  ;;  %v27105_v8 = vld [vmem:[#allocation2 + $0x20] sm:$0xff] }
 0x7de   : > { %22011 = vmatprep.mubr.msk.f32.mxu1 %vm8434_vm7, %v27103_v0  ;;  %8362 = vst.msk [vmem:[#allocation2 + $0x31] sm:$0xff] %vm8359_vm11, %v8268_v9  ;;  %v27259_v9 = vpack.c.bf16 %v18636_v31, %v18635_v18  ;;  %v18669_v31 = vld [vmem:[%s29666_s3 + $0x40] sm:$0xff] }
 0x7df   : > { %22012 = vmatmul.mubr.msk.f32.gmra.mrb[34].mxu1 %vm8434_vm7, %v27105_v8 }
 0x7e1   : > { %v8274_v55 = vpop.permute.xlu1 %8273 }
 0x7e2   : > { %8365 = vst.msk [vmem:[#allocation2 + $0x51] sm:$0xff] %vm8359_vm11, %v8274_v55  ;;  %v27262_v55 = vld [vmem:[#allocation2 + $0x19] sm:$0xff] }
 0x7e5   : > { %v8272_v39 = vpop.permute.xlu1 %8271  ;;  %v8286_v1 = vpop.permute.xlu0 %8285  ;;  %v27113_v60 = vld [vmem:[#allocation2 + $0x30] sm:$0xff]  ;;  %v27115_v63 = vld [vmem:[#allocation2 + $0x38] sm:$0xff] }
 0x7e6   : > { %8364 = vst.msk [vmem:[#allocation2 + $0x49] sm:$0xff] %vm8359_vm11, %v8272_v39  ;;  %8371 = vst.msk [vmem:[#allocation2 + $0x99] sm:$0xff] %vm8359_vm11, %v8286_v1  ;;  %22014 = vmatprep.mubr.msk.f32.mxu1 %vm8434_vm7, %v27113_v60  ;;  %v27268_v39 = vld [vmem:[#allocation2 + $0x21] sm:$0xff]  ;;  %v27272_v1 = vld [vmem:[#allocation2 + $0x31] sm:$0xff] }
 0x7e7   : > { %22015 = vmatmul.mubr.msk.f32.gmra.mrb[36].mxu1 %vm8434_vm7, %v27115_v63 }
 0x7e9   : > { %v8278_v42 = vpop.permute.xlu1 %8277  ;;  %v8290_v50 = vpop.permute.xlu0 %8289 }
 0x7ea   : > { %8367 = vst.msk [vmem:[#allocation2 + $0x69] sm:$0xff] %vm8359_vm11, %v8278_v42  ;;  %8373 = vst.msk [vmem:[#allocation2 + $0xb1] sm:$0xff] %vm8359_vm11, %v8290_v50  ;;  %v27276_v42 = vld [vmem:[#allocation2 + $0x39] sm:$0xff]  ;;  %v27284_v50 = vld [vmem:[#allocation2 + $0x51] sm:$0xff] }
 0x7ed   : > { %v8276_v34 = vpop.permute.xlu1 %8275  ;;  %v8294_v59 = vpop.permute.xlu0 %8293  ;;  %v27125_v52 = vld [vmem:[#allocation2 + $0x48] sm:$0xff]  ;;  %v27127_v49 = vld [vmem:[#allocation2 + $0x50] sm:$0xff] }
 0x7ee   : > { %8366 = vst.msk [vmem:[#allocation2 + $0x61] sm:$0xff] %vm8359_vm11, %v8276_v34  ;;  %8375 = vst.msk [vmem:[#allocation2 + $0xc9] sm:$0xff] %vm8359_vm11, %v8294_v59  ;;  %22017 = vmatprep.mubr.msk.f32.mxu1 %vm8434_vm7, %v27125_v52 }
 0x7ef   : > { %22018 = vmatmul.mubr.msk.f32.gmra.mrb[38].mxu1 %vm8434_vm7, %v27127_v49 }
 0x7f1   : > { %v8282_v21 = vpop.permute.xlu1 %8281  ;;  %v8298_v53 = vpop.permute.xlu0 %8297  ;;  %v27292_v59 = vld [vmem:[#allocation2 + $0x69] sm:$0xff] }
 0x7f2   : > { %8369 = vst.msk [vmem:[#allocation2 + $0x81] sm:$0xff] %vm8359_vm11, %v8282_v21  ;;  %8377 = vst.msk [vmem:[#allocation2 + $0xe1] sm:$0xff] %vm8359_vm11, %v8298_v53 }
 0x7f5   : > { %v8280_v19 = vpop.permute.xlu1 %8279  ;;  %v8302_v61 = vpop.permute.xlu0 %8301  ;;  %v27137_v51 = vld [vmem:[#allocation2 + $0x60] sm:$0xff]  ;;  %v27139_v29 = vld [vmem:[#allocation2 + $0x68] sm:$0xff] }
 0x7f6   : > { %8368 = vst.msk [vmem:[#allocation2 + $0x79] sm:$0xff] %vm8359_vm11, %v8280_v19  ;;  %8379 = vst.msk [vmem:[#allocation2 + $0xf9] sm:$0xff] %vm8359_vm11, %v8302_v61  ;;  %22020 = vmatprep.mubr.msk.f32.mxu1 %vm8434_vm7, %v27137_v51  ;;  %v27288_v34 = vld [vmem:[#allocation2 + $0x61] sm:$0xff]  ;;  %v27308_v61 = vld [vmem:[#allocation2 + $0x99] sm:$0xff] }
 0x7f7   : > { %22021 = vmatmul.mubr.msk.f32.gmra.mrb[40].mxu1 %vm8434_vm7, %v27139_v29 }
 0x7f9   : > { %v8284_v38 = vpop.permute.xlu1 %8283  ;;  %v8306_v4 = vpop.permute.xlu0 %8305  ;;  %v27300_v53 = vld [vmem:[#allocation2 + $0x81] sm:$0xff] }
 0x7fa   : > { %8370 = vst.msk [vmem:[#allocation2 + $0x91] sm:$0xff] %vm8359_vm11, %v8284_v38  ;;  %8381 = vst.msk [vmem:[#allocation2 + $0x111] sm:$0xff] %vm8359_vm11, %v8306_v4  ;;  %v27316_v4 = vld [vmem:[#allocation2 + $0xb1] sm:$0xff] }
 0x7fd   : > { %v8288_v16 = vpop.permute.xlu1 %8287  ;;  %v8310_v37 = vpop.permute.xlu0 %8309  ;;  %v27149_v32 = vld [vmem:[#allocation2 + $0x78] sm:$0xff]  ;;  %v27151_v5 = vld [vmem:[#allocation2 + $0x80] sm:$0xff] }
 0x7fe   : > { %8372 = vst.msk [vmem:[#allocation2 + $0xa9] sm:$0xff] %vm8359_vm11, %v8288_v16  ;;  %8383 = vst.msk [vmem:[#allocation2 + $0x129] sm:$0xff] %vm8359_vm11, %v8310_v37  ;;  %22023 = vmatprep.mubr.msk.f32.mxu1 %vm8434_vm7, %v27149_v32  ;;  %v27296_v21 = vld [vmem:[#allocation2 + $0x79] sm:$0xff]  ;;  %v27324_v37 = vld [vmem:[#allocation2 + $0xc9] sm:$0xff] }
 0x7ff   : > { %22024 = vmatmul.mubr.msk.f32.gmra.mrb[42].mxu1 %vm8434_vm7, %v27151_v5 }
 0x801   : > { %v8292_v54 = vpop.permute.xlu1 %8291  ;;  %v8314_v58 = vpop.permute.xlu0 %8313  ;;  %v27159_v62 = vld [vmem:[#allocation2 + $0x90] sm:$0xff]  ;;  %v27161_v12 = vld [vmem:[#allocation2 + $0x98] sm:$0xff] }
 0x802   : > { %8374 = vst.msk [vmem:[#allocation2 + $0xc1] sm:$0xff] %vm8359_vm11, %v8292_v54  ;;  %8385 = vst.msk [vmem:[#allocation2 + $0x141] sm:$0xff] %vm8359_vm11, %v8314_v58  ;;  %22026 = vmatprep.mubr.msk.f32.mxu1 %vm8434_vm7, %v27159_v62  ;;  %v27304_v19 = vld [vmem:[#allocation2 + $0x91] sm:$0xff]  ;;  %v27332_v58 = vld [vmem:[#allocation2 + $0xe1] sm:$0xff] }
 0x803   : > { %22027 = vmatmul.mubr.msk.f32.gmra.mrb[44].mxu1 %vm8434_vm7, %v27161_v12 }
 0x805   : > { %v8296_v13 = vpop.permute.xlu1 %8295  ;;  %v8318_v41 = vpop.permute.xlu0 %8317  ;;  %v27169_v15 = vld [vmem:[#allocation2 + $0xa8] sm:$0xff]  ;;  %v27171_v20 = vld [vmem:[#allocation2 + $0xb0] sm:$0xff] }
 0x806   : > { %8376 = vst.msk [vmem:[#allocation2 + $0xd9] sm:$0xff] %vm8359_vm11, %v8296_v13  ;;  %8387 = vst.msk [vmem:[#allocation2 + $0x159] sm:$0xff] %vm8359_vm11, %v8318_v41  ;;  %22029 = vmatprep.mubr.msk.f32.mxu1 %vm8434_vm7, %v27169_v15  ;;  %v27312_v38 = vld [vmem:[#allocation2 + $0xa9] sm:$0xff]  ;;  %v27340_v41 = vld [vmem:[#allocation2 + $0xf9] sm:$0xff] }
 0x807   : > { %22030 = vmatmul.mubr.msk.f32.gmra.mrb[46].mxu1 %vm8434_vm7, %v27171_v20 }
 0x809   : > { %v8300_v36 = vpop.permute.xlu1 %8299  ;;  %v8322_v25 = vpop.permute.xlu0 %8321  ;;  %v27179_v40 = vld [vmem:[#allocation2 + $0xc0] sm:$0xff]  ;;  %v27181_v30 = vld [vmem:[#allocation2 + $0xc8] sm:$0xff] }
 0x80a   : > { %8378 = vst.msk [vmem:[#allocation2 + $0xf1] sm:$0xff] %vm8359_vm11, %v8300_v36  ;;  %8389 = vst.msk [vmem:[#allocation2 + $0x171] sm:$0xff] %vm8359_vm11, %v8322_v25  ;;  %22032 = vmatprep.mubr.msk.f32.mxu1 %vm8434_vm7, %v27179_v40  ;;  %v27320_v16 = vld [vmem:[#allocation2 + $0xc1] sm:$0xff]  ;;  %v27348_v25 = vld [vmem:[#allocation2 + $0x111] sm:$0xff] }
 0x80b   : > { %22033 = vmatmul.mubr.msk.f32.gmra.mrb[48].mxu1 %vm8434_vm7, %v27181_v30 }
 0x80d   : > { %v8304_v43 = vpop.permute.xlu1 %8303  ;;  %v8326_v44 = vpop.permute.xlu0 %8325  ;;  %v27189_v14 = vld [vmem:[#allocation2 + $0xd8] sm:$0xff]  ;;  %v27191_v22 = vld [vmem:[#allocation2 + $0xe0] sm:$0xff] }
 0x80e   : > { %8380 = vst.msk [vmem:[#allocation2 + $0x109] sm:$0xff] %vm8359_vm11, %v8304_v43  ;;  %8391 = vst.msk [vmem:[#allocation2 + $0x189] sm:$0xff] %vm8359_vm11, %v8326_v44  ;;  %22035 = vmatprep.mubr.msk.f32.mxu1 %vm8434_vm7, %v27189_v14  ;;  %v27328_v54 = vld [vmem:[#allocation2 + $0xd9] sm:$0xff]  ;;  %v27356_v44 = vld [vmem:[#allocation2 + $0x129] sm:$0xff] }
 0x80f   : > { %22036 = vmatmul.mubr.msk.f32.gmra.mrb[50].mxu1 %vm8434_vm7, %v27191_v22  ;;  %30063 = vst [vmem:[#allocation31_spill] sm:$0xff] %v27356_v44 }
 0x811   : > { %v8308_v48 = vpop.permute.xlu1 %8307  ;;  %v27199_v26 = vld [vmem:[#allocation2 + $0xf0] sm:$0xff]  ;;  %v27201_v2 = vld [vmem:[#allocation2 + $0xf8] sm:$0xff] }
 0x812   : > { %8382 = vst.msk [vmem:[#allocation2 + $0x121] sm:$0xff] %vm8359_vm11, %v8308_v48  ;;  %22038 = vmatprep.mubr.msk.f32.mxu1 %vm8434_vm7, %v27199_v26  ;;  %v27336_v13 = vld [vmem:[#allocation2 + $0xf1] sm:$0xff] }
 0x813   : > { %22039 = vmatmul.mubr.msk.f32.gmra.mrb[52].mxu1 %vm8434_vm7, %v27201_v2  ;;  %v27380_v18 = vld [vmem:[#allocation2 + $0x171] sm:$0xff] }
 0x814   : > { %30069 = vst [vmem:[#allocation9_spill] sm:$0xff] %v27380_v18 }
 0x815   : > { %v8312_v23 = vpop.permute.xlu1 %8311  ;;  %v27208_v6 = vld [vmem:[#allocation2 + $0x108] sm:$0xff]  ;;  %v27210_v7 = vld [vmem:[#allocation2 + $0x110] sm:$0xff] }
 0x816   : > { %8384 = vst.msk [vmem:[#allocation2 + $0x139] sm:$0xff] %vm8359_vm11, %v8312_v23  ;;  %22041 = vmatprep.mubr.msk.f32.mxu1 %vm8434_vm7, %v27208_v6  ;;  %v27344_v36 = vld [vmem:[#allocation2 + $0x109] sm:$0xff]  ;;  %v27364_v23 = vld [vmem:[#allocation2 + $0x141] sm:$0xff] }
 0x817   : > { %22042 = vmatmul.mubr.msk.f32.gmra.mrb[54].mxu1 %vm8434_vm7, %v27210_v7  ;;  %30065 = vst [vmem:[#allocation34_spill] sm:$0xff] %v27364_v23 }
 0x819   : > { %v8316_v33 = vpop.permute.xlu1 %8315  ;;  %v27217_v47 = vld [vmem:[#allocation2 + $0x120] sm:$0xff]  ;;  %v27219_v24 = vld [vmem:[#allocation2 + $0x128] sm:$0xff] }
 0x81a   : > { %8386 = vst.msk [vmem:[#allocation2 + $0x151] sm:$0xff] %vm8359_vm11, %v8316_v33  ;;  %22044 = vmatprep.mubr.msk.f32.mxu1 %vm8434_vm7, %v27217_v47  ;;  %v27352_v43 = vld [vmem:[#allocation2 + $0x121] sm:$0xff] }
 0x81b   : > { %22045 = vmatmul.mubr.msk.f32.gmra.mrb[56].mxu1 %vm8434_vm7, %v27219_v24 }
 0x81d   : > { %v8320_v11 = vpop.permute.xlu1 %8319  ;;  %v27226_v27 = vld [vmem:[#allocation2 + $0x138] sm:$0xff]  ;;  %v27228_v45 = vld [vmem:[#allocation2 + $0x140] sm:$0xff] }
 0x81e   : > { %8388 = vst.msk [vmem:[#allocation2 + $0x169] sm:$0xff] %vm8359_vm11, %v8320_v11  ;;  %22047 = vmatprep.mubr.msk.f32.mxu1 %vm8434_vm7, %v27226_v27  ;;  %v27360_v48 = vld [vmem:[#allocation2 + $0x139] sm:$0xff] }
 0x81f   : > { %22048 = vmatmul.mubr.msk.f32.gmra.mrb[58].mxu1 %vm8434_vm7, %v27228_v45  ;;  %30064 = vst [vmem:[#allocation32_spill] sm:$0xff] %v27360_v48  ;;  %v27372_v11 = vld [vmem:[#allocation2 + $0x159] sm:$0xff] }
 0x820   : > { %30067 = vst [vmem:[#allocation6_spill] sm:$0xff] %v27372_v11 }
 0x821   : > { %v8324_v46 = vpop.permute.xlu1 %8323  ;;  %v27235_v28 = vld [vmem:[#allocation2 + $0x150] sm:$0xff]  ;;  %v27237_v56 = vld [vmem:[#allocation2 + $0x158] sm:$0xff] }
 0x822   : > { %8390 = vst.msk [vmem:[#allocation2 + $0x181] sm:$0xff] %vm8359_vm11, %v8324_v46  ;;  %22050 = vmatprep.mubr.msk.f32.mxu1 %vm8434_vm7, %v27235_v28  ;;  %v27368_v33 = vld [vmem:[#allocation2 + $0x151] sm:$0xff] }
 0x823   : > { %22051 = vmatmul.mubr.msk.f32.gmra.mrb[60].mxu1 %vm8434_vm7, %v27237_v56  ;;  %30066 = vst [vmem:[#allocation36_spill] sm:$0xff] %v27368_v33 }
 0x825   : > { %v27244_v10 = vld [vmem:[#allocation2 + $0x168] sm:$0xff]  ;;  %v27246_v35 = vld [vmem:[#allocation2 + $0x170] sm:$0xff] }
 0x826   : > { %22053 = vmatprep.mubr.msk.f32.mxu1 %vm8434_vm7, %v27244_v10  ;;  %v27376_v46 = vld [vmem:[#allocation2 + $0x169] sm:$0xff] }
 0x827   : > { %22054 = vmatmul.mubr.msk.f32.gmra.mrb[62].mxu1 %vm8434_vm7, %v27246_v35  ;;  %30068 = vst [vmem:[#allocation7_spill] sm:$0xff] %v27376_v46 }
 0x828   : > { %22060 = vmatprep.mubr.msk.f32.mxu1 %vm8434_vm7, %v8788_v17  ;;  %v9176_v17 = vld [vmem:[#allocation2 + $0x2] sm:$0xff] }
 0x82b   : > { %22061 = vmatmul.mubr.msk.f32.vlgmr.msra.gmra.mrb[32].mxu1 %vm8434_vm7, %v8789_v57  ;;  %v18670_v57 = vld [vmem:[%s29666_s3 + $0x48] sm:$0xff] }
 0x82c   : > { %23023 = vmatpush3.bf16.msra.mxu1 %v27095_v3  ;;  %22063 = vmatprep.mubr.msk.f32.mxu1 %vm8434_vm7, %v27262_v55  ;;  %v27280_v3 = vld [vmem:[#allocation2 + $0x49] sm:$0xff] }
 0x82d   : > { %23025 = vmatprep.subr.bf16.mxu1 %v27259_v9 }
 0x82f   : > { %22064 = vmatmul.mubr.msk.f32.gmra.mrb[34].mxu1 %vm8434_vm7, %v27268_v39 }
 0x830   : > { %22066 = vmatprep.mubr.msk.f32.mxu1 %vm8434_vm7, %v27272_v1 }
 0x833   : > { %22067 = vmatmul.mubr.msk.f32.gmra.mrb[36].mxu1 %vm8434_vm7, %v27276_v42 }
 0x834   : > { %22069 = vmatprep.mubr.msk.f32.mxu1 %vm8434_vm7, %v27280_v3 }
 0x837   : > { %22070 = vmatmul.mubr.msk.f32.gmra.mrb[38].mxu1 %vm8434_vm7, %v27284_v50 }
 0x838   : > { %22072 = vmatprep.mubr.msk.f32.mxu1 %vm8434_vm7, %v27288_v34 }
 0x83b   : > { %22073 = vmatmul.mubr.msk.f32.gmra.mrb[40].mxu1 %vm8434_vm7, %v27292_v59 }
 0x83c   : > { %22075 = vmatprep.mubr.msk.f32.mxu1 %vm8434_vm7, %v27296_v21 }
 0x83f   : > { %22076 = vmatmul.mubr.msk.f32.gmra.mrb[42].mxu1 %vm8434_vm7, %v27300_v53 }
 0x840   : > { %22078 = vmatprep.mubr.msk.f32.mxu1 %vm8434_vm7, %v27304_v19 }
 0x843   : > { %22079 = vmatmul.mubr.msk.f32.gmra.mrb[44].mxu1 %vm8434_vm7, %v27308_v61 }
 0x844   : > { %22081 = vmatprep.mubr.msk.f32.mxu1 %vm8434_vm7, %v27312_v38 }
 0x847   : > { %22082 = vmatmul.mubr.msk.f32.gmra.mrb[46].mxu1 %vm8434_vm7, %v27316_v4 }
 0x848   : > { %22084 = vmatprep.mubr.msk.f32.mxu1 %vm8434_vm7, %v27320_v16 }
 0x84b   : > { %22085 = vmatmul.mubr.msk.f32.gmra.mrb[48].mxu1 %vm8434_vm7, %v27324_v37 }
 0x84c   : > { %22087 = vmatprep.mubr.msk.f32.mxu1 %vm8434_vm7, %v27328_v54 }
 0x84f   : > { %22088 = vmatmul.mubr.msk.f32.gmra.mrb[50].mxu1 %vm8434_vm7, %v27332_v58 }
 0x850   : > { %22090 = vmatprep.mubr.msk.f32.mxu1 %vm8434_vm7, %v27336_v13 }
 0x853   : > { %22091 = vmatmul.mubr.msk.f32.gmra.mrb[52].mxu1 %vm8434_vm7, %v27340_v41 }
 0x854   : > { %22093 = vmatprep.mubr.msk.f32.mxu1 %vm8434_vm7, %v27344_v36 }
 0x857   : > { %22094 = vmatmul.mubr.msk.f32.gmra.mrb[54].mxu1 %vm8434_vm7, %v27348_v25 }
 0x858   : > { %22096 = vmatprep.mubr.msk.f32.mxu1 %vm8434_vm7, %v27352_v43 }
 0x85b   : > { %22097 = vmatmul.mubr.msk.f32.gmra.mrb[56].mxu1 %vm8434_vm7, %v27356_v44 }
 0x85c   : > { %22099 = vmatprep.mubr.msk.f32.mxu1 %vm8434_vm7, %v27360_v48 }
 0x85f   : > { %22100 = vmatmul.mubr.msk.f32.gmra.mrb[58].mxu1 %vm8434_vm7, %v27364_v23  ;;  %v27400_v23 = vld [vmem:[#allocation2 + $0x22] sm:$0xff] }
 0x860   : > { %22102 = vmatprep.mubr.msk.f32.mxu1 %vm8434_vm7, %v27368_v33  ;;  %v27391_v33 = vpack.c.bf16 %v18670_v57, %v18669_v31  ;;  %v27416_v31 = vld [vmem:[#allocation2 + $0x52] sm:$0xff]  ;;  %v27420_v57 = vld [vmem:[#allocation2 + $0x62] sm:$0xff] }
 0x861   : > { %30073 = vst [vmem:[#allocation8_spill] sm:$0xff] %v27416_v31  ;;  %30074 = vst [vmem:[#allocation40_spill] sm:$0xff] %v27420_v57 }
 0x863   : > { %22103 = vmatmul.mubr.msk.f32.gmra.mrb[60].mxu1 %vm8434_vm7, %v27372_v11  ;;  %v9177_v11 = vld [vmem:[#allocation2 + $0xa] sm:$0xff] }
 0x864   : > { %22105 = vmatprep.mubr.msk.f32.mxu1 %vm8434_vm7, %v27376_v46  ;;  %v27394_v46 = vld [vmem:[#allocation2 + $0x1a] sm:$0xff] }
 0x867   : > { %22106 = vmatmul.mubr.msk.f32.gmra.mrb[62].mxu1 %vm8434_vm7, %v27380_v18 }
 0x868   : > { %22112 = vmatprep.mubr.msk.f32.mxu1 %vm8434_vm7, %v9176_v17  ;;  %v27404_v17 = vld [vmem:[#allocation2 + $0x32] sm:$0xff] }
 0x869   : > { %30070 = vst [vmem:[#allocation10_spill] sm:$0xff] %v27404_v17 }
 0x86b   : > { %22113 = vmatmul.mubr.msk.f32.vlgmr.msra.gmra.mrb[32].mxu1 %vm8434_vm7, %v9177_v11  ;;  %v27408_v11 = vld [vmem:[#allocation2 + $0x3a] sm:$0xff] }
 0x86c   : > { %23027 = vmatpush3.bf16.msra.mxu1 %v27259_v9  ;;  %22115 = vmatprep.mubr.msk.f32.mxu1 %vm8434_vm7, %v27394_v46  ;;  %30071 = vst [vmem:[#allocation11_spill] sm:$0xff] %v27408_v11  ;;  %v27412_v9 = vld [vmem:[#allocation2 + $0x4a] sm:$0xff] }
 0x86d   : > { %23029 = vmatprep.subr.bf16.mxu1 %v27391_v33  ;;  %30072 = vst [vmem:[#allocation12_spill] sm:$0xff] %v27412_v9 }
 0x86f   : > { %22116 = vmatmul.mubr.msk.f32.gmra.mrb[34].mxu1 %vm8434_vm7, %v27400_v23 }
 0x870   : > { %22118 = vmatprep.mubr.msk.f32.mxu1 %vm8434_vm7, %v27404_v17  ;;  %v27424_v17 = vld [vmem:[#allocation2 + $0x6a] sm:$0xff] }
 0x871   : > { %30075 = vst [vmem:[#allocation13_spill] sm:$0xff] %v27424_v17 }
 0x873   : > { %22119 = vmatmul.mubr.msk.f32.gmra.mrb[36].mxu1 %vm8434_vm7, %v27408_v11  ;;  %v27428_v11 = vld [vmem:[#allocation2 + $0x7a] sm:$0xff] }
 0x874   : > { %22121 = vmatprep.mubr.msk.f32.mxu1 %vm8434_vm7, %v27412_v9  ;;  %30076 = vst [vmem:[#allocation14_spill] sm:$0xff] %v27428_v11  ;;  %v27432_v9 = vld [vmem:[#allocation2 + $0x82] sm:$0xff] }
 0x875   : > { %30077 = vst [vmem:[#allocation15_spill] sm:$0xff] %v27432_v9 }
 0x877   : > { %22122 = vmatmul.mubr.msk.f32.gmra.mrb[38].mxu1 %vm8434_vm7, %v27416_v31  ;;  %v27436_v31 = vld [vmem:[#allocation2 + $0x92] sm:$0xff] }
 0x878   : > { %22124 = vmatprep.mubr.msk.f32.mxu1 %vm8434_vm7, %v27420_v57  ;;  %30078 = vst [vmem:[#allocation16_spill] sm:$0xff] %v27436_v31  ;;  %v27440_v57 = vld [vmem:[#allocation2 + $0x9a] sm:$0xff] }
 0x879   : > { %30079 = vst [vmem:[#allocation17_spill] sm:$0xff] %v27440_v57 }
 0x87b   : > { %22125 = vmatmul.mubr.msk.f32.gmra.mrb[40].mxu1 %vm8434_vm7, %v27424_v17  ;;  %v27444_v17 = vld [vmem:[#allocation2 + $0xaa] sm:$0xff] }
 0x87c   : > { %22127 = vmatprep.mubr.msk.f32.mxu1 %vm8434_vm7, %v27428_v11  ;;  %30080 = vst [vmem:[#allocation18_spill] sm:$0xff] %v27444_v17  ;;  %v27448_v11 = vld [vmem:[#allocation2 + $0xb2] sm:$0xff] }
 0x87d   : > { %30081 = vst [vmem:[#allocation19_spill] sm:$0xff] %v27448_v11 }
 0x87f   : > { %22128 = vmatmul.mubr.msk.f32.gmra.mrb[42].mxu1 %vm8434_vm7, %v27432_v9  ;;  %v27452_v9 = vld [vmem:[#allocation2 + $0xc2] sm:$0xff] }
 0x880   : > { %22130 = vmatprep.mubr.msk.f32.mxu1 %vm8434_vm7, %v27436_v31  ;;  %30082 = vst [vmem:[#allocation20_spill] sm:$0xff] %v27452_v9  ;;  %v27456_v31 = vld [vmem:[#allocation2 + $0xca] sm:$0xff] }
 0x881   : > { %30083 = vst [vmem:[#allocation21_spill] sm:$0xff] %v27456_v31 }
 0x883   : > { %22131 = vmatmul.mubr.msk.f32.gmra.mrb[44].mxu1 %vm8434_vm7, %v27440_v57  ;;  %v27460_v57 = vld [vmem:[#allocation2 + $0xda] sm:$0xff] }
 0x884   : > { %22133 = vmatprep.mubr.msk.f32.mxu1 %vm8434_vm7, %v27444_v17  ;;  %30084 = vst [vmem:[#allocation22_spill] sm:$0xff] %v27460_v57  ;;  %v27464_v17 = vld [vmem:[#allocation2 + $0xe2] sm:$0xff] }
 0x885   : > { %30085 = vst [vmem:[#allocation23_spill] sm:$0xff] %v27464_v17 }
 0x887   : > { %22134 = vmatmul.mubr.msk.f32.gmra.mrb[46].mxu1 %vm8434_vm7, %v27448_v11  ;;  %v27468_v11 = vld [vmem:[#allocation2 + $0xf2] sm:$0xff] }
 0x888   : > { %22136 = vmatprep.mubr.msk.f32.mxu1 %vm8434_vm7, %v27452_v9  ;;  %30086 = vst [vmem:[#allocation24_spill] sm:$0xff] %v27468_v11  ;;  %v27472_v9 = vld [vmem:[#allocation2 + $0xfa] sm:$0xff] }
 0x889   : > { %30087 = vst [vmem:[#allocation25_spill] sm:$0xff] %v27472_v9 }
 0x88b   : > { %22137 = vmatmul.mubr.msk.f32.gmra.mrb[48].mxu1 %vm8434_vm7, %v27456_v31  ;;  %v27476_v31 = vld [vmem:[#allocation2 + $0x10a] sm:$0xff] }
 0x88c   : > { %22139 = vmatprep.mubr.msk.f32.mxu1 %vm8434_vm7, %v27460_v57  ;;  %30088 = vst [vmem:[#allocation26_spill] sm:$0xff] %v27476_v31  ;;  %v27480_v57 = vld [vmem:[#allocation2 + $0x112] sm:$0xff] }
 0x88d   : > { %30089 = vst [vmem:[#allocation27_spill] sm:$0xff] %v27480_v57 }
 0x88f   : > { %22140 = vmatmul.mubr.msk.f32.gmra.mrb[50].mxu1 %vm8434_vm7, %v27464_v17  ;;  %v27484_v17 = vld [vmem:[#allocation2 + $0x122] sm:$0xff] }
 0x890   : > { %22142 = vmatprep.mubr.msk.f32.mxu1 %vm8434_vm7, %v27468_v11  ;;  %30090 = vst [vmem:[#allocation28_spill] sm:$0xff] %v27484_v17  ;;  %v27488_v11 = vld [vmem:[#allocation2 + $0x12a] sm:$0xff] }
 0x891   : > { %30091 = vst [vmem:[#allocation29_spill] sm:$0xff] %v27488_v11 }
 0x893   : > { %22143 = vmatmul.mubr.msk.f32.gmra.mrb[52].mxu1 %vm8434_vm7, %v27472_v9  ;;  %v27492_v9 = vld [vmem:[#allocation2 + $0x13a] sm:$0xff] }
 0x894   : > { %22145 = vmatprep.mubr.msk.f32.mxu1 %vm8434_vm7, %v27476_v31  ;;  %30092 = vst [vmem:[#allocation30_spill] sm:$0xff] %v27492_v9  ;;  %v27496_v31 = vld [vmem:[#allocation2 + $0x142] sm:$0xff] }
 0x895   : > { %30093 = vst [vmem:[#allocation33_spill] sm:$0xff] %v27496_v31 }
 0x897   : > { %22146 = vmatmul.mubr.msk.f32.gmra.mrb[54].mxu1 %vm8434_vm7, %v27480_v57  ;;  %v27500_v57 = vld [vmem:[#allocation2 + $0x152] sm:$0xff] }
 0x898   : > { %22148 = vmatprep.mubr.msk.f32.mxu1 %vm8434_vm7, %v27484_v17  ;;  %30094 = vst [vmem:[#allocation35_spill] sm:$0xff] %v27500_v57  ;;  %v27504_v17 = vld [vmem:[#allocation2 + $0x15a] sm:$0xff] }
 0x899   : > { %30095 = vst [vmem:[#allocation37_spill] sm:$0xff] %v27504_v17 }
 0x89b   : > { %22149 = vmatmul.mubr.msk.f32.gmra.mrb[56].mxu1 %vm8434_vm7, %v27488_v11  ;;  %v27508_v11 = vld [vmem:[#allocation2 + $0x16a] sm:$0xff] }
 0x89c   : > { %22151 = vmatprep.mubr.msk.f32.mxu1 %vm8434_vm7, %v27492_v9  ;;  %v27512_v9 = vld [vmem:[#allocation2 + $0x172] sm:$0xff] }
 0x89d   : > { %30096 = vst [vmem:[#allocation38_spill] sm:$0xff] %v27512_v9 }
 0x89f   : > { %22152 = vmatmul.mubr.msk.f32.gmra.mrb[58].mxu1 %vm8434_vm7, %v27496_v31  ;;  %v18703_v31 = vld [vmem:[%s29666_s3 + $0x50] sm:$0xff] }
 0x8a0   : > { %22154 = vmatprep.mubr.msk.f32.mxu1 %vm8434_vm7, %v27500_v57  ;;  %v18704_v57 = vld [vmem:[%s29666_s3 + $0x58] sm:$0xff] }
 0x8a3   : > { %22155 = vmatmul.mubr.msk.f32.gmra.mrb[60].mxu1 %vm8434_vm7, %v27504_v17  ;;  %v23032_v17 = vpack.c.bf16 %v18704_v57, %v18703_v31  ;;  %v18738_v31 = vld [vmem:[%s29666_s3 + $0x68] sm:$0xff] }
 0x8a4   : > { %22157 = vmatprep.mubr.msk.f32.mxu1 %vm8434_vm7, %v27508_v11 }
 0x8a7   : > { %22158 = vmatmul.mubr.msk.f32.gmra.mrb[62].mxu1 %vm8434_vm7, %v27512_v9 }
 0x8a8   : > { %22164 = vmatprep.mubr.msk.f32.mxu1 %vm8434_vm7, %v27103_v0  ;;  %v27583_v0 = vld [vmem:[#allocation2 + $0x180] sm:$0xff] }
 0x8ab   : > { %22165 = vmatmul.mubr.msk.f32.vlgmr.msra.gmra.mrb[32].mxu1 %vm8434_vm7, %v27105_v8  ;;  %v27587_v8 = vld [vmem:[#allocation2 + $0x188] sm:$0xff] }
 0x8ac   : > { %23031 = vmatpush3.bf16.msra.mxu1 %v27391_v33  ;;  %22167 = vmatprep.mubr.msk.f32.mxu1 %vm8434_vm7, %v27113_v60  ;;  %v18737_v33 = vld [vmem:[%s29666_s3 + $0x60] sm:$0xff] }
 0x8ad   : > { %23033 = vmatprep.subr.bf16.mxu1 %v23032_v17  ;;  %v23036_v57 = vpack.c.bf16 %v18738_v31, %v18737_v33  ;;  %v30100_v33 = vld [vmem:[#allocation7_spill] sm:$0xff]  ;;  %v27657_v31 = vld [vmem:[#allocation2 + $0x181] sm:$0xff] }
 0x8ae   : > { %30101 = vst [vmem:[#allocation39_spill] sm:$0xff] %v27657_v31 }
 0x8af   : > { %22168 = vmatmul.mubr.msk.f32.gmra.mrb[34].mxu1 %vm8434_vm7, %v27115_v63 }
 0x8b0   : > { %22170 = vmatprep.mubr.msk.f32.mxu1 %vm8434_vm7, %v27125_v52 }
 0x8b3   : > { %22171 = vmatmul.mubr.msk.f32.gmra.mrb[36].mxu1 %vm8434_vm7, %v27127_v49 }
 0x8b4   : > { %22173 = vmatprep.mubr.msk.f32.mxu1 %vm8434_vm7, %v27137_v51 }
 0x8b7   : > { %22174 = vmatmul.mubr.msk.f32.gmra.mrb[38].mxu1 %vm8434_vm7, %v27139_v29 }
 0x8b8   : > { %22176 = vmatprep.mubr.msk.f32.mxu1 %vm8434_vm7, %v27149_v32 }
 0x8bb   : > { %22177 = vmatmul.mubr.msk.f32.gmra.mrb[40].mxu1 %vm8434_vm7, %v27151_v5 }
 0x8bc   : > { %22179 = vmatprep.mubr.msk.f32.mxu1 %vm8434_vm7, %v27159_v62 }
 0x8bf   : > { %22180 = vmatmul.mubr.msk.f32.gmra.mrb[42].mxu1 %vm8434_vm7, %v27161_v12 }
 0x8c0   : > { %22182 = vmatprep.mubr.msk.f32.mxu1 %vm8434_vm7, %v27169_v15 }
 0x8c3   : > { %22183 = vmatmul.mubr.msk.f32.gmra.mrb[44].mxu1 %vm8434_vm7, %v27171_v20 }
 0x8c4   : > { %22185 = vmatprep.mubr.msk.f32.mxu1 %vm8434_vm7, %v27179_v40 }
 0x8c7   : > { %22186 = vmatmul.mubr.msk.f32.gmra.mrb[46].mxu1 %vm8434_vm7, %v27181_v30 }
 0x8c8   : > { %22188 = vmatprep.mubr.msk.f32.mxu1 %vm8434_vm7, %v27189_v14 }
 0x8cb   : > { %22189 = vmatmul.mubr.msk.f32.gmra.mrb[48].mxu1 %vm8434_vm7, %v27191_v22 }
 0x8cc   : > { %22191 = vmatprep.mubr.msk.f32.mxu1 %vm8434_vm7, %v27199_v26 }
 0x8cf   : > { %22192 = vmatmul.mubr.msk.f32.gmra.mrb[50].mxu1 %vm8434_vm7, %v27201_v2 }
 0x8d0   : > { %22194 = vmatprep.mubr.msk.f32.mxu1 %vm8434_vm7, %v27208_v6 }
 0x8d3   : > { %22195 = vmatmul.mubr.msk.f32.gmra.mrb[52].mxu1 %vm8434_vm7, %v27210_v7 }
 0x8d4   : > { %22197 = vmatprep.mubr.msk.f32.mxu1 %vm8434_vm7, %v27217_v47 }
 0x8d7   : > { %22198 = vmatmul.mubr.msk.f32.gmra.mrb[54].mxu1 %vm8434_vm7, %v27219_v24 }
 0x8d8   : > { %22200 = vmatprep.mubr.msk.f32.mxu1 %vm8434_vm7, %v27226_v27 }
 0x8db   : > { %22201 = vmatmul.mubr.msk.f32.gmra.mrb[56].mxu1 %vm8434_vm7, %v27228_v45 }
 0x8dc   : > { %22203 = vmatprep.mubr.msk.f32.mxu1 %vm8434_vm7, %v27235_v28 }
 0x8df   : > { %22204 = vmatmul.mubr.msk.f32.gmra.mrb[58].mxu1 %vm8434_vm7, %v27237_v56 }
 0x8e0   : > { %22206 = vmatprep.mubr.msk.f32.mxu1 %vm8434_vm7, %v27244_v10 }
 0x8e3   : > { %22207 = vmatmul.mubr.msk.f32.gmra.mrb[60].mxu1 %vm8434_vm7, %v27246_v35 }
 0x8e4   : > { %22209 = vmatprep.mubr.msk.f32.mxu1 %vm8434_vm7, %v27583_v0 }
 0x8e7   : > { %22210 = vmatmul.mubr.msk.f32.gmra.mrb[62].mxu1 %vm8434_vm7, %v27587_v8 }
 0x8e8   : > { %22216 = vmatprep.mubr.msk.f32.mxu1 %vm8434_vm7, %v27262_v55  ;;  %v30097_v55 = vld [vmem:[#allocation34_spill] sm:$0xff] }
 0x8eb   : > { %22217 = vmatmul.mubr.msk.f32.vlgmr.msra.gmra.mrb[32].mxu1 %vm8434_vm7, %v27268_v39  ;;  %v30098_v39 = vld [vmem:[#allocation36_spill] sm:$0xff] }
 0x8ec   : > { %23035 = vmatpush3.bf16.msra.mxu1 %v23032_v17  ;;  %22219 = vmatprep.mubr.msk.f32.mxu1 %vm8434_vm7, %v27272_v1  ;;  %v30099_v17 = vld [vmem:[#allocation6_spill] sm:$0xff] }
 0x8ed   : > { %23037 = vmatprep.subr.bf16.mxu1 %v23036_v57 }
 0x8ef   : > { %22220 = vmatmul.mubr.msk.f32.gmra.mrb[34].mxu1 %vm8434_vm7, %v27276_v42 }
 0x8f0   : > { %22222 = vmatprep.mubr.msk.f32.mxu1 %vm8434_vm7, %v27280_v3 }
 0x8f3   : > { %22223 = vmatmul.mubr.msk.f32.gmra.mrb[36].mxu1 %vm8434_vm7, %v27284_v50 }
 0x8f4   : > { %22225 = vmatprep.mubr.msk.f32.mxu1 %vm8434_vm7, %v27288_v34 }
 0x8f7   : > { %22226 = vmatmul.mubr.msk.f32.gmra.mrb[38].mxu1 %vm8434_vm7, %v27292_v59 }
 0x8f8   : > { %22228 = vmatprep.mubr.msk.f32.mxu1 %vm8434_vm7, %v27296_v21 }
 0x8fb   : > { %22229 = vmatmul.mubr.msk.f32.gmra.mrb[40].mxu1 %vm8434_vm7, %v27300_v53 }
 0x8fc   : > { %22231 = vmatprep.mubr.msk.f32.mxu1 %vm8434_vm7, %v27304_v19 }
 0x8ff   : > { %22232 = vmatmul.mubr.msk.f32.gmra.mrb[42].mxu1 %vm8434_vm7, %v27308_v61 }
 0x900   : > { %22234 = vmatprep.mubr.msk.f32.mxu1 %vm8434_vm7, %v27312_v38 }
 0x903   : > { %22235 = vmatmul.mubr.msk.f32.gmra.mrb[44].mxu1 %vm8434_vm7, %v27316_v4 }
 0x904   : > { %22237 = vmatprep.mubr.msk.f32.mxu1 %vm8434_vm7, %v27320_v16 }
 0x907   : > { %22238 = vmatmul.mubr.msk.f32.gmra.mrb[46].mxu1 %vm8434_vm7, %v27324_v37 }
 0x908   : > { %22240 = vmatprep.mubr.msk.f32.mxu1 %vm8434_vm7, %v27328_v54 }
 0x90b   : > { %22241 = vmatmul.mubr.msk.f32.gmra.mrb[48].mxu1 %vm8434_vm7, %v27332_v58 }
 0x90c   : > { %22243 = vmatprep.mubr.msk.f32.mxu1 %vm8434_vm7, %v27336_v13 }
 0x90f   : > { %22244 = vmatmul.mubr.msk.f32.gmra.mrb[50].mxu1 %vm8434_vm7, %v27340_v41 }
 0x910   : > { %22246 = vmatprep.mubr.msk.f32.mxu1 %vm8434_vm7, %v27344_v36 }
 0x913   : > { %22247 = vmatmul.mubr.msk.f32.gmra.mrb[52].mxu1 %vm8434_vm7, %v27348_v25 }
 0x914   : > { %22249 = vmatprep.mubr.msk.f32.mxu1 %vm8434_vm7, %v27352_v43 }
 0x917   : > { %22250 = vmatmul.mubr.msk.f32.gmra.mrb[54].mxu1 %vm8434_vm7, %v27356_v44  ;;  %v30106_v44 = vld [vmem:[#allocation8_spill] sm:$0xff] }
 0x918   : > { %22252 = vmatprep.mubr.msk.f32.mxu1 %vm8434_vm7, %v27360_v48  ;;  %v27661_v48 = vld [vmem:[#allocation2 + $0x189] sm:$0xff] }
 0x919   : > { %30102 = vst [vmem:[#allocation41_spill] sm:$0xff] %v27661_v48 }
 0x91b   : > { %22253 = vmatmul.mubr.msk.f32.gmra.mrb[56].mxu1 %vm8434_vm7, %v30097_v55  ;;  %v30105_v55 = vld [vmem:[#allocation12_spill] sm:$0xff] }
 0x91c   : > { %22255 = vmatprep.mubr.msk.f32.mxu1 %vm8434_vm7, %v30098_v39  ;;  %v18771_v39 = vld [vmem:[%s29666_s3 + $0x70] sm:$0xff] }
 0x91f   : > { %22256 = vmatmul.mubr.msk.f32.gmra.mrb[58].mxu1 %vm8434_vm7, %v30099_v17  ;;  %v18772_v17 = vld [vmem:[%s29666_s3 + $0x78] sm:$0xff] }
 0x920   : > { %22258 = vmatprep.mubr.msk.f32.mxu1 %vm8434_vm7, %v30100_v33  ;;  %v30104_v33 = vld [vmem:[#allocation11_spill] sm:$0xff] }
 0x923   : > { %22259 = vmatmul.mubr.msk.f32.gmra.mrb[60].mxu1 %vm8434_vm7, %v27380_v18  ;;  %v23040_v18 = vpack.c.bf16 %v18772_v17, %v18771_v39  ;;  %v30111_v39 = vld [vmem:[#allocation16_spill] sm:$0xff]  ;;  %v30112_v17 = vld [vmem:[#allocation17_spill] sm:$0xff] }
 0x924   : > { %22261 = vmatprep.mubr.msk.f32.mxu1 %vm8434_vm7, %v27657_v31  ;;  %v30103_v31 = vld [vmem:[#allocation10_spill] sm:$0xff] }
 0x927   : > { %22262 = vmatmul.mubr.msk.f32.gmra.mrb[62].mxu1 %vm8434_vm7, %v27661_v48  ;;  %v30107_v48 = vld [vmem:[#allocation40_spill] sm:$0xff] }
 0x928   : > { %22268 = vmatprep.mubr.msk.f32.mxu1 %vm8434_vm7, %v27394_v46  ;;  %v30108_v46 = vld [vmem:[#allocation13_spill] sm:$0xff] }
 0x92b   : > { %22269 = vmatmul.mubr.msk.f32.vlgmr.msra.gmra.mrb[32].mxu1 %vm8434_vm7, %v27400_v23  ;;  %v30109_v23 = vld [vmem:[#allocation14_spill] sm:$0xff] }
 0x92c   : > { %23039 = vmatpush3.bf16.msra.mxu1 %v23036_v57  ;;  %22271 = vmatprep.mubr.msk.f32.mxu1 %vm8434_vm7, %v30103_v31  ;;  %v30110_v57 = vld [vmem:[#allocation15_spill] sm:$0xff] }
 0x92d   : > { %23041 = vmatprep.subr.bf16.mxu1 %v23040_v18 }
 0x92f   : > { %22272 = vmatmul.mubr.msk.f32.gmra.mrb[34].mxu1 %vm8434_vm7, %v30104_v33 }
 0x930   : > { %22274 = vmatprep.mubr.msk.f32.mxu1 %vm8434_vm7, %v30105_v55  ;;  %v30113_v55 = vld [vmem:[#allocation18_spill] sm:$0xff] }
 0x933   : > { %22275 = vmatmul.mubr.msk.f32.gmra.mrb[36].mxu1 %vm8434_vm7, %v30106_v44  ;;  %v30114_v44 = vld [vmem:[#allocation19_spill] sm:$0xff] }
 0x934   : > { %22277 = vmatprep.mubr.msk.f32.mxu1 %vm8434_vm7, %v30107_v48  ;;  %v30115_v48 = vld [vmem:[#allocation20_spill] sm:$0xff] }
 0x937   : > { %22278 = vmatmul.mubr.msk.f32.gmra.mrb[38].mxu1 %vm8434_vm7, %v30108_v46  ;;  %v30116_v46 = vld [vmem:[#allocation21_spill] sm:$0xff] }
 0x938   : > { %22280 = vmatprep.mubr.msk.f32.mxu1 %vm8434_vm7, %v30109_v23  ;;  %v30117_v23 = vld [vmem:[#allocation22_spill] sm:$0xff] }
 0x93b   : > { %22281 = vmatmul.mubr.msk.f32.gmra.mrb[40].mxu1 %vm8434_vm7, %v30110_v57  ;;  %v30118_v57 = vld [vmem:[#allocation23_spill] sm:$0xff] }
 0x93c   : > { %22283 = vmatprep.mubr.msk.f32.mxu1 %vm8434_vm7, %v30111_v39  ;;  %v30119_v39 = vld [vmem:[#allocation24_spill] sm:$0xff] }
 0x93f   : > { %22284 = vmatmul.mubr.msk.f32.gmra.mrb[42].mxu1 %vm8434_vm7, %v30112_v17  ;;  %v30120_v17 = vld [vmem:[#allocation25_spill] sm:$0xff] }
 0x940   : > { %22286 = vmatprep.mubr.msk.f32.mxu1 %vm8434_vm7, %v30113_v55  ;;  %v30121_v55 = vld [vmem:[#allocation26_spill] sm:$0xff] }
 0x943   : > { %22287 = vmatmul.mubr.msk.f32.gmra.mrb[44].mxu1 %vm8434_vm7, %v30114_v44  ;;  %v30122_v44 = vld [vmem:[#allocation27_spill] sm:$0xff] }
 0x944   : > { %22289 = vmatprep.mubr.msk.f32.mxu1 %vm8434_vm7, %v30115_v48  ;;  %v30123_v48 = vld [vmem:[#allocation28_spill] sm:$0xff] }
 0x947   : > { %22290 = vmatmul.mubr.msk.f32.gmra.mrb[46].mxu1 %vm8434_vm7, %v30116_v46  ;;  %v30124_v46 = vld [vmem:[#allocation29_spill] sm:$0xff] }
 0x948   : > { %22292 = vmatprep.mubr.msk.f32.mxu1 %vm8434_vm7, %v30117_v23  ;;  %v30125_v23 = vld [vmem:[#allocation30_spill] sm:$0xff] }
 0x94b   : > { %22293 = vmatmul.mubr.msk.f32.gmra.mrb[48].mxu1 %vm8434_vm7, %v30118_v57  ;;  %v30126_v57 = vld [vmem:[#allocation33_spill] sm:$0xff] }
 0x94c   : > { %22295 = vmatprep.mubr.msk.f32.mxu1 %vm8434_vm7, %v30119_v39  ;;  %v30127_v39 = vld [vmem:[#allocation35_spill] sm:$0xff] }
 0x94f   : > { %22296 = vmatmul.mubr.msk.f32.gmra.mrb[50].mxu1 %vm8434_vm7, %v30120_v17  ;;  %v30128_v17 = vld [vmem:[#allocation37_spill] sm:$0xff] }
 0x950   : > { %22298 = vmatprep.mubr.msk.f32.mxu1 %vm8434_vm7, %v30121_v55 }
 0x953   : > { %22299 = vmatmul.mubr.msk.f32.gmra.mrb[52].mxu1 %vm8434_vm7, %v30122_v44 }
 0x954   : > { %22301 = vmatprep.mubr.msk.f32.mxu1 %vm8434_vm7, %v30123_v48  ;;  %v27731_v48 = vld [vmem:[#allocation2 + $0x182] sm:$0xff] }
 0x957   : > { %22302 = vmatmul.mubr.msk.f32.gmra.mrb[54].mxu1 %vm8434_vm7, %v30124_v46 }
 0x958   : > { %22304 = vmatprep.mubr.msk.f32.mxu1 %vm8434_vm7, %v30125_v23  ;;  %v27735_v23 = vld [vmem:[#allocation2 + $0x18a] sm:$0xff] }
 0x95b   : > { %22305 = vmatmul.mubr.msk.f32.gmra.mrb[56].mxu1 %vm8434_vm7, %v30126_v57 }
 0x95c   : > { %22307 = vmatprep.mubr.msk.f32.mxu1 %vm8434_vm7, %v30127_v39  ;;  %v18805_v39 = vld [vmem:[%s29666_s3 + $0x80] sm:$0xff] }
 0x95f   : > { %22308 = vmatmul.mubr.msk.f32.gmra.mrb[58].mxu1 %vm8434_vm7, %v30128_v17  ;;  %v18806_v17 = vld [vmem:[%s29666_s3 + $0x88] sm:$0xff] }
 0x960   : > { %22310 = vmatprep.mubr.msk.f32.mxu1 %vm8434_vm7, %v27508_v11 }
 0x963   : > { %22311 = vmatmul.mubr.msk.f32.gmra.mrb[60].mxu1 %vm8434_vm7, %v27512_v9  ;;  %v23044_v9 = vpack.c.bf16 %v18806_v17, %v18805_v39 }
 0x964   : > { %22313 = vmatprep.mubr.msk.f32.mxu1 %vm8434_vm7, %v27731_v48 }
 0x967   : > { %22314 = vmatmul.mubr.msk.f32.gmra.mrb[62].mxu1 %vm8434_vm7, %v27735_v23 }
 0x968   : > { %22320 = vmatprep.mubr.msk.f32.mxu1 %vm8434_vm7, %v27113_v60  ;;  %v10758_v60 = vld [vmem:[#allocation2 + $0x198] sm:$0xff] }
 0x96b   : > { %22321 = vmatmul.mubr.msk.f32.vlgmr.msra.gmra.mrb[32].mxu1 %vm8434_vm7, %v27115_v63  ;;  %v10759_v63 = vld [vmem:[#allocation2 + $0x1a0] sm:$0xff] }
 0x96c   : > { %23043 = vmatpush3.bf16.msra.mxu1 %v23040_v18  ;;  %22323 = vmatprep.mubr.msk.f32.mxu1 %vm8434_vm7, %v27125_v52  ;;  %v30129_v52 = vld [vmem:[#allocation31_spill] sm:$0xff] }
 0x96d   : > { %23045 = vmatprep.subr.bf16.mxu1 %v23044_v9 }
 0x96f   : > { %22324 = vmatmul.mubr.msk.f32.gmra.mrb[34].mxu1 %vm8434_vm7, %v27127_v49  ;;  %v30130_v49 = vld [vmem:[#allocation32_spill] sm:$0xff] }
 0x970   : > { %22326 = vmatprep.mubr.msk.f32.mxu1 %vm8434_vm7, %v27137_v51  ;;  %v30131_v51 = vld [vmem:[#allocation34_spill] sm:$0xff] }
 0x973   : > { %22327 = vmatmul.mubr.msk.f32.gmra.mrb[36].mxu1 %vm8434_vm7, %v27139_v29  ;;  %v30132_v29 = vld [vmem:[#allocation36_spill] sm:$0xff] }
 0x974   : > { %22329 = vmatprep.mubr.msk.f32.mxu1 %vm8434_vm7, %v27149_v32  ;;  %v30133_v32 = vld [vmem:[#allocation6_spill] sm:$0xff] }
 0x977   : > { %22330 = vmatmul.mubr.msk.f32.gmra.mrb[38].mxu1 %vm8434_vm7, %v27151_v5  ;;  %v30134_v5 = vld [vmem:[#allocation7_spill] sm:$0xff] }
 0x978   : > { %22332 = vmatprep.mubr.msk.f32.mxu1 %vm8434_vm7, %v27159_v62  ;;  %v30135_v62 = vld [vmem:[#allocation9_spill] sm:$0xff] }
 0x97b   : > { %22333 = vmatmul.mubr.msk.f32.gmra.mrb[40].mxu1 %vm8434_vm7, %v27161_v12  ;;  %v30136_v12 = vld [vmem:[#allocation39_spill] sm:$0xff] }
 0x97c   : > { %22335 = vmatprep.mubr.msk.f32.mxu1 %vm8434_vm7, %v27169_v15  ;;  %v11146_v15 = vld [vmem:[#allocation2 + $0x199] sm:$0xff] }
 0x97f   : > { %22336 = vmatmul.mubr.msk.f32.gmra.mrb[42].mxu1 %vm8434_vm7, %v27171_v20  ;;  %v30137_v20 = vld [vmem:[#allocation41_spill] sm:$0xff] }
 0x980   : > { %22338 = vmatprep.mubr.msk.f32.mxu1 %vm8434_vm7, %v27179_v40  ;;  %v11147_v40 = vld [vmem:[#allocation2 + $0x1a1] sm:$0xff] }
 0x983   : > { %22339 = vmatmul.mubr.msk.f32.gmra.mrb[44].mxu1 %vm8434_vm7, %v27181_v30  ;;  %v30138_v30 = vld [vmem:[#allocation12_spill] sm:$0xff] }
 0x984   : > { %22341 = vmatprep.mubr.msk.f32.mxu1 %vm8434_vm7, %v27189_v14  ;;  %v30139_v14 = vld [vmem:[#allocation8_spill] sm:$0xff] }
 0x987   : > { %22342 = vmatmul.mubr.msk.f32.gmra.mrb[46].mxu1 %vm8434_vm7, %v27191_v22  ;;  %v30140_v22 = vld [vmem:[#allocation40_spill] sm:$0xff] }
 0x988   : > { %22344 = vmatprep.mubr.msk.f32.mxu1 %vm8434_vm7, %v27199_v26  ;;  %v30141_v26 = vld [vmem:[#allocation13_spill] sm:$0xff] }
 0x98b   : > { %22345 = vmatmul.mubr.msk.f32.gmra.mrb[48].mxu1 %vm8434_vm7, %v27201_v2  ;;  %v30142_v2 = vld [vmem:[#allocation14_spill] sm:$0xff] }
 0x98c   : > { %22347 = vmatprep.mubr.msk.f32.mxu1 %vm8434_vm7, %v27208_v6  ;;  %v30143_v6 = vld [vmem:[#allocation15_spill] sm:$0xff] }
 0x98f   : > { %22348 = vmatmul.mubr.msk.f32.gmra.mrb[50].mxu1 %vm8434_vm7, %v27210_v7  ;;  %v30144_v7 = vld [vmem:[#allocation16_spill] sm:$0xff] }
 0x990   : > { %22350 = vmatprep.mubr.msk.f32.mxu1 %vm8434_vm7, %v27217_v47  ;;  %v30145_v47 = vld [vmem:[#allocation17_spill] sm:$0xff] }
 0x993   : > { %22351 = vmatmul.mubr.msk.f32.gmra.mrb[52].mxu1 %vm8434_vm7, %v27219_v24  ;;  %v30146_v24 = vld [vmem:[#allocation18_spill] sm:$0xff] }
 0x994   : > { %22353 = vmatprep.mubr.msk.f32.mxu1 %vm8434_vm7, %v27226_v27  ;;  %v30147_v27 = vld [vmem:[#allocation19_spill] sm:$0xff] }
 0x997   : > { %22354 = vmatmul.mubr.msk.f32.gmra.mrb[54].mxu1 %vm8434_vm7, %v27228_v45  ;;  %v30148_v45 = vld [vmem:[#allocation20_spill] sm:$0xff] }
 0x998   : > { %22356 = vmatprep.mubr.msk.f32.mxu1 %vm8434_vm7, %v27235_v28  ;;  %v30149_v28 = vld [vmem:[#allocation21_spill] sm:$0xff] }
 0x99b   : > { %22357 = vmatmul.mubr.msk.f32.gmra.mrb[56].mxu1 %vm8434_vm7, %v27237_v56  ;;  %v30150_v56 = vld [vmem:[#allocation22_spill] sm:$0xff] }
 0x99c   : > { %22359 = vmatprep.mubr.msk.f32.mxu1 %vm8434_vm7, %v27244_v10  ;;  %v30151_v10 = vld [vmem:[#allocation23_spill] sm:$0xff] }
 0x99f   : > { %22360 = vmatmul.mubr.msk.f32.gmra.mrb[58].mxu1 %vm8434_vm7, %v27246_v35  ;;  %v30152_v35 = vld [vmem:[#allocation24_spill] sm:$0xff] }
 0x9a0   : > { %22362 = vmatprep.mubr.msk.f32.mxu1 %vm8434_vm7, %v27583_v0 }
 0x9a3   : > { %22363 = vmatmul.mubr.msk.f32.gmra.mrb[60].mxu1 %vm8434_vm7, %v27587_v8 }
 0x9a4   : > { %22365 = vmatprep.mubr.msk.f32.mxu1 %vm8434_vm7, %v10758_v60 }
 0x9a7   : > { %22366 = vmatmul.mubr.msk.f32.gmra.mrb[62].mxu1 %vm8434_vm7, %v10759_v63 }
 0x9a8   : > { %22372 = vmatprep.mubr.msk.f32.mxu1 %vm8434_vm7, %v27272_v1  ;;  %v30153_v1 = vld [vmem:[#allocation25_spill] sm:$0xff] }
 0x9ab   : > { %22373 = vmatmul.mubr.msk.f32.vlgmr.msra.gmra.mrb[32].mxu1 %vm8434_vm7, %v27276_v42  ;;  %v30154_v42 = vld [vmem:[#allocation28_spill] sm:$0xff] }
 0x9ac   : > { %23047 = vmatpush3.bf16.msra.mxu1 %v23044_v9  ;;  %22375 = vmatprep.mubr.msk.f32.mxu1 %vm8434_vm7, %v27280_v3  ;;  %v30155_v3 = vld [vmem:[#allocation30_spill] sm:$0xff] }
 0x9af   : > { %22376 = vmatmul.mubr.msk.f32.gmra.mrb[34].mxu1 %vm8434_vm7, %v27284_v50  ;;  %v30156_v50 = vld [vmem:[#allocation35_spill] sm:$0xff] }
 0x9b0   : > { %22378 = vmatprep.mubr.msk.f32.mxu1 %vm8434_vm7, %v27288_v34  ;;  %v30157_v34 = vld [vmem:[#allocation37_spill] sm:$0xff] }
 0x9b3   : > { %22379 = vmatmul.mubr.msk.f32.gmra.mrb[36].mxu1 %vm8434_vm7, %v27292_v59  ;;  %v30158_v59 = vld [vmem:[#allocation38_spill] sm:$0xff] }
 0x9b4   : > { %22381 = vmatprep.mubr.msk.f32.mxu1 %vm8434_vm7, %v27296_v21  ;;  %v11534_v21 = vld [vmem:[#allocation2 + $0x19a] sm:$0xff] }
 0x9b7   : > { %22382 = vmatmul.mubr.msk.f32.gmra.mrb[38].mxu1 %vm8434_vm7, %v27300_v53  ;;  %v11535_v53 = vld [vmem:[#allocation2 + $0x1a2] sm:$0xff] }
 0x9b8   : > { %22384 = vmatprep.mubr.msk.f32.mxu1 %vm8434_vm7, %v27304_v19  ;;  %v12189_v19 = vld [vmem:[%s29667_s4] sm:$0xff] }
 0x9bb   : > { %22385 = vmatmul.mubr.msk.f32.gmra.mrb[40].mxu1 %vm8434_vm7, %v27308_v61  ;;  %v12190_v61 = vld [vmem:[%s29667_s4 + $0x8] sm:$0xff] }
 0x9bc   : > { %22387 = vmatprep.mubr.msk.f32.mxu1 %vm8434_vm7, %v27312_v38  ;;  %v23048_v38 = vpack.c.bf16 %v12190_v61, %v12189_v19 }
 0x9be   : > { %23049 = vmatprep.subr.bf16.mxu0 %v23048_v38 }
 0x9bf   : > { %22388 = vmatmul.mubr.msk.f32.gmra.mrb[42].mxu1 %vm8434_vm7, %v27316_v4  ;;  %v12191_v4 = vld [vmem:[%s29667_s4 + $0x10] sm:$0xf]  ;;  %23051 = vmatpush3.bf16.msra.mxu0 %v23048_v38 }
 0x9c0   : > { %22390 = vmatprep.mubr.msk.f32.mxu1 %vm8434_vm7, %v27320_v16  ;;  %22476 = vmatprep.subr.msk.mxu0 %vm4746_vm5, %v12191_v4  ;;  %v12157_v16 = vld [vmem:[#allocation2] sm:$0xff] }
 0x9c3   : > { %22391 = vmatmul.mubr.msk.f32.gmra.mrb[44].mxu1 %vm8434_vm7, %v27324_v37  ;;  %22477 = vmatpush3.msk.msra.mxu0 %vm4746_vm5, %v12191_v4  ;;  %v18873_v37 = vld [vmem:[%s29667_s4 + $0x18] sm:$0xff] }
 0x9c4   : > { %22393 = vmatprep.mubr.msk.f32.mxu1 %vm8434_vm7, %v27328_v54  ;;  %v18874_v54 = vld [vmem:[%s29667_s4 + $0x20] sm:$0xff] }
 0x9c7   : > { %22394 = vmatmul.mubr.msk.f32.gmra.mrb[46].mxu1 %vm8434_vm7, %v27332_v58  ;;  %v27951_v58 = vld [vmem:[%s29671_s8] ss:$0 sm:$0xff] }
 0x9c8   : > { %22396 = vmatprep.mubr.msk.f32.mxu1 %vm8434_vm7, %v27336_v13  ;;  %v23052_v13 = vpack.c.bf16 %v18874_v54, %v18873_v37  ;;  %v18875_v54 = vld [vmem:[%s29667_s4 + $0x28] sm:$0xf] }
 0x9ca   : > { %23053 = vmatprep.subr.bf16.mxu0 %v23052_v13 }
 0x9cb   : > { %22397 = vmatmul.mubr.msk.f32.gmra.mrb[48].mxu1 %vm8434_vm7, %v27340_v41  ;;  %v12158_v41 = vld [vmem:[#allocation2 + $0x8] sm:$0xff] }
 0x9cc   : > { %22399 = vmatprep.mubr.msk.f32.mxu1 %vm8434_vm7, %v27344_v36 }
 0x9cf   : > { %22400 = vmatmul.mubr.msk.f32.gmra.mrb[50].mxu1 %vm8434_vm7, %v27348_v25 }
 0x9d0   : > { %22402 = vmatprep.mubr.msk.f32.mxu1 %vm8434_vm7, %v27352_v43 }
 0x9d3   : > { %22403 = vmatmul.mubr.msk.f32.gmra.mrb[52].mxu1 %vm8434_vm7, %v30129_v52 }
 0x9d4   : > { %22405 = vmatprep.mubr.msk.f32.mxu1 %vm8434_vm7, %v30130_v49 }
 0x9d7   : > { %22406 = vmatmul.mubr.msk.f32.gmra.mrb[54].mxu1 %vm8434_vm7, %v30131_v51 }
 0x9d8   : > { %22408 = vmatprep.mubr.msk.f32.mxu1 %vm8434_vm7, %v30132_v29 }
 0x9db   : > { %22409 = vmatmul.mubr.msk.f32.gmra.mrb[56].mxu1 %vm8434_vm7, %v30133_v32 }
 0x9dc   : > { %22411 = vmatprep.mubr.msk.f32.mxu1 %vm8434_vm7, %v30134_v5 }
 0x9df   : > { %22412 = vmatmul.mubr.msk.f32.gmra.mrb[58].mxu1 %vm8434_vm7, %v30135_v62 }
 0x9e0   : > { %22414 = vmatprep.mubr.msk.f32.mxu1 %vm8434_vm7, %v30136_v12 }
 0x9e3   : > { %22415 = vmatmul.mubr.msk.f32.gmra.mrb[60].mxu1 %vm8434_vm7, %v30137_v20 }
 0x9e4   : > { %22417 = vmatprep.mubr.msk.f32.mxu1 %vm8434_vm7, %v11146_v15 }
 0x9e7   : > { %22418 = vmatmul.mubr.msk.f32.gmra.mrb[62].mxu1 %vm8434_vm7, %v11147_v40 }
 0x9e8   : > { %22424 = vmatprep.mubr.msk.f32.mxu1 %vm8434_vm7, %v30103_v31 }
 0x9eb   : > { %22425 = vmatmul.mubr.msk.f32.vlgmr.msra.gmra.mrb[32].mxu1 %vm8434_vm7, %v30104_v33 }
 0x9ec   : > { %22427 = vmatprep.mubr.msk.f32.mxu1 %vm8434_vm7, %v30138_v30 }
 0x9ef   : > { %22428 = vmatmul.mubr.msk.f32.gmra.mrb[34].mxu1 %vm8434_vm7, %v30139_v14 }
 0x9f0   : > { %22430 = vmatprep.mubr.msk.f32.mxu1 %vm8434_vm7, %v30140_v22 }
 0x9f3   : > { %22431 = vmatmul.mubr.msk.f32.gmra.mrb[36].mxu1 %vm8434_vm7, %v30141_v26 }
 0x9f4   : > { %22433 = vmatprep.mubr.msk.f32.mxu1 %vm8434_vm7, %v30142_v2 }
 0x9f7   : > { %22434 = vmatmul.mubr.msk.f32.gmra.mrb[38].mxu1 %vm8434_vm7, %v30143_v6 }
 0x9f8   : > { %22436 = vmatprep.mubr.msk.f32.mxu1 %vm8434_vm7, %v30144_v7 }
 0x9fb   : > { %22437 = vmatmul.mubr.msk.f32.gmra.mrb[40].mxu1 %vm8434_vm7, %v30145_v47 }
 0x9fc   : > { %22439 = vmatprep.mubr.msk.f32.mxu1 %vm8434_vm7, %v30146_v24 }
 0x9ff   : > { %22440 = vmatmul.mubr.msk.f32.gmra.mrb[42].mxu1 %vm8434_vm7, %v30147_v27 }
 0xa00   : > { %22442 = vmatprep.mubr.msk.f32.mxu1 %vm8434_vm7, %v30148_v45 }
 0xa03   : > { %22443 = vmatmul.mubr.msk.f32.gmra.mrb[44].mxu1 %vm8434_vm7, %v30149_v28 }
 0xa04   : > { %22445 = vmatprep.mubr.msk.f32.mxu1 %vm8434_vm7, %v30150_v56 }
 0xa07   : > { %22446 = vmatmul.mubr.msk.f32.gmra.mrb[46].mxu1 %vm8434_vm7, %v30151_v10 }
 0xa08   : > { %22448 = vmatprep.mubr.msk.f32.mxu1 %vm8434_vm7, %v30152_v35 }
 0xa0b   : > { %22449 = vmatmul.mubr.msk.f32.gmra.mrb[48].mxu1 %vm8434_vm7, %v30153_v1 }
 0xa0c   : > { %22451 = vmatprep.mubr.msk.f32.mxu1 %vm8434_vm7, %v30121_v55 }
 0xa0f   : > { %22452 = vmatmul.mubr.msk.f32.gmra.mrb[50].mxu1 %vm8434_vm7, %v30122_v44 }
 0xa10   : > { %22454 = vmatprep.mubr.msk.f32.mxu1 %vm8434_vm7, %v30154_v42 }
 0xa13   : > { %22455 = vmatmul.mubr.msk.f32.gmra.mrb[52].mxu1 %vm8434_vm7, %v30124_v46 }
 0xa14   : > { %22457 = vmatprep.mubr.msk.f32.mxu1 %vm8434_vm7, %v30155_v3 }
 0xa17   : > { %22458 = vmatmul.mubr.msk.f32.gmra.mrb[54].mxu1 %vm8434_vm7, %v30126_v57 }
 0xa18   : > { %22460 = vmatprep.mubr.msk.f32.mxu1 %vm8434_vm7, %v30156_v50 }
 0xa1b   : > { %22461 = vmatmul.mubr.msk.f32.gmra.mrb[56].mxu1 %vm8434_vm7, %v30157_v34 }
 0xa1c   : > { %22463 = vmatprep.mubr.msk.f32.mxu1 %vm8434_vm7, %v27508_v11 }
 0xa1f   : > { %22464 = vmatmul.mubr.msk.f32.gmra.mrb[58].mxu1 %vm8434_vm7, %v30158_v59 }
 0xa20   : > { %22466 = vmatprep.mubr.msk.f32.mxu1 %vm8434_vm7, %v27731_v48 }
 0xa23   : > { %22467 = vmatmul.mubr.msk.f32.gmra.mrb[60].mxu1 %vm8434_vm7, %v27735_v23 }
 0xa24   : > { %22469 = vmatprep.mubr.msk.f32.mxu1 %vm8434_vm7, %v11534_v21 }
 0xa27   : > { %22470 = vmatmul.mubr.msk.f32.gmra.mrb[62].mxu1 %vm8434_vm7, %v11535_v53  ;;  %vm12192_vm7 = vcmask 162816  }
 0xa28   : > { %22478 = vmatprep.mubr.msk.f32.mxu0 %vm12192_vm7, %v12157_v16 }
 0xa29   : > { %22479 = vmatmul.mubr.msk.f32.vlgmr.msra.gmra.mrb[96].mxu0 %vm12192_vm7, %v12158_v41 }
 0xa2a   : > { %23055 = vmatpush3.bf16.msra.mxu0 %v23052_v13 }
 0xa2b   : > { %22530 = vmatprep.subr.msk.mxu0 %vm4746_vm5, %v18875_v54 }
 0xa2e   : > { %22531 = vmatpush3.msk.msra.mxu0 %vm4746_vm5, %v18875_v54 }
 0xabe   : > { %v22426_v36 = vpop.f32.mrb[32].mxu1 }
 0xabf   : > { %v23612_v25 = vadd.f32 %v22426_v36, %v27951_v58  ;;  %v11701_v43 = vpop.f32.mrb[33].mxu1 }
 0xac0   : > { %v23613_v44 = vadd.f32 %v27951_v58, %v11701_v43 }
 0xac1   : > { %v11925_v48 = vmul.f32 0.2, %v23612_v25  ;;  %vm11893_vm12 = vcmp.ge.f32.partialorder %v23612_v25, 0.0 }
 0xac2   : > { %vm11892_vm13 = vcmp.ge.f32.partialorder %v23613_v44, 0.0  ;;  %v11924_v18 = vmul.f32 0.2, %v23613_v44  ;;  %v22429_v11 = vpop.f32.mrb[34].mxu1 }
 0xac3   : > { %v23614_v9 = vadd.f32 %v22429_v11, %v27951_v58  ;;  %v11711_v0 = vpop.f32.mrb[35].mxu1  ;;  %v11957_v8 = vsel %vm11893_vm12, %v23612_v25, %v11925_v48 }
 0xac4   : > { %v23615_v55 = vadd.f32 %v27951_v58, %v11711_v0  ;;  %12022 = vrot.lane.b32.xlu0 %v11957_v8, %s24806_s15  ;;  %v11956_v33 = vsel %vm11892_vm13, %v23613_v44, %v11924_v18 }
 0xac5   : > { %v11927_v31 = vmul.f32 0.2, %v23614_v9  ;;  %12020 = vrot.lane.b32.xlu1 %v11956_v33, %s24806_s15  ;;  %vm11895_vm14 = vcmp.ge.f32.partialorder %v23614_v9, 0.0 }
 0xac6   : > { %vm11894_vm15 = vcmp.ge.f32.partialorder %v23615_v55, 0.0  ;;  %v11926_v46 = vmul.f32 0.2, %v23615_v55  ;;  %v22432_v23 = vpop.f32.mrb[36].mxu1 }
 0xac7   : > { %v23616_v57 = vadd.f32 %v22432_v23, %v27951_v58  ;;  %v11721_v39 = vpop.f32.mrb[37].mxu1  ;;  %v11959_v17 = vsel %vm11895_vm14, %v23614_v9, %v11927_v31 }
 0xac8   : > { %v23617_v60 = vadd.f32 %v27951_v58, %v11721_v39  ;;  %12026 = vrot.lane.b32.xlu0 %v11959_v17, %s24806_s15  ;;  %v11958_v63 = vsel %vm11894_vm15, %v23615_v55, %v11926_v46 }
 0xac9   : > { %v11929_v52 = vmul.f32 0.2, %v23616_v57  ;;  %12024 = vrot.lane.b32.xlu1 %v11958_v63, %s24806_s15  ;;  %vm11897_vm0 = vcmp.ge.f32.partialorder %v23616_v57, 0.0 }
 0xaca   : > { %vm11896_vm1 = vcmp.ge.f32.partialorder %v23617_v60, 0.0  ;;  %v11928_v49 = vmul.f32 0.2, %v23617_v60  ;;  %v22435_v51 = vpop.f32.mrb[38].mxu1 }
 0xacb   : > { %v23618_v29 = vadd.f32 %v22435_v51, %v27951_v58  ;;  %v11731_v32 = vpop.f32.mrb[39].mxu1  ;;  %v11961_v5 = vsel %vm11897_vm0, %v23616_v57, %v11929_v52 }
 0xacc   : > { %v23619_v62 = vadd.f32 %v27951_v58, %v11731_v32  ;;  %12030 = vrot.lane.b32.xlu0 %v11961_v5, %s24806_s15  ;;  %v11960_v12 = vsel %vm11896_vm1, %v23617_v60, %v11928_v49 }
 0xacd   : > { %v11931_v15 = vmul.f32 0.2, %v23618_v29  ;;  %12028 = vrot.lane.b32.xlu1 %v11960_v12, %s24806_s15  ;;  %vm11899_vm8 = vcmp.ge.f32.partialorder %v23618_v29, 0.0 }
 0xace   : > { %vm11898_vm3 = vcmp.ge.f32.partialorder %v23619_v62, 0.0  ;;  %v11930_v20 = vmul.f32 0.2, %v23619_v62  ;;  %v22438_v40 = vpop.f32.mrb[40].mxu1 }
 0xacf   : > { %v23620_v30 = vadd.f32 %v22438_v40, %v27951_v58  ;;  %v11741_v14 = vpop.f32.mrb[41].mxu1  ;;  %v11963_v22 = vsel %vm11899_vm8, %v23618_v29, %v11931_v15 }
 0xad0   : > { %v23621_v26 = vadd.f32 %v27951_v58, %v11741_v14  ;;  %12034 = vrot.lane.b32.xlu0 %v11963_v22, %s24806_s15  ;;  %v11962_v2 = vsel %vm11898_vm3, %v23619_v62, %v11930_v20 }
 0xad1   : > { %v11933_v6 = vmul.f32 0.2, %v23620_v30  ;;  %12032 = vrot.lane.b32.xlu1 %v11962_v2, %s24806_s15  ;;  %vm11901_vm4 = vcmp.ge.f32.partialorder %v23620_v30, 0.0 }
 0xad2   : > { %vm11900_vm6 = vcmp.ge.f32.partialorder %v23621_v26, 0.0  ;;  %v11932_v7 = vmul.f32 0.2, %v23621_v26  ;;  %v22441_v47 = vpop.f32.mrb[42].mxu1 }
 0xad3   : > { %v23622_v24 = vadd.f32 %v22441_v47, %v27951_v58  ;;  %v11751_v27 = vpop.f32.mrb[43].mxu1  ;;  %v11965_v45 = vsel %vm11901_vm4, %v23620_v30, %v11933_v6 }
 0xad4   : > { %v23623_v28 = vadd.f32 %v27951_v58, %v11751_v27  ;;  %12038 = vrot.lane.b32.xlu0 %v11965_v45, %s24806_s15  ;;  %v11964_v56 = vsel %vm11900_vm6, %v23621_v26, %v11932_v7 }
 0xad5   : > { %vm11903_vm9 = vcmp.ge.f32.partialorder %v23622_v24, 0.0  ;;  %v11935_v10 = vmul.f32 0.2, %v23622_v24  ;;  %12036 = vrot.lane.b32.xlu1 %v11964_v56, %s24806_s15 }
 0xad6   : > { %vm11902_vm10 = vcmp.ge.f32.partialorder %v23623_v28, 0.0  ;;  %v11934_v35 = vmul.f32 0.2, %v23623_v28  ;;  %v22444_v1 = vpop.f32.mrb[44].mxu1 }
 0xad7   : > { %v23624_v42 = vadd.f32 %v22444_v1, %v27951_v58  ;;  %v11761_v3 = vpop.f32.mrb[45].mxu1  ;;  %v11967_v50 = vsel %vm11903_vm9, %v23622_v24, %v11935_v10 }
 0xad8   : > { %v23625_v34 = vadd.f32 %v27951_v58, %v11761_v3  ;;  %12042 = vrot.lane.b32.xlu0 %v11967_v50, %s24806_s15  ;;  %v11966_v59 = vsel %vm11902_vm10, %v23623_v28, %v11934_v35 }
 0xad9   : > { %vm11905_vm11 = vcmp.ge.f32.partialorder %v23624_v42, 0.0  ;;  %v11937_v21 = vmul.f32 0.2, %v23624_v42  ;;  %12040 = vrot.lane.b32.xlu1 %v11966_v59, %s24806_s15 }
 0xada   : > { %vm11904_vm12 = vcmp.ge.f32.partialorder %v23625_v34, 0.0  ;;  %v11936_v53 = vmul.f32 0.2, %v23625_v34  ;;  %v22447_v19 = vpop.f32.mrb[46].mxu1 }
 0xadb   : > { %v23626_v61 = vadd.f32 %v22447_v19, %v27951_v58  ;;  %v11771_v38 = vpop.f32.mrb[47].mxu1  ;;  %v11969_v4 = vsel %vm11905_vm11, %v23624_v42, %v11937_v21 }
 0xadc   : > { %v23627_v16 = vadd.f32 %v27951_v58, %v11771_v38  ;;  %12046 = vrot.lane.b32.xlu0 %v11969_v4, %s24806_s15  ;;  %v11968_v37 = vsel %vm11904_vm12, %v23625_v34, %v11936_v53  ;;  %v18909_v4 = vld [vmem:[%s29667_s4 + $0x30] sm:$0xff] }
 0xadd   : > { %vm11907_vm13 = vcmp.ge.f32.partialorder %v23626_v61, 0.0  ;;  %v11939_v13 = vmul.f32 0.2, %v23626_v61  ;;  %12044 = vrot.lane.b32.xlu1 %v11968_v37, %s24806_s15 }
 0xade   : > { %vm11906_vm14 = vcmp.ge.f32.partialorder %v23627_v16, 0.0  ;;  %v11938_v41 = vmul.f32 0.2, %v23627_v16  ;;  %v22450_v36 = vpop.f32.mrb[48].mxu1 }
 0xadf   : > { %v23628_v25 = vadd.f32 %v22450_v36, %v27951_v58  ;;  %v11781_v43 = vpop.f32.mrb[49].mxu1  ;;  %v11971_v44 = vsel %vm11907_vm13, %v23626_v61, %v11939_v13 }
 0xae0   : > { %v23629_v48 = vadd.f32 %v27951_v58, %v11781_v43  ;;  %12050 = vrot.lane.b32.xlu0 %v11971_v44, %s24806_s15  ;;  %v11970_v18 = vsel %vm11906_vm14, %v23627_v16, %v11938_v41  ;;  %v18910_v16 = vld [vmem:[%s29667_s4 + $0x38] sm:$0xff] }
 0xae1   : > { %vm11909_vm15 = vcmp.ge.f32.partialorder %v23628_v25, 0.0  ;;  %v11941_v11 = vmul.f32 0.2, %v23628_v25  ;;  %12048 = vrot.lane.b32.xlu1 %v11970_v18, %s24806_s15  ;;  %v28025_v41 = vpack.c.bf16 %v18910_v16, %v18909_v4 }
 0xae2   : > { %vm11908_vm0 = vcmp.ge.f32.partialorder %v23629_v48, 0.0  ;;  %v11940_v9 = vmul.f32 0.2, %v23629_v48  ;;  %v22453_v0 = vpop.f32.mrb[50].mxu1 }
 0xae3   : > { %v23630_v8 = vadd.f32 %v22453_v0, %v27951_v58  ;;  %v11791_v55 = vpop.f32.mrb[51].mxu1  ;;  %v11973_v33 = vsel %vm11909_vm15, %v23628_v25, %v11941_v11  ;;  %23057 = vmatprep.subr.bf16.mxu0 %v28025_v41 }
 0xae4   : > { %v23631_v31 = vadd.f32 %v27951_v58, %v11791_v55  ;;  %12054 = vrot.lane.b32.xlu0 %v11973_v33, %s24806_s15  ;;  %v11972_v46 = vsel %vm11908_vm0, %v23629_v48, %v11940_v9 }
 0xae5   : > { %vm11911_vm1 = vcmp.ge.f32.partialorder %v23630_v8, 0.0  ;;  %v11943_v23 = vmul.f32 0.2, %v23630_v8  ;;  %12052 = vrot.lane.b32.xlu1 %v11972_v46, %s24806_s15 }
 0xae6   : > { %vm11910_vm8 = vcmp.ge.f32.partialorder %v23631_v31, 0.0  ;;  %v11942_v57 = vmul.f32 0.2, %v23631_v31  ;;  %v22456_v39 = vpop.f32.mrb[52].mxu1 }
 0xae7   : > { %v23632_v17 = vadd.f32 %v22456_v39, %v27951_v58  ;;  %v11801_v60 = vpop.f32.mrb[53].mxu1  ;;  %v11975_v63 = vsel %vm11911_vm1, %v23630_v8, %v11943_v23 }
 0xae8   : > { %v23633_v52 = vadd.f32 %v27951_v58, %v11801_v60  ;;  %12058 = vrot.lane.b32.xlu0 %v11975_v63, %s24806_s15  ;;  %v11974_v49 = vsel %vm11910_vm8, %v23631_v31, %v11942_v57  ;;  %vm12116_vm8 = vcmask 162944  }
 0xae9   : > { %vm11913_vm3 = vcmp.ge.f32.partialorder %v23632_v17, 0.0  ;;  %v11945_v51 = vmul.f32 0.2, %v23632_v17  ;;  %12056 = vrot.lane.b32.xlu1 %v11974_v49, %s24806_s15 }
 0xaea   : > { %vm11912_vm4 = vcmp.ge.f32.partialorder %v23633_v52, 0.0  ;;  %v11944_v29 = vmul.f32 0.2, %v23633_v52  ;;  %v22459_v32 = vpop.f32.mrb[54].mxu1 }
 0xaeb   : > { %v23634_v5 = vadd.f32 %v22459_v32, %v27951_v58  ;;  %v11811_v62 = vpop.f32.mrb[55].mxu1  ;;  %v11977_v12 = vsel %vm11913_vm3, %v23632_v17, %v11945_v51 }
 0xaec   : > { %v23635_v15 = vadd.f32 %v27951_v58, %v11811_v62  ;;  %12062 = vrot.lane.b32.xlu0 %v11977_v12, %s24806_s15  ;;  %v11976_v20 = vsel %vm11912_vm4, %v23633_v52, %v11944_v29 }
 0xaed   : > { %vm11915_vm6 = vcmp.ge.f32.partialorder %v23634_v5, 0.0  ;;  %v11947_v40 = vmul.f32 0.2, %v23634_v5  ;;  %12060 = vrot.lane.b32.xlu1 %v11976_v20, %s24806_s15 }
 0xaee   : > { %vm11914_vm9 = vcmp.ge.f32.partialorder %v23635_v15, 0.0  ;;  %v11946_v30 = vmul.f32 0.2, %v23635_v15  ;;  %v22462_v14 = vpop.f32.mrb[56].mxu1 }
 0xaef   : > { %v23636_v22 = vadd.f32 %v22462_v14, %v27951_v58  ;;  %v11821_v26 = vpop.f32.mrb[57].mxu1  ;;  %v11979_v2 = vsel %vm11915_vm6, %v23634_v5, %v11947_v40 }
 0xaf0   : > { %v23637_v6 = vadd.f32 %v27951_v58, %v11821_v26  ;;  %12066 = vrot.lane.b32.xlu0 %v11979_v2, %s24806_s15  ;;  %v11978_v7 = vsel %vm11914_vm9, %v23635_v15, %v11946_v30 }
 0xaf1   : > { %vm11917_vm10 = vcmp.ge.f32.partialorder %v23636_v22, 0.0  ;;  %v11949_v47 = vmul.f32 0.2, %v23636_v22  ;;  %12064 = vrot.lane.b32.xlu1 %v11978_v7, %s24806_s15 }
 0xaf2   : > { %vm11916_vm11 = vcmp.ge.f32.partialorder %v23637_v6, 0.0  ;;  %v11948_v24 = vmul.f32 0.2, %v23637_v6  ;;  %v22465_v27 = vpop.f32.mrb[58].mxu1 }
 0xaf3   : > { %v23638_v45 = vadd.f32 %v22465_v27, %v27951_v58  ;;  %v11831_v28 = vpop.f32.mrb[59].mxu1  ;;  %v11981_v56 = vsel %vm11917_vm10, %v23636_v22, %v11949_v47 }
 0xaf4   : > { %v23639_v10 = vadd.f32 %v27951_v58, %v11831_v28  ;;  %12070 = vrot.lane.b32.xlu0 %v11981_v56, %s24806_s15  ;;  %v11980_v35 = vsel %vm11916_vm11, %v23637_v6, %v11948_v24 }
 0xaf5   : > { %vm11919_vm12 = vcmp.ge.f32.partialorder %v23638_v45, 0.0  ;;  %v11951_v1 = vmul.f32 0.2, %v23638_v45  ;;  %12068 = vrot.lane.b32.xlu1 %v11980_v35, %s24806_s15 }
 0xaf6   : > { %vm11918_vm13 = vcmp.ge.f32.partialorder %v23639_v10, 0.0  ;;  %v11950_v42 = vmul.f32 0.2, %v23639_v10  ;;  %v22468_v3 = vpop.f32.mrb[60].mxu1 }
 0xaf7   : > { %v23640_v50 = vadd.f32 %v22468_v3, %v27951_v58  ;;  %v11841_v34 = vpop.f32.mrb[61].mxu1  ;;  %v11983_v59 = vsel %vm11919_vm12, %v23638_v45, %v11951_v1 }
 0xaf8   : > { %v23641_v21 = vadd.f32 %v27951_v58, %v11841_v34  ;;  %12074 = vrot.lane.b32.xlu0 %v11983_v59, %s24806_s15  ;;  %v11982_v53 = vsel %vm11918_vm13, %v23639_v10, %v11950_v42 }
 0xaf9   : > { %vm11921_vm14 = vcmp.ge.f32.partialorder %v23640_v50, 0.0  ;;  %v11953_v19 = vmul.f32 0.2, %v23640_v50  ;;  %12072 = vrot.lane.b32.xlu1 %v11982_v53, %s24806_s15 }
 0xafa   : > { %vm11920_vm15 = vcmp.ge.f32.partialorder %v23641_v21, 0.0  ;;  %v11952_v61 = vmul.f32 0.2, %v23641_v21  ;;  %v22471_v38 = vpop.f32.mrb[62].mxu1 }
 0xafb   : > { %v23642_v37 = vadd.f32 %v22471_v38, %v27951_v58  ;;  %v11851_v54 = vpop.f32.mrb[63].mxu1  ;;  %v11985_v13 = vsel %vm11921_vm14, %v23640_v50, %v11953_v19 }
 0xafc   : > { %v23643_v36 = vadd.f32 %v27951_v58, %v11851_v54  ;;  %12078 = vrot.lane.b32.xlu0 %v11985_v13, %s24806_s15  ;;  %v11984_v25 = vsel %vm11920_vm15, %v23641_v21, %v11952_v61 }
 0xafd   : > { %vm11923_vm0 = vcmp.ge.f32.partialorder %v23642_v37, 0.0  ;;  %v11955_v43 = vmul.f32 0.2, %v23642_v37  ;;  %12076 = vrot.lane.b32.xlu1 %v11984_v25, %s24806_s15 }
 0xafe   : > { %vm11922_vm1 = vcmp.ge.f32.partialorder %v23643_v36, 0.0  ;;  %v11954_v44 = vmul.f32 0.2, %v23643_v36 }
 0xaff   : > { %v11987_v48 = vsel %vm11923_vm0, %v23642_v37, %v11955_v43 }
 0xb00   : > { %12082 = vrot.lane.b32.xlu0 %v11987_v48, %s24806_s15  ;;  %v11986_v18 = vsel %vm11922_vm1, %v23643_v36, %v11954_v44 }
 0xb01   : > { %12080 = vrot.lane.b32.xlu1 %v11986_v18, %s24806_s15  ;;  %v12549_v18 = vld [vmem:[#allocation2 + $0x1] sm:$0xff]  ;;  %s17823_s15 = sshll.u32 %s379_s13, 4  ;;  %s29623_s15 = int_to_ptr.vmem [resolvable:$true] %s17823_s15 }
 0xb02   : > { %s24737_s25 = scalar_lea.vmem %s29623_s15, 256 }
 0xb03   : > { %p24738_p11 = scmp.ne.s32.totalorder %s29623_s15, %s24737_s25 }
 0xb05   : > { %p24739_p12 = pnand %p24738_p11, %p24908_p5 }
 0xb07   : > { %p24740_p13 = pneg %p24739_p12 }
 0xb36   : > { %v12023_v11 = vpop.permute.xlu0 %12022 }
 0xb37   : > { %v12021_v58 = vpop.permute.xlu1 %12020  ;;  %12118 = vst.msk [vmem:[#allocation2 + $0x21] sm:$0xff] %vm12116_vm8, %v12023_v11  ;;  %v12550_v11 = vld [vmem:[#allocation2 + $0x9] sm:$0xff] }
 0xb38   : > { %12117 = vst.msk [vmem:[#allocation2 + $0x19] sm:$0xff] %vm12116_vm8, %v12021_v58  ;;  %v18911_v58 = vld [vmem:[%s29667_s4 + $0x40] sm:$0xf] }
 0xb3a   : > { %v12027_v9 = vpop.permute.xlu0 %12026 }
 0xb3b   : > { %v12025_v0 = vpop.permute.xlu1 %12024  ;;  %12120 = vst.msk [vmem:[#allocation2 + $0x39] sm:$0xff] %vm12116_vm8, %v12027_v9  ;;  %v18945_v9 = vld [vmem:[%s29667_s4 + $0x48] sm:$0xff] }
 0xb3c   : > { %12119 = vst.msk [vmem:[#allocation2 + $0x31] sm:$0xff] %vm12116_vm8, %v12025_v0  ;;  %v18946_v0 = vld [vmem:[%s29667_s4 + $0x50] sm:$0xff] }
 0xb3e   : > { %v12031_v8 = vpop.permute.xlu0 %12030 }
 0xb3f   : > { %v12029_v55 = vpop.permute.xlu1 %12028  ;;  %v28037_v33 = vld [vmem:[#allocation2 + $0x18] sm:$0xff]  ;;  %12122 = vst.msk [vmem:[#allocation2 + $0x51] sm:$0xff] %vm12116_vm8, %v12031_v8  ;;  %v28040_v31 = vld [vmem:[#allocation2 + $0x20] sm:$0xff] }
 0xb40   : > { %22481 = vmatprep.mubr.msk.f32.mxu0 %vm12192_vm7, %v28037_v33  ;;  %12121 = vst.msk [vmem:[#allocation2 + $0x49] sm:$0xff] %vm12116_vm8, %v12029_v55  ;;  %v28196_v8 = vld [vmem:[#allocation2 + $0x19] sm:$0xff]  ;;  %v28202_v55 = vpack.c.bf16 %v18946_v0, %v18945_v9  ;;  %v12942_v9 = vld [vmem:[#allocation2 + $0xa] sm:$0xff] }
 0xb41   : > { %22482 = vmatmul.mubr.msk.f32.gmra.mrb[98].mxu0 %vm12192_vm7, %v28040_v31  ;;  %v18947_v0 = vld [vmem:[%s29667_s4 + $0x58] sm:$0xf] }
 0xb42   : > { %v12035_v46 = vpop.permute.xlu0 %12034 }
 0xb43   : > { %12124 = vst.msk [vmem:[#allocation2 + $0x69] sm:$0xff] %vm12116_vm8, %v12035_v46  ;;  %v12033_v23 = vpop.permute.xlu1 %12032  ;;  %v28048_v57 = vld [vmem:[#allocation2 + $0x30] sm:$0xff]  ;;  %v28050_v39 = vld [vmem:[#allocation2 + $0x38] sm:$0xff]  ;;  %v28204_v46 = vld [vmem:[#allocation2 + $0x21] sm:$0xff] }
 0xb44   : > { %12123 = vst.msk [vmem:[#allocation2 + $0x61] sm:$0xff] %vm12116_vm8, %v12033_v23  ;;  %22484 = vmatprep.mubr.msk.f32.mxu0 %vm12192_vm7, %v28048_v57  ;;  %v28208_v23 = vld [vmem:[#allocation2 + $0x31] sm:$0xff] }
 0xb45   : > { %22485 = vmatmul.mubr.msk.f32.gmra.mrb[100].mxu0 %vm12192_vm7, %v28050_v39 }
 0xb46   : > { %v12039_v17 = vpop.permute.xlu0 %12038 }
 0xb47   : > { %12126 = vst.msk [vmem:[#allocation2 + $0x81] sm:$0xff] %vm12116_vm8, %v12039_v17  ;;  %v12037_v60 = vpop.permute.xlu1 %12036  ;;  %v28058_v63 = vld [vmem:[#allocation2 + $0x48] sm:$0xff]  ;;  %v28060_v52 = vld [vmem:[#allocation2 + $0x50] sm:$0xff] }
 0xb48   : > { %12125 = vst.msk [vmem:[#allocation2 + $0x79] sm:$0xff] %vm12116_vm8, %v12037_v60  ;;  %22487 = vmatprep.mubr.msk.f32.mxu0 %vm12192_vm7, %v28058_v63  ;;  %v28218_v17 = vld [vmem:[#allocation2 + $0x49] sm:$0xff]  ;;  %v28222_v60 = vld [vmem:[#allocation2 + $0x51] sm:$0xff] }
 0xb49   : > { %22488 = vmatmul.mubr.msk.f32.gmra.mrb[102].mxu0 %vm12192_vm7, %v28060_v52 }
 0xb4a   : > { %v12043_v49 = vpop.permute.xlu0 %12042 }
 0xb4b   : > { %12128 = vst.msk [vmem:[#allocation2 + $0x99] sm:$0xff] %vm12116_vm8, %v12043_v49  ;;  %v12041_v51 = vpop.permute.xlu1 %12040  ;;  %v28068_v29 = vld [vmem:[#allocation2 + $0x60] sm:$0xff]  ;;  %v28070_v32 = vld [vmem:[#allocation2 + $0x68] sm:$0xff] }
 0xb4c   : > { %12127 = vst.msk [vmem:[#allocation2 + $0x91] sm:$0xff] %vm12116_vm8, %v12041_v51  ;;  %22490 = vmatprep.mubr.msk.f32.mxu0 %vm12192_vm7, %v28068_v29  ;;  %v28226_v49 = vld [vmem:[#allocation2 + $0x61] sm:$0xff]  ;;  %v28230_v51 = vld [vmem:[#allocation2 + $0x69] sm:$0xff] }
 0xb4d   : > { %22491 = vmatmul.mubr.msk.f32.gmra.mrb[104].mxu0 %vm12192_vm7, %v28070_v32 }
 0xb4e   : > { %v12047_v5 = vpop.permute.xlu0 %12046 }
 0xb4f   : > { %12130 = vst.msk [vmem:[#allocation2 + $0xb1] sm:$0xff] %vm12116_vm8, %v12047_v5  ;;  %v12045_v62 = vpop.permute.xlu1 %12044  ;;  %v28078_v12 = vld [vmem:[#allocation2 + $0x78] sm:$0xff]  ;;  %v28080_v15 = vld [vmem:[#allocation2 + $0x80] sm:$0xff] }
 0xb50   : > { %12129 = vst.msk [vmem:[#allocation2 + $0xa9] sm:$0xff] %vm12116_vm8, %v12045_v62  ;;  %22493 = vmatprep.mubr.msk.f32.mxu0 %vm12192_vm7, %v28078_v12  ;;  %v28234_v5 = vld [vmem:[#allocation2 + $0x79] sm:$0xff]  ;;  %v28238_v62 = vld [vmem:[#allocation2 + $0x81] sm:$0xff] }
 0xb51   : > { %22494 = vmatmul.mubr.msk.f32.gmra.mrb[106].mxu0 %vm12192_vm7, %v28080_v15 }
 0xb52   : > { %v12051_v20 = vpop.permute.xlu0 %12050 }
 0xb53   : > { %12132 = vst.msk [vmem:[#allocation2 + $0xc9] sm:$0xff] %vm12116_vm8, %v12051_v20  ;;  %v12049_v40 = vpop.permute.xlu1 %12048  ;;  %v28088_v30 = vld [vmem:[#allocation2 + $0x90] sm:$0xff]  ;;  %v28090_v14 = vld [vmem:[#allocation2 + $0x98] sm:$0xff] }
 0xb54   : > { %12131 = vst.msk [vmem:[#allocation2 + $0xc1] sm:$0xff] %vm12116_vm8, %v12049_v40  ;;  %22496 = vmatprep.mubr.msk.f32.mxu0 %vm12192_vm7, %v28088_v30  ;;  %v28242_v20 = vld [vmem:[#allocation2 + $0x91] sm:$0xff]  ;;  %v28246_v40 = vld [vmem:[#allocation2 + $0x99] sm:$0xff] }
 0xb55   : > { %22497 = vmatmul.mubr.msk.f32.gmra.mrb[108].mxu0 %vm12192_vm7, %v28090_v14 }
 0xb56   : > { %v12055_v22 = vpop.permute.xlu0 %12054 }
 0xb57   : > { %12134 = vst.msk [vmem:[#allocation2 + $0xe1] sm:$0xff] %vm12116_vm8, %v12055_v22  ;;  %v12053_v26 = vpop.permute.xlu1 %12052  ;;  %v28098_v2 = vld [vmem:[#allocation2 + $0xa8] sm:$0xff]  ;;  %v28100_v6 = vld [vmem:[#allocation2 + $0xb0] sm:$0xff] }
 0xb58   : > { %12133 = vst.msk [vmem:[#allocation2 + $0xd9] sm:$0xff] %vm12116_vm8, %v12053_v26  ;;  %22499 = vmatprep.mubr.msk.f32.mxu0 %vm12192_vm7, %v28098_v2  ;;  %v28250_v22 = vld [vmem:[#allocation2 + $0xa9] sm:$0xff]  ;;  %v28254_v26 = vld [vmem:[#allocation2 + $0xb1] sm:$0xff] }
 0xb59   : > { %22500 = vmatmul.mubr.msk.f32.gmra.mrb[110].mxu0 %vm12192_vm7, %v28100_v6 }
 0xb5a   : > { %v12059_v7 = vpop.permute.xlu0 %12058 }
 0xb5b   : > { %12136 = vst.msk [vmem:[#allocation2 + $0xf9] sm:$0xff] %vm12116_vm8, %v12059_v7  ;;  %v12057_v47 = vpop.permute.xlu1 %12056  ;;  %v28108_v24 = vld [vmem:[#allocation2 + $0xc0] sm:$0xff]  ;;  %v28110_v27 = vld [vmem:[#allocation2 + $0xc8] sm:$0xff] }
 0xb5c   : > { %12135 = vst.msk [vmem:[#allocation2 + $0xf1] sm:$0xff] %vm12116_vm8, %v12057_v47  ;;  %22502 = vmatprep.mubr.msk.f32.mxu0 %vm12192_vm7, %v28108_v24  ;;  %v28258_v7 = vld [vmem:[#allocation2 + $0xc1] sm:$0xff]  ;;  %v28262_v47 = vld [vmem:[#allocation2 + $0xc9] sm:$0xff] }
 0xb5d   : > { %22503 = vmatmul.mubr.msk.f32.gmra.mrb[112].mxu0 %vm12192_vm7, %v28110_v27 }
 0xb5e   : > { %v12063_v45 = vpop.permute.xlu0 %12062 }
 0xb5f   : > { %12138 = vst.msk [vmem:[#allocation2 + $0x111] sm:$0xff] %vm12116_vm8, %v12063_v45  ;;  %v12061_v28 = vpop.permute.xlu1 %12060  ;;  %v28118_v56 = vld [vmem:[#allocation2 + $0xd8] sm:$0xff]  ;;  %v28120_v10 = vld [vmem:[#allocation2 + $0xe0] sm:$0xff] }
 0xb60   : > { %12137 = vst.msk [vmem:[#allocation2 + $0x109] sm:$0xff] %vm12116_vm8, %v12061_v28  ;;  %22505 = vmatprep.mubr.msk.f32.mxu0 %vm12192_vm7, %v28118_v56  ;;  %v28266_v45 = vld [vmem:[#allocation2 + $0xd9] sm:$0xff]  ;;  %v28270_v28 = vld [vmem:[#allocation2 + $0xe1] sm:$0xff] }
 0xb61   : > { %22506 = vmatmul.mubr.msk.f32.gmra.mrb[114].mxu0 %vm12192_vm7, %v28120_v10 }
 0xb62   : > { %v12067_v35 = vpop.permute.xlu0 %12066 }
 0xb63   : > { %12140 = vst.msk [vmem:[#allocation2 + $0x129] sm:$0xff] %vm12116_vm8, %v12067_v35  ;;  %v12065_v1 = vpop.permute.xlu1 %12064  ;;  %v28128_v42 = vld [vmem:[#allocation2 + $0xf0] sm:$0xff]  ;;  %v28130_v3 = vld [vmem:[#allocation2 + $0xf8] sm:$0xff] }
 0xb64   : > { %12139 = vst.msk [vmem:[#allocation2 + $0x121] sm:$0xff] %vm12116_vm8, %v12065_v1  ;;  %22508 = vmatprep.mubr.msk.f32.mxu0 %vm12192_vm7, %v28128_v42  ;;  %v28274_v35 = vld [vmem:[#allocation2 + $0xf1] sm:$0xff]  ;;  %v28278_v1 = vld [vmem:[#allocation2 + $0xf9] sm:$0xff] }
 0xb65   : > { %22509 = vmatmul.mubr.msk.f32.gmra.mrb[116].mxu0 %vm12192_vm7, %v28130_v3 }
 0xb66   : > { %v12071_v50 = vpop.permute.xlu0 %12070 }
 0xb67   : > { %12142 = vst.msk [vmem:[#allocation2 + $0x141] sm:$0xff] %vm12116_vm8, %v12071_v50  ;;  %v12069_v34 = vpop.permute.xlu1 %12068  ;;  %v28138_v59 = vld [vmem:[#allocation2 + $0x108] sm:$0xff]  ;;  %v28140_v21 = vld [vmem:[#allocation2 + $0x110] sm:$0xff] }
 0xb68   : > { %12141 = vst.msk [vmem:[#allocation2 + $0x139] sm:$0xff] %vm12116_vm8, %v12069_v34  ;;  %22511 = vmatprep.mubr.msk.f32.mxu0 %vm12192_vm7, %v28138_v59  ;;  %v28282_v50 = vld [vmem:[#allocation2 + $0x109] sm:$0xff]  ;;  %v28286_v34 = vld [vmem:[#allocation2 + $0x111] sm:$0xff] }
 0xb69   : > { %22512 = vmatmul.mubr.msk.f32.gmra.mrb[118].mxu0 %vm12192_vm7, %v28140_v21 }
 0xb6a   : > { %v12075_v53 = vpop.permute.xlu0 %12074 }
 0xb6b   : > { %12144 = vst.msk [vmem:[#allocation2 + $0x159] sm:$0xff] %vm12116_vm8, %v12075_v53  ;;  %v12073_v19 = vpop.permute.xlu1 %12072  ;;  %v28148_v61 = vld [vmem:[#allocation2 + $0x120] sm:$0xff]  ;;  %v28150_v38 = vld [vmem:[#allocation2 + $0x128] sm:$0xff] }
 0xb6c   : > { %12143 = vst.msk [vmem:[#allocation2 + $0x151] sm:$0xff] %vm12116_vm8, %v12073_v19  ;;  %22514 = vmatprep.mubr.msk.f32.mxu0 %vm12192_vm7, %v28148_v61  ;;  %v28290_v53 = vld [vmem:[#allocation2 + $0x121] sm:$0xff]  ;;  %v28294_v19 = vld [vmem:[#allocation2 + $0x129] sm:$0xff] }
 0xb6d   : > { %22515 = vmatmul.mubr.msk.f32.gmra.mrb[120].mxu0 %vm12192_vm7, %v28150_v38  ;;  %30159 = vst [vmem:[#allocation10_spill] sm:$0xff] %v28290_v53 }
 0xb6e   : > { %v12079_v4 = vpop.permute.xlu0 %12078 }
 0xb6f   : > { %12146 = vst.msk [vmem:[#allocation2 + $0x171] sm:$0xff] %vm12116_vm8, %v12079_v4  ;;  %v12077_v16 = vpop.permute.xlu1 %12076  ;;  %v28158_v37 = vld [vmem:[#allocation2 + $0x138] sm:$0xff]  ;;  %v28160_v54 = vld [vmem:[#allocation2 + $0x140] sm:$0xff] }
 0xb70   : > { %12145 = vst.msk [vmem:[#allocation2 + $0x169] sm:$0xff] %vm12116_vm8, %v12077_v16  ;;  %22517 = vmatprep.mubr.msk.f32.mxu0 %vm12192_vm7, %v28158_v37  ;;  %v28298_v4 = vld [vmem:[#allocation2 + $0x139] sm:$0xff]  ;;  %v28302_v16 = vld [vmem:[#allocation2 + $0x141] sm:$0xff] }
 0xb71   : > { %22518 = vmatmul.mubr.msk.f32.gmra.mrb[122].mxu0 %vm12192_vm7, %v28160_v54  ;;  %30160 = vst [vmem:[#allocation11_spill] sm:$0xff] %v28298_v4  ;;  %30161 = vst [vmem:[#allocation26_spill] sm:$0xff] %v28302_v16 }
 0xb72   : > { %v12083_v13 = vpop.permute.xlu0 %12082 }
 0xb73   : > { %12148 = vst.msk [vmem:[#allocation2 + $0x189] sm:$0xff] %vm12116_vm8, %v12083_v13  ;;  %v12081_v36 = vpop.permute.xlu1 %12080  ;;  %v28168_v25 = vld [vmem:[#allocation2 + $0x150] sm:$0xff]  ;;  %v28170_v43 = vld [vmem:[#allocation2 + $0x158] sm:$0xff] }
 0xb74   : > { %12147 = vst.msk [vmem:[#allocation2 + $0x181] sm:$0xff] %vm12116_vm8, %v12081_v36  ;;  %22520 = vmatprep.mubr.msk.f32.mxu0 %vm12192_vm7, %v28168_v25  ;;  %v28306_v13 = vld [vmem:[#allocation2 + $0x151] sm:$0xff]  ;;  %v28310_v36 = vld [vmem:[#allocation2 + $0x159] sm:$0xff] }
 0xb75   : > { %22521 = vmatmul.mubr.msk.f32.gmra.mrb[124].mxu0 %vm12192_vm7, %v28170_v43  ;;  %30162 = vst [vmem:[#allocation27_spill] sm:$0xff] %v28306_v13  ;;  %30163 = vst [vmem:[#allocation29_spill] sm:$0xff] %v28310_v36 }
 0xb77   : > { %v28177_v44 = vld [vmem:[#allocation2 + $0x168] sm:$0xff]  ;;  %v28179_v48 = vld [vmem:[#allocation2 + $0x170] sm:$0xff] }
 0xb78   : > { %22523 = vmatprep.mubr.msk.f32.mxu0 %vm12192_vm7, %v28177_v44 }
 0xb79   : > { %22524 = vmatmul.mubr.msk.f32.gmra.mrb[126].mxu0 %vm12192_vm7, %v28179_v48 }
 0xb7a   : > { %22532 = vmatprep.mubr.msk.f32.mxu0 %vm12192_vm7, %v12549_v18  ;;  %v28314_v18 = vld [vmem:[#allocation2 + $0x169] sm:$0xff] }
 0xb7b   : > { %30164 = vst [vmem:[#allocation33_spill] sm:$0xff] %v28314_v18 }
 0xb7d   : > { %22533 = vmatmul.mubr.msk.f32.vlgmr.msra.gmra.mrb[96].mxu0 %vm12192_vm7, %v12550_v11  ;;  %v12941_v11 = vld [vmem:[#allocation2 + $0x2] sm:$0xff] }
 0xb7e   : > { %23059 = vmatpush3.bf16.msra.mxu0 %v28025_v41  ;;  %22535 = vmatprep.mubr.msk.f32.mxu0 %vm12192_vm7, %v28196_v8  ;;  %v28214_v41 = vld [vmem:[#allocation2 + $0x39] sm:$0xff] }
 0xb7f   : > { %22584 = vmatprep.subr.msk.mxu0 %vm4746_vm5, %v18911_v58 }
 0xb81   : > { %22536 = vmatmul.mubr.msk.f32.gmra.mrb[98].mxu0 %vm12192_vm7, %v28204_v46 }
 0xb82   : > { %22538 = vmatprep.mubr.msk.f32.mxu0 %vm12192_vm7, %v28208_v23  ;;  %22585 = vmatpush3.msk.msra.mxu0 %vm4746_vm5, %v18911_v58  ;;  %v28318_v58 = vld [vmem:[#allocation2 + $0x171] sm:$0xff] }
 0xb83   : > { %23061 = vmatprep.subr.bf16.mxu0 %v28202_v55  ;;  %30165 = vst [vmem:[#allocation31_spill] sm:$0xff] %v28318_v58 }
 0xb85   : > { %22539 = vmatmul.mubr.msk.f32.gmra.mrb[100].mxu0 %vm12192_vm7, %v28214_v41 }
 0xb86   : > { %22541 = vmatprep.mubr.msk.f32.mxu0 %vm12192_vm7, %v28218_v17 }
 0xb89   : > { %22542 = vmatmul.mubr.msk.f32.gmra.mrb[102].mxu0 %vm12192_vm7, %v28222_v60 }
 0xb8a   : > { %22544 = vmatprep.mubr.msk.f32.mxu0 %vm12192_vm7, %v28226_v49 }
 0xb8d   : > { %22545 = vmatmul.mubr.msk.f32.gmra.mrb[104].mxu0 %vm12192_vm7, %v28230_v51 }
 0xb8e   : > { %22547 = vmatprep.mubr.msk.f32.mxu0 %vm12192_vm7, %v28234_v5 }
 0xb91   : > { %22548 = vmatmul.mubr.msk.f32.gmra.mrb[106].mxu0 %vm12192_vm7, %v28238_v62 }
 0xb92   : > { %22550 = vmatprep.mubr.msk.f32.mxu0 %vm12192_vm7, %v28242_v20 }
 0xb95   : > { %22551 = vmatmul.mubr.msk.f32.gmra.mrb[108].mxu0 %vm12192_vm7, %v28246_v40 }
 0xb96   : > { %22553 = vmatprep.mubr.msk.f32.mxu0 %vm12192_vm7, %v28250_v22 }
 0xb99   : > { %22554 = vmatmul.mubr.msk.f32.gmra.mrb[110].mxu0 %vm12192_vm7, %v28254_v26 }
 0xb9a   : > { %22556 = vmatprep.mubr.msk.f32.mxu0 %vm12192_vm7, %v28258_v7 }
 0xb9d   : > { %22557 = vmatmul.mubr.msk.f32.gmra.mrb[112].mxu0 %vm12192_vm7, %v28262_v47 }
 0xb9e   : > { %22559 = vmatprep.mubr.msk.f32.mxu0 %vm12192_vm7, %v28266_v45 }
 0xba1   : > { %22560 = vmatmul.mubr.msk.f32.gmra.mrb[114].mxu0 %vm12192_vm7, %v28270_v28 }
 0xba2   : > { %22562 = vmatprep.mubr.msk.f32.mxu0 %vm12192_vm7, %v28274_v35 }
 0xba5   : > { %22563 = vmatmul.mubr.msk.f32.gmra.mrb[116].mxu0 %vm12192_vm7, %v28278_v1 }
 0xba6   : > { %22565 = vmatprep.mubr.msk.f32.mxu0 %vm12192_vm7, %v28282_v50 }
 0xba9   : > { %22566 = vmatmul.mubr.msk.f32.gmra.mrb[118].mxu0 %vm12192_vm7, %v28286_v34 }
 0xbaa   : > { %22568 = vmatprep.mubr.msk.f32.mxu0 %vm12192_vm7, %v28290_v53 }
 0xbad   : > { %22569 = vmatmul.mubr.msk.f32.gmra.mrb[120].mxu0 %vm12192_vm7, %v28294_v19 }
 0xbae   : > { %22571 = vmatprep.mubr.msk.f32.mxu0 %vm12192_vm7, %v28298_v4 }
 0xbb1   : > { %22572 = vmatmul.mubr.msk.f32.gmra.mrb[122].mxu0 %vm12192_vm7, %v28302_v16  ;;  %v28345_v16 = vld [vmem:[#allocation2 + $0x32] sm:$0xff] }
 0xbb2   : > { %22574 = vmatprep.mubr.msk.f32.mxu0 %vm12192_vm7, %v28306_v13  ;;  %v28333_v13 = vld [vmem:[#allocation2 + $0x1a] sm:$0xff]  ;;  %30166 = vst [vmem:[#allocation32_spill] sm:$0xff] %v28345_v16 }
 0xbb5   : > { %22575 = vmatmul.mubr.msk.f32.gmra.mrb[124].mxu0 %vm12192_vm7, %v28310_v36  ;;  %v18981_v36 = vld [vmem:[%s29667_s4 + $0x60] sm:$0xff] }
 0xbb6   : > { %22577 = vmatprep.mubr.msk.f32.mxu0 %vm12192_vm7, %v28314_v18  ;;  %v18982_v18 = vld [vmem:[%s29667_s4 + $0x68] sm:$0xff] }
 0xbb9   : > { %22578 = vmatmul.mubr.msk.f32.gmra.mrb[126].mxu0 %vm12192_vm7, %v28318_v58  ;;  %v28341_v58 = vld [vmem:[#allocation2 + $0x22] sm:$0xff] }
 0xbba   : > { %22586 = vmatprep.mubr.msk.f32.mxu0 %vm12192_vm7, %v12941_v11  ;;  %v28339_v11 = vpack.c.bf16 %v18982_v18, %v18981_v36  ;;  %v28355_v36 = vld [vmem:[#allocation2 + $0x4a] sm:$0xff]  ;;  %v28359_v18 = vld [vmem:[#allocation2 + $0x52] sm:$0xff] }
 0xbbb   : > { %30168 = vst [vmem:[#allocation36_spill] sm:$0xff] %v28355_v36  ;;  %30169 = vst [vmem:[#allocation6_spill] sm:$0xff] %v28359_v18 }
 0xbbd   : > { %22587 = vmatmul.mubr.msk.f32.vlgmr.msra.gmra.mrb[96].mxu0 %vm12192_vm7, %v12942_v9  ;;  %v28363_v9 = vld [vmem:[#allocation2 + $0x62] sm:$0xff] }
 0xbbe   : > { %23063 = vmatpush3.bf16.msra.mxu0 %v28202_v55  ;;  %22589 = vmatprep.mubr.msk.f32.mxu0 %vm12192_vm7, %v28333_v13  ;;  %v28351_v55 = vld [vmem:[#allocation2 + $0x3a] sm:$0xff]  ;;  %30170 = vst [vmem:[#allocation7_spill] sm:$0xff] %v28363_v9 }
 0xbbf   : > { %22638 = vmatprep.subr.msk.mxu0 %vm4746_vm5, %v18947_v0  ;;  %30167 = vst [vmem:[#allocation34_spill] sm:$0xff] %v28351_v55 }
 0xbc1   : > { %22590 = vmatmul.mubr.msk.f32.gmra.mrb[98].mxu0 %vm12192_vm7, %v28341_v58 }
 0xbc2   : > { %22592 = vmatprep.mubr.msk.f32.mxu0 %vm12192_vm7, %v28345_v16  ;;  %22639 = vmatpush3.msk.msra.mxu0 %vm4746_vm5, %v18947_v0  ;;  %v28367_v0 = vld [vmem:[#allocation2 + $0x6a] sm:$0xff] }
 0xbc3   : > { %23065 = vmatprep.subr.bf16.mxu0 %v28339_v11  ;;  %30171 = vst [vmem:[#allocation9_spill] sm:$0xff] %v28367_v0 }
 0xbc5   : > { %22593 = vmatmul.mubr.msk.f32.gmra.mrb[100].mxu0 %vm12192_vm7, %v28351_v55  ;;  %v28371_v55 = vld [vmem:[#allocation2 + $0x7a] sm:$0xff] }
 0xbc6   : > { %22595 = vmatprep.mubr.msk.f32.mxu0 %vm12192_vm7, %v28355_v36  ;;  %30172 = vst [vmem:[#allocation39_spill] sm:$0xff] %v28371_v55  ;;  %v28375_v36 = vld [vmem:[#allocation2 + $0x82] sm:$0xff] }
 0xbc7   : > { %30173 = vst [vmem:[#allocation41_spill] sm:$0xff] %v28375_v36 }
 0xbc9   : > { %22596 = vmatmul.mubr.msk.f32.gmra.mrb[102].mxu0 %vm12192_vm7, %v28359_v18  ;;  %v28379_v18 = vld [vmem:[#allocation2 + $0x92] sm:$0xff] }
 0xbca   : > { %22598 = vmatprep.mubr.msk.f32.mxu0 %vm12192_vm7, %v28363_v9  ;;  %30174 = vst [vmem:[#allocation12_spill] sm:$0xff] %v28379_v18  ;;  %v28383_v9 = vld [vmem:[#allocation2 + $0x9a] sm:$0xff] }
 0xbcb   : > { %30175 = vst [vmem:[#allocation8_spill] sm:$0xff] %v28383_v9 }
 0xbcd   : > { %22599 = vmatmul.mubr.msk.f32.gmra.mrb[104].mxu0 %vm12192_vm7, %v28367_v0  ;;  %v28387_v0 = vld [vmem:[#allocation2 + $0xaa] sm:$0xff] }
 0xbce   : > { %22601 = vmatprep.mubr.msk.f32.mxu0 %vm12192_vm7, %v28371_v55  ;;  %30176 = vst [vmem:[#allocation40_spill] sm:$0xff] %v28387_v0  ;;  %v28391_v55 = vld [vmem:[#allocation2 + $0xb2] sm:$0xff] }
 0xbcf   : > { %30177 = vst [vmem:[#allocation13_spill] sm:$0xff] %v28391_v55 }
 0xbd1   : > { %22602 = vmatmul.mubr.msk.f32.gmra.mrb[106].mxu0 %vm12192_vm7, %v28375_v36  ;;  %v28395_v36 = vld [vmem:[#allocation2 + $0xc2] sm:$0xff] }
 0xbd2   : > { %22604 = vmatprep.mubr.msk.f32.mxu0 %vm12192_vm7, %v28379_v18  ;;  %30178 = vst [vmem:[#allocation14_spill] sm:$0xff] %v28395_v36  ;;  %v28399_v18 = vld [vmem:[#allocation2 + $0xca] sm:$0xff] }
 0xbd3   : > { %30179 = vst [vmem:[#allocation15_spill] sm:$0xff] %v28399_v18 }
 0xbd5   : > { %22605 = vmatmul.mubr.msk.f32.gmra.mrb[108].mxu0 %vm12192_vm7, %v28383_v9  ;;  %v28403_v9 = vld [vmem:[#allocation2 + $0xda] sm:$0xff] }
 0xbd6   : > { %22607 = vmatprep.mubr.msk.f32.mxu0 %vm12192_vm7, %v28387_v0  ;;  %30180 = vst [vmem:[#allocation16_spill] sm:$0xff] %v28403_v9  ;;  %v28407_v0 = vld [vmem:[#allocation2 + $0xe2] sm:$0xff] }
 0xbd7   : > { %30181 = vst [vmem:[#allocation17_spill] sm:$0xff] %v28407_v0 }
 0xbd9   : > { %22608 = vmatmul.mubr.msk.f32.gmra.mrb[110].mxu0 %vm12192_vm7, %v28391_v55  ;;  %v28411_v55 = vld [vmem:[#allocation2 + $0xf2] sm:$0xff] }
 0xbda   : > { %22610 = vmatprep.mubr.msk.f32.mxu0 %vm12192_vm7, %v28395_v36  ;;  %30182 = vst [vmem:[#allocation18_spill] sm:$0xff] %v28411_v55  ;;  %v28415_v36 = vld [vmem:[#allocation2 + $0xfa] sm:$0xff] }
 0xbdb   : > { %30183 = vst [vmem:[#allocation19_spill] sm:$0xff] %v28415_v36 }
 0xbdd   : > { %22611 = vmatmul.mubr.msk.f32.gmra.mrb[112].mxu0 %vm12192_vm7, %v28399_v18  ;;  %v28419_v18 = vld [vmem:[#allocation2 + $0x10a] sm:$0xff] }
 0xbde   : > { %22613 = vmatprep.mubr.msk.f32.mxu0 %vm12192_vm7, %v28403_v9  ;;  %30184 = vst [vmem:[#allocation20_spill] sm:$0xff] %v28419_v18  ;;  %v28423_v9 = vld [vmem:[#allocation2 + $0x112] sm:$0xff] }
 0xbdf   : > { %30185 = vst [vmem:[#allocation21_spill] sm:$0xff] %v28423_v9 }
 0xbe1   : > { %22614 = vmatmul.mubr.msk.f32.gmra.mrb[114].mxu0 %vm12192_vm7, %v28407_v0  ;;  %v28427_v0 = vld [vmem:[#allocation2 + $0x122] sm:$0xff] }
 0xbe2   : > { %22616 = vmatprep.mubr.msk.f32.mxu0 %vm12192_vm7, %v28411_v55  ;;  %30186 = vst [vmem:[#allocation22_spill] sm:$0xff] %v28427_v0  ;;  %v28431_v55 = vld [vmem:[#allocation2 + $0x12a] sm:$0xff] }
 0xbe3   : > { %30187 = vst [vmem:[#allocation23_spill] sm:$0xff] %v28431_v55 }
 0xbe5   : > { %22617 = vmatmul.mubr.msk.f32.gmra.mrb[116].mxu0 %vm12192_vm7, %v28415_v36  ;;  %v28435_v36 = vld [vmem:[#allocation2 + $0x13a] sm:$0xff] }
 0xbe6   : > { %22619 = vmatprep.mubr.msk.f32.mxu0 %vm12192_vm7, %v28419_v18  ;;  %30188 = vst [vmem:[#allocation24_spill] sm:$0xff] %v28435_v36  ;;  %v28439_v18 = vld [vmem:[#allocation2 + $0x142] sm:$0xff] }
 0xbe9   : > { %22620 = vmatmul.mubr.msk.f32.gmra.mrb[118].mxu0 %vm12192_vm7, %v28423_v9  ;;  %v28443_v9 = vld [vmem:[#allocation2 + $0x152] sm:$0xff] }
 0xbea   : > { %22622 = vmatprep.mubr.msk.f32.mxu0 %vm12192_vm7, %v28427_v0  ;;  %30189 = vst [vmem:[#allocation25_spill] sm:$0xff] %v28443_v9  ;;  %v28447_v0 = vld [vmem:[#allocation2 + $0x15a] sm:$0xff] }
 0xbeb   : > { %30190 = vst [vmem:[#allocation28_spill] sm:$0xff] %v28447_v0 }
 0xbed   : > { %22623 = vmatmul.mubr.msk.f32.gmra.mrb[120].mxu0 %vm12192_vm7, %v28431_v55  ;;  %v28451_v55 = vld [vmem:[#allocation2 + $0x16a] sm:$0xff] }
 0xbee   : > { %22625 = vmatprep.mubr.msk.f32.mxu0 %vm12192_vm7, %v28435_v36  ;;  %30191 = vst [vmem:[#allocation30_spill] sm:$0xff] %v28451_v55  ;;  %v28455_v36 = vld [vmem:[#allocation2 + $0x172] sm:$0xff] }
 0xbef   : > { %30192 = vst [vmem:[#allocation35_spill] sm:$0xff] %v28455_v36 }
 0xbf1   : > { %22626 = vmatmul.mubr.msk.f32.gmra.mrb[122].mxu0 %vm12192_vm7, %v28439_v18 }
 0xbf2   : > { %22628 = vmatprep.mubr.msk.f32.mxu0 %vm12192_vm7, %v28443_v9  ;;  %v18983_v9 = vld [vmem:[%s29667_s4 + $0x70] sm:$0xf] }
 0xbf5   : > { %22629 = vmatmul.mubr.msk.f32.gmra.mrb[124].mxu0 %vm12192_vm7, %v28447_v0  ;;  %v19017_v0 = vld [vmem:[%s29667_s4 + $0x78] sm:$0xff] }
 0xbf6   : > { %22631 = vmatprep.mubr.msk.f32.mxu0 %vm12192_vm7, %v28451_v55  ;;  %v19018_v55 = vld [vmem:[%s29667_s4 + $0x80] sm:$0xff] }
 0xbf9   : > { %22632 = vmatmul.mubr.msk.f32.gmra.mrb[126].mxu0 %vm12192_vm7, %v28455_v36 }
 0xbfa   : > { %22640 = vmatprep.mubr.msk.f32.mxu0 %vm12192_vm7, %v28037_v33  ;;  %v23068_v33 = vpack.c.bf16 %v19018_v55, %v19017_v0  ;;  %v19019_v55 = vld [vmem:[%s29667_s4 + $0x88] sm:$0xf]  ;;  %v19054_v0 = vld [vmem:[%s29667_s4 + $0x98] sm:$0xff] }
 0xbfd   : > { %22641 = vmatmul.mubr.msk.f32.vlgmr.msra.gmra.mrb[96].mxu0 %vm12192_vm7, %v28040_v31  ;;  %v28531_v31 = vld [vmem:[#allocation2 + $0x180] sm:$0xff] }
 0xbfe   : > { %23067 = vmatpush3.bf16.msra.mxu0 %v28339_v11  ;;  %22643 = vmatprep.mubr.msk.f32.mxu0 %vm12192_vm7, %v28048_v57  ;;  %v28535_v11 = vld [vmem:[#allocation2 + $0x188] sm:$0xff] }
 0xbff   : > { %22692 = vmatprep.subr.msk.mxu0 %vm4746_vm5, %v18983_v9 }
 0xc01   : > { %22644 = vmatmul.mubr.msk.f32.gmra.mrb[98].mxu0 %vm12192_vm7, %v28050_v39 }
 0xc02   : > { %22646 = vmatprep.mubr.msk.f32.mxu0 %vm12192_vm7, %v28058_v63  ;;  %22693 = vmatpush3.msk.msra.mxu0 %vm4746_vm5, %v18983_v9  ;;  %v19053_v9 = vld [vmem:[%s29667_s4 + $0x90] sm:$0xff] }
 0xc03   : > { %23069 = vmatprep.subr.bf16.mxu0 %v23068_v33 }
 0xc05   : > { %22647 = vmatmul.mubr.msk.f32.gmra.mrb[100].mxu0 %vm12192_vm7, %v28060_v52 }
 0xc06   : > { %22649 = vmatprep.mubr.msk.f32.mxu0 %vm12192_vm7, %v28068_v29 }
 0xc09   : > { %22650 = vmatmul.mubr.msk.f32.gmra.mrb[102].mxu0 %vm12192_vm7, %v28070_v32 }
 0xc0a   : > { %22652 = vmatprep.mubr.msk.f32.mxu0 %vm12192_vm7, %v28078_v12 }
 0xc0d   : > { %22653 = vmatmul.mubr.msk.f32.gmra.mrb[104].mxu0 %vm12192_vm7, %v28080_v15 }
 0xc0e   : > { %22655 = vmatprep.mubr.msk.f32.mxu0 %vm12192_vm7, %v28088_v30 }
 0xc11   : > { %22656 = vmatmul.mubr.msk.f32.gmra.mrb[106].mxu0 %vm12192_vm7, %v28090_v14 }
 0xc12   : > { %22658 = vmatprep.mubr.msk.f32.mxu0 %vm12192_vm7, %v28098_v2 }
 0xc15   : > { %22659 = vmatmul.mubr.msk.f32.gmra.mrb[108].mxu0 %vm12192_vm7, %v28100_v6 }
 0xc16   : > { %22661 = vmatprep.mubr.msk.f32.mxu0 %vm12192_vm7, %v28108_v24 }
 0xc19   : > { %22662 = vmatmul.mubr.msk.f32.gmra.mrb[110].mxu0 %vm12192_vm7, %v28110_v27 }
 0xc1a   : > { %22664 = vmatprep.mubr.msk.f32.mxu0 %vm12192_vm7, %v28118_v56 }
 0xc1d   : > { %22665 = vmatmul.mubr.msk.f32.gmra.mrb[112].mxu0 %vm12192_vm7, %v28120_v10 }
 0xc1e   : > { %22667 = vmatprep.mubr.msk.f32.mxu0 %vm12192_vm7, %v28128_v42 }
 0xc21   : > { %22668 = vmatmul.mubr.msk.f32.gmra.mrb[114].mxu0 %vm12192_vm7, %v28130_v3 }
 0xc22   : > { %22670 = vmatprep.mubr.msk.f32.mxu0 %vm12192_vm7, %v28138_v59 }
 0xc25   : > { %22671 = vmatmul.mubr.msk.f32.gmra.mrb[116].mxu0 %vm12192_vm7, %v28140_v21 }
 0xc26   : > { %22673 = vmatprep.mubr.msk.f32.mxu0 %vm12192_vm7, %v28148_v61 }
 0xc29   : > { %22674 = vmatmul.mubr.msk.f32.gmra.mrb[118].mxu0 %vm12192_vm7, %v28150_v38 }
 0xc2a   : > { %22676 = vmatprep.mubr.msk.f32.mxu0 %vm12192_vm7, %v28158_v37 }
 0xc2d   : > { %22677 = vmatmul.mubr.msk.f32.gmra.mrb[120].mxu0 %vm12192_vm7, %v28160_v54 }
 0xc2e   : > { %22679 = vmatprep.mubr.msk.f32.mxu0 %vm12192_vm7, %v28168_v25 }
 0xc31   : > { %22680 = vmatmul.mubr.msk.f32.gmra.mrb[122].mxu0 %vm12192_vm7, %v28170_v43 }
 0xc32   : > { %22682 = vmatprep.mubr.msk.f32.mxu0 %vm12192_vm7, %v28177_v44 }
 0xc35   : > { %22683 = vmatmul.mubr.msk.f32.gmra.mrb[124].mxu0 %vm12192_vm7, %v28179_v48 }
 0xc36   : > { %22685 = vmatprep.mubr.msk.f32.mxu0 %vm12192_vm7, %v28531_v31 }
 0xc39   : > { %22686 = vmatmul.mubr.msk.f32.gmra.mrb[126].mxu0 %vm12192_vm7, %v28535_v11 }
 0xc3a   : > { %22694 = vmatprep.mubr.msk.f32.mxu0 %vm12192_vm7, %v28196_v8  ;;  %v23072_v8 = vpack.c.bf16 %v19054_v0, %v19053_v9  ;;  %v30196_v9 = vld [vmem:[#allocation33_spill] sm:$0xff]  ;;  %v30197_v0 = vld [vmem:[#allocation31_spill] sm:$0xff] }
 0xc3d   : > { %22695 = vmatmul.mubr.msk.f32.vlgmr.msra.gmra.mrb[96].mxu0 %vm12192_vm7, %v28204_v46  ;;  %v30193_v46 = vld [vmem:[#allocation26_spill] sm:$0xff] }
 0xc3e   : > { %23071 = vmatpush3.bf16.msra.mxu0 %v23068_v33  ;;  %22697 = vmatprep.mubr.msk.f32.mxu0 %vm12192_vm7, %v28208_v23  ;;  %v30194_v33 = vld [vmem:[#allocation27_spill] sm:$0xff] }
 0xc3f   : > { %22746 = vmatprep.subr.msk.mxu0 %vm4746_vm5, %v19019_v55 }
 0xc41   : > { %22698 = vmatmul.mubr.msk.f32.gmra.mrb[98].mxu0 %vm12192_vm7, %v28214_v41 }
 0xc42   : > { %22700 = vmatprep.mubr.msk.f32.mxu0 %vm12192_vm7, %v28218_v17  ;;  %22747 = vmatpush3.msk.msra.mxu0 %vm4746_vm5, %v19019_v55  ;;  %v30195_v55 = vld [vmem:[#allocation29_spill] sm:$0xff] }
 0xc43   : > { %23073 = vmatprep.subr.bf16.mxu0 %v23072_v8 }
 0xc45   : > { %22701 = vmatmul.mubr.msk.f32.gmra.mrb[100].mxu0 %vm12192_vm7, %v28222_v60 }
 0xc46   : > { %22703 = vmatprep.mubr.msk.f32.mxu0 %vm12192_vm7, %v28226_v49 }
 0xc49   : > { %22704 = vmatmul.mubr.msk.f32.gmra.mrb[102].mxu0 %vm12192_vm7, %v28230_v51 }
 0xc4a   : > { %22706 = vmatprep.mubr.msk.f32.mxu0 %vm12192_vm7, %v28234_v5 }
 0xc4d   : > { %22707 = vmatmul.mubr.msk.f32.gmra.mrb[104].mxu0 %vm12192_vm7, %v28238_v62 }
 0xc4e   : > { %22709 = vmatprep.mubr.msk.f32.mxu0 %vm12192_vm7, %v28242_v20 }
 0xc51   : > { %22710 = vmatmul.mubr.msk.f32.gmra.mrb[106].mxu0 %vm12192_vm7, %v28246_v40 }
 0xc52   : > { %22712 = vmatprep.mubr.msk.f32.mxu0 %vm12192_vm7, %v28250_v22 }
 0xc55   : > { %22713 = vmatmul.mubr.msk.f32.gmra.mrb[108].mxu0 %vm12192_vm7, %v28254_v26 }
 0xc56   : > { %22715 = vmatprep.mubr.msk.f32.mxu0 %vm12192_vm7, %v28258_v7 }
 0xc59   : > { %22716 = vmatmul.mubr.msk.f32.gmra.mrb[110].mxu0 %vm12192_vm7, %v28262_v47 }
 0xc5a   : > { %22718 = vmatprep.mubr.msk.f32.mxu0 %vm12192_vm7, %v28266_v45 }
 0xc5d   : > { %22719 = vmatmul.mubr.msk.f32.gmra.mrb[112].mxu0 %vm12192_vm7, %v28270_v28 }
 0xc5e   : > { %22721 = vmatprep.mubr.msk.f32.mxu0 %vm12192_vm7, %v28274_v35 }
 0xc61   : > { %22722 = vmatmul.mubr.msk.f32.gmra.mrb[114].mxu0 %vm12192_vm7, %v28278_v1 }
 0xc62   : > { %22724 = vmatprep.mubr.msk.f32.mxu0 %vm12192_vm7, %v28282_v50 }
 0xc65   : > { %22725 = vmatmul.mubr.msk.f32.gmra.mrb[116].mxu0 %vm12192_vm7, %v28286_v34 }
 0xc66   : > { %22727 = vmatprep.mubr.msk.f32.mxu0 %vm12192_vm7, %v28290_v53  ;;  %v28610_v53 = vld [vmem:[#allocation2 + $0x181] sm:$0xff] }
 0xc67   : > { %30198 = vst [vmem:[#allocation37_spill] sm:$0xff] %v28610_v53 }
 0xc69   : > { %22728 = vmatmul.mubr.msk.f32.gmra.mrb[118].mxu0 %vm12192_vm7, %v28294_v19 }
 0xc6a   : > { %22730 = vmatprep.mubr.msk.f32.mxu0 %vm12192_vm7, %v28298_v4  ;;  %v28614_v4 = vld [vmem:[#allocation2 + $0x189] sm:$0xff] }
 0xc6b   : > { %30199 = vst [vmem:[#allocation38_spill] sm:$0xff] %v28614_v4 }
 0xc6d   : > { %22731 = vmatmul.mubr.msk.f32.gmra.mrb[120].mxu0 %vm12192_vm7, %v30193_v46 }
 0xc6e   : > { %22733 = vmatprep.mubr.msk.f32.mxu0 %vm12192_vm7, %v30194_v33  ;;  %v30202_v33 = vld [vmem:[#allocation6_spill] sm:$0xff] }
 0xc71   : > { %22734 = vmatmul.mubr.msk.f32.gmra.mrb[122].mxu0 %vm12192_vm7, %v30195_v55  ;;  %v30201_v55 = vld [vmem:[#allocation36_spill] sm:$0xff] }
 0xc72   : > { %22736 = vmatprep.mubr.msk.f32.mxu0 %vm12192_vm7, %v30196_v9  ;;  %v19055_v9 = vld [vmem:[%s29667_s4 + $0xa0] sm:$0xf] }
 0xc75   : > { %22737 = vmatmul.mubr.msk.f32.gmra.mrb[124].mxu0 %vm12192_vm7, %v30197_v0  ;;  %v19089_v0 = vld [vmem:[%s29667_s4 + $0xa8] sm:$0xff] }
 0xc76   : > { %22739 = vmatprep.mubr.msk.f32.mxu0 %vm12192_vm7, %v28610_v53  ;;  %v19090_v53 = vld [vmem:[%s29667_s4 + $0xb0] sm:$0xff] }
 0xc79   : > { %22740 = vmatmul.mubr.msk.f32.gmra.mrb[126].mxu0 %vm12192_vm7, %v28614_v4  ;;  %v30200_v4 = vld [vmem:[#allocation34_spill] sm:$0xff] }
 0xc7a   : > { %22748 = vmatprep.mubr.msk.f32.mxu0 %vm12192_vm7, %v28333_v13  ;;  %v23076_v13 = vpack.c.bf16 %v19090_v53, %v19089_v0  ;;  %v30206_v53 = vld [vmem:[#allocation41_spill] sm:$0xff]  ;;  %v30207_v0 = vld [vmem:[#allocation12_spill] sm:$0xff] }
 0xc7d   : > { %22749 = vmatmul.mubr.msk.f32.vlgmr.msra.gmra.mrb[96].mxu0 %vm12192_vm7, %v28341_v58  ;;  %v30203_v58 = vld [vmem:[#allocation7_spill] sm:$0xff] }
 0xc7e   : > { %23075 = vmatpush3.bf16.msra.mxu0 %v23072_v8  ;;  %22751 = vmatprep.mubr.msk.f32.mxu0 %vm12192_vm7, %v28345_v16  ;;  %v30204_v8 = vld [vmem:[#allocation9_spill] sm:$0xff]  ;;  %v30205_v16 = vld [vmem:[#allocation39_spill] sm:$0xff] }
 0xc7f   : > { %22800 = vmatprep.subr.msk.mxu0 %vm4746_vm5, %v19055_v9 }
 0xc81   : > { %22752 = vmatmul.mubr.msk.f32.gmra.mrb[98].mxu0 %vm12192_vm7, %v30200_v4 }
 0xc82   : > { %22754 = vmatprep.mubr.msk.f32.mxu0 %vm12192_vm7, %v30201_v55  ;;  %22801 = vmatpush3.msk.msra.mxu0 %vm4746_vm5, %v19055_v9  ;;  %v30208_v9 = vld [vmem:[#allocation8_spill] sm:$0xff] }
 0xc83   : > { %23077 = vmatprep.subr.bf16.mxu0 %v23076_v13  ;;  %v30209_v55 = vld [vmem:[#allocation40_spill] sm:$0xff] }
 0xc85   : > { %22755 = vmatmul.mubr.msk.f32.gmra.mrb[100].mxu0 %vm12192_vm7, %v30202_v33  ;;  %v30210_v33 = vld [vmem:[#allocation13_spill] sm:$0xff] }
 0xc86   : > { %22757 = vmatprep.mubr.msk.f32.mxu0 %vm12192_vm7, %v30203_v58  ;;  %v30211_v58 = vld [vmem:[#allocation14_spill] sm:$0xff] }
 0xc89   : > { %22758 = vmatmul.mubr.msk.f32.gmra.mrb[102].mxu0 %vm12192_vm7, %v30204_v8  ;;  %v30212_v8 = vld [vmem:[#allocation15_spill] sm:$0xff] }
 0xc8a   : > { %22760 = vmatprep.mubr.msk.f32.mxu0 %vm12192_vm7, %v30205_v16  ;;  %v30213_v16 = vld [vmem:[#allocation16_spill] sm:$0xff] }
 0xc8d   : > { %22761 = vmatmul.mubr.msk.f32.gmra.mrb[104].mxu0 %vm12192_vm7, %v30206_v53  ;;  %v30214_v53 = vld [vmem:[#allocation17_spill] sm:$0xff] }
 0xc8e   : > { %22763 = vmatprep.mubr.msk.f32.mxu0 %vm12192_vm7, %v30207_v0  ;;  %v30215_v0 = vld [vmem:[#allocation18_spill] sm:$0xff] }
 0xc91   : > { %22764 = vmatmul.mubr.msk.f32.gmra.mrb[106].mxu0 %vm12192_vm7, %v30208_v9  ;;  %v30216_v9 = vld [vmem:[#allocation19_spill] sm:$0xff] }
 0xc92   : > { %22766 = vmatprep.mubr.msk.f32.mxu0 %vm12192_vm7, %v30209_v55  ;;  %v30217_v55 = vld [vmem:[#allocation20_spill] sm:$0xff] }
 0xc95   : > { %22767 = vmatmul.mubr.msk.f32.gmra.mrb[108].mxu0 %vm12192_vm7, %v30210_v33  ;;  %v30218_v33 = vld [vmem:[#allocation21_spill] sm:$0xff] }
 0xc96   : > { %22769 = vmatprep.mubr.msk.f32.mxu0 %vm12192_vm7, %v30211_v58  ;;  %v30219_v58 = vld [vmem:[#allocation22_spill] sm:$0xff] }
 0xc99   : > { %22770 = vmatmul.mubr.msk.f32.gmra.mrb[110].mxu0 %vm12192_vm7, %v30212_v8  ;;  %v30220_v8 = vld [vmem:[#allocation23_spill] sm:$0xff] }
 0xc9a   : > { %22772 = vmatprep.mubr.msk.f32.mxu0 %vm12192_vm7, %v30213_v16  ;;  %v30221_v16 = vld [vmem:[#allocation24_spill] sm:$0xff] }
 0xc9d   : > { %22773 = vmatmul.mubr.msk.f32.gmra.mrb[112].mxu0 %vm12192_vm7, %v30214_v53 }
 0xc9e   : > { %22775 = vmatprep.mubr.msk.f32.mxu0 %vm12192_vm7, %v30215_v0  ;;  %v30222_v0 = vld [vmem:[#allocation25_spill] sm:$0xff] }
 0xca1   : > { %22776 = vmatmul.mubr.msk.f32.gmra.mrb[114].mxu0 %vm12192_vm7, %v30216_v9  ;;  %v30223_v9 = vld [vmem:[#allocation28_spill] sm:$0xff] }
 0xca2   : > { %22778 = vmatprep.mubr.msk.f32.mxu0 %vm12192_vm7, %v30217_v55  ;;  %v30224_v55 = vld [vmem:[#allocation30_spill] sm:$0xff] }
 0xca5   : > { %22779 = vmatmul.mubr.msk.f32.gmra.mrb[116].mxu0 %vm12192_vm7, %v30218_v33 }
 0xca6   : > { %22781 = vmatprep.mubr.msk.f32.mxu0 %vm12192_vm7, %v30219_v58  ;;  %v28689_v58 = vld [vmem:[#allocation2 + $0x182] sm:$0xff] }
 0xca7   : > { %30225 = vst [vmem:[#allocation26_spill] sm:$0xff] %v28689_v58 }
 0xca9   : > { %22782 = vmatmul.mubr.msk.f32.gmra.mrb[118].mxu0 %vm12192_vm7, %v30220_v8 }
 0xcaa   : > { %22784 = vmatprep.mubr.msk.f32.mxu0 %vm12192_vm7, %v30221_v16  ;;  %v28693_v16 = vld [vmem:[#allocation2 + $0x18a] sm:$0xff] }
 0xcad   : > { %22785 = vmatmul.mubr.msk.f32.gmra.mrb[120].mxu0 %vm12192_vm7, %v28439_v18 }
 0xcae   : > { %22787 = vmatprep.mubr.msk.f32.mxu0 %vm12192_vm7, %v30222_v0 }
 0xcb1   : > { %22788 = vmatmul.mubr.msk.f32.gmra.mrb[122].mxu0 %vm12192_vm7, %v30223_v9 }
 0xcb2   : > { %22790 = vmatprep.mubr.msk.f32.mxu0 %vm12192_vm7, %v30224_v55  ;;  %v19091_v55 = vld [vmem:[%s29667_s4 + $0xb8] sm:$0xf] }
 0xcb5   : > { %22791 = vmatmul.mubr.msk.f32.gmra.mrb[124].mxu0 %vm12192_vm7, %v28455_v36  ;;  %v19125_v36 = vld [vmem:[%s29667_s4 + $0xc0] sm:$0xff] }
 0xcb6   : > { %22793 = vmatprep.mubr.msk.f32.mxu0 %vm12192_vm7, %v28689_v58  ;;  %v19126_v58 = vld [vmem:[%s29667_s4 + $0xc8] sm:$0xff] }
 0xcb9   : > { %22794 = vmatmul.mubr.msk.f32.gmra.mrb[126].mxu0 %vm12192_vm7, %v28693_v16 }
 0xcba   : > { %22802 = vmatprep.mubr.msk.f32.mxu0 %vm12192_vm7, %v28048_v57  ;;  %v23080_v57 = vpack.c.bf16 %v19126_v58, %v19125_v36 }
 0xcbd   : > { %22803 = vmatmul.mubr.msk.f32.vlgmr.msra.gmra.mrb[96].mxu0 %vm12192_vm7, %v28050_v39  ;;  %v14539_v39 = vld [vmem:[#allocation2 + $0x198] sm:$0xff] }
 0xcbe   : > { %23079 = vmatpush3.bf16.msra.mxu0 %v23076_v13  ;;  %22805 = vmatprep.mubr.msk.f32.mxu0 %vm12192_vm7, %v28058_v63  ;;  %v14540_v63 = vld [vmem:[#allocation2 + $0x1a0] sm:$0xff] }
 0xcbf   : > { %22854 = vmatprep.subr.msk.mxu0 %vm4746_vm5, %v19091_v55 }
 0xcc1   : > { %22806 = vmatmul.mubr.msk.f32.gmra.mrb[98].mxu0 %vm12192_vm7, %v28060_v52  ;;  %v19127_v52 = vld [vmem:[%s29667_s4 + $0xd0] sm:$0xf] }
 0xcc2   : > { %22808 = vmatprep.mubr.msk.f32.mxu0 %vm12192_vm7, %v28068_v29  ;;  %22855 = vmatpush3.msk.msra.mxu0 %vm4746_vm5, %v19091_v55  ;;  %v30226_v29 = vld [vmem:[#allocation10_spill] sm:$0xff] }
 0xcc3   : > { %23081 = vmatprep.subr.bf16.mxu0 %v23080_v57 }
 0xcc5   : > { %22809 = vmatmul.mubr.msk.f32.gmra.mrb[100].mxu0 %vm12192_vm7, %v28070_v32  ;;  %v30227_v32 = vld [vmem:[#allocation11_spill] sm:$0xff] }
 0xcc6   : > { %22811 = vmatprep.mubr.msk.f32.mxu0 %vm12192_vm7, %v28078_v12  ;;  %v30228_v12 = vld [vmem:[#allocation27_spill] sm:$0xff] }
 0xcc9   : > { %22812 = vmatmul.mubr.msk.f32.gmra.mrb[102].mxu0 %vm12192_vm7, %v28080_v15  ;;  %v30229_v15 = vld [vmem:[#allocation29_spill] sm:$0xff] }
 0xcca   : > { %22814 = vmatprep.mubr.msk.f32.mxu0 %vm12192_vm7, %v28088_v30  ;;  %v30230_v30 = vld [vmem:[#allocation33_spill] sm:$0xff] }
 0xccd   : > { %22815 = vmatmul.mubr.msk.f32.gmra.mrb[104].mxu0 %vm12192_vm7, %v28090_v14  ;;  %v30231_v14 = vld [vmem:[#allocation31_spill] sm:$0xff] }
 0xcce   : > { %22817 = vmatprep.mubr.msk.f32.mxu0 %vm12192_vm7, %v28098_v2  ;;  %v30232_v2 = vld [vmem:[#allocation37_spill] sm:$0xff] }
 0xcd1   : > { %22818 = vmatmul.mubr.msk.f32.gmra.mrb[106].mxu0 %vm12192_vm7, %v28100_v6  ;;  %v14931_v6 = vld [vmem:[#allocation2 + $0x199] sm:$0xff] }
 0xcd2   : > { %22820 = vmatprep.mubr.msk.f32.mxu0 %vm12192_vm7, %v28108_v24  ;;  %v30233_v24 = vld [vmem:[#allocation38_spill] sm:$0xff] }
 0xcd5   : > { %22821 = vmatmul.mubr.msk.f32.gmra.mrb[108].mxu0 %vm12192_vm7, %v28110_v27  ;;  %v14932_v27 = vld [vmem:[#allocation2 + $0x1a1] sm:$0xff] }
 0xcd6   : > { %22823 = vmatprep.mubr.msk.f32.mxu0 %vm12192_vm7, %v28118_v56  ;;  %v30234_v56 = vld [vmem:[#allocation32_spill] sm:$0xff] }
 0xcd9   : > { %22824 = vmatmul.mubr.msk.f32.gmra.mrb[110].mxu0 %vm12192_vm7, %v28120_v10  ;;  %v30235_v10 = vld [vmem:[#allocation36_spill] sm:$0xff] }
 0xcda   : > { %22826 = vmatprep.mubr.msk.f32.mxu0 %vm12192_vm7, %v28128_v42  ;;  %v30236_v42 = vld [vmem:[#allocation6_spill] sm:$0xff] }
 0xcdd   : > { %22827 = vmatmul.mubr.msk.f32.gmra.mrb[112].mxu0 %vm12192_vm7, %v28130_v3  ;;  %v30237_v3 = vld [vmem:[#allocation7_spill] sm:$0xff] }
 0xcde   : > { %22829 = vmatprep.mubr.msk.f32.mxu0 %vm12192_vm7, %v28138_v59  ;;  %v30238_v59 = vld [vmem:[#allocation9_spill] sm:$0xff] }
 0xce1   : > { %22830 = vmatmul.mubr.msk.f32.gmra.mrb[114].mxu0 %vm12192_vm7, %v28140_v21  ;;  %v30239_v21 = vld [vmem:[#allocation39_spill] sm:$0xff] }
 0xce2   : > { %22832 = vmatprep.mubr.msk.f32.mxu0 %vm12192_vm7, %v28148_v61  ;;  %v30240_v61 = vld [vmem:[#allocation41_spill] sm:$0xff] }
 0xce5   : > { %22833 = vmatmul.mubr.msk.f32.gmra.mrb[116].mxu0 %vm12192_vm7, %v28150_v38  ;;  %v30241_v38 = vld [vmem:[#allocation12_spill] sm:$0xff] }
 0xce6   : > { %22835 = vmatprep.mubr.msk.f32.mxu0 %vm12192_vm7, %v28158_v37  ;;  %v30242_v37 = vld [vmem:[#allocation8_spill] sm:$0xff] }
 0xce9   : > { %22836 = vmatmul.mubr.msk.f32.gmra.mrb[118].mxu0 %vm12192_vm7, %v28160_v54  ;;  %v30243_v54 = vld [vmem:[#allocation40_spill] sm:$0xff] }
 0xcea   : > { %22838 = vmatprep.mubr.msk.f32.mxu0 %vm12192_vm7, %v28168_v25  ;;  %v30244_v25 = vld [vmem:[#allocation13_spill] sm:$0xff] }
 0xced   : > { %22839 = vmatmul.mubr.msk.f32.gmra.mrb[120].mxu0 %vm12192_vm7, %v28170_v43  ;;  %v30245_v43 = vld [vmem:[#allocation14_spill] sm:$0xff] }
 0xcee   : > { %22841 = vmatprep.mubr.msk.f32.mxu0 %vm12192_vm7, %v28177_v44  ;;  %v30246_v44 = vld [vmem:[#allocation15_spill] sm:$0xff] }
 0xcf1   : > { %22842 = vmatmul.mubr.msk.f32.gmra.mrb[122].mxu0 %vm12192_vm7, %v28179_v48  ;;  %v30247_v48 = vld [vmem:[#allocation16_spill] sm:$0xff] }
 0xcf2   : > { %22844 = vmatprep.mubr.msk.f32.mxu0 %vm12192_vm7, %v28531_v31 }
 0xcf5   : > { %22845 = vmatmul.mubr.msk.f32.gmra.mrb[124].mxu0 %vm12192_vm7, %v28535_v11 }
 0xcf6   : > { %22847 = vmatprep.mubr.msk.f32.mxu0 %vm12192_vm7, %v14539_v39 }
 0xcf9   : > { %22848 = vmatmul.mubr.msk.f32.gmra.mrb[126].mxu0 %vm12192_vm7, %v14540_v63 }
 0xcfa   : > { %22856 = vmatprep.mubr.msk.f32.mxu0 %vm12192_vm7, %v28208_v23  ;;  %v30248_v23 = vld [vmem:[#allocation18_spill] sm:$0xff] }
 0xcfd   : > { %22857 = vmatmul.mubr.msk.f32.vlgmr.msra.gmra.mrb[96].mxu0 %vm12192_vm7, %v28214_v41  ;;  %v30249_v41 = vld [vmem:[#allocation19_spill] sm:$0xff] }
 0xcfe   : > { %23083 = vmatpush3.bf16.msra.mxu0 %v23080_v57  ;;  %22859 = vmatprep.mubr.msk.f32.mxu0 %vm12192_vm7, %v28218_v17  ;;  %v30250_v17 = vld [vmem:[#allocation20_spill] sm:$0xff] }
 0xcff   : > { %22908 = vmatprep.subr.msk.mxu0 %vm4746_vm5, %v19127_v52 }
 0xd01   : > { %22860 = vmatmul.mubr.msk.f32.gmra.mrb[98].mxu0 %vm12192_vm7, %v28222_v60  ;;  %v30251_v60 = vld [vmem:[#allocation22_spill] sm:$0xff] }
 0xd02   : > { %22862 = vmatprep.mubr.msk.f32.mxu0 %vm12192_vm7, %v28226_v49  ;;  %22909 = vmatpush3.msk.msra.mxu0 %vm4746_vm5, %v19127_v52  ;;  %v30252_v49 = vld [vmem:[#allocation24_spill] sm:$0xff] }
 0xd05   : > { %22863 = vmatmul.mubr.msk.f32.gmra.mrb[100].mxu0 %vm12192_vm7, %v28230_v51  ;;  %v30253_v51 = vld [vmem:[#allocation30_spill] sm:$0xff] }
 0xd06   : > { %22865 = vmatprep.mubr.msk.f32.mxu0 %vm12192_vm7, %v28234_v5  ;;  %v30254_v5 = vld [vmem:[#allocation35_spill] sm:$0xff] }
 0xd09   : > { %22866 = vmatmul.mubr.msk.f32.gmra.mrb[102].mxu0 %vm12192_vm7, %v28238_v62  ;;  %v30255_v62 = vld [vmem:[#allocation26_spill] sm:$0xff] }
 0xd0a   : > { %22868 = vmatprep.mubr.msk.f32.mxu0 %vm12192_vm7, %v28242_v20  ;;  %v15323_v20 = vld [vmem:[#allocation2 + $0x19a] sm:$0xff] }
 0xd0d   : > { %22869 = vmatmul.mubr.msk.f32.gmra.mrb[104].mxu0 %vm12192_vm7, %v28246_v40  ;;  %v15324_v40 = vld [vmem:[#allocation2 + $0x1a2] sm:$0xff] }
 0xd0e   : > { %22871 = vmatprep.mubr.msk.f32.mxu0 %vm12192_vm7, %v28250_v22 }
 0xd11   : > { %22872 = vmatmul.mubr.msk.f32.gmra.mrb[106].mxu0 %vm12192_vm7, %v28254_v26 }
 0xd12   : > { %22874 = vmatprep.mubr.msk.f32.mxu0 %vm12192_vm7, %v28258_v7 }
 0xd15   : > { %22875 = vmatmul.mubr.msk.f32.gmra.mrb[108].mxu0 %vm12192_vm7, %v28262_v47 }
 0xd16   : > { %22877 = vmatprep.mubr.msk.f32.mxu0 %vm12192_vm7, %v28266_v45 }
 0xd19   : > { %22878 = vmatmul.mubr.msk.f32.gmra.mrb[110].mxu0 %vm12192_vm7, %v28270_v28 }
 0xd1a   : > { %22880 = vmatprep.mubr.msk.f32.mxu0 %vm12192_vm7, %v28274_v35 }
 0xd1d   : > { %22881 = vmatmul.mubr.msk.f32.gmra.mrb[112].mxu0 %vm12192_vm7, %v28278_v1 }
 0xd1e   : > { %22883 = vmatprep.mubr.msk.f32.mxu0 %vm12192_vm7, %v28282_v50 }
 0xd21   : > { %22884 = vmatmul.mubr.msk.f32.gmra.mrb[114].mxu0 %vm12192_vm7, %v28286_v34 }
 0xd22   : > { %22886 = vmatprep.mubr.msk.f32.mxu0 %vm12192_vm7, %v30226_v29 }
 0xd25   : > { %22887 = vmatmul.mubr.msk.f32.gmra.mrb[116].mxu0 %vm12192_vm7, %v28294_v19 }
 0xd26   : > { %22889 = vmatprep.mubr.msk.f32.mxu0 %vm12192_vm7, %v30227_v32 }
 0xd29   : > { %22890 = vmatmul.mubr.msk.f32.gmra.mrb[118].mxu0 %vm12192_vm7, %v30193_v46 }
 0xd2a   : > { %22892 = vmatprep.mubr.msk.f32.mxu0 %vm12192_vm7, %v30228_v12 }
 0xd2d   : > { %22893 = vmatmul.mubr.msk.f32.gmra.mrb[120].mxu0 %vm12192_vm7, %v30229_v15 }
 0xd2e   : > { %22895 = vmatprep.mubr.msk.f32.mxu0 %vm12192_vm7, %v30230_v30 }
 0xd31   : > { %22896 = vmatmul.mubr.msk.f32.gmra.mrb[122].mxu0 %vm12192_vm7, %v30231_v14 }
 0xd32   : > { %22898 = vmatprep.mubr.msk.f32.mxu0 %vm12192_vm7, %v30232_v2 }
 0xd35   : > { %22899 = vmatmul.mubr.msk.f32.gmra.mrb[124].mxu0 %vm12192_vm7, %v30233_v24 }
 0xd36   : > { %22901 = vmatprep.mubr.msk.f32.mxu0 %vm12192_vm7, %v14931_v6 }
 0xd39   : > { %22902 = vmatmul.mubr.msk.f32.gmra.mrb[126].mxu0 %vm12192_vm7, %v14932_v27 }
 0xd3a   : > { %22910 = vmatprep.mubr.msk.f32.mxu0 %vm12192_vm7, %v30234_v56 }
 0xd3d   : > { %22911 = vmatmul.mubr.msk.f32.vlgmr.msra.gmra.mrb[96].mxu0 %vm12192_vm7, %v30200_v4 }
 0xd3e   : > { %22913 = vmatprep.mubr.msk.f32.mxu0 %vm12192_vm7, %v30235_v10 }
 0xd41   : > { %22914 = vmatmul.mubr.msk.f32.gmra.mrb[98].mxu0 %vm12192_vm7, %v30236_v42 }
 0xd42   : > { %22916 = vmatprep.mubr.msk.f32.mxu0 %vm12192_vm7, %v30237_v3 }
 0xd45   : > { %22917 = vmatmul.mubr.msk.f32.gmra.mrb[100].mxu0 %vm12192_vm7, %v30238_v59 }
 0xd46   : > { %22919 = vmatprep.mubr.msk.f32.mxu0 %vm12192_vm7, %v30239_v21 }
 0xd49   : > { %22920 = vmatmul.mubr.msk.f32.gmra.mrb[102].mxu0 %vm12192_vm7, %v30240_v61 }
 0xd4a   : > { %22922 = vmatprep.mubr.msk.f32.mxu0 %vm12192_vm7, %v30241_v38 }
 0xd4d   : > { %22923 = vmatmul.mubr.msk.f32.gmra.mrb[104].mxu0 %vm12192_vm7, %v30242_v37 }
 0xd4e   : > { %22925 = vmatprep.mubr.msk.f32.mxu0 %vm12192_vm7, %v30243_v54 }
 0xd51   : > { %22926 = vmatmul.mubr.msk.f32.gmra.mrb[106].mxu0 %vm12192_vm7, %v30244_v25 }
 0xd52   : > { %22928 = vmatprep.mubr.msk.f32.mxu0 %vm12192_vm7, %v30245_v43 }
 0xd55   : > { %22929 = vmatmul.mubr.msk.f32.gmra.mrb[108].mxu0 %vm12192_vm7, %v30246_v44 }
 0xd56   : > { %22931 = vmatprep.mubr.msk.f32.mxu0 %vm12192_vm7, %v30247_v48 }
 0xd59   : > { %22932 = vmatmul.mubr.msk.f32.gmra.mrb[110].mxu0 %vm12192_vm7, %v30214_v53 }
 0xd5a   : > { %22934 = vmatprep.mubr.msk.f32.mxu0 %vm12192_vm7, %v30248_v23 }
 0xd5d   : > { %22935 = vmatmul.mubr.msk.f32.gmra.mrb[112].mxu0 %vm12192_vm7, %v30249_v41 }
 0xd5e   : > { %22937 = vmatprep.mubr.msk.f32.mxu0 %vm12192_vm7, %v30250_v17 }
 0xd61   : > { %22938 = vmatmul.mubr.msk.f32.gmra.mrb[114].mxu0 %vm12192_vm7, %v30218_v33 }
 0xd62   : > { %22940 = vmatprep.mubr.msk.f32.mxu0 %vm12192_vm7, %v30251_v60 }
 0xd65   : > { %22941 = vmatmul.mubr.msk.f32.gmra.mrb[116].mxu0 %vm12192_vm7, %v30220_v8 }
 0xd66   : > { %22943 = vmatprep.mubr.msk.f32.mxu0 %vm12192_vm7, %v30252_v49 }
 0xd69   : > { %22944 = vmatmul.mubr.msk.f32.gmra.mrb[118].mxu0 %vm12192_vm7, %v28439_v18  ;;  %v28922_v18 = vld [vmem:[%s29672_s9] ss:$0 sm:$0xff] }
 0xd6a   : > { %22946 = vmatprep.mubr.msk.f32.mxu0 %vm12192_vm7, %v30222_v0 }
 0xd6d   : > { %22947 = vmatmul.mubr.msk.f32.gmra.mrb[120].mxu0 %vm12192_vm7, %v30223_v9 }
 0xd6e   : > { %22949 = vmatprep.mubr.msk.f32.mxu0 %vm12192_vm7, %v30253_v51 }
 0xd71   : > { %22950 = vmatmul.mubr.msk.f32.gmra.mrb[122].mxu0 %vm12192_vm7, %v30254_v5 }
 0xd72   : > { %22952 = vmatprep.mubr.msk.f32.mxu0 %vm12192_vm7, %v30255_v62 }
 0xd75   : > { %22953 = vmatmul.mubr.msk.f32.gmra.mrb[124].mxu0 %vm12192_vm7, %v28693_v16 }
 0xd76   : > { %22955 = vmatprep.mubr.msk.f32.mxu0 %vm12192_vm7, %v15323_v20 }
 0xd79   : > { %22956 = vmatmul.mubr.msk.f32.gmra.mrb[126].mxu0 %vm12192_vm7, %v15324_v40 }
 0xe10   : > { %v22912_v22 = vpop.f32.mrb[96].mxu0 }
 0xe11   : > { %v15494_v26 = vpop.f32.mrb[97].mxu0  ;;  %v23644_v8 = vadd.f32 %v22912_v22, %v28922_v18 }
 0xe12   : > { %v23645_v57 = vadd.f32 %v28922_v18, %v15494_v26 }
 0xe13   : > { %v15718_v12 = vmul.f32 0.2, %v23644_v8  ;;  %vm15686_vm6 = vcmp.ge.f32.partialorder %v23644_v8, 0.0 }
 0xe14   : > { %v22915_v7 = vpop.f32.mrb[98].mxu0  ;;  %v15717_v2 = vmul.f32 0.2, %v23645_v57  ;;  %vm15685_vm9 = vcmp.ge.f32.partialorder %v23645_v57, 0.0 }
 0xe15   : > { %v15504_v47 = vpop.f32.mrb[99].mxu0  ;;  %v23646_v56 = vadd.f32 %v22915_v7, %v28922_v18  ;;  %v15750_v3 = vsel %vm15686_vm6, %v23644_v8, %v15718_v12 }
 0xe16   : > { %v23647_v59 = vadd.f32 %v28922_v18, %v15504_v47  ;;  %v15749_v61 = vsel %vm15685_vm9, %v23645_v57, %v15717_v2 }
 0xe17   : > { %v15720_v37 = vmul.f32 0.2, %v23646_v56  ;;  %vm15688_vm12 = vcmp.ge.f32.partialorder %v23646_v56, 0.0 }
 0xe18   : > { %v28899_v45 = vpop.f32.mrb[100].mxu0  ;;  %v15719_v44 = vmul.f32 0.2, %v23647_v59  ;;  %vm15687_vm13 = vcmp.ge.f32.partialorder %v23647_v59, 0.0 }
 0xe19   : > { %v28901_v28 = vpop.f32.mrb[101].mxu0  ;;  %v23648_v17 = vadd.f32 %v28899_v45, %v28922_v18  ;;  %v15752_v51 = vsel %vm15688_vm12, %v23646_v56, %v15720_v37 }
 0xe1a   : > { %v23649_v5 = vadd.f32 %v28922_v18, %v28901_v28  ;;  %v15751_v20 = vsel %vm15687_vm13, %v23647_v59, %v15719_v44 }
 0xe1b   : > { %v15722_v22 = vmul.f32 0.2, %v23648_v17  ;;  %vm15690_vm0 = vcmp.ge.f32.partialorder %v23648_v17, 0.0 }
 0xe1c   : > { %v28903_v35 = vpop.f32.mrb[102].mxu0  ;;  %v15721_v45 = vmul.f32 0.2, %v23649_v5  ;;  %vm15689_vm1 = vcmp.ge.f32.partialorder %v23649_v5, 0.0 }
 0xe1d   : > { %v28905_v1 = vpop.f32.mrb[103].mxu0 }
 0xe20   : > { %v28907_v50 = vpop.f32.mrb[104].mxu0 }
 0xe21   : > { %v28909_v34 = vpop.f32.mrb[105].mxu0 }
 0xe24   : > { %v28911_v19 = vpop.f32.mrb[106].mxu0 }
 0xe25   : > { %v28913_v4 = vpop.f32.mrb[107].mxu0 }
 0xe28   : > { %v28915_v16 = vpop.f32.mrb[108].mxu0 }
 0xe29   : > { %v28917_v36 = vpop.f32.mrb[109].mxu0 }
 0xe2c   : > { %v22933_v31 = vpop.f32.mrb[110].mxu0 }
 0xe2d   : > { %v23658_v11 = vadd.f32 %v22933_v31, %v28922_v18  ;;  %v15564_v46 = vpop.f32.mrb[111].mxu0 }
 0xe2e   : > { %v23659_v33 = vadd.f32 %v28922_v18, %v15564_v46  ;;  %v23650_v46 = vadd.f32 %v28903_v35, %v28922_v18 }
 0xe2f   : > { %vm15700_vm5 = vcmp.ge.f32.partialorder %v23658_v11, 0.0  ;;  %v15732_v55 = vmul.f32 0.2, %v23658_v11 }
 0xe30   : > { %vm15699_vm7 = vcmp.ge.f32.partialorder %v23659_v33, 0.0  ;;  %v15731_v13 = vmul.f32 0.2, %v23659_v33  ;;  %v22936_v58 = vpop.f32.mrb[112].mxu0 }
 0xe31   : > { %v23660_v53 = vadd.f32 %v22936_v58, %v28922_v18  ;;  %v15574_v0 = vpop.f32.mrb[113].mxu0  ;;  %v15764_v9 = vsel %vm15700_vm5, %v23658_v11, %v15732_v55  ;;  %v23651_v58 = vadd.f32 %v28922_v18, %v28905_v1 }
 0xe32   : > { %v23661_v39 = vadd.f32 %v28922_v18, %v15574_v0  ;;  %15843 = vrot.lane.b32.xlu0 %v15764_v9, %s24807_s22  ;;  %v15763_v63 = vsel %vm15699_vm7, %v23659_v33, %v15731_v13  ;;  %v15754_v13 = vsel %vm15690_vm0, %v23648_v17, %v15722_v22  ;;  %v15724_v9 = vmul.f32 0.2, %v23650_v46  ;;  %v29004_v22 = vld [vmem:[%s29668_s5 + $0x8] sm:$0xff] }
 0xe33   : > { %vm15702_vm3 = vcmp.ge.f32.partialorder %v23660_v53, 0.0  ;;  %v15734_v52 = vmul.f32 0.2, %v23660_v53  ;;  %15841 = vrot.lane.b32.xlu1 %v15763_v63, %s24807_s22  ;;  %vm15692_vm7 = vcmp.ge.f32.partialorder %v23650_v46, 0.0  ;;  %v15723_v63 = vmul.f32 0.2, %v23651_v58  ;;  %20796 = vmatprep.mubr.msk.f32.mxu1 %vm385_vm2, %v29004_v22 }
 0xe34   : > { %vm15701_vm4 = vcmp.ge.f32.partialorder %v23661_v39, 0.0  ;;  %v15733_v29 = vmul.f32 0.2, %v23661_v39  ;;  %v22939_v32 = vpop.f32.mrb[114].mxu0  ;;  %v15756_v12 = vsel %vm15692_vm7, %v23650_v46, %v15724_v9  ;;  %v16156_v46 = vld [vmem:[#allocation2 + $0x1] sm:$0xff] }
 0xe35   : > { %v23662_v15 = vadd.f32 %v22939_v32, %v28922_v18  ;;  %v15584_v30 = vpop.f32.mrb[115].mxu0  ;;  %v15766_v14 = vsel %vm15702_vm3, %v23660_v53, %v15734_v52  ;;  %v15753_v53 = vsel %vm15689_vm1, %v23649_v5, %v15721_v45  ;;  %vm15691_vm3 = vcmp.ge.f32.partialorder %v23651_v58, 0.0 }
 0xe36   : > { %v23663_v6 = vadd.f32 %v28922_v18, %v15584_v30  ;;  %15847 = vrot.lane.b32.xlu0 %v15766_v14, %s24807_s22  ;;  %v15765_v24 = vsel %vm15701_vm4, %v23661_v39, %v15733_v29  ;;  %v23652_v29 = vadd.f32 %v28907_v50, %v28922_v18  ;;  %v15755_v14 = vsel %vm15691_vm3, %v23651_v58, %v15723_v63 }
 0xe37   : > { %15845 = vrot.lane.b32.xlu1 %v15765_v24, %s24807_s22  ;;  %v15736_v10 = vmul.f32 0.2, %v23662_v15  ;;  %vm15704_vm10 = vcmp.ge.f32.partialorder %v23662_v15, 0.0  ;;  %vm15909_vm3 = vcmask 195744  }
 0xe38   : > { %v22942_v27 = vpop.f32.mrb[116].mxu0  ;;  %v15735_v21 = vmul.f32 0.2, %v23663_v6  ;;  %vm15703_vm11 = vcmp.ge.f32.partialorder %v23663_v6, 0.0  ;;  %v15726_v2 = vmul.f32 0.2, %v23652_v29 }
 0xe39   : > { %v15594_v42 = vpop.f32.mrb[117].mxu0  ;;  %v23664_v54 = vadd.f32 %v22942_v27, %v28922_v18  ;;  %v15768_v43 = vsel %vm15704_vm10, %v23662_v15, %v15736_v10  ;;  %v23653_v15 = vadd.f32 %v28922_v18, %v28909_v34  ;;  %vm15694_vm9 = vcmp.ge.f32.partialorder %v23652_v29, 0.0 }
 0xe3a   : > { %15815 = vrot.lane.b32.xlu0 %v15750_v3, %s24807_s22  ;;  %v23665_v48 = vadd.f32 %v28922_v18, %v15594_v42  ;;  %v15767_v23 = vsel %vm15703_vm11, %v23663_v6, %v15735_v21  ;;  %v23654_v34 = vadd.f32 %v28911_v19, %v28922_v18  ;;  %v15758_v42 = vsel %vm15694_vm9, %v23652_v29, %v15726_v2 }
 0xe3b   : > { %15813 = vrot.lane.b32.xlu1 %v15749_v61, %s24807_s22  ;;  %v15738_v60 = vmul.f32 0.2, %v23664_v54  ;;  %vm15706_vm14 = vcmp.ge.f32.partialorder %v23664_v54, 0.0  ;;  %v15725_v27 = vmul.f32 0.2, %v23653_v15  ;;  %vm15693_vm10 = vcmp.ge.f32.partialorder %v23653_v15, 0.0 }
 0xe3c   : > { %v22945_v38 = vpop.f32.mrb[118].mxu0  ;;  %v15737_v62 = vmul.f32 0.2, %v23665_v48  ;;  %vm15705_vm15 = vcmp.ge.f32.partialorder %v23665_v48, 0.0  ;;  %v23655_v3 = vadd.f32 %v28922_v18, %v28913_v4  ;;  %v15728_v61 = vmul.f32 0.2, %v23654_v34 }
 0xe3d   : > { %v15604_v25 = vpop.f32.mrb[119].mxu0  ;;  %v23666_v26 = vadd.f32 %v22945_v38, %v28922_v18  ;;  %v15770_v47 = vsel %vm15706_vm14, %v23664_v54, %v15738_v60  ;;  %v15757_v21 = vsel %vm15693_vm10, %v23653_v15, %v15725_v27  ;;  %vm15696_vm13 = vcmp.ge.f32.partialorder %v23654_v34, 0.0 }
 0xe3e   : > { %15851 = vrot.lane.b32.xlu0 %v15768_v43, %s24807_s22  ;;  %v23667_v31 = vadd.f32 %v28922_v18, %v15604_v25  ;;  %v15769_v28 = vsel %vm15705_vm15, %v23665_v48, %v15737_v62  ;;  %v15727_v54 = vmul.f32 0.2, %v23655_v3  ;;  %vm15695_vm14 = vcmp.ge.f32.partialorder %v23655_v3, 0.0 }
 0xe3f   : > { %15849 = vrot.lane.b32.xlu1 %v15767_v23, %s24807_s22  ;;  %v15740_v33 = vmul.f32 0.2, %v23666_v26  ;;  %vm15708_vm8 = vcmp.ge.f32.partialorder %v23666_v26, 0.0  ;;  %v23656_v4 = vadd.f32 %v28915_v16, %v28922_v18  ;;  %v15760_v44 = vsel %vm15696_vm13, %v23654_v34, %v15728_v61 }
 0xe40   : > { %v22948_v41 = vpop.f32.mrb[120].mxu0  ;;  %v15739_v8 = vmul.f32 0.2, %v23667_v31  ;;  %vm15707_vm5 = vcmp.ge.f32.partialorder %v23667_v31, 0.0  ;;  %v23657_v48 = vadd.f32 %v28922_v18, %v28917_v36 }
 0xe41   : > { %v15614_v49 = vpop.f32.mrb[121].mxu0  ;;  %v23668_v57 = vadd.f32 %v22948_v41, %v28922_v18  ;;  %v15772_v39 = vsel %vm15708_vm8, %v23666_v26, %v15740_v33  ;;  %v15759_v41 = vsel %vm15695_vm14, %v23655_v3, %v15727_v54  ;;  %v15730_v17 = vmul.f32 0.2, %v23656_v4  ;;  %v16157_v33 = vld [vmem:[#allocation2 + $0x9] sm:$0xff] }
 0xe42   : > { %15819 = vrot.lane.b32.xlu0 %v15752_v51, %s24807_s22  ;;  %v23669_v1 = vadd.f32 %v28922_v18, %v15614_v49  ;;  %v15771_v52 = vsel %vm15707_vm5, %v23667_v31, %v15739_v8  ;;  %vm15698_vm1 = vcmp.ge.f32.partialorder %v23656_v4, 0.0  ;;  %v15729_v16 = vmul.f32 0.2, %v23657_v48 }
 0xe43   : > { %15817 = vrot.lane.b32.xlu1 %v15751_v20, %s24807_s22  ;;  %v15742_v32 = vmul.f32 0.2, %v23668_v57  ;;  %vm15710_vm4 = vcmp.ge.f32.partialorder %v23668_v57, 0.0  ;;  %vm15697_vm8 = vcmp.ge.f32.partialorder %v23657_v48, 0.0  ;;  %v15762_v62 = vsel %vm15698_vm1, %v23656_v4, %v15730_v17 }
 0xe44   : > { %v22951_v40 = vpop.f32.mrb[122].mxu0  ;;  %v15741_v30 = vmul.f32 0.2, %v23669_v1  ;;  %vm15709_vm6 = vcmp.ge.f32.partialorder %v23669_v1, 0.0 }
 0xe45   : > { %v15624_v7 = vpop.f32.mrb[123].mxu0  ;;  %v23670_v6 = vadd.f32 %v22951_v40, %v28922_v18  ;;  %v15774_v24 = vsel %vm15710_vm4, %v23668_v57, %v15742_v32  ;;  %v15761_v40 = vsel %vm15697_vm8, %v23657_v48, %v15729_v16  ;;  %vm29017_vm4 = vmpackc.low %vm385_vm2, %vm385_vm2 }
 0xe46   : > { %15855 = vrot.lane.b32.xlu0 %v15770_v47, %s24807_s22  ;;  %v23671_v50 = vadd.f32 %v28922_v18, %v15624_v7  ;;  %v15773_v56 = vsel %vm15709_vm6, %v23669_v1, %v15741_v30 }
 0xe47   : > { %15853 = vrot.lane.b32.xlu1 %v15769_v28, %s24807_s22  ;;  %v15744_v10 = vmul.f32 0.2, %v23670_v6  ;;  %vm15712_vm11 = vcmp.ge.f32.partialorder %v23670_v6, 0.0  ;;  %v15950_v28 = vld [vmem:[#allocation2] sm:$0xff] }
 0xe48   : > { %v22954_v11 = vpop.f32.mrb[124].mxu0  ;;  %v15743_v59 = vmul.f32 0.2, %v23671_v50  ;;  %vm15711_vm12 = vcmp.ge.f32.partialorder %v23671_v50, 0.0 }
 0xe49   : > { %v15634_v55 = vpop.f32.mrb[125].mxu0  ;;  %v23672_v38 = vadd.f32 %v22954_v11, %v28922_v18  ;;  %v15776_v37 = vsel %vm15712_vm11, %v23670_v6, %v15744_v10  ;;  %v15951_v11 = vld [vmem:[#allocation2 + $0x8] sm:$0xff] }
 0xe4a   : > { %15823 = vrot.lane.b32.xlu0 %v15754_v13, %s24807_s22  ;;  %v23673_v19 = vadd.f32 %v28922_v18, %v15634_v55  ;;  %v15775_v25 = vsel %vm15711_vm12, %v23671_v50, %v15743_v59  ;;  %v23087_v57 = vpack.c.bf16 %v15951_v11, %v15950_v28 }
 0xe4b   : > { %15821 = vrot.lane.b32.xlu1 %v15753_v53, %s24807_s22  ;;  %v15746_v43 = vmul.f32 0.2, %v23672_v38  ;;  %vm15714_vm15 = vcmp.ge.f32.partialorder %v23672_v38, 0.0 }
 0xe4c   : > { %v28960_v0 = vpop.f32.mrb[126].mxu0  ;;  %v15745_v23 = vmul.f32 0.2, %v23673_v19  ;;  %vm15713_vm0 = vcmp.ge.f32.partialorder %v23673_v19, 0.0 }
 0xe4d   : > { %v28963_v35 = vpop.f32.mrb[127].mxu0  ;;  %v23674_v60 = vadd.f32 %v28960_v0, %v28922_v18  ;;  %v15778_v49 = vsel %vm15714_vm15, %v23672_v38, %v15746_v43 }
 0xe4e   : > { %15859 = vrot.lane.b32.xlu0 %v15772_v39, %s24807_s22  ;;  %v23675_v51 = vadd.f32 %v28922_v18, %v28963_v35  ;;  %v15777_v36 = vsel %vm15713_vm0, %v23673_v19, %v15745_v23  ;;  %v23135_v35 = vpack.c.bf16 %v16157_v33, %v16156_v46 }
 0xe4f   : > { %15857 = vrot.lane.b32.xlu1 %v15771_v52, %s24807_s22  ;;  %v15748_v5 = vmul.f32 0.2, %v23674_v60  ;;  %vm15716_vm5 = vcmp.ge.f32.partialorder %v23674_v60, 0.0 }
 0xe50   : > { %v15747_v20 = vmul.f32 0.2, %v23675_v51  ;;  %vm15715_vm7 = vcmp.ge.f32.partialorder %v23675_v51, 0.0 }
 0xe51   : > { %v15780_v18 = vsel %vm15716_vm5, %v23674_v60, %v15748_v5 }
 0xe52   : > { %15827 = vrot.lane.b32.xlu0 %v15756_v12, %s24807_s22  ;;  %v15779_v26 = vsel %vm15715_vm7, %v23675_v51, %v15747_v20 }
 0xe53   : > { %15825 = vrot.lane.b32.xlu1 %v15755_v14, %s24807_s22 }
 0xe56   : > { %15863 = vrot.lane.b32.xlu0 %v15774_v24, %s24807_s22 }
 0xe57   : > { %15861 = vrot.lane.b32.xlu1 %v15773_v56, %s24807_s22 }
 0xe5a   : > { %15831 = vrot.lane.b32.xlu0 %v15758_v42, %s24807_s22 }
 0xe5b   : > { %15829 = vrot.lane.b32.xlu1 %v15757_v21, %s24807_s22 }
 0xe5e   : > { %15867 = vrot.lane.b32.xlu0 %v15776_v37, %s24807_s22 }
 0xe5f   : > { %15865 = vrot.lane.b32.xlu1 %v15775_v25, %s24807_s22 }
 0xe62   : > { %15835 = vrot.lane.b32.xlu0 %v15760_v44, %s24807_s22 }
 0xe63   : > { %15833 = vrot.lane.b32.xlu1 %v15759_v41, %s24807_s22 }
 0xe66   : > { %15871 = vrot.lane.b32.xlu0 %v15778_v49, %s24807_s22 }
 0xe67   : > { %15869 = vrot.lane.b32.xlu1 %v15777_v36, %s24807_s22 }
 0xe6a   : > { %15839 = vrot.lane.b32.xlu0 %v15762_v62, %s24807_s22 }
 0xe6b   : > { %15837 = vrot.lane.b32.xlu1 %v15761_v40, %s24807_s22 }
 0xe6e   : > { %15875 = vrot.lane.b32.xlu0 %v15780_v18, %s24807_s22 }
 0xe6f   : > { %15873 = vrot.lane.b32.xlu1 %v15779_v26, %s24807_s22 }
 0xea4   : > { %v15844_v7 = vpop.permute.xlu0 %15843 }
 0xea5   : > { %v15842_v47 = vpop.permute.xlu1 %15841  ;;  %15925 = vst.msk [vmem:[#allocation2 + $0xc9] sm:$0xff] %vm15909_vm3, %v15844_v7 }
 0xea6   : > { %15924 = vst.msk [vmem:[#allocation2 + $0xc1] sm:$0xff] %vm15909_vm3, %v15842_v47 }
 0xea8   : > { %v15848_v45 = vpop.permute.xlu0 %15847 }
 0xea9   : > { %v15846_v31 = vpop.permute.xlu1 %15845  ;;  %15927 = vst.msk [vmem:[#allocation2 + $0xe1] sm:$0xff] %vm15909_vm3, %v15848_v45 }
 0xeaa   : > { %15926 = vst.msk [vmem:[#allocation2 + $0xd9] sm:$0xff] %vm15909_vm3, %v15846_v31 }
 0xeac   : > { %v15816_v13 = vpop.permute.xlu0 %15815  ;;  %v16173_v58 = vld [vmem:[#allocation2 + $0xc9] sm:$0xff] }
 0xead   : > { %v15814_v8 = vpop.permute.xlu1 %15813  ;;  %v15966_v53 = vld [vmem:[#allocation2 + $0xc0] sm:$0xff]  ;;  %v15967_v0 = vld [vmem:[#allocation2 + $0xc8] sm:$0xff]  ;;  %15911 = vst.msk [vmem:[#allocation2 + $0x21] sm:$0xff] %vm15909_vm3, %v15816_v13 }
 0xeae   : > { %v16172_v9 = vld [vmem:[#allocation2 + $0xc1] sm:$0xff]  ;;  %v29022_v39 = vpack.c.bf16 %v15967_v0, %v15966_v53  ;;  %15910 = vst.msk [vmem:[#allocation2 + $0x19] sm:$0xff] %vm15909_vm3, %v15814_v8 }
 0xeaf   : > { %v29025_v63 = vpack.c.bf16 %v16173_v58, %v16172_v9 }
 0xeb0   : > { %23086 = vmatprep.subr.msk.bf16.mxu0 %vm29017_vm4, %v29022_v39  ;;  %v15852_v1 = vpop.permute.xlu0 %15851  ;;  %v16175_v52 = vld [vmem:[#allocation2 + $0xe1] sm:$0xff] }
 0xeb1   : > { %23134 = vmatprep.subr.msk.bf16.mxu1 %vm29017_vm4, %v29025_v63  ;;  %15929 = vst.msk [vmem:[#allocation2 + $0xf9] sm:$0xff] %vm15909_vm3, %v15852_v1  ;;  %23089 = vmatpush3.bf16.xpose.msk.msra.mxu0 %vm29017_vm4, %v23087_v57  ;;  %v15850_v29 = vpop.permute.xlu1 %15849  ;;  %v15968_v32 = vld [vmem:[#allocation2 + $0xd8] sm:$0xff]  ;;  %v15969_v12 = vld [vmem:[#allocation2 + $0xe0] sm:$0xff] }
 0xeb2   : > { %23137 = vmatpush3.bf16.xpose.msk.msra.mxu1 %vm29017_vm4, %v23135_v35  ;;  %v16174_v15 = vld [vmem:[#allocation2 + $0xd9] sm:$0xff]  ;;  %15928 = vst.msk [vmem:[#allocation2 + $0xf1] sm:$0xff] %vm15909_vm3, %v15850_v29  ;;  %v29039_v30 = vpack.c.bf16 %v15969_v12, %v15968_v32 }
 0xeb3   : > { %v29041_v14 = vpack.c.bf16 %v16175_v52, %v16174_v15 }
 0xeb4   : > { %23092 = vmatprep.subr.msk.bf16.mxu0 %vm29017_vm4, %v29039_v30  ;;  %v15820_v2 = vpop.permute.xlu0 %15819  ;;  %v16159_v6 = vld [vmem:[#allocation2 + $0x21] sm:$0xff] }
 0xeb5   : > { %23140 = vmatprep.subr.msk.bf16.mxu1 %vm29017_vm4, %v29041_v14  ;;  %15913 = vst.msk [vmem:[#allocation2 + $0x39] sm:$0xff] %vm15909_vm3, %v15820_v2  ;;  %v15818_v24 = vpop.permute.xlu1 %15817  ;;  %v15952_v27 = vld [vmem:[#allocation2 + $0x18] sm:$0xff]  ;;  %v15953_v50 = vld [vmem:[#allocation2 + $0x20] sm:$0xff] }
 0xeb6   : > { %v16158_v56 = vld [vmem:[#allocation2 + $0x19] sm:$0xff]  ;;  %15912 = vst.msk [vmem:[#allocation2 + $0x31] sm:$0xff] %vm15909_vm3, %v15818_v24  ;;  %v29051_v34 = vpack.c.bf16 %v15953_v50, %v15952_v27 }
 0xeb7   : > { %v29053_v10 = vpack.c.bf16 %v16159_v6, %v16158_v56 }
 0xeb8   : > { %v15856_v42 = vpop.permute.xlu0 %15855  ;;  %v16177_v3 = vld [vmem:[#allocation2 + $0xf9] sm:$0xff] }
 0xeb9   : > { %15931 = vst.msk [vmem:[#allocation2 + $0x111] sm:$0xff] %vm15909_vm3, %v15856_v42  ;;  %23095 = vmatpush3.bf16.xpose.msk.msra.mxu0 %vm29017_vm4, %v29051_v34  ;;  %v15854_v59 = vpop.permute.xlu1 %15853  ;;  %v15970_v21 = vld [vmem:[#allocation2 + $0xf0] sm:$0xff]  ;;  %v15971_v61 = vld [vmem:[#allocation2 + $0xf8] sm:$0xff] }
 0xeba   : > { %23143 = vmatpush3.bf16.xpose.msk.msra.mxu1 %vm29017_vm4, %v29053_v10  ;;  %v16176_v38 = vld [vmem:[#allocation2 + $0xf1] sm:$0xff]  ;;  %15930 = vst.msk [vmem:[#allocation2 + $0x109] sm:$0xff] %vm15909_vm3, %v15854_v59  ;;  %v29063_v37 = vpack.c.bf16 %v15971_v61, %v15970_v21 }
 0xebb   : > { %v29065_v54 = vpack.c.bf16 %v16177_v3, %v16176_v38 }
 0xebc   : > { %23098 = vmatprep.subr.msk.bf16.mxu0 %vm29017_vm4, %v29063_v37  ;;  %v15824_v19 = vpop.permute.xlu0 %15823  ;;  %v16161_v25 = vld [vmem:[#allocation2 + $0x39] sm:$0xff] }
 0xebd   : > { %23146 = vmatprep.subr.msk.bf16.mxu1 %vm29017_vm4, %v29065_v54  ;;  %15915 = vst.msk [vmem:[#allocation2 + $0x51] sm:$0xff] %vm15909_vm3, %v15824_v19  ;;  %v15822_v4 = vpop.permute.xlu1 %15821  ;;  %v15954_v43 = vld [vmem:[#allocation2 + $0x30] sm:$0xff]  ;;  %v15955_v44 = vld [vmem:[#allocation2 + $0x38] sm:$0xff] }
 0xebe   : > { %v16160_v48 = vld [vmem:[#allocation2 + $0x31] sm:$0xff]  ;;  %15914 = vst.msk [vmem:[#allocation2 + $0x49] sm:$0xff] %vm15909_vm3, %v15822_v4  ;;  %v29075_v23 = vpack.c.bf16 %v15955_v44, %v15954_v43 }
 0xebf   : > { %v29077_v41 = vpack.c.bf16 %v16161_v25, %v16160_v48 }
 0xec0   : > { %v15860_v17 = vpop.permute.xlu0 %15859  ;;  %v16179_v60 = vld [vmem:[#allocation2 + $0x111] sm:$0xff] }
 0xec1   : > { %15933 = vst.msk [vmem:[#allocation2 + $0x129] sm:$0xff] %vm15909_vm3, %v15860_v17  ;;  %23101 = vmatpush3.bf16.xpose.msk.msra.mxu0 %vm29017_vm4, %v29075_v23  ;;  %v15858_v49 = vpop.permute.xlu1 %15857  ;;  %v15972_v16 = vld [vmem:[#allocation2 + $0x108] sm:$0xff]  ;;  %v15973_v51 = vld [vmem:[#allocation2 + $0x110] sm:$0xff] }
 0xec2   : > { %23149 = vmatpush3.bf16.xpose.msk.msra.mxu1 %vm29017_vm4, %v29077_v41  ;;  %v16178_v36 = vld [vmem:[#allocation2 + $0x109] sm:$0xff]  ;;  %15932 = vst.msk [vmem:[#allocation2 + $0x121] sm:$0xff] %vm15909_vm3, %v15858_v49  ;;  %v29087_v5 = vpack.c.bf16 %v15973_v51, %v15972_v16 }
 0xec3   : > { %v29089_v62 = vpack.c.bf16 %v16179_v60, %v16178_v36 }
 0xec4   : > { %23104 = vmatprep.subr.msk.bf16.mxu0 %vm29017_vm4, %v29087_v5  ;;  %v15828_v20 = vpop.permute.xlu0 %15827  ;;  %v16163_v40 = vld [vmem:[#allocation2 + $0x51] sm:$0xff] }
 0xec5   : > { %23152 = vmatprep.subr.msk.bf16.mxu1 %vm29017_vm4, %v29089_v62  ;;  %15917 = vst.msk [vmem:[#allocation2 + $0x69] sm:$0xff] %vm15909_vm3, %v15828_v20  ;;  %v15826_v18 = vpop.permute.xlu1 %15825  ;;  %v15956_v26 = vld [vmem:[#allocation2 + $0x48] sm:$0xff]  ;;  %v15957_v7 = vld [vmem:[#allocation2 + $0x50] sm:$0xff] }
 0xec6   : > { %v16162_v47 = vld [vmem:[#allocation2 + $0x49] sm:$0xff]  ;;  %15916 = vst.msk [vmem:[#allocation2 + $0x61] sm:$0xff] %vm15909_vm3, %v15826_v18  ;;  %v29099_v45 = vpack.c.bf16 %v15957_v7, %v15956_v26 }
 0xec7   : > { %v29101_v31 = vpack.c.bf16 %v16163_v40, %v16162_v47 }
 0xec8   : > { %v15864_v28 = vpop.permute.xlu0 %15863  ;;  %v16181_v11 = vld [vmem:[#allocation2 + $0x129] sm:$0xff] }
 0xec9   : > { %15935 = vst.msk [vmem:[#allocation2 + $0x141] sm:$0xff] %vm15909_vm3, %v15864_v28  ;;  %23107 = vmatpush3.bf16.xpose.msk.msra.mxu0 %vm29017_vm4, %v29099_v45  ;;  %v15862_v46 = vpop.permute.xlu1 %15861  ;;  %v15974_v33 = vld [vmem:[#allocation2 + $0x120] sm:$0xff]  ;;  %v15975_v13 = vld [vmem:[#allocation2 + $0x128] sm:$0xff] }
 0xeca   : > { %23155 = vmatpush3.bf16.xpose.msk.msra.mxu1 %vm29017_vm4, %v29101_v31  ;;  %v16180_v58 = vld [vmem:[#allocation2 + $0x121] sm:$0xff]  ;;  %15934 = vst.msk [vmem:[#allocation2 + $0x139] sm:$0xff] %vm15909_vm3, %v15862_v46  ;;  %v29111_v8 = vpack.c.bf16 %v15975_v13, %v15974_v33 }
 0xecb   : > { %v29113_v53 = vpack.c.bf16 %v16181_v11, %v16180_v58 }
 0xecc   : > { %23110 = vmatprep.subr.msk.bf16.mxu0 %vm29017_vm4, %v29111_v8  ;;  %v15832_v0 = vpop.permute.xlu0 %15831  ;;  %v16165_v9 = vld [vmem:[#allocation2 + $0x69] sm:$0xff] }
 0xecd   : > { %23158 = vmatprep.subr.msk.bf16.mxu1 %vm29017_vm4, %v29113_v53  ;;  %15919 = vst.msk [vmem:[#allocation2 + $0x81] sm:$0xff] %vm15909_vm3, %v15832_v0  ;;  %v15830_v57 = vpop.permute.xlu1 %15829  ;;  %v15958_v35 = vld [vmem:[#allocation2 + $0x60] sm:$0xff]  ;;  %v15959_v1 = vld [vmem:[#allocation2 + $0x68] sm:$0xff] }
 0xece   : > { %v16164_v52 = vld [vmem:[#allocation2 + $0x61] sm:$0xff]  ;;  %15918 = vst.msk [vmem:[#allocation2 + $0x79] sm:$0xff] %vm15909_vm3, %v15830_v57  ;;  %v29123_v29 = vpack.c.bf16 %v15959_v1, %v15958_v35  ;;  %v16379_v1 = vld [vmem:[#allocation2 + $0xca] sm:$0xff] }
 0xecf   : > { %v29125_v32 = vpack.c.bf16 %v16165_v9, %v16164_v52  ;;  %v16378_v35 = vld [vmem:[#allocation2 + $0xc2] sm:$0xff] }
 0xed0   : > { %v15868_v12 = vpop.permute.xlu0 %15867  ;;  %v16183_v15 = vld [vmem:[#allocation2 + $0x141] sm:$0xff] }
 0xed1   : > { %15937 = vst.msk [vmem:[#allocation2 + $0x159] sm:$0xff] %vm15909_vm3, %v15868_v12  ;;  %23113 = vmatpush3.bf16.xpose.msk.msra.mxu0 %vm29017_vm4, %v29123_v29  ;;  %v15866_v2 = vpop.permute.xlu1 %15865  ;;  %v15976_v6 = vld [vmem:[#allocation2 + $0x138] sm:$0xff]  ;;  %v15977_v24 = vld [vmem:[#allocation2 + $0x140] sm:$0xff] }
 0xed2   : > { %23161 = vmatpush3.bf16.xpose.msk.msra.mxu1 %vm29017_vm4, %v29125_v32  ;;  %v16182_v27 = vld [vmem:[#allocation2 + $0x139] sm:$0xff]  ;;  %15936 = vst.msk [vmem:[#allocation2 + $0x151] sm:$0xff] %vm15909_vm3, %v15866_v2  ;;  %v29135_v50 = vpack.c.bf16 %v15977_v24, %v15976_v6  ;;  %v29197_v24 = vpack.c.bf16 %v16379_v1, %v16378_v35  ;;  %v16389_v1 = vld [vmem:[#allocation2 + $0x142] sm:$0xff] }
 0xed3   : > { %v29137_v56 = vpack.c.bf16 %v16183_v15, %v16182_v27  ;;  %v16362_v27 = vld [vmem:[#allocation2 + $0x2] sm:$0xff]  ;;  %v16388_v35 = vld [vmem:[#allocation2 + $0x13a] sm:$0xff] }
 0xed4   : > { %23116 = vmatprep.subr.msk.bf16.mxu0 %vm29017_vm4, %v29135_v50  ;;  %v15836_v42 = vpop.permute.xlu0 %15835  ;;  %v16167_v3 = vld [vmem:[#allocation2 + $0x81] sm:$0xff] }
 0xed5   : > { %23164 = vmatprep.subr.msk.bf16.mxu1 %vm29017_vm4, %v29137_v56  ;;  %15921 = vst.msk [vmem:[#allocation2 + $0x99] sm:$0xff] %vm15909_vm3, %v15836_v42  ;;  %v15834_v59 = vpop.permute.xlu1 %15833  ;;  %v15960_v21 = vld [vmem:[#allocation2 + $0x78] sm:$0xff]  ;;  %v15961_v61 = vld [vmem:[#allocation2 + $0x80] sm:$0xff]  ;;  %v16363_v42 = vld [vmem:[#allocation2 + $0xa] sm:$0xff] }
 0xed6   : > { %v16166_v38 = vld [vmem:[#allocation2 + $0x79] sm:$0xff]  ;;  %15920 = vst.msk [vmem:[#allocation2 + $0x91] sm:$0xff] %vm15909_vm3, %v15834_v59  ;;  %v29147_v19 = vpack.c.bf16 %v15961_v61, %v15960_v21  ;;  %v16381_v21 = vld [vmem:[#allocation2 + $0xe2] sm:$0xff]  ;;  %v19228_v61 = vld [vmem:[%s29668_s5 + $0x10] sm:$0xff] }
 0xed7   : > { %v29149_v25 = vpack.c.bf16 %v16167_v3, %v16166_v38  ;;  %v23183_v3 = vpack.c.bf16 %v16363_v42, %v16362_v27  ;;  %v16380_v59 = vld [vmem:[#allocation2 + $0xda] sm:$0xff]  ;;  %v16373_v27 = vld [vmem:[#allocation2 + $0x82] sm:$0xff] }
 0xed8   : > { %v15872_v4 = vpop.permute.xlu0 %15871  ;;  %v16185_v43 = vld [vmem:[#allocation2 + $0x159] sm:$0xff]  ;;  %v29213_v38 = vpack.c.bf16 %v16381_v21, %v16380_v59 }
 0xed9   : > { %15939 = vst.msk [vmem:[#allocation2 + $0x171] sm:$0xff] %vm15909_vm3, %v15872_v4  ;;  %23119 = vmatpush3.bf16.xpose.msk.msra.mxu0 %vm29017_vm4, %v29147_v19  ;;  %v15870_v44 = vpop.permute.xlu1 %15869  ;;  %v15978_v48 = vld [vmem:[#allocation2 + $0x150] sm:$0xff]  ;;  %v15979_v17 = vld [vmem:[#allocation2 + $0x158] sm:$0xff] }
 0xeda   : > { %23167 = vmatpush3.bf16.xpose.msk.msra.mxu1 %vm29017_vm4, %v29149_v25  ;;  %v16184_v60 = vld [vmem:[#allocation2 + $0x151] sm:$0xff]  ;;  %15938 = vst.msk [vmem:[#allocation2 + $0x169] sm:$0xff] %vm15909_vm3, %v15870_v44  ;;  %v29159_v49 = vpack.c.bf16 %v15979_v17, %v15978_v48  ;;  %v16364_v4 = vld [vmem:[#allocation2 + $0x1a] sm:$0xff] }
 0xedb   : > { %v29161_v16 = vpack.c.bf16 %v16185_v43, %v16184_v60  ;;  %v16365_v43 = vld [vmem:[#allocation2 + $0x22] sm:$0xff]  ;;  %v16382_v44 = vld [vmem:[#allocation2 + $0xf2] sm:$0xff]  ;;  %v16383_v48 = vld [vmem:[#allocation2 + $0xfa] sm:$0xff] }
 0xedc   : > { %23122 = vmatprep.subr.msk.bf16.mxu0 %vm29017_vm4, %v29159_v49  ;;  %v15840_v51 = vpop.permute.xlu0 %15839  ;;  %v16169_v36 = vld [vmem:[#allocation2 + $0x99] sm:$0xff]  ;;  %v29221_v17 = vpack.c.bf16 %v16365_v43, %v16364_v4  ;;  %v29223_v60 = vpack.c.bf16 %v16383_v48, %v16382_v44 }
 0xedd   : > { %23170 = vmatprep.subr.msk.bf16.mxu1 %vm29017_vm4, %v29161_v16  ;;  %15923 = vst.msk [vmem:[#allocation2 + $0xb1] sm:$0xff] %vm15909_vm3, %v15840_v51  ;;  %v15838_v20 = vpop.permute.xlu1 %15837  ;;  %v15962_v40 = vld [vmem:[#allocation2 + $0x90] sm:$0xff]  ;;  %v15963_v18 = vld [vmem:[#allocation2 + $0x98] sm:$0xff] }
 0xede   : > { %v16168_v26 = vld [vmem:[#allocation2 + $0x91] sm:$0xff]  ;;  %15922 = vst.msk [vmem:[#allocation2 + $0xa9] sm:$0xff] %vm15909_vm3, %v15838_v20  ;;  %v29171_v7 = vpack.c.bf16 %v15963_v18, %v15962_v40  ;;  %v16367_v51 = vld [vmem:[#allocation2 + $0x3a] sm:$0xff] }
 0xedf   : > { %v29173_v47 = vpack.c.bf16 %v16169_v36, %v16168_v26  ;;  %v16384_v36 = vld [vmem:[#allocation2 + $0x10a] sm:$0xff]  ;;  %v16385_v20 = vld [vmem:[#allocation2 + $0x112] sm:$0xff]  ;;  %v16375_v43 = vld [vmem:[#allocation2 + $0x9a] sm:$0xff] }
 0xee0   : > { %v15876_v28 = vpop.permute.xlu0 %15875  ;;  %v16187_v11 = vld [vmem:[#allocation2 + $0x171] sm:$0xff]  ;;  %v29233_v18 = vpack.c.bf16 %v16385_v20, %v16384_v36 }
 0xee1   : > { %15941 = vst.msk [vmem:[#allocation2 + $0x189] sm:$0xff] %vm15909_vm3, %v15876_v28  ;;  %23125 = vmatpush3.bf16.xpose.msk.msra.mxu0 %vm29017_vm4, %v29171_v7  ;;  %v15874_v46 = vpop.permute.xlu1 %15873  ;;  %v15980_v33 = vld [vmem:[#allocation2 + $0x168] sm:$0xff]  ;;  %v15981_v13 = vld [vmem:[#allocation2 + $0x170] sm:$0xff] }
 0xee2   : > { %23173 = vmatpush3.bf16.xpose.msk.msra.mxu1 %vm29017_vm4, %v29173_v47  ;;  %v16186_v58 = vld [vmem:[#allocation2 + $0x169] sm:$0xff]  ;;  %15940 = vst.msk [vmem:[#allocation2 + $0x181] sm:$0xff] %vm15909_vm3, %v15874_v46  ;;  %v29183_v0 = vpack.c.bf16 %v15981_v13, %v15980_v33  ;;  %v16369_v28 = vld [vmem:[#allocation2 + $0x52] sm:$0xff] }
 0xee3   : > { %v29185_v9 = vpack.c.bf16 %v16187_v11, %v16186_v58  ;;  %v16368_v26 = vld [vmem:[#allocation2 + $0x4a] sm:$0xff]  ;;  %v16386_v11 = vld [vmem:[#allocation2 + $0x122] sm:$0xff]  ;;  %v16390_v42 = vld [vmem:[#allocation2 + $0x152] sm:$0xff] }
 0xee4   : > { %23128 = vmatprep.subr.msk.bf16.mxu0 %vm29017_vm4, %v29183_v0  ;;  %v16171_v57 = vld [vmem:[#allocation2 + $0xb1] sm:$0xff]  ;;  %v29241_v33 = vpack.c.bf16 %v16369_v28, %v16368_v26  ;;  %v16370_v58 = vld [vmem:[#allocation2 + $0x62] sm:$0xff] }
 0xee5   : > { %23176 = vmatprep.subr.msk.bf16.mxu1 %vm29017_vm4, %v29185_v9  ;;  %v15964_v52 = vld [vmem:[#allocation2 + $0xa8] sm:$0xff]  ;;  %v15965_v12 = vld [vmem:[#allocation2 + $0xb0] sm:$0xff]  ;;  %v19262_v28 = vld [vmem:[%s29668_s5 + $0x18] sm:$0xff] }
 0xee6   : > { %v16170_v15 = vld [vmem:[#allocation2 + $0xa9] sm:$0xff]  ;;  %v29193_v2 = vpack.c.bf16 %v15965_v12, %v15964_v52  ;;  %v29253_v12 = vpack.c.bf16 %v16389_v1, %v16388_v35  ;;  %v16374_v4 = vld [vmem:[#allocation2 + $0x92] sm:$0xff] }
 0xee7   : > { %v29195_v6 = vpack.c.bf16 %v16171_v57, %v16170_v15  ;;  %v16387_v46 = vld [vmem:[#allocation2 + $0x12a] sm:$0xff]  ;;  %v16372_v15 = vld [vmem:[#allocation2 + $0x7a] sm:$0xff]  ;;  %v16393_v48 = vld [vmem:[#allocation2 + $0x172] sm:$0xff] }
 0xee8   : > { %v29243_v13 = vpack.c.bf16 %v16387_v46, %v16386_v11  ;;  %v16371_v57 = vld [vmem:[#allocation2 + $0x6a] sm:$0xff]  ;;  %v29261_v59 = vpack.c.bf16 %v16373_v27, %v16372_v15  ;;  %v16377_v20 = vld [vmem:[#allocation2 + $0xb2] sm:$0xff]  ;;  %v19296_v46 = vld [vmem:[%s29668_s5 + $0x20] sm:$0xff] }
 0xee9   : > { %23131 = vmatpush3.bf16.xpose.msk.msra.mxu0 %vm29017_vm4, %v29193_v2  ;;  %v29251_v52 = vpack.c.bf16 %v16371_v57, %v16370_v58  ;;  %v16392_v44 = vld [vmem:[#allocation2 + $0x16a] sm:$0xff] }
 0xeea   : > { %23179 = vmatpush3.bf16.xpose.msk.msra.mxu1 %vm29017_vm4, %v29195_v6  ;;  %v16376_v36 = vld [vmem:[#allocation2 + $0xaa] sm:$0xff] }
 0xeeb   : > { %23182 = vmatprep.subr.msk.bf16.mxu1 %vm29017_vm4, %v29197_v24  ;;  %v29281_v26 = vpack.c.bf16 %v16377_v20, %v16376_v36  ;;  %v19330_v57 = vld [vmem:[%s29668_s5 + $0x28] sm:$0xff]  ;;  %v19364_v1 = vld [vmem:[%s29668_s5 + $0x30] sm:$0xff] }
 0xef1   : > { %20797 = vmatmul.mubr.msk.f32.vlgmr.msra.gmra.mrb[64].mxu1 %vm385_vm2, %v29004_v22  ;;  %v16366_v22 = vld [vmem:[#allocation2 + $0x32] sm:$0xff] }
 0xef2   : > { %23185 = vmatpush3.bf16.xpose.msk.msra.mxu1 %vm29017_vm4, %v23183_v3  ;;  %20830 = vmatprep.mubr.msk.f32.mxu1 %vm385_vm2, %v19228_v61  ;;  %v29231_v40 = vpack.c.bf16 %v16367_v51, %v16366_v22  ;;  %v16391_v3 = vld [vmem:[#allocation2 + $0x15a] sm:$0xff]  ;;  %v29271_v22 = vpack.c.bf16 %v16375_v43, %v16374_v4  ;;  %v29273_v51 = vpack.c.bf16 %v16393_v48, %v16392_v44 }
 0xef3   : > { %23188 = vmatprep.subr.msk.bf16.mxu1 %vm29017_vm4, %v29213_v38  ;;  %v29263_v21 = vpack.c.bf16 %v16391_v3, %v16390_v42 }
 0xefa   : > { %23191 = vmatpush3.bf16.xpose.msk.msra.mxu1 %vm29017_vm4, %v29221_v17 }
 0xefb   : > { %23194 = vmatprep.subr.msk.bf16.mxu1 %vm29017_vm4, %v29223_v60 }
 0xf02   : > { %23197 = vmatpush3.bf16.xpose.msk.msra.mxu1 %vm29017_vm4, %v29231_v40 }
 0xf03   : > { %23200 = vmatprep.subr.msk.bf16.mxu1 %vm29017_vm4, %v29233_v18 }
 0xf0a   : > { %23203 = vmatpush3.bf16.xpose.msk.msra.mxu1 %vm29017_vm4, %v29241_v33 }
 0xf0b   : > { %23206 = vmatprep.subr.msk.bf16.mxu1 %vm29017_vm4, %v29243_v13 }
 0xf12   : > { %23209 = vmatpush3.bf16.xpose.msk.msra.mxu1 %vm29017_vm4, %v29251_v52 }
 0xf13   : > { %23212 = vmatprep.subr.msk.bf16.mxu1 %vm29017_vm4, %v29253_v12 }
 0xf1a   : > { %23215 = vmatpush3.bf16.xpose.msk.msra.mxu1 %vm29017_vm4, %v29261_v59 }
 0xf1b   : > { %23218 = vmatprep.subr.msk.bf16.mxu1 %vm29017_vm4, %v29263_v21 }
 0xf22   : > { %23221 = vmatpush3.bf16.xpose.msk.msra.mxu1 %vm29017_vm4, %v29271_v22 }
 0xf23   : > { %23224 = vmatprep.subr.msk.bf16.mxu1 %vm29017_vm4, %v29273_v51 }
 0xf2a   : > { %23227 = vmatpush3.bf16.xpose.msk.msra.mxu1 %vm29017_vm4, %v29281_v26 }
 0xf2b   : > { %23230 = vmatprep.subr.msk.bf16.mxu1 %vm29017_vm4, %v29039_v30 }
 0xf31   : > { %20831 = vmatmul.mubr.msk.f32.vlgmr.msra.gmra.mrb[64].mxu1 %vm385_vm2, %v19228_v61  ;;  %v16599_v61 = vld [vmem:[#allocation2 + $0x188] sm:$0xff] }
 0xf32   : > { %23233 = vmatpush3.bf16.xpose.msk.msra.mxu1 %vm29017_vm4, %v29051_v34  ;;  %20864 = vmatprep.mubr.msk.f32.mxu1 %vm385_vm2, %v19262_v28  ;;  %v16598_v34 = vld [vmem:[#allocation2 + $0x180] sm:$0xff] }
 0xf33   : > { %23236 = vmatprep.subr.msk.bf16.mxu1 %vm29017_vm4, %v29063_v37  ;;  %v29330_v11 = vpack.c.bf16 %v16599_v61, %v16598_v34 }
 0xf3a   : > { %23239 = vmatpush3.bf16.xpose.msk.msra.mxu1 %vm29017_vm4, %v29075_v23 }
 0xf3b   : > { %23242 = vmatprep.subr.msk.bf16.mxu1 %vm29017_vm4, %v29087_v5 }
 0xf42   : > { %23245 = vmatpush3.bf16.xpose.msk.msra.mxu1 %vm29017_vm4, %v29099_v45 }
 0xf43   : > { %23248 = vmatprep.subr.msk.bf16.mxu1 %vm29017_vm4, %v29111_v8 }
 0xf4a   : > { %23251 = vmatpush3.bf16.xpose.msk.msra.mxu1 %vm29017_vm4, %v29123_v29 }
 0xf4b   : > { %23254 = vmatprep.subr.msk.bf16.mxu1 %vm29017_vm4, %v29135_v50 }
 0xf52   : > { %23257 = vmatpush3.bf16.xpose.msk.msra.mxu1 %vm29017_vm4, %v29147_v19 }
 0xf53   : > { %23260 = vmatprep.subr.msk.bf16.mxu1 %vm29017_vm4, %v29159_v49 }
 0xf5a   : > { %23263 = vmatpush3.bf16.xpose.msk.msra.mxu1 %vm29017_vm4, %v29171_v7 }
 0xf5b   : > { %23266 = vmatprep.subr.msk.bf16.mxu1 %vm29017_vm4, %v29183_v0 }
 0xf62   : > { %23269 = vmatpush3.bf16.xpose.msk.msra.mxu1 %vm29017_vm4, %v29193_v2 }
 0xf63   : > { %23272 = vmatprep.subr.msk.bf16.mxu1 %vm29017_vm4, %v29330_v11 }
 0xf6a   : > { %23275 = vmatpush3.bf16.xpose.msk.msra.mxu1 %vm29017_vm4, %v29022_v39 }
 0xf6b   : > { %23278 = vmatprep.subr.msk.bf16.mxu1 %vm29017_vm4, %v29041_v14  ;;  %v16804_v14 = vld [vmem:[#allocation2 + $0x181] sm:$0xff] }
 0xf71   : > { %20865 = vmatmul.mubr.msk.f32.vlgmr.msra.gmra.mrb[64].mxu1 %vm385_vm2, %v19262_v28 }
 0xf72   : > { %23281 = vmatpush3.bf16.xpose.msk.msra.mxu1 %vm29017_vm4, %v29053_v10  ;;  %20898 = vmatprep.mubr.msk.f32.mxu1 %vm385_vm2, %v19296_v46  ;;  %v16805_v10 = vld [vmem:[#allocation2 + $0x189] sm:$0xff] }
 0xf73   : > { %23284 = vmatprep.subr.msk.bf16.mxu1 %vm29017_vm4, %v29065_v54  ;;  %v29385_v58 = vpack.c.bf16 %v16805_v10, %v16804_v14 }
 0xf7a   : > { %23287 = vmatpush3.bf16.xpose.msk.msra.mxu1 %vm29017_vm4, %v29077_v41 }
 0xf7b   : > { %23290 = vmatprep.subr.msk.bf16.mxu1 %vm29017_vm4, %v29089_v62 }
 0xf82   : > { %23293 = vmatpush3.bf16.xpose.msk.msra.mxu1 %vm29017_vm4, %v29101_v31 }
 0xf83   : > { %23296 = vmatprep.subr.msk.bf16.mxu1 %vm29017_vm4, %v29113_v53 }
 0xf8a   : > { %23299 = vmatpush3.bf16.xpose.msk.msra.mxu1 %vm29017_vm4, %v29125_v32 }
 0xf8b   : > { %23302 = vmatprep.subr.msk.bf16.mxu1 %vm29017_vm4, %v29137_v56 }
 0xf92   : > { %23305 = vmatpush3.bf16.xpose.msk.msra.mxu1 %vm29017_vm4, %v29149_v25 }
 0xf93   : > { %23308 = vmatprep.subr.msk.bf16.mxu1 %vm29017_vm4, %v29161_v16 }
 0xf9a   : > { %23311 = vmatpush3.bf16.xpose.msk.msra.mxu1 %vm29017_vm4, %v29173_v47 }
 0xf9b   : > { %23314 = vmatprep.subr.msk.bf16.mxu1 %vm29017_vm4, %v29185_v9 }
 0xfa2   : > { %23317 = vmatpush3.bf16.xpose.msk.msra.mxu1 %vm29017_vm4, %v29195_v6 }
 0xfa3   : > { %23320 = vmatprep.subr.msk.bf16.mxu1 %vm29017_vm4, %v29385_v58 }
 0xfaa   : > { %23323 = vmatpush3.bf16.xpose.msk.msra.mxu1 %vm29017_vm4, %v29025_v63  ;;  %v17010_v63 = vld [vmem:[#allocation2 + $0x182] sm:$0xff] }
 0xfab   : > { %23326 = vmatprep.subr.msk.bf16.mxu1 %vm29017_vm4, %v29213_v38 }
 0xfb1   : > { %20899 = vmatmul.mubr.msk.f32.vlgmr.msra.gmra.mrb[64].mxu1 %vm385_vm2, %v19296_v46 }
 0xfb2   : > { %23329 = vmatpush3.bf16.xpose.msk.msra.mxu1 %vm29017_vm4, %v29221_v17  ;;  %20932 = vmatprep.mubr.msk.f32.mxu1 %vm385_vm2, %v19330_v57  ;;  %v17011_v17 = vld [vmem:[#allocation2 + $0x18a] sm:$0xff] }
 0xfb3   : > { %23332 = vmatprep.subr.msk.bf16.mxu1 %vm29017_vm4, %v29223_v60  ;;  %v29440_v35 = vpack.c.bf16 %v17011_v17, %v17010_v63 }
 0xfba   : > { %23335 = vmatpush3.bf16.xpose.msk.msra.mxu1 %vm29017_vm4, %v29231_v40 }
 0xfbb   : > { %23338 = vmatprep.subr.msk.bf16.mxu1 %vm29017_vm4, %v29233_v18 }
 0xfc2   : > { %23341 = vmatpush3.bf16.xpose.msk.msra.mxu1 %vm29017_vm4, %v29241_v33 }
 0xfc3   : > { %23344 = vmatprep.subr.msk.bf16.mxu1 %vm29017_vm4, %v29243_v13 }
 0xfca   : > { %23347 = vmatpush3.bf16.xpose.msk.msra.mxu1 %vm29017_vm4, %v29251_v52 }
 0xfcb   : > { %23350 = vmatprep.subr.msk.bf16.mxu1 %vm29017_vm4, %v29253_v12 }
 0xfd2   : > { %23353 = vmatpush3.bf16.xpose.msk.msra.mxu1 %vm29017_vm4, %v29261_v59 }
 0xfd3   : > { %23356 = vmatprep.subr.msk.bf16.mxu1 %vm29017_vm4, %v29263_v21 }
 0xfda   : > { %23359 = vmatpush3.bf16.xpose.msk.msra.mxu1 %vm29017_vm4, %v29271_v22 }
 0xfdb   : > { %23362 = vmatprep.subr.msk.bf16.mxu1 %vm29017_vm4, %v29273_v51 }
 0xfe2   : > { %23365 = vmatpush3.bf16.xpose.msk.msra.mxu1 %vm29017_vm4, %v29281_v26 }
 0xfe3   : > { %23368 = vmatprep.subr.msk.bf16.mxu1 %vm29017_vm4, %v29440_v35 }
 0xfea   : > { %23371 = vmatpush3.bf16.xpose.msk.msra.mxu1 %vm29017_vm4, %v29197_v24 }
 0xfeb   : > { %23374 = vmatprep.subr.msk.bf16.mxu1 %vm29017_vm4, %v29063_v37  ;;  %v17216_v37 = vld [vmem:[#allocation2 + $0x198] sm:$0xff] }
 0xff1   : > { %20933 = vmatmul.mubr.msk.f32.vlgmr.msra.gmra.mrb[64].mxu1 %vm385_vm2, %v19330_v57 }
 0xff2   : > { %23377 = vmatpush3.bf16.xpose.msk.msra.mxu1 %vm29017_vm4, %v29075_v23  ;;  %20966 = vmatprep.mubr.msk.f32.mxu1 %vm385_vm2, %v19364_v1  ;;  %v17217_v23 = vld [vmem:[#allocation2 + $0x1a0] sm:$0xff] }
 0xff3   : > { %23380 = vmatprep.subr.msk.bf16.mxu1 %vm29017_vm4, %v29087_v5  ;;  %v23414_v5 = vpack.c.bf16 %v17217_v23, %v17216_v37 }
 0xffa   : > { %23383 = vmatpush3.bf16.xpose.msk.msra.mxu1 %vm29017_vm4, %v29099_v45  ;;  %v15949_v45 = vld [vmem:[%s29668_s5] sm:$0xff] }
 0xffb   : > { %23386 = vmatprep.subr.msk.bf16.mxu1 %vm29017_vm4, %v29111_v8  ;;  %20762 = vmatprep.mubr.msk.f32.mxu0 %vm385_vm2, %v15949_v45  ;;  %v17405_v8 = vld [vmem:[#allocation2 + $0xc9] sm:$0xff] }
 0xffc   : > { %20763 = vmatmul.mubr.msk.f32.vlgmr.msra.gmra.mrb[128].mxu0 %vm385_vm2, %v15949_v45 }
0x1002   : > { %23389 = vmatpush3.bf16.xpose.msk.msra.mxu1 %vm29017_vm4, %v29123_v29 }
0x1003   : > { %23392 = vmatprep.subr.msk.bf16.mxu1 %vm29017_vm4, %v29135_v50  ;;  %v17407_v50 = vld [vmem:[#allocation2 + $0xe1] sm:$0xff] }
0x100a   : > { %23395 = vmatpush3.bf16.xpose.msk.msra.mxu1 %vm29017_vm4, %v29147_v19  ;;  %v19432_v19 = vld [vmem:[%s29668_s5 + $0x40] sm:$0xff] }
0x100b   : > { %23398 = vmatprep.subr.msk.bf16.mxu1 %vm29017_vm4, %v29159_v49  ;;  %v17629_v49 = vld [vmem:[#allocation2 + $0x1a2] sm:$0xff] }
0x1012   : > { %23401 = vmatpush3.bf16.xpose.msk.msra.mxu1 %vm29017_vm4, %v29171_v7 }
0x1013   : > { %23404 = vmatprep.subr.msk.bf16.mxu1 %vm29017_vm4, %v29183_v0 }
0x101a   : > { %23407 = vmatpush3.bf16.xpose.msk.msra.mxu1 %vm29017_vm4, %v29193_v2 }
0x101b   : > { %23410 = vmatprep.subr.msk.bf16.mxu1 %vm29017_vm4, %v29330_v11 }
0x1022   : > { %23413 = vmatpush3.bf16.xpose.msk.msra.mxu1 %vm29017_vm4, %v29022_v39  ;;  %v19398_v39 = vld [vmem:[%s29668_s5 + $0x38] sm:$0xff] }
0x1023   : > { %23416 = vmatprep.subr.msk.bf16.mxu1 %vm29017_vm4, %v23414_v5 }
0x102a   : > { %23419 = vmatpush3.bf16.xpose.msk.msra.mxu1 %vm29017_vm4, %v29039_v30  ;;  %v15942_v30 = vld [vmem:[%s29673_s10] sm:$0xff] }
0x102b   : > { %23422 = vmatprep.subr.msk.bf16.mxu1 %vm29017_vm4, %v29065_v54  ;;  %v24808_v54 = vmov 0  }
0x102c   : > { %24733 = vset.pattern.permute.xlu1 %v24808_v54  ;;  %24734 = vset.pattern.permute.xlu0 %v24808_v54 }
0x102d   : > { %15945 = vperm.xlu1 %24733, %v15942_v30  }
0x1031   : > { %20967 = vmatmul.mubr.msk.f32.vlgmr.msra.gmra.mrb[64].mxu1 %vm385_vm2, %v19364_v1 }
0x1032   : > { %23425 = vmatpush3.bf16.xpose.msk.msra.mxu1 %vm29017_vm4, %v29077_v41  ;;  %21000 = vmatprep.mubr.msk.f32.mxu1 %vm385_vm2, %v19398_v39  ;;  %v17422_v41 = vld [vmem:[#allocation2 + $0x199] sm:$0xff] }
0x1033   : > { %23428 = vmatprep.subr.msk.bf16.mxu1 %vm29017_vm4, %v29089_v62  ;;  %v17423_v62 = vld [vmem:[#allocation2 + $0x1a1] sm:$0xff] }
0x103a   : > { %23431 = vmatpush3.bf16.xpose.msk.msra.mxu1 %vm29017_vm4, %v29101_v31  ;;  %v17404_v31 = vld [vmem:[#allocation2 + $0xc1] sm:$0xff] }
0x103b   : > { %23434 = vmatprep.subr.msk.bf16.mxu1 %vm29017_vm4, %v29113_v53  ;;  %v23462_v53 = vpack.c.bf16 %v17423_v62, %v17422_v41  ;;  %v23459_v29 = vpack.c.bf16 %v17405_v8, %v17404_v31 }
0x1042   : > { %23437 = vmatpush3.bf16.xpose.msk.msra.mxu1 %vm29017_vm4, %v29125_v32  ;;  %v17406_v32 = vld [vmem:[#allocation2 + $0xd9] sm:$0xff] }
0x1043   : > { %23440 = vmatprep.subr.msk.bf16.mxu1 %vm29017_vm4, %v29137_v56  ;;  %v23465_v56 = vpack.c.bf16 %v17407_v50, %v17406_v32 }
0x104a   : > { %23443 = vmatpush3.bf16.xpose.msk.msra.mxu1 %vm29017_vm4, %v29149_v25  ;;  %v17628_v25 = vld [vmem:[#allocation2 + $0x19a] sm:$0xff] }
0x104b   : > { %23446 = vmatprep.subr.msk.bf16.mxu1 %vm29017_vm4, %v29161_v16  ;;  %v23510_v16 = vpack.c.bf16 %v17629_v49, %v17628_v25 }
0x1052   : > { %23449 = vmatpush3.bf16.xpose.msk.msra.mxu1 %vm29017_vm4, %v29173_v47 }
0x1053   : > { %23452 = vmatprep.subr.msk.bf16.mxu1 %vm29017_vm4, %v29185_v9 }
0x105a   : > { %23455 = vmatpush3.bf16.xpose.msk.msra.mxu1 %vm29017_vm4, %v29195_v6 }
0x105b   : > { %23458 = vmatprep.subr.msk.bf16.mxu1 %vm29017_vm4, %v29385_v58 }
0x1062   : > { %23461 = vmatpush3.bf16.xpose.msk.msra.mxu1 %vm29017_vm4, %v23459_v29 }
0x1063   : > { %23464 = vmatprep.subr.msk.bf16.mxu1 %vm29017_vm4, %v23462_v53 }
0x106a   : > { %23467 = vmatpush3.bf16.xpose.msk.msra.mxu1 %vm29017_vm4, %v23465_v56 }
0x106b   : > { %23470 = vmatprep.subr.msk.bf16.mxu1 %vm29017_vm4, %v29223_v60 }
0x1071   : > { %21001 = vmatmul.mubr.msk.f32.vlgmr.msra.gmra.mrb[64].mxu1 %vm385_vm2, %v19398_v39 }
0x1072   : > { %23473 = vmatpush3.bf16.xpose.msk.msra.mxu1 %vm29017_vm4, %v29231_v40  ;;  %21034 = vmatprep.mubr.msk.f32.mxu1 %vm385_vm2, %v19432_v19 }
0x1073   : > { %23476 = vmatprep.subr.msk.bf16.mxu1 %vm29017_vm4, %v29233_v18 }
0x107a   : > { %23479 = vmatpush3.bf16.xpose.msk.msra.mxu1 %vm29017_vm4, %v29241_v33 }
0x107b   : > { %23482 = vmatprep.subr.msk.bf16.mxu1 %vm29017_vm4, %v29243_v13  ;;  %v24736_v13 = vld [vmem:[%s24923_s14 + $0x8] sm:$0xff] }
0x1082   : > { %23485 = vmatpush3.bf16.xpose.msk.msra.mxu1 %vm29017_vm4, %v29251_v52 }
0x1083   : > { %23488 = vmatprep.subr.msk.bf16.mxu1 %vm29017_vm4, %v29253_v12 }
0x108a   : > { %23491 = vmatpush3.bf16.xpose.msk.msra.mxu1 %vm29017_vm4, %v29261_v59 }
0x108b   : > { %23494 = vmatprep.subr.msk.bf16.mxu1 %vm29017_vm4, %v29263_v21 }
0x1092   : > { %23497 = vmatpush3.bf16.xpose.msk.msra.mxu1 %vm29017_vm4, %v29271_v22 }
0x1093   : > { %23500 = vmatprep.subr.msk.bf16.mxu1 %vm29017_vm4, %v29273_v51 }
0x109a   : > { %23503 = vmatpush3.bf16.xpose.msk.msra.mxu1 %vm29017_vm4, %v29281_v26 }
0x109b   : > { %23506 = vmatprep.subr.msk.bf16.mxu1 %vm29017_vm4, %v29440_v35 }
0x10a2   : > { %23509 = vmatpush3.bf16.xpose.msk.msra.mxu1 %vm29017_vm4, %v29197_v24 }
0x10a3   : > { %23512 = vmatprep.subr.msk.bf16.mxu1 %vm29017_vm4, %v23510_v16 }
0x10aa   : > { %23515 = vmatpush3.bf16.xpose.msk.msra.mxu1 %vm29017_vm4, %v29213_v38  ;;  %v24735_v38 = vld [vmem:[%s24923_s14] sm:$0xff]  ;;  %s24809_s14 = smov [#allocation3]  }
0x10ab   : > { %s24741_s30 = sshll.u32 %s24809_s14, 4  ;;  %s24742_s30 = int_to_ptr.vmem [resolvable:$false] %s24741_s30 }
0x10ac   : > { %v15946_v0 = vpop.permute.xlu1 %15945  ;;  %s24743_s0 = scalar_lea.vmem %s24742_s30, 512  ;;  %p24744_p0 = scmp.lt.s32.totalorder %s29623_s15, %s24742_s30 }
0x10ad   : > { %p24745_p1 = scmp.lt.s32.totalorder %s24743_s0, %s24737_s25 }
0x10af   : > { %p24746_p2 = por %p24745_p1, %p24744_p0 }
0x10b1   : > { %21035 = vmatmul.mubr.msk.f32.vlgmr.msra.gmra.mrb[64].mxu1 %vm385_vm2, %v19432_v19  ;;  %p24747_p3 = pnand %p24746_p2, %p24740_p13 }
0x10cf   : > { %v16147_v7 = vpop.f32.mrb[128].mxu0 }
0x10d0   : > { %v16149_v47 = vpop.f32.mrb[129].mxu0  ;;  %v16152_v9 = vadd.f32 %v16147_v7, %v15946_v0 }
0x10d1   : > { %v16153_v2 = vadd.f32 %v16149_v47, %v15946_v0 }
0x1184   : > { %v17795_v6 = vpop.f32.mrb[64].mxu1 }
0x1185   : > { %v23677_v24 = vadd.f32 %v17795_v6, %v16152_v9  ;;  %v17797_v60 = vpop.f32.mrb[65].mxu1 }
0x1186   : > { %v23679_v40 = vadd.f32 %v17797_v60, %v16153_v2 }
0x1187   : > { %v17802_v18 = vmul.f32 0.2, %v23677_v24 }
0x1188   : > { %v17803_v55 = vmul.f32 0.2, %v23679_v40 }
0x1189   : > { %v17804_v33 = vadd.f32 %v24735_v38, %v17802_v18 }
0x118a   : > { %v17805_v52 = vadd.f32 %v24736_v13, %v17803_v55 }
0x118b   : > { %17806 = vst [vmem:[%s379_s13] sm:$0xff] %v17804_v33 }
0x118c   : > { %17807 = vst [vmem:[%s379_s13 + $0x8] sm:$0xff] %v17805_v52 }
0x118d   : > { %24750 = shalt.err (!%p24747_p3)
}
0x118e   : > { %s24751_s29 = scalar_lea.hbm %s29621_s24, 256  ;;  %s24755_s16 = scalar_lea.hbm %s29674_s11, 512 }
0x118f   : > { %p24752_p4 = scmp.ne.s32.totalorder %s29621_s24, %s24751_s29  ;;  %p24756_p9 = scmp.lt.u32.totalorder %s29621_s24, %s29674_s11 }
0x1190   : > { %p24757_p10 = scmp.lt.u32.totalorder %s24755_s16, %s24751_s29  ;;  %p24759_p12 = scmp.lt.u32.totalorder %s24751_s29, %s29621_s24 }
0x1191   : > { %p24753_p7 = pnand %p24752_p4, %p24908_p5 }
0x1192   : > { %p24758_p11 = por %p24757_p10, %p24756_p9 }
0x1193   : > { %p24754_p8 = pneg %p24753_p7 }
0x1194   : > { %p24760_p13 = por %p24759_p12, %p24758_p11 }
0x1196   : > { %p24761_p0 = pnand %p24760_p13, %p24754_p8 }
0x1198   : > { %24764 = shalt.err (!%p24761_p0)
}
0x1199   : > { %24686 = dma.vmem_to_hbm [thread:$0]  (%p24908_p5), %s29623_s15, 256, %s29621_s24, %s17809_s21  }
0x119a PF: > { %p24692_p1 = scmp.ge.s32.totalorder %s24799_s20, 2  ;;  %s17835_s0 = sand.u32 1, %s24787_s17  }
0x119b   : > { %s17836_s25 = scalar_lea.sflag [#allocation4], %s17835_s0 }
0x119c   : > { %p24689_p2 = pnand %p24692_p1, %p24912_p6 }
0x119e   : > { %24782 = dma.done.wait (!%p24689_p2), %s17836_s25, 256  }
0x119f   : > { %24784 = vsyncadd (!%p24689_p2), %s17836_s25, 4294967040  ;;  %p21_p3 = scmp.ge.s32.totalorder %s24895_s23, 4   ;;  %s30258_s17 = smov %s24791_s18 }
0x11a0   : > { %s30259_s18 = smov %s24795_s19  ;;  %s30260_s19 = smov %s24906_s26 }
0x11a1   : > { %s30261_s20 = smov %s24895_s23  ;;  %23 = sbr.rel (!%p21_p3) target bundleno = 5 (0x5), region = 142 }
0x11a8   :  { %17841 = vsyncpa [#allocation4], 1 }
0x11a9   :  { %17843 = vsyncpa [#allocation4 + $0x1], 1 }

</bundles_post_ra>
